<compile_context>
chip_gen: v7x
topology: tpu7x:2x2x1
jax: 0.10.0
libtpu: 0.0.40
codegen_flags: <defaults>
</compile_context>

<pallas_src>
import functools
import math

import jax
import jax.numpy as jnp
from jax.experimental import pallas as pl
from jax.experimental.pallas import tpu as pltpu


def _attnpool_kernel(x_ref, pos_ref, wqkv_ref, bqkv_ref, wc_ref, bc_ref,
                     out_ref, *, num_heads, mxu_dtype, approx_softmax):
    # x_ref:    (L, BT, C)    seq-first input block (BT batch elements)
    # pos_ref:  (L+1, C)      positional embedding (f32)
    # wqkv_ref: (C, 3C)       [Wq*scale | Wk | Wv], pre-transposed, MXU dtype
    # bqkv_ref: (1, 3C)       [bq*scale | bk | bv], f32
    # wc_ref:   (C, Do)       c_proj weight, pre-transposed, MXU dtype
    # bc_ref:   (1, Do)       c_proj bias, f32
    # out_ref:  (L+1, BT, Do)
    L, BT, C = x_ref.shape
    H = num_heads
    hd = C // H
    L1 = L + 1

    # ---- mean-token prepend + positional embedding (f32 elementwise) ------
    x = x_ref[...].astype(jnp.float32)                        # (L, BT, C)
    mean = jnp.mean(x, axis=0, keepdims=True)                 # (1, BT, C)
    xe = jnp.concatenate([mean, x], axis=0)                   # (L1, BT, C)
    xe = xe + pos_ref[...].astype(jnp.float32)[:, None, :]

    # ---- fused Q/K/V projection: one big MXU call --------------------------
    # (L1, BT, C) -> (L1*BT, C) is layout-trivial because BT % 8 == 0.
    x2 = xe.reshape(L1 * BT, C).astype(mxu_dtype)
    qkv = jnp.dot(x2, wqkv_ref[...], preferred_element_type=jnp.float32)
    qkv = (qkv + bqkv_ref[...]).astype(mxu_dtype)             # (L1*BT, 3C)

    # Single batch-leading transpose of the projected tensor.
    qkv = pltpu.einshape("lbf->blf", qkv.reshape(L1, BT, 3 * C))  # (BT, L1, 3C)

    # ---- head split: (BT, L1, 3C) -> three (H*BT, L1, hd) operands ---------
    def take_heads(base):
        parts = [qkv[:, :, base + h * hd: base + (h + 1) * hd][None]
                 for h in range(H)]                           # H x (1, BT, L1, hd)
        # Leading-axis concat + trivial merge of the two untiled leading dims.
        return jnp.concatenate(parts, axis=0).reshape(H * BT, L1, hd)

    qh = take_heads(0)
    kh = take_heads(C)
    vh = take_heads(2 * C)

    # ---- attention: two batched MXU einsums, f32 accumulate / f32 softmax --
    s = jnp.einsum("bqd,bkd->bqk", qh, kh,
                   preferred_element_type=jnp.float32)        # (H*BT, L1, L1)
    s = s - jnp.max(s, axis=-1, keepdims=True)
    p = jnp.exp(s)
    denom = jnp.sum(p, axis=-1, keepdims=True)
    if approx_softmax:
        p = p * pl.reciprocal(denom, approx=True)             # fast EUP path
    else:
        p = p / denom                                         # exact (PyTorch parity)
    o = jnp.einsum("bqk,bkd->bqd", p.astype(mxu_dtype), vh,
                   preferred_element_type=jnp.float32)        # (H*BT, L1, hd)

    # ---- merge heads into the lane dim, c_proj, write seq-first ------------
    o = o.astype(mxu_dtype).reshape(H, BT, L1, hd)
    o = jnp.concatenate([o[h] for h in range(H)], axis=-1)    # (BT, L1, C)
    o = pltpu.einshape("blc->lbc", o).reshape(L1 * BT, C)     # trivial reshape
    out = jnp.dot(o, wc_ref[...], preferred_element_type=jnp.float32)
    out = out + bc_ref[...]
    out_ref[...] = out.reshape(L1, BT, -1).astype(out_ref.dtype)


def _vmem_capacity_bytes():
    """Best-effort per-core VMEM capacity; conservative 64 MiB (v7x) fallback."""
    try:
        return int(pltpu.get_tpu_info().vmem_capacity_bytes)
    except Exception:
        return 64 * 1024 * 1024


def _pick_batch_block(N, L, C, Do, H, x_itemsize, out_itemsize, mxu_itemsize,
                      vmem_budget):
    """Largest multiple-of-8 batch block fitting the VMEM budget.

    Prefers keeping the grid >= 2 steps so the 'parallel' batch axis can be
    split across both TensorCores on v7x.
    """
    L1 = L + 1
    resident = ((C * 3 * C + C * Do) * mxu_itemsize           # single-buffered weights
                + (L1 * C + 3 * C + Do) * 4)                  # pos + biases (f32)
    per_elem = (
        2 * L * C * x_itemsize                    # x block, double-buffered
        + 2 * L1 * Do * out_itemsize              # out block, double-buffered
        + L1 * C * 4                              # xe (f32)
        + L1 * 3 * C * (4 + 2 * mxu_itemsize)     # qkv f32 + cast + transposed copy
        + 3 * L1 * C * mxu_itemsize               # q/k/v head-major copies
        + 2 * H * L1 * L1 * 4                     # scores + probs (f32)
        + L1 * C * (4 + 2 * mxu_itemsize)         # per-head + merged outputs
        + L1 * Do * 4                             # pre-store output (f32)
    )
    avail = max(vmem_budget - resident, 8 * per_elem)
    cap = max(8, (avail // per_elem) // 8 * 8)
    if N % 8 != 0:
        # TODO(synk): ragged batch falls back to a single block (grid of 1).
        return N
    divisors = [d for d in range(8, N + 1, 8) if N % d == 0]
    fitting = [d for d in divisors if d <= cap] or [8]
    multi_step = [d for d in fitting if N // d >= 2]
    return max(multi_step) if multi_step else max(fitting)


def attention_pool_2d(x_lnc, params, num_heads, *,
                      mxu_dtype=jnp.bfloat16, approx_softmax=False):
    """x_lnc: (L, N, C) seq-first.  Returns (L+1, N, output_dim) like PyTorch."""
    L, N, C = x_lnc.shape
    Do = params["wc"].shape[0]
    H = num_heads
    assert C % H == 0, "embed_dim must be divisible by num_heads"
    hd = C // H
    scale = 1.0 / math.sqrt(hd)
    mxu_dtype = jnp.dtype(mxu_dtype)

    # Host-side packing (once): nn.Linear (out,in) -> (in,out), the query
    # scale folded into Wq/bq, q/k/v fused, big operands cast to MXU dtype.
    wqkv = jnp.concatenate(
        [params["wq"].T * scale, params["wk"].T, params["wv"].T],
        axis=1).astype(mxu_dtype)                                    # (C, 3C)
    bqkv = jnp.concatenate(
        [params["bq"] * scale, params["bk"], params["bv"]]
    ).reshape(1, 3 * C).astype(jnp.float32)
    wc_t = params["wc"].T.astype(mxu_dtype)                          # (C, Do)
    bc = params["bc"].reshape(1, Do).astype(jnp.float32)
    pos = params["pos"].astype(jnp.float32)                          # (L+1, C)

    # Generation-aware VMEM budget -> batch block and scoped-VMEM limit.
    vmem_budget = (_vmem_capacity_bytes() * 3) // 4
    bt = _pick_batch_block(N, L, C, Do, H,
                           x_itemsize=x_lnc.dtype.itemsize,
                           out_itemsize=x_lnc.dtype.itemsize,
                           mxu_itemsize=mxu_dtype.itemsize,
                           vmem_budget=vmem_budget)
    grid = (N // bt,)

    def _resident(shape):
        # Constant-index blocks: DMA'd once, single-buffered (halves the
        # resident-weight VMEM -- required to fit CLIP-scale weights on v7x).
        return pl.BlockSpec(shape, lambda n: (0,) * len(shape),
                            pipeline_mode=pl.Buffered(1))

    kernel = functools.partial(_attnpool_kernel, num_heads=H,
                               mxu_dtype=mxu_dtype,
                               approx_softmax=approx_softmax)
    return pl.pallas_call(
        kernel,
        out_shape=jax.ShapeDtypeStruct((L + 1, N, Do), x_lnc.dtype),
        grid_spec=pltpu.PrefetchScalarGridSpec(
            num_scalar_prefetch=0,
            grid=grid,
            in_specs=[
                pl.BlockSpec((L, bt, C), lambda n: (0, n, 0)),       # x block
                _resident((L + 1, C)),                               # pos
                _resident((C, 3 * C)),                               # fused Wqkv
                _resident((1, 3 * C)),                               # fused bias
                _resident((C, Do)),                                  # Wc
                _resident((1, Do)),                                  # bc
            ],
            out_specs=pl.BlockSpec((L + 1, bt, Do), lambda n: (0, n, 0)),
        ),
        compiler_params=pltpu.CompilerParams(
            dimension_semantics=("parallel",),
            vmem_limit_bytes=vmem_budget,
        ),
    )(x_lnc, pos, wqkv, bqkv, wc_t, bc)


def reference(x_lnc, params, num_heads):
    """Pure-JAX reference reproducing F.multi_head_attention_forward semantics."""
    hp = jax.lax.Precision.HIGHEST
    x = jnp.concatenate([x_lnc.mean(axis=0, keepdims=True), x_lnc], axis=0)
    x = x + params["pos"][:, None, :]
    q = jnp.dot(x, params["wq"].T, precision=hp) + params["bq"]
    k = jnp.dot(x, params["wk"].T, precision=hp) + params["bk"]
    v = jnp.dot(x, params["wv"].T, precision=hp) + params["bv"]
    L1, N, C = q.shape
    H = num_heads
    hd = C // H
    qh = q.reshape(L1, N, H, hd) * (1.0 / math.sqrt(hd))
    kh = k.reshape(L1, N, H, hd)
    vh = v.reshape(L1, N, H, hd)
    s = jnp.einsum("qnhd,knhd->nhqk", qh, kh, precision=hp)
    p = jax.nn.softmax(s, axis=-1)
    o = jnp.einsum("nhqk,knhd->qnhd", p, vh, precision=hp).reshape(L1, N, C)
    return jnp.dot(o, params["wc"].T, precision=hp) + params["bc"]


def make_params(sequence_len, embed_dim, output_dim, key):
    keys = jax.random.split(key, 9)
    C, Do = embed_dim, output_dim
    return {
        # nn.Parameter(torch.randn(L+1, C) / C**0.5)
        "pos": jax.random.normal(keys[0], (sequence_len + 1, C), jnp.float32)
               / math.sqrt(C),
        "wq": jax.random.normal(keys[1], (C, C), jnp.float32) * (1.0 / math.sqrt(C)),
        "bq": jax.random.normal(keys[2], (C,), jnp.float32) * 0.02,
        "wk": jax.random.normal(keys[3], (C, C), jnp.float32) * (1.0 / math.sqrt(C)),
        "bk": jax.random.normal(keys[4], (C,), jnp.float32) * 0.02,
        "wv": jax.random.normal(keys[5], (C, C), jnp.float32) * (1.0 / math.sqrt(C)),
        "bv": jax.random.normal(keys[6], (C,), jnp.float32) * 0.02,
        "wc": jax.random.normal(keys[7], (Do, C), jnp.float32) * (1.0 / math.sqrt(C)),
        "bc": jax.random.normal(keys[8], (Do,), jnp.float32) * 0.02,
    }


if __name__ == "__main__":
    # x is (sequence_len, batch, embed_dim).  Batch=16 exercises the blocked
    # grid (2 steps of 8 batch elements -> both TensorCores on v7x);
    # C=Do=128 keeps every matmul/store lane-dense.
    SEQ_LEN, BATCH, EMBED_DIM, NUM_HEADS, OUTPUT_DIM = 16, 16, 128, 4, 128

    root = jax.random.PRNGKey(0)
    k_x, k_p = jax.random.split(root)
    x = jax.random.normal(k_x, (SEQ_LEN, BATCH, EMBED_DIM), jnp.float32)
    params = make_params(SEQ_LEN, EMBED_DIM, OUTPUT_DIM, k_p)

    ref = jax.block_until_ready(reference(x, params, NUM_HEADS))

    # 1) Exact-parity configuration: f32 MXU operands + exact softmax divide.
    out_f32 = jax.block_until_ready(
        attention_pool_2d(x, params, NUM_HEADS, mxu_dtype=jnp.float32))
    assert out_f32.shape == (SEQ_LEN + 1, BATCH, OUTPUT_DIM), out_f32.shape
    err_f32 = float(jnp.max(jnp.abs(out_f32 - ref)))
    assert jnp.allclose(out_f32, ref, atol=2e-3, rtol=2e-3), err_f32

    # 2) Fast (default) configuration: bf16 MXU operands, f32 accumulate and
    #    f32 softmax.  bf16 matmuls trade ~1% accuracy vs. the f32 reference,
    #    so the tolerance is wider here (per the perf review guidance).
    out_bf16 = jax.block_until_ready(attention_pool_2d(x, params, NUM_HEADS))
    assert out_bf16.shape == (SEQ_LEN + 1, BATCH, OUTPUT_DIM), out_bf16.shape
    err_bf16 = float(jnp.max(jnp.abs(out_bf16 - ref)))
    assert jnp.allclose(out_bf16, ref, atol=1e-1, rtol=1e-1), err_bf16

    print("KERNEL_OK")
</pallas_src>

<mosaic_0001>
module attributes {stable_mosaic.version = 11 : i64} {
  func.func @_attnpool_kernel(%arg0: i32, %arg1: memref<16x8x128xf32, #tpu.memory_space<vmem>>, %arg2: memref<17x128xf32, #tpu.memory_space<vmem>>, %arg3: memref<128x384xf32, #tpu.memory_space<vmem>>, %arg4: memref<1x384xf32, #tpu.memory_space<vmem>>, %arg5: memref<128x128xf32, #tpu.memory_space<vmem>>, %arg6: memref<1x128xf32, #tpu.memory_space<vmem>>, %arg7: memref<17x8x128xf32, #tpu.memory_space<vmem>>) attributes {dimension_semantics = [#tpu.dimension_semantics<parallel>], iteration_bounds = array<i64: 2>, scalar_prefetch = 0 : i64, scratch_operands = 0 : i64, tpu.core_type = #tpu.core_type<tc>, window_params = [{transform_indices = @transform_0, window_bounds = array<i64: 16, 8, 128>}, {pipeline_mode = #tpu.pipeline_mode<synchronous>, transform_indices = @transform_1, window_bounds = array<i64: 17, 128>}, {pipeline_mode = #tpu.pipeline_mode<synchronous>, transform_indices = @transform_2, window_bounds = array<i64: 128, 384>}, {pipeline_mode = #tpu.pipeline_mode<synchronous>, transform_indices = @transform_3, window_bounds = array<i64: 1, 384>}, {pipeline_mode = #tpu.pipeline_mode<synchronous>, transform_indices = @transform_4, window_bounds = array<i64: 128, 128>}, {pipeline_mode = #tpu.pipeline_mode<synchronous>, transform_indices = @transform_5, window_bounds = array<i64: 1, 128>}, {transform_indices = @transform_6, window_bounds = array<i64: 17, 8, 128>}]} {
    %c0 = arith.constant 0 : index
    %c0_0 = arith.constant 0 : index
    %c0_1 = arith.constant 0 : index
    %0 = vector.load %arg1[%c0, %c0_0, %c0_1] : memref<16x8x128xf32, #tpu.memory_space<vmem>>, vector<16x8x128xf32>
    %cst = arith.constant dense<0.000000e+00> : vector<8x128xf32>
    %1 = vector.multi_reduction <add>, %0, %cst [0] : vector<16x8x128xf32> to vector<8x128xf32>
    %2 = vector.shape_cast %1 : vector<8x128xf32> to vector<1x8x128xf32>
    %cst_2 = arith.constant 1.600000e+01 : f32
    %3 = vector.broadcast %cst_2 : f32 to vector<1x8x128xf32>
    %4 = arith.divf %2, %3 : vector<1x8x128xf32>
    %5 = tpu.concatenate %4, %0 in 0 : vector<1x8x128xf32>, vector<16x8x128xf32> -> vector<17x8x128xf32>
    %c0_3 = arith.constant 0 : index
    %c0_4 = arith.constant 0 : index
    %6 = vector.load %arg2[%c0_3, %c0_4] : memref<17x128xf32, #tpu.memory_space<vmem>>, vector<17x128xf32>
    %7 = vector.shape_cast %6 : vector<17x128xf32> to vector<17x1x128xf32>
    %8 = vector.broadcast %7 : vector<17x1x128xf32> to vector<17x8x128xf32>
    %9 = arith.addf %5, %8 : vector<17x8x128xf32>
    %10 = vector.shape_cast %9 : vector<17x8x128xf32> to vector<136x128xf32>
    %c0_5 = arith.constant 0 : index
    %c0_6 = arith.constant 0 : index
    %11 = vector.load %arg3[%c0_5, %c0_6] : memref<128x384xf32, #tpu.memory_space<vmem>>, vector<128x384xf32>
    %cst_7 = arith.constant dense<0.000000e+00> : vector<136x384xf32>
    %12 = tpu.matmul %10, %11, %cst_7 {dimension_numbers = #tpu.dot_dimension_numbers<[1], [0], [0], [1], [0, 0, 1, 1], [], []>} : vector<136x128xf32>, vector<128x384xf32>, vector<136x384xf32> -> vector<136x384xf32>
    %c0_8 = arith.constant 0 : index
    %c0_9 = arith.constant 0 : index
    %13 = vector.load %arg4[%c0_8, %c0_9] : memref<1x384xf32, #tpu.memory_space<vmem>>, vector<1x384xf32>
    %14 = vector.broadcast %13 : vector<1x384xf32> to vector<136x384xf32>
    %15 = arith.addf %12, %14 : vector<136x384xf32>
    %16 = vector.shape_cast %15 : vector<136x384xf32> to vector<17x8x384xf32>
    %17 = tpu.transpose %16, [1, 0, 2] : vector<17x8x384xf32> -> vector<8x17x384xf32>
    %18 = vector.extract_strided_slice %17 {offsets = [0, 0, 0], sizes = [8, 17, 32], strides = [1, 1, 1]} : vector<8x17x384xf32> to vector<8x17x32xf32>
    %19 = vector.shape_cast %18 : vector<8x17x32xf32> to vector<1x8x17x32xf32>
    %20 = vector.extract_strided_slice %17 {offsets = [0, 0, 32], sizes = [8, 17, 32], strides = [1, 1, 1]} : vector<8x17x384xf32> to vector<8x17x32xf32>
    %21 = vector.shape_cast %20 : vector<8x17x32xf32> to vector<1x8x17x32xf32>
    %22 = vector.extract_strided_slice %17 {offsets = [0, 0, 64], sizes = [8, 17, 32], strides = [1, 1, 1]} : vector<8x17x384xf32> to vector<8x17x32xf32>
    %23 = vector.shape_cast %22 : vector<8x17x32xf32> to vector<1x8x17x32xf32>
    %24 = vector.extract_strided_slice %17 {offsets = [0, 0, 96], sizes = [8, 17, 32], strides = [1, 1, 1]} : vector<8x17x384xf32> to vector<8x17x32xf32>
    %25 = vector.shape_cast %24 : vector<8x17x32xf32> to vector<1x8x17x32xf32>
    %26 = tpu.concatenate %19, %21, %23, %25 in 0 : vector<1x8x17x32xf32>, vector<1x8x17x32xf32>, vector<1x8x17x32xf32>, vector<1x8x17x32xf32> -> vector<4x8x17x32xf32>
    %27 = vector.shape_cast %26 : vector<4x8x17x32xf32> to vector<32x17x32xf32>
    %28 = vector.extract_strided_slice %17 {offsets = [0, 0, 128], sizes = [8, 17, 32], strides = [1, 1, 1]} : vector<8x17x384xf32> to vector<8x17x32xf32>
    %29 = vector.shape_cast %28 : vector<8x17x32xf32> to vector<1x8x17x32xf32>
    %30 = vector.extract_strided_slice %17 {offsets = [0, 0, 160], sizes = [8, 17, 32], strides = [1, 1, 1]} : vector<8x17x384xf32> to vector<8x17x32xf32>
    %31 = vector.shape_cast %30 : vector<8x17x32xf32> to vector<1x8x17x32xf32>
    %32 = vector.extract_strided_slice %17 {offsets = [0, 0, 192], sizes = [8, 17, 32], strides = [1, 1, 1]} : vector<8x17x384xf32> to vector<8x17x32xf32>
    %33 = vector.shape_cast %32 : vector<8x17x32xf32> to vector<1x8x17x32xf32>
    %34 = vector.extract_strided_slice %17 {offsets = [0, 0, 224], sizes = [8, 17, 32], strides = [1, 1, 1]} : vector<8x17x384xf32> to vector<8x17x32xf32>
    %35 = vector.shape_cast %34 : vector<8x17x32xf32> to vector<1x8x17x32xf32>
    %36 = tpu.concatenate %29, %31, %33, %35 in 0 : vector<1x8x17x32xf32>, vector<1x8x17x32xf32>, vector<1x8x17x32xf32>, vector<1x8x17x32xf32> -> vector<4x8x17x32xf32>
    %37 = vector.shape_cast %36 : vector<4x8x17x32xf32> to vector<32x17x32xf32>
    %38 = vector.extract_strided_slice %17 {offsets = [0, 0, 256], sizes = [8, 17, 32], strides = [1, 1, 1]} : vector<8x17x384xf32> to vector<8x17x32xf32>
    %39 = vector.shape_cast %38 : vector<8x17x32xf32> to vector<1x8x17x32xf32>
    %40 = vector.extract_strided_slice %17 {offsets = [0, 0, 288], sizes = [8, 17, 32], strides = [1, 1, 1]} : vector<8x17x384xf32> to vector<8x17x32xf32>
    %41 = vector.shape_cast %40 : vector<8x17x32xf32> to vector<1x8x17x32xf32>
    %42 = vector.extract_strided_slice %17 {offsets = [0, 0, 320], sizes = [8, 17, 32], strides = [1, 1, 1]} : vector<8x17x384xf32> to vector<8x17x32xf32>
    %43 = vector.shape_cast %42 : vector<8x17x32xf32> to vector<1x8x17x32xf32>
    %44 = vector.extract_strided_slice %17 {offsets = [0, 0, 352], sizes = [8, 17, 32], strides = [1, 1, 1]} : vector<8x17x384xf32> to vector<8x17x32xf32>
    %45 = vector.shape_cast %44 : vector<8x17x32xf32> to vector<1x8x17x32xf32>
    %46 = tpu.concatenate %39, %41, %43, %45 in 0 : vector<1x8x17x32xf32>, vector<1x8x17x32xf32>, vector<1x8x17x32xf32>, vector<1x8x17x32xf32> -> vector<4x8x17x32xf32>
    %47 = vector.shape_cast %46 : vector<4x8x17x32xf32> to vector<32x17x32xf32>
    "tpu.trace_start"() <{level = 10 : i32, message = "bqd,bkd->bqk"}> : () -> ()
    %cst_10 = arith.constant dense<0.000000e+00> : vector<32x17x17xf32>
    %48 = tpu.matmul %27, %37, %cst_10 {dimension_numbers = #tpu.dot_dimension_numbers<[2], [2], [1], [1], [0, 0, 0, 1, 1, 1], [0], [0]>} : vector<32x17x32xf32>, vector<32x17x32xf32>, vector<32x17x17xf32> -> vector<32x17x17xf32>
    "tpu.trace_stop"() : () -> ()
    %cst_11 = arith.constant dense<0xFF800000> : vector<32x17xf32>
    %49 = vector.multi_reduction <maximumf>, %48, %cst_11 [2] : vector<32x17x17xf32> to vector<32x17xf32>
    %50 = vector.shape_cast %49 : vector<32x17xf32> to vector<32x17x1xf32>
    %51 = vector.broadcast %50 : vector<32x17x1xf32> to vector<32x17x17xf32>
    %52 = arith.subf %48, %51 : vector<32x17x17xf32>
    %53 = math.exp %52 : vector<32x17x17xf32>
    %cst_12 = arith.constant dense<0.000000e+00> : vector<32x17xf32>
    %54 = vector.multi_reduction <add>, %53, %cst_12 [2] : vector<32x17x17xf32> to vector<32x17xf32>
    %55 = vector.shape_cast %54 : vector<32x17xf32> to vector<32x17x1xf32>
    %56 = vector.broadcast %55 : vector<32x17x1xf32> to vector<32x17x17xf32>
    %57 = arith.divf %53, %56 : vector<32x17x17xf32>
    "tpu.trace_start"() <{level = 10 : i32, message = "bqk,bkd->bqd"}> : () -> ()
    %cst_13 = arith.constant dense<0.000000e+00> : vector<32x17x32xf32>
    %58 = tpu.matmul %57, %47, %cst_13 {dimension_numbers = #tpu.dot_dimension_numbers<[2], [1], [1], [2], [0, 0, 0, 1, 1, 2], [0], [0]>} : vector<32x17x17xf32>, vector<32x17x32xf32>, vector<32x17x32xf32> -> vector<32x17x32xf32>
    "tpu.trace_stop"() : () -> ()
    %59 = vector.shape_cast %58 : vector<32x17x32xf32> to vector<4x8x17x32xf32>
    %60 = vector.extract_strided_slice %59 {offsets = [0, 0, 0, 0], sizes = [1, 8, 17, 32], strides = [1, 1, 1, 1]} : vector<4x8x17x32xf32> to vector<1x8x17x32xf32>
    %61 = vector.shape_cast %60 : vector<1x8x17x32xf32> to vector<8x17x32xf32>
    %62 = vector.extract_strided_slice %59 {offsets = [1, 0, 0, 0], sizes = [1, 8, 17, 32], strides = [1, 1, 1, 1]} : vector<4x8x17x32xf32> to vector<1x8x17x32xf32>
    %63 = vector.shape_cast %62 : vector<1x8x17x32xf32> to vector<8x17x32xf32>
    %64 = vector.extract_strided_slice %59 {offsets = [2, 0, 0, 0], sizes = [1, 8, 17, 32], strides = [1, 1, 1, 1]} : vector<4x8x17x32xf32> to vector<1x8x17x32xf32>
    %65 = vector.shape_cast %64 : vector<1x8x17x32xf32> to vector<8x17x32xf32>
    %66 = vector.extract_strided_slice %59 {offsets = [3, 0, 0, 0], sizes = [1, 8, 17, 32], strides = [1, 1, 1, 1]} : vector<4x8x17x32xf32> to vector<1x8x17x32xf32>
    %67 = vector.shape_cast %66 : vector<1x8x17x32xf32> to vector<8x17x32xf32>
    %68 = tpu.concatenate %61, %63, %65, %67 in 2 : vector<8x17x32xf32>, vector<8x17x32xf32>, vector<8x17x32xf32>, vector<8x17x32xf32> -> vector<8x17x128xf32>
    %69 = tpu.transpose %68, [1, 0, 2] : vector<8x17x128xf32> -> vector<17x8x128xf32>
    %70 = vector.shape_cast %69 : vector<17x8x128xf32> to vector<136x128xf32>
    %c0_14 = arith.constant 0 : index
    %c0_15 = arith.constant 0 : index
    %71 = vector.load %arg5[%c0_14, %c0_15] : memref<128x128xf32, #tpu.memory_space<vmem>>, vector<128x128xf32>
    %cst_16 = arith.constant dense<0.000000e+00> : vector<136x128xf32>
    %72 = tpu.matmul %70, %71, %cst_16 {dimension_numbers = #tpu.dot_dimension_numbers<[1], [0], [0], [1], [0, 0, 1, 1], [], []>} : vector<136x128xf32>, vector<128x128xf32>, vector<136x128xf32> -> vector<136x128xf32>
    %c0_17 = arith.constant 0 : index
    %c0_18 = arith.constant 0 : index
    %73 = vector.load %arg6[%c0_17, %c0_18] : memref<1x128xf32, #tpu.memory_space<vmem>>, vector<1x128xf32>
    %74 = vector.broadcast %73 : vector<1x128xf32> to vector<136x128xf32>
    %75 = arith.addf %72, %74 : vector<136x128xf32>
    %76 = vector.shape_cast %75 : vector<136x128xf32> to vector<17x8x128xf32>
    %c0_19 = arith.constant 0 : index
    %c0_20 = arith.constant 0 : index
    %c0_21 = arith.constant 0 : index
    %77 = vector.load %arg7[%c0_19, %c0_20, %c0_21] : memref<17x8x128xf32, #tpu.memory_space<vmem>>, vector<17x8x128xf32>
    tpu.vector_store %arg7[%c0_19, %c0_20, %c0_21], %76 {strides = array<i32>} : memref<17x8x128xf32, #tpu.memory_space<vmem>>, vector<17x8x128xf32>,
    return
  }
  func.func @transform_0(%arg0: i32) -> (i32, i32, i32) {
    %c0_i32 = arith.constant 0 : i32
    %c0_i32_0 = arith.constant 0 : i32
    %c0_i32_1 = arith.constant 0 : i32
    return %c0_i32, %arg0, %c0_i32_0 : i32, i32, i32
  }
  func.func @transform_1(%arg0: i32) -> (i32, i32) {
    %c0_i32 = arith.constant 0 : i32
    %c0_i32_0 = arith.constant 0 : i32
    %c0_i32_1 = arith.constant 0 : i32
    return %c0_i32, %c0_i32_0 : i32, i32
  }
  func.func @transform_2(%arg0: i32) -> (i32, i32) {
    %c0_i32 = arith.constant 0 : i32
    %c0_i32_0 = arith.constant 0 : i32
    %c0_i32_1 = arith.constant 0 : i32
    return %c0_i32, %c0_i32_0 : i32, i32
  }
  func.func @transform_3(%arg0: i32) -> (i32, i32) {
    %c0_i32 = arith.constant 0 : i32
    %c0_i32_0 = arith.constant 0 : i32
    %c0_i32_1 = arith.constant 0 : i32
    return %c0_i32, %c0_i32_0 : i32, i32
  }
  func.func @transform_4(%arg0: i32) -> (i32, i32) {
    %c0_i32 = arith.constant 0 : i32
    %c0_i32_0 = arith.constant 0 : i32
    %c0_i32_1 = arith.constant 0 : i32
    return %c0_i32, %c0_i32_0 : i32, i32
  }
  func.func @transform_5(%arg0: i32) -> (i32, i32) {
    %c0_i32 = arith.constant 0 : i32
    %c0_i32_0 = arith.constant 0 : i32
    %c0_i32_1 = arith.constant 0 : i32
    return %c0_i32, %c0_i32_0 : i32, i32
  }
  func.func @transform_6(%arg0: i32) -> (i32, i32, i32) {
    %c0_i32 = arith.constant 0 : i32
    %c0_i32_0 = arith.constant 0 : i32
    %c0_i32_1 = arith.constant 0 : i32
    return %c0_i32, %arg0, %c0_i32_0 : i32, i32, i32
  }
}

</mosaic_0001>

<bundles_post_ra>
// kernel: tpu_custom_call.1
= control target key start
LH: loop header
LB: loop body
LE: loop exit
PB: predicated region body
PF: predicated region fallthrough
CT: control target
= control target key end

     0   :  { %s18131_s0 = inlined_call_operand.hbm [shape: f32[16,16,128], index: 0, kind: input, shape index: {}]   ;;  %s18132_s1 = inlined_call_operand.hbm [shape: f32[17,128], index: 1, kind: input, shape index: {}]   ;;  %s18133_s2 = inlined_call_operand.hbm [shape: f32[128,384], index: 2, kind: input, shape index: {}]   ;;  %s18134_s3 = inlined_call_operand.vmem [shape: f32[1,384], index: 3, kind: input, shape index: {}]   ;;  %s18135_s4 = inlined_call_operand.hbm [shape: f32[128,128], index: 4, kind: input, shape index: {}]   ;;  %s18136_s5 = inlined_call_operand.vmem [shape: f32[1,128], index: 5, kind: input, shape index: {}]   ;;  %s18137_s6 = inlined_call_operand.hbm [shape: f32[17,16,128], index: 6, kind: output, shape index: {}]  }
   0x1   :  { %18307 = sst [smem:[#allocation130_spill]] %s18132_s1 }
   0x2   :  { %11 = vsyncpa [#allocation3], 0 }
   0x3   :  { %13 = vsyncpa [#allocation3 + $0x1], 0 }
   0x4   :  { %14 = vsyncpa [#allocation6], 0 }
   0x5   :  { %15 = vsyncpa [#allocation9], 0 }
   0x6   :  { %16 = vsyncpa [#allocation4], 0 }
   0x7   :  { %18 = vsyncpa [#allocation4 + $0x1], 0  ;;  %s13569_s21 = smov 0   ;;  %s13571_s22 = smov 0  }
   0x8   :  { %s13573_s23 = smov 0   ;;  %s13575_s24 = smov 0  }
   0x9 LB: > { %18308 = sst [smem:[#allocation15_spill]] %s13498_s21  ;;  %s13590_s25 = sadd.s32 4294967295, %s13510_s24   ;;  %s13510_s24 = sphi %s13575_s24, %s18861_s24   ;;  %s13506_s23 = sphi %s13573_s23, %s18865_s23   ;;  %s13502_s22 = sphi %s13571_s22, %s18864_s22   ;;  %s13498_s21 = sphi %s13569_s21, %s18863_s21  }
   0xa   : > { %s10367_s26 = sadd.s32 4294967294, %s13510_s24   ;;  %s13594_s27 = sadd.s32 1, %s13510_s24  }
   0xb   : > { %18309 = sst [smem:[#allocation16_spill]] %s13594_s27  ;;  %s31_s28 = sadd.s32 1, %s13506_s23 }
   0xc   : > { %s28_s29 = ssub.s32 %s13510_s24, %s13594_s27  ;;  %p38_p0 = scmp.ne.s32.totalorder %s13506_s23, %s13502_s22 }
   0xd   : > { %p29_p1 = scmp.eq.s32.totalorder %s28_s29, 0  ;;  %p39_p2 = scmp.eq.s32.totalorder %s13510_s24, 0 }
   0xe   : > { %p44_p3 = scmp.ne.s32.totalorder %s13502_s22, %s13498_s21  ;;  %p18138_p4 = scmp.eq.s32.totalorder %s13590_s25, 0 }
   0xf   : > { %s13606_s30 = scalar_select %p29_p1, %s13506_s23, %s31_s28  }
  0x10   : > { %p13608_p5 = por %p39_p2, %p38_p0  ;;  %p13614_p6 = por %p18138_p4, %p44_p3 }
  0x11   : > { %18310 = sst [smem:[#allocation17_spill]] %s13606_s30  ;;  %p173_p7 = scmp.eq.s32.totalorder %s13590_s25, 1 }
  0x12   : > { %s18311_s7 = scalar_select %p13608_p5, 1, 0 }
  0x13   : > { %s18312_s8 = scalar_select %p13614_p6, 1, 0 }
  0x14   : > { %p179_p8 = scmp.eq.s32.totalorder %s10367_s26, 1  ;;  %p10368_p9 = scmp.ge.s32.totalorder %s13510_s24, 1 }
  0x15   : > { %p186_p10 = scmp.lt.s32.totalorder %s13510_s24, 3  ;;  %p13621_p11 = por %p173_p7, %p38_p0 }
  0x16   : > { %p13625_p12 = por %p179_p8, %p44_p3  ;;  %s13512_s12 = smov [#allocation5]  }
  0x17   : > { %s18313_s9 = scalar_select %p13621_p11, 1, 0 }
  0x18   : > { %s18314_s10 = scalar_select %p13625_p12, 1, 0 }
  0x19   : > { %p13629_p13 = pnand %p10368_p9, %p186_p10  ;;  %s198_s13 = sshll.u32 %s13512_s12, 4  ;;  %s199_s13 = int_to_ptr.vmem [resolvable:$true] %s198_s13 }
  0x1a   : > { %18315 = sst [smem:[#allocation18_spill]] %s18314_s10  ;;  %s13513_s15 = smov [#allocation7]  }
  0x1b   : > { %s18316_s11 = scalar_select %p13629_p13, 1, 0 }
  0x1c   : > { %p12618_p1 = pneg %p13629_p13  ;;  %s211_s16 = sshll.u32 %s13513_s15, 4  ;;  %s212_s16 = int_to_ptr.vmem [resolvable:$true] %s211_s16 }
  0x1d   : > { %s18318_s1 = sld [smem:[#allocation130_spill]] }
  0x1e   : > { %p13637_p2 = pnand %p12618_p1, %p18138_p4 }
  0x20   : > { %p13651_p8 = pneg %p13637_p2 }
  0x23   : > { %s13322_s19 = scalar_lea.hbm %s18318_s1, 384 }
  0x24   : > { %p13323_p7 = scmp.ne.s32.totalorder %s18318_s1, %s13322_s19  ;;  %p13329_p1 = scmp.lt.u32.totalorder %s13322_s19, %s18318_s1 }
  0x26   : > { %p13325_p9 = pnand %p13651_p8, %p13323_p7 }
  0x28   : > { %p13326_p10 = pneg %p13325_p9 }
  0x2a   : > { %p13331_p0 = pnand %p13329_p1, %p13326_p10 }
  0x2c   : > { %13334 = shalt.err (!%p13331_p0)
}
  0x2d   : > { %s13335_s15 = scalar_lea.vmem %s199_s13, 384  ;;  %p13343_p11 = scmp.lt.s32.totalorder %s199_s13, %s199_s13 }
  0x2e   : > { %p13336_p4 = scmp.ne.s32.totalorder %s199_s13, %s13335_s15  ;;  %p13344_p6 = scmp.lt.s32.totalorder %s13335_s15, %s13335_s15 }
  0x30   : > { %p13338_p3 = pnand %p13336_p4, %p13651_p8  ;;  %p13345_p13 = por %p13344_p6, %p13343_p11 }
  0x32   : > { %p13339_p12 = pneg %p13338_p3 }
  0x34   : > { %p13346_p5 = pnand %p13345_p13, %p13339_p12 }
  0x36   : > { %13349 = shalt.err (!%p13346_p5)
}
  0x37   : > { %s18145_s17 = smov 128   ;;  %s18147_s18 = smov 8  }
  0x38   : > { %12621 = dma.hbm_to_vmem [thread:$0]  (!%p13637_p2), %s18318_s1, 384, %s199_s13, [#allocation6], %s18145_s17, %s18145_s17, %s18147_s18  }
  0x39   : > { %p18320_p4 = scmp.ne.s32.totalorder %s18311_s7, 0  ;;  %p18321_p0 = scmp.lt.s32.totalorder %s13510_s24, 2 }
  0x3a   : > { %s13350_s15 = scalar_lea.hbm %s18133_s2, 6144 }
  0x3b   : > { %p13674_p3 = pnand %p18321_p0, %p18320_p4  ;;  %p13351_p5 = scmp.ne.s32.totalorder %s18133_s2, %s13350_s15 }
  0x3c   : > { %p13357_p12 = scmp.lt.u32.totalorder %s13350_s15, %s18133_s2 }
  0x3d   : > { %s18322_s26 = scalar_select %p13674_p3, 1, 0 }
  0x3e   : > { %p13353_p6 = pnand %p13351_p5, %p13651_p8 }
  0x40   : > { %p13354_p11 = pneg %p13353_p6 }
  0x42   : > { %p13359_p13 = pnand %p13357_p12, %p13354_p11 }
  0x44   : > { %13362 = shalt.err (!%p13359_p13)
}
  0x45   : > { %s13363_s7 = scalar_lea.vmem %s212_s16, 6144  ;;  %p13371_p1 = scmp.lt.s32.totalorder %s212_s16, %s212_s16 }
  0x46   : > { %p13364_p7 = scmp.ne.s32.totalorder %s212_s16, %s13363_s7  ;;  %p13372_p4 = scmp.lt.s32.totalorder %s13363_s7, %s13363_s7 }
  0x48   : > { %p13366_p9 = pnand %p13364_p7, %p13651_p8  ;;  %p13373_p0 = por %p13372_p4, %p13371_p1 }
  0x4a   : > { %p13367_p10 = pneg %p13366_p9 }
  0x4c   : > { %p13374_p3 = pnand %p13373_p0, %p13367_p10 }
  0x4e   : > { %13377 = shalt.err (!%p13374_p3)
}
  0x4f   : > { %s13516_s27 = smov 384   ;;  %s13517_s30 = smov 24  }
  0x50   : > { %12624 = dma.hbm_to_vmem [thread:$0]  (!%p13637_p2), %s18133_s2, 6144, %s212_s16, [#allocation6], %s13516_s27, %s13516_s27, %s13517_s30  }
  0x51   : > { %s13518_s12 = smov [#allocation8]   ;;  %s244_s19 = sand.u32 1, %s13506_s23  }
  0x52   : > { %s227_s15 = sshll.u32 %s13518_s12, 4  ;;  %s13378_s7 = scalar_lea.hbm %s18135_s4, 2048  ;;  %s228_s15 = int_to_ptr.vmem [resolvable:$true] %s227_s15 }
  0x53   : > { %p13379_p3 = scmp.ne.s32.totalorder %s18135_s4, %s13378_s7  ;;  %p13385_p11 = scmp.lt.u32.totalorder %s13378_s7, %s18135_s4 }
  0x55   : > { %p13381_p5 = pnand %p13379_p3, %p13651_p8 }
  0x57   : > { %p13382_p6 = pneg %p13381_p5 }
  0x59   : > { %p13387_p12 = pnand %p13385_p11, %p13382_p6 }
  0x5b   : > { %13390 = shalt.err (!%p13387_p12)
}
  0x5c   : > { %s13391_s16 = scalar_lea.vmem %s228_s15, 2048  ;;  %p13399_p10 = scmp.lt.s32.totalorder %s228_s15, %s228_s15 }
  0x5d   : > { %p13392_p13 = scmp.ne.s32.totalorder %s228_s15, %s13391_s16  ;;  %p13400_p1 = scmp.lt.s32.totalorder %s13391_s16, %s13391_s16 }
  0x5f   : > { %p13394_p7 = pnand %p13392_p13, %p13651_p8  ;;  %p13401_p4 = por %p13400_p1, %p13399_p10 }
  0x61   : > { %p13395_p9 = pneg %p13394_p7 }
  0x63   : > { %p13402_p0 = pnand %p13401_p4, %p13395_p9 }
  0x65   : > { %13405 = shalt.err (!%p13402_p0)
}
  0x66   : > { %s18323_s1 = smov 8   ;;  %s18324_s17 = smov 128  }
  0x67   : > { %12627 = dma.hbm_to_vmem [thread:$0]  (!%p13637_p2), %s18135_s4, 2048, %s228_s15, [#allocation9], %s18324_s17, %s18324_s17, %s18323_s1  }
  0x68   : > { %s10373_s28 = sshll.u32 %s244_s19, 7  ;;  %s10374_s18 = sshll.u32 %s13510_s24, 7 }
  0x69   : > { %s13722_s20 = scalar_lea.hbm %s18131_s0, %s10374_s18  ;;  %s248_s14 = scalar_lea.vmem [#allocation2], %s10373_s28 }
  0x6a   : > { %s254_s29 = sshll.u32 %s248_s14, 4  ;;  %s13726_s12 = scalar_lea.sflag [#allocation3], %s244_s19  ;;  %s13724_s29 = int_to_ptr.vmem [resolvable:$true] %s254_s29 }
  0x6b   : > { %s13406_s13 = scalar_lea.hbm %s13722_s20, 2048  ;;  %p18325_p2 = scmp.ne.s32.totalorder %s18322_s26, 0 }
  0x6c   : > { %p13407_p8 = scmp.ne.s32.totalorder %s13722_s20, %s13406_s13  ;;  %s13411_s16 = scalar_lea.hbm %s18131_s0, 4096 }
  0x6d   : > { %p13408_p3 = pneg %p18325_p2  ;;  %p13412_p11 = scmp.lt.u32.totalorder %s13722_s20, %s18131_s0 }
  0x6e   : > { %p13413_p12 = scmp.lt.u32.totalorder %s13411_s16, %s13406_s13  ;;  %p13415_p7 = scmp.lt.u32.totalorder %s13406_s13, %s13722_s20 }
  0x6f   : > { %p13409_p5 = pnand %p13408_p3, %p13407_p8 }
  0x70   : > { %p13414_p13 = por %p13413_p12, %p13412_p11 }
  0x71   : > { %p13410_p6 = pneg %p13409_p5 }
  0x72   : > { %p13416_p9 = por %p13415_p7, %p13414_p13 }
  0x74   : > { %p13417_p10 = pnand %p13416_p9, %p13410_p6 }
  0x76   : > { %13420 = shalt.err (!%p13417_p10)
}
  0x77   : > { %s13421_s19 = scalar_lea.vmem %s13724_s29, 2048  ;;  %s13519_s28 = smov [#allocation2]  }
  0x78   : > { %p13422_p1 = scmp.ne.s32.totalorder %s13724_s29, %s13421_s19  ;;  %s13426_s18 = sshll.u32 %s13519_s28, 4  ;;  %s13427_s18 = int_to_ptr.vmem [resolvable:$false] %s13426_s18 }
  0x79   : > { %s13428_s27 = scalar_lea.vmem %s13427_s18, 4096  ;;  %p13429_p8 = scmp.lt.s32.totalorder %s13724_s29, %s13427_s18 }
  0x7a   : > { %p13424_p4 = pnand %p13422_p1, %p13408_p3  ;;  %p13430_p5 = scmp.lt.s32.totalorder %s13428_s27, %s13421_s19 }
  0x7c   : > { %p13425_p0 = pneg %p13424_p4  ;;  %p13431_p11 = por %p13430_p5, %p13429_p8 }
  0x7e   : > { %p13432_p12 = pnand %p13431_p11, %p13425_p0 }
  0x80   : > { %13435 = shalt.err (!%p13432_p12)
}
  0x81   : > { %s13520_s30 = smov 256   ;;  %p18326_p3 = scmp.ne.s32.totalorder %s18316_s11, 0 }
  0x82   : > { %12631 = dma.hbm_to_vmem [thread:$0]  (!%p18325_p2), %s13722_s20, 2048, %s13724_s29, %s13726_s12, %s13520_s30, %s18324_s17, %s18323_s1  }
  0x83   : > { %266 = sbr.rel (%p18326_p3) target bundleno = 2772 (0xad4), region = 44 }
  0x8a   : > { %s13759_s14 = sand.u32 1, %s13502_s22   ;;  %p18327_p6 = scmp.ne.s32.totalorder %s18312_s8, 0 }
  0x8b   : > { %s10376_s13 = sshll.u32 %s13759_s14, 7  ;;  %s269_s15 = scalar_lea.sflag [#allocation3], %s13759_s14 }
  0x8c   : > { %s13763_s7 = scalar_lea.vmem [#allocation2], %s10376_s13 }
  0x8d   : > { %13481 = dma.done.wait (%p18327_p6), %s269_s15, 2048  }
  0x8e   : > { %13483 = vsyncadd (%p18327_p6), %s269_s15, 4294965248  ;;  %p18328_p2 = scmp.eq.s32.totalorder %s13590_s25, 0 }
  0x90   : > { %13485 = dma.done.wait (%p18328_p2), [#allocation6], 6528   ;;  %p18329_p13 = pmov %p18328_p2 }
  0x91   : > { %p18330_p7 = pmov %p18328_p2 }
  0x92   : > { %13487 = vsyncadd (%p18329_p13), [#allocation6], 4294960768 }
  0x93   : > { %13489 = dma.done.wait (%p18330_p7), [#allocation9], 2048   ;;  %p18331_p9 = pmov %p18328_p2 }
  0x94   : > { %v18153_v0 = vmov 0.0   ;;  %v567_v1 = vld [vmem:[#allocation7 + $0x8] sm:$0xff]  ;;  %v570_v2 = vld [vmem:[#allocation7 + $0x20] sm:$0xff]  ;;  %v569_v5 = vld [vmem:[#allocation7 + $0x18] sm:$0xff]  ;;  %v13522_v20 = vmov 1966171168   ;;  %v356_v22 = vlaneseq }
  0x95   : > { %13491 = vsyncadd (%p18331_p9), [#allocation9], 4294965248  ;;  %695 = vmatprep.mubr.f32.mxu0 %v18153_v0  ;;  %731 = vmatprep.mubr.f32.mxu1 %v18153_v0  ;;  %v566_v3 = vld [vmem:[#allocation7] sm:$0xff]  ;;  %v12281_v4 = vpack.c.bf16 %v570_v2, %v567_v1  ;;  %v573_v6 = vld [vmem:[#allocation7 + $0x38] sm:$0xff]  ;;  %v354_v21 = vunpack.c.l.s4 %v13522_v20  ;;  %vm13524_vm0 = vmmov 0   ;;  %s13527_s26 = smov 96  }
  0x96   : > { %v576_v7 = vld [vmem:[#allocation7 + $0x50] sm:$0xff]  ;;  %v12283_v8 = vpack.c.bf16 %v569_v5, %v566_v3  ;;  %v575_v11 = vld [vmem:[#allocation7 + $0x48] sm:$0xff]  ;;  %v582_v13 = vld [vmem:[#allocation7 + $0x80] sm:$0xff]  ;;  %v13788_v33 = vshrl.u32 %v356_v22, 7  ;;  %vm2463_vm1 = vcmask 261120   ;;  %s13528_s1 = smov 64  }
  0x97   : > { %v12285_v9 = vpack.c.bf16 %v576_v7, %v573_v6  ;;  %v572_v10 = vld [vmem:[#allocation7 + $0x30] sm:$0xff]  ;;  %v579_v12 = vld [vmem:[#allocation7 + $0x68] sm:$0xff]  ;;  %12282 = vmatprep.subr.bf16.mxu0 %v12281_v4  ;;  %12585 = vmatprep.subr.bf16.mxu1 %v12281_v4  ;;  %v578_v16 = vld [vmem:[#allocation7 + $0x60] sm:$0xff]  ;;  %v355_v32 = vunpack.c.0.s8 %v354_v21  ;;  %s13529_s17 = smov 32   ;;  %vm5408_vm3 = vcmask 138240   ;;  %vm5415_vm4 = vcmask 131072  }
  0x98   : > { %12284 = vmatpush1.bf16.msra.mxu0 %v12283_v8  ;;  %12593 = vmatpush1.bf16.msra.mxu1 %v12283_v8  ;;  %v12287_v14 = vpack.c.bf16 %v575_v11, %v572_v10  ;;  %v12289_v15 = vpack.c.bf16 %v582_v13, %v579_v12  ;;  %v581_v17 = vld [vmem:[#allocation7 + $0x78] sm:$0xff]  ;;  %v588_v19 = vld [vmem:[#allocation7 + $0xb0] sm:$0xff]  ;;  %v587_v26 = vld [vmem:[#allocation7 + $0xa8] sm:$0xff]  ;;  %v13824_v7 = vsub.s32 0, %v13788_v33  ;;  %vm6475_vm5 = vcmask 1040384   ;;  %s12601_s20 = smul.u32 136, %s13759_s14 }
  0x99   : > { %12286 = vmatprep.subr.bf16.mxu0 %v12285_v9  ;;  %12586 = vmatprep.subr.bf16.mxu1 %v12285_v9  ;;  %v585_v18 = vld [vmem:[#allocation7 + $0x98] sm:$0xff]  ;;  %v12291_v23 = vpack.c.bf16 %v581_v17, %v578_v16  ;;  %v584_v25 = vld [vmem:[#allocation7 + $0x90] sm:$0xff]  ;;  %v591_v27 = vld [vmem:[#allocation7 + $0xc8] sm:$0xff]  ;;  %v13800_v44 = vsub.s32 %v355_v32, %v13788_v33  ;;  %vm9716_vm6 = vcmask 785408   ;;  %vm9691_vm7 = vcmask 523264   ;;  %s10702_s21 = sshll.u32 %s13590_s25, 7 }
  0x9a   : > { %v12293_v24 = vpack.c.bf16 %v588_v19, %v585_v18  ;;  %v594_v28 = vld [vmem:[#allocation7 + $0xe0] sm:$0xff]  ;;  %v13780_v29 = vld [vmem:[%s13763_s7] sm:$0xff]  ;;  %v13783_v30 = vld [vmem:[%s13763_s7 + $0x8] sm:$0xff]  ;;  %v12295_v34 = vpack.c.bf16 %v587_v26, %v584_v25  ;;  %s18045_s16 = scalar_lea.vmem [#allocation10], %s12601_s20  ;;  %s18083_s18 = scalar_lea.hbm %s18137_s6, %s10702_s21 }
  0x9b   : > { %v13786_v31 = vld [vmem:[%s13763_s7 + $0x10] sm:$0xff]  ;;  %v329_v35 = vadd.f32 %v13783_v30, %v13780_v29  ;;  %v12297_v36 = vpack.c.bf16 %v594_v28, %v591_v27  ;;  %v590_v37 = vld [vmem:[#allocation7 + $0xc0] sm:$0xff]  ;;  %v600_v41 = vld [vmem:[#allocation7 + $0x110] sm:$0xff]  ;;  %s10265_s10 = sshll.u32 %s18045_s16, 4  ;;  %s10253_s27 = scalar_lea.sflag [#allocation4], %s13759_s14  ;;  %s18085_s10 = int_to_ptr.vmem [resolvable:$true] %s10265_s10 }
  0x9c   : > { %12288 = vmatpush1.bf16.msra.mxu0 %v12287_v14  ;;  %12594 = vmatpush1.bf16.msra.mxu1 %v12287_v14  ;;  %v593_v38 = vld [vmem:[#allocation7 + $0xd8] sm:$0xff]  ;;  %v13793_v39 = vld [vmem:[%s13763_s7 + $0x18] sm:$0xff]  ;;  %v13797_v43 = vld [vmem:[%s13763_s7 + $0x20] sm:$0xff]  ;;  %s13436_s30 = scalar_lea.vmem %s18085_s10, 2176  ;;  %p18856_p1 = scmp.ne.s32.totalorder %s18313_s9, 0 }
  0x9d   : > { %12290 = vmatprep.subr.bf16.mxu0 %v12289_v15  ;;  %12587 = vmatprep.subr.bf16.mxu1 %v12289_v15  ;;  %v597_v40 = vld [vmem:[#allocation7 + $0xf8] sm:$0xff]  ;;  %v330_v42 = vadd.f32 %v329_v35, %v13786_v31  ;;  %v12299_v45 = vpack.c.bf16 %v593_v38, %v590_v37  ;;  %v13803_v47 = vld [vmem:[#allocation5] sm:$0xff]  ;;  %v596_v49 = vld [vmem:[#allocation7 + $0xf0] sm:$0xff]  ;;  %p13437_p10 = scmp.ne.s32.totalorder %s18085_s10, %s13436_s30  ;;  %s13530_s25 = smov [#allocation10]  }
  0x9e   : > { %v12301_v48 = vpack.c.bf16 %v600_v41, %v597_v40  ;;  %v599_v50 = vld [vmem:[#allocation7 + $0x108] sm:$0xff]  ;;  %v318_v51 = vld [vmem:[%s13763_s7 + $0x28] sm:$0xff]  ;;  %v352_v52 = vcombine.high %v13803_v47, %v13803_v47  ;;  %v606_v54 = vld [vmem:[#allocation7 + $0x140] sm:$0xff]  ;;  %v359_v38 = vrot.slane %v13803_v47, %v13800_v44  ;;  %s13440_s13 = sshll.u32 %s13530_s25, 4  ;;  %s13441_s13 = int_to_ptr.vmem [resolvable:$false] %s13440_s13 }
  0x9f   : > { %v331_v46 = vadd.f32 %v330_v42, %v13793_v39  ;;  %v603_v53 = vld [vmem:[#allocation7 + $0x128] sm:$0xff]  ;;  %v13810_v56 = vld [vmem:[%s13763_s7 + $0x30] sm:$0xff]  ;;  %v12303_v58 = vpack.c.bf16 %v599_v50, %v596_v49  ;;  %v602_v61 = vld [vmem:[#allocation7 + $0x120] sm:$0xff]  ;;  %v18151_v42 = vmov 0.0|0.0   ;;  %p13438_p4 = pnand %p13437_p10, %p18856_p1  ;;  %s13442_s15 = scalar_lea.vmem %s13441_s13, 4352 }
  0xa0   : > { %12292 = vmatpush1.bf16.msra.mxu0 %v12291_v23  ;;  %12595 = vmatpush1.bf16.msra.mxu1 %v12291_v23  ;;  %v366_v57 = vrot.slane %v352_v52, %v13800_v44  ;;  %v12305_v60 = vpack.c.bf16 %v606_v54, %v603_v53  ;;  %v605_v62 = vld [vmem:[#allocation7 + $0x138] sm:$0xff]  ;;  %v13814_v63 = vld [vmem:[%s13763_s7 + $0x38] sm:$0xff]  ;;  %v612_v3 = vld [vmem:[#allocation7 + $0x170] sm:$0xff]  ;;  %v367_v49 = vcombine.high %v359_v38, %v359_v38  ;;  %p13443_p8 = scmp.lt.s32.totalorder %s18085_s10, %s13441_s13  ;;  %p13444_p5 = scmp.lt.s32.totalorder %s13442_s15, %s13436_s30 }
  0xa1   : > { %12294 = vmatprep.subr.bf16.mxu0 %v12293_v24  ;;  %12588 = vmatprep.subr.bf16.mxu1 %v12293_v24  ;;  %v332_v55 = vadd.f32 %v331_v46, %v13797_v43  ;;  %v609_v2 = vld [vmem:[#allocation7 + $0x158] sm:$0xff]  ;;  %v13821_v6 = vld [vmem:[%s13763_s7 + $0x40] sm:$0xff]  ;;  %v12307_v9 = vpack.c.bf16 %v605_v62, %v602_v61  ;;  %v13832_v12 = vld [vmem:[#allocation5 + $0x8] sm:$0xff]  ;;  %v375_v54 = vrot.slane %v359_v38, %v13800_v44  ;;  %p13439_p0 = pneg %p13438_p4 }
  0xa2   : > { %v13817_v1 = vrot.slane %v366_v57, %v13800_v44  ;;  %v368_v5 = vcombine.high %v366_v57, %v366_v57  ;;  %v12309_v13 = vpack.c.bf16 %v612_v3, %v609_v2  ;;  %v608_v14 = vld [vmem:[#allocation7 + $0x150] sm:$0xff]  ;;  %v611_v15 = vld [vmem:[#allocation7 + $0x168] sm:$0xff]  ;;  %v13839_v18 = vld [vmem:[%s13763_s7 + $0x50] sm:$0xff]  ;;  %v408_v21 = vrot.slane %v13832_v12, %v13800_v44  ;;  %p13445_p11 = por %p13444_p5, %p13443_p8 }
  0xa3   : > { %v333_v59 = vadd.f32 %v332_v55, %v318_v51  ;;  %v13835_v16 = vld [vmem:[%s13763_s7 + $0x48] sm:$0xff]  ;;  %v12311_v22 = vpack.c.bf16 %v611_v15, %v608_v14  ;;  %v13848_v24 = vld [vmem:[%s13763_s7 + $0x58] sm:$0xff]  ;;  %v571_v26 = vld [vmem:[#allocation7 + $0x28] sm:$0xff]  ;;  %v401_v3 = vcombine.high %v13832_v12, %v13832_v12  ;;  %v397_v14 = vcombine.high %v375_v54, %v375_v54 }
  0xa4   : > { %12296 = vmatpush1.bf16.msra.mxu0 %v12295_v34  ;;  %12596 = vmatpush1.bf16.msra.mxu1 %v12295_v34  ;;  %v398_v8 = vcombine.high %v13817_v1, %v13817_v1  ;;  %v13830_v11 = vrot.slane %v368_v5, %v13800_v44  ;;  %v568_v25 = vld [vmem:[#allocation7 + $0x10] sm:$0xff]  ;;  %v13852_v28 = vld [vmem:[%s13763_s7 + $0x60] sm:$0xff]  ;;  %v424_v35 = vrot.slane %v408_v21, %v13800_v44  ;;  %v577_v46 = vld [vmem:[#allocation7 + $0x58] sm:$0xff]  ;;  %p13446_p12 = pnand %p13445_p11, %p13439_p0 }
  0xa5   : > { %12298 = vmatprep.subr.bf16.mxu0 %v12297_v36  ;;  %12589 = vmatprep.subr.bf16.mxu1 %v12297_v36  ;;  %v334_v4 = vadd.f32 %v333_v59, %v13810_v56  ;;  %v416_v36 = vcombine.high %v408_v21, %v408_v21  ;;  %v12314_v40 = vpack.c.bf16 %v571_v26, %v568_v25  ;;  %v13862_v41 = vld [vmem:[%s13763_s7 + $0x68] sm:$0xff]  ;;  %v13868_v50 = vld [vmem:[%s13763_s7 + $0x70] sm:$0xff]  ;;  %v13880_v57 = vld [vmem:[%s13763_s7 + $0x78] sm:$0xff] }
  0xa6   : > { %v491_v19 = vrot.slane %v398_v8, %v13824_v7  ;;  %v400_v20 = vcombine.high %v13830_v11, %v13830_v11  ;;  %v583_v59 = vld [vmem:[#allocation7 + $0x88] sm:$0xff]  ;;  %v446_v61 = vcombine.high %v424_v35, %v424_v35  ;;  %v467_v5 = vrot.slane %v375_v54, %v13824_v7  ;;  %v601_v38 = vld [vmem:[#allocation7 + $0x118] sm:$0xff]  ;;  %vm14317_vm2 = vmpackc.low %vm2463_vm1, %vm2463_vm1 }
  0xa7   : > { %v335_v10 = vadd.f32 %v334_v4, %v13814_v63  ;;  %v438_v52 = vrot.slane %v416_v36, %v13800_v44 }
  0xa8   : > { %12300 = vmatpush1.bf16.msra.mxu0 %v12299_v45  ;;  %12597 = vmatpush1.bf16.msra.mxu1 %v12299_v45  ;;  %v13854_v32 = vadd.f32 %v491_v19, %v318_v51  ;;  %v495_v34 = vrot.slane %v400_v20, %v13824_v7  ;;  %v574_v45 = vld [vmem:[#allocation7 + $0x40] sm:$0xff]  ;;  %v499_v51 = vrot.slane %v424_v35, %v13824_v7 }
  0xa9   : > { %12302 = vmatprep.subr.bf16.mxu0 %v12301_v48  ;;  %12590 = vmatprep.subr.bf16.mxu1 %v12301_v48  ;;  %v336_v17 = vadd.f32 %v335_v10, %v13821_v6  ;;  %v12317_v55 = vpack.c.bf16 %v577_v46, %v574_v45  ;;  %v503_v2 = vrot.slane %v438_v52, %v13824_v7  ;;  %v589_v10 = vld [vmem:[#allocation7 + $0xb8] sm:$0xff] }
  0xaa   : > { %v13872_v47 = vadd.f32 %v495_v34, %v13810_v56  ;;  %v13887_v62 = vadd.f32 %v499_v51, %v13814_v63  ;;  %v507_v15 = vrot.slane %v446_v61, %v13824_v7  ;;  %v415_v19 = vrot.slane %v401_v3, %v13800_v44  ;;  %v607_v51 = vld [vmem:[#allocation7 + $0x148] sm:$0xff] }
  0xab   : > { %v337_v23 = vadd.f32 %v336_v17, %v13835_v16  ;;  %v13900_v12 = vadd.f32 %v503_v2, %v13821_v6  ;;  %v448_v17 = vcombine.high %v438_v52, %v438_v52  ;;  %v475_v6 = vrot.slane %v397_v14, %v13824_v7  ;;  %v10380_v2 = vld.sshfl [vmem:[#allocation5 + $0x10] sm:$0x1 pattern:$0x75316420] }
  0xac   : > { %12304 = vmatpush1.bf16.msra.mxu0 %v12303_v58  ;;  %12598 = vmatpush1.bf16.msra.mxu1 %v12303_v58  ;;  %v580_v58 = vld [vmem:[#allocation7 + $0x70] sm:$0xff]  ;;  %v431_v35 = vrot.slane %v415_v19, %v13800_v44  ;;  %v417_v36 = vcombine.high %v415_v19, %v415_v19  ;;  %v622_v14 = vsub.s32 1, %v13788_v33 }
  0xad   : > { %12306 = vmatprep.subr.bf16.mxu0 %v12305_v60  ;;  %12591 = vmatprep.subr.bf16.mxu1 %v12305_v60  ;;  %v338_v27 = vadd.f32 %v337_v23, %v13839_v18  ;;  %v389_v60 = vrot.slane %v367_v49, %v13800_v44  ;;  %v12320_v8 = vpack.c.bf16 %v583_v59, %v580_v58  ;;  %v595_v23 = vld [vmem:[#allocation7 + $0xe8] sm:$0xff]  ;;  %v613_v59 = vld [vmem:[#allocation7 + $0x178] sm:$0xff] }
  0xae   : > { %v511_v34 = vrot.slane %v448_v17, %v13824_v7  ;;  %v515_v46 = vrot.slane %v431_v35, %v13824_v7  ;;  %v13526_v17 = vmov 1934713408  }
  0xaf   : > { %v339_v37 = vadd.f32 %v338_v27, %v13848_v24  ;;  %v471_v63 = vrot.slane %v389_v60, %v13824_v7  ;;  %v399_v26 = vcombine.high %v389_v60, %v389_v60  ;;  %v13913_v27 = vadd.f32 %v507_v15, %v13835_v16 }
  0xb0   : > { %12308 = vmatpush1.bf16.msra.mxu0 %v12307_v9  ;;  %12599 = vmatpush1.bf16.msra.mxu1 %v12307_v9  ;;  %v586_v9 = vld [vmem:[#allocation7 + $0xa0] sm:$0xff]  ;;  %v13923_v16 = vadd.f32 %v475_v6, %v13783_v30  ;;  %v13929_v45 = vadd.f32 %v511_v34, %v13839_v18  ;;  %v604_v30 = vld [vmem:[#allocation7 + $0x130] sm:$0xff]  ;;  %v483_v18 = vrot.slane %v13817_v1, %v13824_v7  ;;  %v1015_v19 = vunpack.c.l.s4 %v13526_v17 }
  0xb1   : > { %12310 = vmatprep.subr.bf16.mxu0 %v12309_v13  ;;  %12592 = vmatprep.subr.bf16.mxu1 %v12309_v13  ;;  %v340_v48 = vadd.f32 %v339_v37, %v13852_v28  ;;  %v12323_v21 = vpack.c.bf16 %v589_v10, %v586_v9  ;;  %v13909_v25 = vadd.f32 %v471_v63, %v13780_v29  ;;  %v598_v37 = vld [vmem:[#allocation7 + $0x100] sm:$0xff] }
  0xb2   : > { %v12329_v49 = vpack.c.bf16 %v601_v38, %v598_v37  ;;  %v12332_v58 = vpack.c.bf16 %v607_v51, %v604_v30  ;;  %v553_v1 = vadd.f32 %v483_v18, %v13793_v39  ;;  %v1016_v34 = vunpack.c.0.s8 %v1015_v19 }
  0xb3   : > { %v341_v53 = vadd.f32 %v340_v48, %v13862_v41  ;;  %v445_v48 = vrot.slane %v417_v36, %v13800_v44 }
  0xb4   : > { %12312 = vmatpush1.bf16.msra.mxu0 %v12311_v22  ;;  %12600 = vmatpush1.bf16.msra.mxu1 %v12311_v22  ;;  %v592_v22 = vld [vmem:[#allocation7 + $0xd0] sm:$0xff] }
  0xb5   : > { %12313 = vmatprep.subr.bf16.mxu1 %v18151_v42  ;;  %12337 = vmatprep.subr.bf16.mxu0 %v18151_v42  ;;  %v342_v56 = vadd.f32 %v341_v53, %v13868_v50  ;;  %v12326_v29 = vpack.c.bf16 %v595_v23, %v592_v22  ;;  %v13942_v53 = vadd.f32 %v515_v46, %v13848_v24 }
  0xb6   : > { %v519_v54 = vrot.slane %v445_v48, %v13824_v7  ;;  %v449_v61 = vcombine.high %v445_v48, %v445_v48  ;;  %v14052_v48 = vsub.s32 %v1016_v34, %v13788_v33 }
  0xb7   : > { %732 = vmatmul.mubr.f32.vlgmr.msra.gmra.mrb[0].mxu1 %v13854_v32  ;;  %v343_v4 = vadd.f32 %v342_v56, %v13880_v57  ;;  %v487_v56 = vrot.slane %v13830_v11, %v13824_v7 }
  0xb8   : > { %737 = vmatprep.mubr.f32.mxu1 %v18153_v0  ;;  %12315 = vmatpush3.bf16.msra.mxu1 %v12314_v40  ;;  %v479_v40 = vrot.slane %v399_v26, %v13824_v7  ;;  %v562_v24 = vadd.f32 %v519_v54, %v13852_v28  ;;  %v527_v28 = vrot.slane %v449_v61, %v13824_v7 }
  0xb9   : > { %12316 = vmatprep.subr.bf16.mxu1 %v18151_v42  ;;  %v345_v13 = vmul.f32 0.0625, %v343_v4  ;;  %v554_v39 = vadd.f32 %v487_v56, %v13797_v43  ;;  %v463_v4 = vrot.slane %v10380_v2, %v13800_v44  ;;  %18333 = vst [vmem:[#allocation20_spill] sm:$0xff] %v14052_v48 }
  0xba   : > { %v552_v52 = vadd.f32 %v479_v40, %v13786_v31  ;;  %v610_v31 = vld [vmem:[#allocation7 + $0x160] sm:$0xff] }
  0xbb   : > { %738 = vmatmul.mubr.f32.gmra.mrb[2].mxu1 %v13872_v47  ;;  %v13903_v20 = vadd.f32 %v467_v5, %v345_v13  ;;  %v12335_v3 = vpack.c.bf16 %v613_v59, %v610_v31  ;;  %v564_v5 = vadd.f32 %v527_v28, %v13868_v50  ;;  %v531_v43 = vrot.slane %v463_v4, %v13824_v7 }
  0xbc   : > { %743 = vmatprep.mubr.f32.mxu1 %v18153_v0  ;;  %12318 = vmatpush3.bf16.msra.mxu1 %v12317_v55  ;;  %v447_v55 = vcombine.high %v431_v35, %v431_v35 }
  0xbd   : > { %12319 = vmatprep.subr.bf16.mxu1 %v18151_v42  ;;  %696 = vmatmul.mubr.f32.vlgmr.msra.gmra.mrb[0].mxu0 %v13903_v20  ;;  %v565_v44 = vadd.f32 %v531_v43, %v13880_v57 }
  0xbe   : > { %701 = vmatprep.mubr.f32.mxu0 %v18153_v0  ;;  %v523_v60 = vrot.slane %v447_v55, %v13824_v7 }
  0xbf   : > { %744 = vmatmul.mubr.f32.gmra.mrb[4].mxu1 %v13887_v62 }
  0xc0   : > { %749 = vmatprep.mubr.f32.mxu1 %v18153_v0  ;;  %12321 = vmatpush3.bf16.msra.mxu1 %v12320_v8  ;;  %v563_v11 = vadd.f32 %v523_v60, %v13862_v41 }
  0xc1   : > { %12322 = vmatprep.subr.bf16.mxu1 %v18151_v42  ;;  %702 = vmatmul.mubr.f32.gmra.mrb[2].mxu0 %v13909_v25 }
  0xc2   : > { %707 = vmatprep.mubr.f32.mxu0 %v18153_v0 }
  0xc3   : > { %750 = vmatmul.mubr.f32.gmra.mrb[6].mxu1 %v13900_v12 }
  0xc4   : > { %755 = vmatprep.mubr.f32.mxu1 %v18153_v0  ;;  %12324 = vmatpush3.bf16.msra.mxu1 %v12323_v21 }
  0xc5   : > { %12325 = vmatprep.subr.bf16.mxu1 %v18151_v42  ;;  %708 = vmatmul.mubr.f32.gmra.mrb[4].mxu0 %v13923_v16 }
  0xc6   : > { %713 = vmatprep.mubr.f32.mxu0 %v18153_v0 }
  0xc7   : > { %756 = vmatmul.mubr.f32.gmra.mrb[8].mxu1 %v13913_v27 }
  0xc8   : > { %761 = vmatprep.mubr.f32.mxu1 %v18153_v0  ;;  %12327 = vmatpush3.bf16.msra.mxu1 %v12326_v29 }
  0xc9   : > { %12328 = vmatprep.subr.bf16.mxu1 %v18151_v42  ;;  %714 = vmatmul.mubr.f32.gmra.mrb[6].mxu0 %v552_v52 }
  0xca   : > { %719 = vmatprep.mubr.f32.mxu0 %v18153_v0 }
  0xcb   : > { %762 = vmatmul.mubr.f32.gmra.mrb[10].mxu1 %v13929_v45 }
  0xcc   : > { %767 = vmatprep.mubr.f32.mxu1 %v18153_v0  ;;  %12330 = vmatpush3.bf16.msra.mxu1 %v12329_v49 }
  0xcd   : > { %12331 = vmatprep.subr.bf16.mxu1 %v18151_v42  ;;  %720 = vmatmul.mubr.f32.gmra.mrb[8].mxu0 %v553_v1 }
  0xce   : > { %725 = vmatprep.mubr.f32.mxu0 %v18153_v0 }
  0xcf   : > { %768 = vmatmul.mubr.f32.gmra.mrb[12].mxu1 %v13942_v53 }
  0xd0   : > { %773 = vmatprep.mubr.f32.mxu1 %v18153_v0  ;;  %12333 = vmatpush3.bf16.msra.mxu1 %v12332_v58 }
  0xd1   : > { %12334 = vmatprep.subr.bf16.mxu1 %v18151_v42  ;;  %726 = vmatmul.mubr.f32.gmra.mrb[10].mxu0 %v554_v39 }
  0xd2   : > { %11244 = vmatprep.mubr.msk.f32.mxu0 %vm13524_vm0, %v18153_v0 }
  0xd3   : > { %774 = vmatmul.mubr.f32.gmra.mrb[14].mxu1 %v562_v24 }
  0xd4   : > { %779 = vmatprep.mubr.f32.mxu1 %v18153_v0  ;;  %12336 = vmatpush3.bf16.msra.mxu1 %v12335_v3 }
  0xd5   : > { %12341 = vmatprep.subr.bf16.mxu1 %v18151_v42 }
  0xd7   : > { %780 = vmatmul.mubr.f32.gmra.mrb[16].mxu1 %v563_v11 }
  0xd8   : > { %785 = vmatprep.mubr.f32.mxu1 %v18153_v0 }
  0xdb   : > { %786 = vmatmul.mubr.f32.gmra.mrb[18].mxu1 %v564_v5 }
  0xdc   : > { %791 = vmatprep.mubr.f32.mxu1 %v18153_v0 }
  0xdf   : > { %792 = vmatmul.mubr.f32.gmra.mrb[20].mxu1 %v565_v44 }
  0xe0   : > { %11187 = vmatprep.mubr.msk.f32.mxu1 %vm13524_vm0, %v18153_v0 }
  0xe3   : > { %11188 = vmatmul.mubr.f32.vlgmr.msra.gmra.mrb[22].mxu1 %v13903_v20 }
  0xe4   : > { %11190 = vmatprep.mubr.msk.f32.mxu1 %vm13524_vm0, %v18153_v0 }
  0xe7   : > { %11191 = vmatmul.mubr.f32.gmra.mrb[24].mxu1 %v13909_v25 }
  0xe8   : > { %11193 = vmatprep.mubr.msk.f32.mxu1 %vm13524_vm0, %v18153_v0 }
  0xeb   : > { %11194 = vmatmul.mubr.f32.gmra.mrb[26].mxu1 %v13923_v16 }
  0xec   : > { %11196 = vmatprep.mubr.msk.f32.mxu1 %vm13524_vm0, %v18153_v0 }
  0xef   : > { %11197 = vmatmul.mubr.f32.gmra.mrb[28].mxu1 %v552_v52 }
  0xf0   : > { %11199 = vmatprep.mubr.msk.f32.mxu1 %vm13524_vm0, %v18153_v0 }
  0xf3   : > { %11200 = vmatmul.mubr.f32.gmra.mrb[30].mxu1 %v553_v1 }
  0xf4   : > { %11202 = vmatprep.mubr.msk.f32.mxu1 %vm13524_vm0, %v18153_v0 }
  0xf7   : > { %11203 = vmatmul.mubr.f32.gmra.mrb[32].mxu1 %v554_v39 }
  0xf8   : > { %11205 = vmatprep.mubr.msk.f32.mxu1 %vm13524_vm0, %v18153_v0 }
  0xfb   : > { %11206 = vmatmul.mubr.f32.gmra.mrb[34].mxu1 %v13854_v32  ;;  %v14019_v32 = vld [vmem:[%s18134_s3] sm:$0x7] }
  0xfc   : > { %11208 = vmatprep.mubr.msk.f32.mxu1 %vm13524_vm0, %v18153_v0  ;;  %v14023_v41 = vrot.slane %v14019_v32, %v13824_v7  ;;  %v13525_v7 = vmov 1983009808   ;;  %v14038_v6 = vrot.slane %v14019_v32, %v622_v14 }
  0xff   : > { %11209 = vmatmul.mubr.f32.gmra.mrb[36].mxu1 %v13872_v47 }
 0x100   : > { %11211 = vmatprep.mubr.msk.f32.mxu1 %vm13524_vm0, %v18153_v0 }
 0x103   : > { %11212 = vmatmul.mubr.f32.gmra.mrb[38].mxu1 %v13887_v62 }
 0x104   : > { %11214 = vmatprep.mubr.msk.f32.mxu1 %vm13524_vm0, %v18153_v0 }
 0x107   : > { %11215 = vmatmul.mubr.f32.gmra.mrb[40].mxu1 %v13900_v12  ;;  %v951_v12 = vunpack.c.l.s4 %v13525_v7 }
 0x108   : > { %11217 = vmatprep.mubr.msk.f32.mxu1 %vm13524_vm0, %v18153_v0 }
 0x10b   : > { %11218 = vmatmul.mubr.f32.gmra.mrb[42].mxu1 %v13913_v27  ;;  %v952_v27 = vunpack.c.0.s8 %v951_v12 }
 0x10c   : > { %11220 = vmatprep.mubr.msk.f32.mxu1 %vm13524_vm0, %v18153_v0 }
 0x10d   : > { %v14049_v46 = vsub.s32 %v952_v27, %v13788_v33 }
 0x10f   : > { %11221 = vmatmul.mubr.f32.gmra.mrb[44].mxu1 %v13929_v45  ;;  %18332 = vst [vmem:[#allocation19_spill] sm:$0xff] %v14049_v46 }
 0x110   : > { %11223 = vmatprep.mubr.msk.f32.mxu1 %vm13524_vm0, %v18153_v0 }
 0x113   : > { %11224 = vmatmul.mubr.f32.gmra.mrb[46].mxu1 %v13942_v53 }
 0x114   : > { %11226 = vmatprep.mubr.msk.f32.mxu1 %vm13524_vm0, %v18153_v0 }
 0x117   : > { %11227 = vmatmul.mubr.f32.gmra.mrb[48].mxu1 %v562_v24 }
 0x118   : > { %11229 = vmatprep.mubr.msk.f32.mxu1 %vm13524_vm0, %v18153_v0 }
 0x11b   : > { %11230 = vmatmul.mubr.f32.gmra.mrb[50].mxu1 %v563_v11 }
 0x11c   : > { %11232 = vmatprep.mubr.msk.f32.mxu1 %vm13524_vm0, %v18153_v0 }
 0x11f   : > { %11233 = vmatmul.mubr.f32.gmra.mrb[52].mxu1 %v564_v5 }
 0x120   : > { %11235 = vmatprep.mubr.msk.f32.mxu1 %vm13524_vm0, %v18153_v0 }
 0x123   : > { %11236 = vmatmul.mubr.f32.gmra.mrb[54].mxu1 %v565_v44 }
 0x124   : > { %11259 = vmatprep.mubr.msk.f32.mxu1 %vm13524_vm0, %v18153_v0 }
 0x18a   : > { %v733_v50 = vpop.f32.mrb[0].mxu1 }
 0x18b   : > { %v14026_v47 = vadd.f32 %v733_v50, %v14023_v41  ;;  %v735_v57 = vpop.f32.mrb[1].mxu1 }
 0x18c   : > { %v14056_v18 = vadd.f32 %v735_v57, %v14038_v6 }
 0x18e   : > { %v739_v62 = vpop.f32.mrb[2].mxu1 }
 0x18f   : > { %v14029_v8 = vadd.f32 %v739_v62, %v14023_v41  ;;  %v14031_v9 = vpop.f32.mrb[3].mxu1 }
 0x190   : > { %v697_v15 = vpop.f32.mrb[0].mxu0 }
 0x191   : > { %v698_v20 = vadd.f32 %v697_v15, %v14023_v41  ;;  %v699_v21 = vpop.f32.mrb[1].mxu0 }
 0x192   : > { %v745_v10 = vpop.f32.mrb[4].mxu1  ;;  %v700_v58 = vadd.f32 %v699_v21, %v14038_v6 }
 0x193   : > { %v746_v13 = vadd.f32 %v745_v10, %v14023_v41  ;;  %v747_v63 = vpop.f32.mrb[5].mxu1 }
 0x194   : > { %v703_v26 = vpop.f32.mrb[2].mxu0  ;;  %v14042_v29 = vadd.f32 %v747_v63, %v14038_v6 }
 0x195   : > { %v704_v35 = vadd.f32 %v703_v26, %v14023_v41  ;;  %v705_v36 = vpop.f32.mrb[3].mxu0 }
 0x196   : > { %v751_v22 = vpop.f32.mrb[6].mxu1  ;;  %v706_v24 = vadd.f32 %v705_v36, %v14038_v6 }
 0x197   : > { %v752_v23 = vadd.f32 %v751_v22, %v14023_v41  ;;  %v753_v25 = vpop.f32.mrb[7].mxu1 }
 0x198   : > { %v709_v45 = vpop.f32.mrb[4].mxu0  ;;  %v14065_v59 = vadd.f32 %v753_v25, %v14038_v6 }
 0x199   : > { %v710_v51 = vadd.f32 %v709_v45, %v14023_v41  ;;  %v711_v52 = vpop.f32.mrb[5].mxu0 }
 0x19a   : > { %v757_v37 = vpop.f32.mrb[8].mxu1  ;;  %v712_v31 = vadd.f32 %v711_v52, %v14038_v6 }
 0x19b   : > { %v758_v38 = vadd.f32 %v757_v37, %v14023_v41  ;;  %v759_v16 = vpop.f32.mrb[9].mxu1  ;;  %v948_v60 = vcombine.low %v698_v20, %v710_v51  ;;  %v949_v61 = vcombine.high %v698_v20, %v710_v51 }
 0x19c   : > { %v14046_v40 = vadd.f32 %v759_v16, %v14038_v6  ;;  %v1269_v3 = vcombine.low %v700_v58, %v712_v31  ;;  %v1270_v39 = vcombine.high %v700_v58, %v712_v31  ;;  %v715_v11 = vpop.f32.mrb[6].mxu0 }
 0x19d   : > { %v1084_v49 = vcombine.low %v746_v13, %v758_v38  ;;  %v1085_v30 = vcombine.high %v746_v13, %v758_v38  ;;  %v956_v5 = vrot.slane %v948_v60, %v14049_v46  ;;  %v716_v43 = vadd.f32 %v715_v11, %v14023_v41  ;;  %v717_v44 = vpop.f32.mrb[7].mxu0 }
 0x19e   : > { %v1405_v53 = vcombine.low %v14042_v29, %v14046_v40  ;;  %v1406_v54 = vcombine.high %v14042_v29, %v14046_v40  ;;  %v763_v55 = vpop.f32.mrb[10].mxu1  ;;  %v14083_v10 = vrot.slane %v949_v61, %v14049_v46  ;;  %v1277_v13 = vrot.slane %v1269_v3, %v14049_v46 }
 0x19f   : > { %v764_v1 = vadd.f32 %v763_v55, %v14023_v41  ;;  %v765_v56 = vpop.f32.mrb[11].mxu1  ;;  %v14070_v2 = vrot.slane %v1084_v49, %v14049_v46  ;;  %v14075_v50 = vrot.slane %v1085_v30, %v14049_v46  ;;  %v718_v63 = vadd.f32 %v717_v44, %v14038_v6 }
 0x1a0   : > { %v14078_v57 = vadd.f32 %v765_v56, %v14038_v6  ;;  %v964_v7 = vcombine.low %v704_v35, %v716_v43  ;;  %v965_v12 = vcombine.high %v704_v35, %v716_v43  ;;  %v721_v22 = vpop.f32.mrb[8].mxu0  ;;  %v14111_v37 = vrot.slane %v1270_v39, %v14049_v46 }
 0x1a1   : > { %v1100_v28 = vcombine.low %v752_v23, %v764_v1  ;;  %v1101_v4 = vcombine.high %v752_v23, %v764_v1  ;;  %v1285_v20 = vcombine.low %v706_v24, %v718_v63  ;;  %v1286_v21 = vcombine.high %v706_v24, %v718_v63  ;;  %v723_v35 = vpop.f32.mrb[9].mxu0 }
 0x1a2   : > { %v14080_v62 = vpop.f32.mrb[12].mxu1  ;;  %v1421_v19 = vcombine.low %v14065_v59, %v14078_v57  ;;  %v972_v26 = vrot.slane %v964_v7, %v14049_v46  ;;  %v14103_v27 = vrot.slane %v965_v12, %v14049_v46  ;;  %v722_v34 = vadd.f32 %v721_v22, %v14023_v41 }
 0x1a3   : > { %v14088_v14 = vrot.slane %v1100_v28, %v14049_v46  ;;  %v14090_v15 = vpop.f32.mrb[13].mxu1  ;;  %v14093_v17 = vrot.slane %v1101_v4, %v14049_v46  ;;  %v1293_v38 = vrot.slane %v1285_v20, %v14049_v46  ;;  %v14115_v16 = vrot.slane %v1286_v21, %v14049_v46 }
 0x1a4   : > { %v724_v40 = vadd.f32 %v723_v35, %v14038_v6  ;;  %v1012_v49 = vcombine.low %v956_v5, %v972_v26  ;;  %v1013_v30 = vcombine.high %v956_v5, %v972_v26  ;;  %v1028_v51 = vcombine.low %v14083_v10, %v14103_v27  ;;  %v727_v56 = vpop.f32.mrb[10].mxu0 }
 0x1a5   : > { %v1148_v23 = vcombine.low %v14070_v2, %v14088_v14  ;;  %v1149_v25 = vcombine.high %v14070_v2, %v14088_v14  ;;  %v1164_v36 = vcombine.low %v14075_v50, %v14093_v17  ;;  %v1029_v52 = vcombine.high %v14083_v10, %v14103_v27  ;;  %v729_v60 = vpop.f32.mrb[11].mxu0 }
 0x1a6   : > { %v14108_v29 = vpop.f32.mrb[14].mxu1  ;;  %v1333_v55 = vcombine.low %v1277_v13, %v1293_v38  ;;  %v1334_v58 = vcombine.high %v1277_v13, %v1293_v38  ;;  %v1349_v31 = vcombine.low %v14111_v37, %v14115_v16  ;;  %v1350_v1 = vcombine.high %v14111_v37, %v14115_v16 }
 0x1a7   : > { %v14118_v45 = vpop.f32.mrb[15].mxu1  ;;  %v742_v24 = vadd.f32 %v14031_v9, %v14038_v6  ;;  %v14131_v61 = vrot.slane %v1405_v53, %v14049_v46  ;;  %v14136_v39 = vrot.slane %v1012_v49, %v14052_v48  ;;  %v14139_v11 = vrot.slane %v1013_v30, %v14052_v48 }
 0x1a8   : > { %v14142_v28 = vrot.slane %v1406_v54, %v14049_v46  ;;  %v14145_v4 = vrot.slane %v1148_v23, %v14052_v48  ;;  %v980_v9 = vcombine.low %v722_v34, %v14026_v47  ;;  %v981_v53 = vcombine.high %v722_v34, %v14026_v47 }
 0x1a9   : > { %v1301_v43 = vcombine.low %v724_v40, %v14056_v18  ;;  %v1302_v44 = vcombine.high %v724_v40, %v14056_v18  ;;  %v14154_v13 = vrot.slane %v1028_v51, %v14052_v48  ;;  %v728_v63 = vadd.f32 %v727_v56, %v14023_v41 }
 0x1aa   : > { %v14133_v3 = vpop.f32.mrb[16].mxu1  ;;  %v730_v54 = vadd.f32 %v729_v60, %v14038_v6  ;;  %v1165_v7 = vcombine.high %v14075_v50, %v14093_v17  ;;  %v1341_v12 = vrot.slane %v1333_v55, %v14052_v48  ;;  %v1348_v20 = vrot.slane %v1334_v58, %v14052_v48 }
 0x1ab   : > { %v14147_v5 = vpop.f32.mrb[17].mxu1  ;;  %v988_v47 = vrot.slane %v980_v9, %v14049_v46  ;;  %v995_v21 = vrot.slane %v981_v53, %v14049_v46  ;;  %v996_v18 = vcombine.low %v728_v63, %v14029_v8  ;;  %v997_v23 = vcombine.high %v728_v63, %v14029_v8 }
 0x1ac   : > { %v1317_v26 = vcombine.low %v730_v54, %v742_v24  ;;  %v1318_v34 = vcombine.high %v730_v54, %v742_v24  ;;  %v1309_v37 = vrot.slane %v1301_v43, %v14049_v46  ;;  %v1316_v38 = vrot.slane %v1302_v44, %v14049_v46 }
 0x1ad   : > { %v1422_v16 = vcombine.high %v14065_v59, %v14078_v57  ;;  %v1429_v40 = vrot.slane %v1421_v19, %v14049_v46  ;;  %v1004_v49 = vrot.slane %v996_v18, %v14049_v46  ;;  %v1011_v30 = vrot.slane %v997_v23, %v14049_v46 }
 0x1ae   : > { %v787_v22 = vpop.f32.mrb[18].mxu1  ;;  %v1325_v51 = vrot.slane %v1317_v26, %v14049_v46  ;;  %v1332_v8 = vrot.slane %v1318_v34, %v14049_v46  ;;  %v770_v59 = vadd.f32 %v14080_v62, %v14023_v41  ;;  %v1357_v18 = vrot.slane %v1349_v31, %v14052_v48 }
 0x1af   : > { %v789_v35 = vpop.f32.mrb[19].mxu1  ;;  %v14176_v55 = vrot.slane %v1422_v16, %v14049_v46  ;;  %v1469_v58 = vcombine.low %v14131_v61, %v1429_v40  ;;  %v1470_v56 = vcombine.high %v14131_v61, %v1429_v40  ;;  %v1044_v19 = vcombine.low %v988_v47, %v1004_v49 }
 0x1b0   : > { %v1045_v24 = vcombine.high %v988_v47, %v1004_v49  ;;  %v1060_v60 = vcombine.low %v995_v21, %v1011_v30  ;;  %v1061_v9 = vcombine.high %v995_v21, %v1011_v30  ;;  %v1365_v43 = vcombine.low %v1309_v37, %v1325_v51 }
 0x1b1   : > { %v1366_v44 = vcombine.high %v1309_v37, %v1325_v51  ;;  %v1381_v63 = vcombine.low %v1316_v38, %v1332_v8  ;;  %v1382_v54 = vcombine.high %v1316_v38, %v1332_v8  ;;  %v1364_v23 = vrot.slane %v1350_v1, %v14052_v48 }
 0x1b2   : > { %v14182_v57 = vpop.f32.mrb[20].mxu1  ;;  %v1052_v61 = vrot.slane %v1044_v19, %v14052_v48  ;;  %v1059_v62 = vrot.slane %v1045_v24, %v14052_v48  ;;  %v1373_v26 = vrot.slane %v1365_v43, %v14052_v48  ;;  %v14195_v37 = vrot.slane %v1060_v60, %v14052_v48 }
 0x1b3   : > { %v14184_v53 = vpop.f32.mrb[21].mxu1  ;;  %v1380_v47 = vrot.slane %v1366_v44, %v14052_v48  ;;  %v1389_v21 = vrot.slane %v1381_v63, %v14052_v48  ;;  %v1396_v34 = vrot.slane %v1382_v54, %v14052_v48  ;;  %v14198_v38 = vrot.slane %v1061_v9, %v14052_v48 }
 0x1b4   : > { %v1485_v31 = vcombine.low %v14142_v28, %v14176_v55  ;;  %v1486_v1 = vcombine.high %v14142_v28, %v14176_v55  ;;  %v14204_v16 = vcombine.low %v1341_v12, %v1373_v26  ;;  %v14206_v40 = vcombine.high %v1341_v12, %v1373_v26 }
 0x1b5   : > { %v14208_v49 = vcombine.low %v1348_v20, %v1380_v47  ;;  %v14210_v30 = vcombine.high %v1348_v20, %v1380_v47  ;;  %v14212_v51 = vcombine.low %v1357_v18, %v1389_v21  ;;  %v14214_v8 = vcombine.high %v1357_v18, %v1389_v21 }
 0x1b6   : > { %v14216_v19 = vcombine.low %v1364_v23, %v1396_v34  ;;  %v14218_v24 = vcombine.high %v1364_v23, %v1396_v34  ;;  %v1477_v60 = vrot.slane %v1469_v58, %v14052_v48  ;;  %v1484_v28 = vrot.slane %v1470_v56, %v14052_v48 }
 0x1b7   : > { %v772_v12 = vadd.f32 %v14090_v15, %v14038_v6  ;;  %v776_v55 = vadd.f32 %v14108_v29, %v14023_v41  ;;  %v778_v20 = vadd.f32 %v14118_v45, %v14038_v6  ;;  %v14229_v9 = vcombine.high %v14136_v39, %v1052_v61 }
 0x1b8   : > { %v14232_v43 = vcombine.low %v14136_v39, %v1052_v61  ;;  %v782_v58 = vadd.f32 %v14133_v3, %v14023_v41  ;;  %v784_v56 = vadd.f32 %v14147_v5, %v14038_v6  ;;  %v788_v15 = vadd.f32 %v787_v22, %v14023_v41 }
 0x1b9   : > { %v790_v44 = vadd.f32 %v789_v35, %v14038_v6  ;;  %v14241_v29 = vcombine.high %v14139_v11, %v1059_v62  ;;  %1941 = vrot.lane.b32.xlu1 %v14229_v9, %s13527_s26  ;;  %v14248_v3 = vcombine.low %v14139_v11, %v1059_v62  ;;  %v14268_v34 = vcombine.high %v14154_v13, %v14195_v37 }
 0x1ba   : > { %1935 = vrot.lane.b32.xlu0 %v14232_v43, %s13527_s26  ;;  %v1116_v45 = vcombine.low %v770_v59, %v782_v58  ;;  %v1117_v39 = vcombine.high %v770_v59, %v782_v58  ;;  %v1437_v5 = vcombine.low %v772_v12, %v784_v56  ;;  %v1438_v63 = vcombine.high %v772_v12, %v784_v56 }
 0x1bb   : > { %v1132_v22 = vcombine.low %v776_v55, %v788_v15  ;;  %v1133_v54 = vcombine.high %v776_v55, %v788_v15  ;;  %v1453_v23 = vcombine.low %v778_v20, %v790_v44  ;;  %v1454_v61 = vcombine.high %v778_v20, %v790_v44 }
 0x1bc   : > { %v1124_v35 = vrot.slane %v1116_v45, %v14049_v46  ;;  %v14252_v18 = vrot.slane %v1117_v39, %v14049_v46  ;;  %v1445_v26 = vrot.slane %v1437_v5, %v14049_v46  ;;  %v1452_v47 = vrot.slane %v1438_v63, %v14049_v46 }
 0x1bd   : > { %v1140_v59 = vrot.slane %v1132_v22, %v14049_v46  ;;  %v14258_v11 = vrot.slane %v1133_v54, %v14049_v46  ;;  %v1461_v62 = vrot.slane %v1453_v23, %v14049_v46  ;;  %v1468_v21 = vrot.slane %v1454_v61, %v14049_v46  ;;  %1953 = vrot.lane.b32.xlu1 %v14241_v29, %s13527_s26 }
 0x1be   : > { %1947 = vrot.lane.b32.xlu0 %v14248_v3, %s13527_s26  ;;  %v1043_v39 = vrot.slane %v1029_v52, %v14052_v48  ;;  %v1493_v5 = vrot.slane %v1485_v31, %v14052_v48  ;;  %v1500_v63 = vrot.slane %v1486_v1, %v14052_v48  ;;  %v14289_v10 = vcombine.low %v14154_v13, %v14195_v37 }
 0x1bf   : > { %v1180_v12 = vcombine.low %v1124_v35, %v1140_v59  ;;  %v1181_v55 = vcombine.high %v1124_v35, %v1140_v59  ;;  %v1196_v20 = vcombine.low %v14252_v18, %v14258_v11  ;;  %v1197_v58 = vcombine.high %v14252_v18, %v14258_v11 }
 0x1c0   : > { %v1501_v56 = vcombine.low %v1445_v26, %v1461_v62  ;;  %v1502_v15 = vcombine.high %v1445_v26, %v1461_v62  ;;  %v1517_v44 = vcombine.low %v1452_v47, %v1468_v21  ;;  %v1518_v45 = vcombine.high %v1452_v47, %v1468_v21 }
 0x1c1   : > { %v1188_v22 = vrot.slane %v1180_v12, %v14052_v48  ;;  %1965 = vrot.lane.b32.xlu1 %v14268_v34, %s13527_s26  ;;  %v14292_v27 = vcombine.high %v1043_v39, %v14198_v38  ;;  %v14295_v52 = vcombine.low %v1043_v39, %v14198_v38  ;;  %v14299_v31 = vadd.f32 %v14182_v57, %v14023_v41 }
 0x1c2   : > { %v1509_v54 = vrot.slane %v1501_v56, %v14052_v48  ;;  %v1516_v35 = vrot.slane %v1502_v15, %v14052_v48  ;;  %v1525_v18 = vrot.slane %v1517_v44, %v14052_v48  ;;  %v1532_v23 = vrot.slane %v1518_v45, %v14052_v48  ;;  %1959 = vrot.lane.b32.xlu0 %v14289_v10, %s13527_s26 }
 0x1c3   : > { %v14325_v57 = vadd.f32 %v14184_v53, %v14038_v6  ;;  %v14334_v21 = vcombine.low %v14145_v4, %v1188_v22  ;;  %v1163_v12 = vrot.slane %v1149_v25, %v14052_v48  ;;  %v1195_v6 = vrot.slane %v1181_v55, %v14052_v48 }
 0x1c4   : > { %v1533_v1 = vcombine.low %v1477_v60, %v1509_v54  ;;  %v1534_v61 = vcombine.high %v1477_v60, %v1509_v54  ;;  %v14301_v26 = vcombine.low %v1484_v28, %v1516_v35  ;;  %v14303_v47 = vcombine.high %v1484_v28, %v1516_v35 }
 0x1c5   : > { %v14305_v59 = vcombine.low %v1493_v5, %v1525_v18  ;;  %v14307_v13 = vcombine.high %v1493_v5, %v1525_v18  ;;  %v14309_v37 = vcombine.low %v1500_v63, %v1532_v23  ;;  %v14311_v11 = vcombine.high %v1500_v63, %v1532_v23  ;;  %1977 = vrot.lane.b32.xlu1 %v14292_v27, %s13527_s26 }
 0x1c6   : > { %v12338_v38 = vpack.c.bf16 %v1533_v1, %v14204_v16  ;;  %v12342_v60 = vpack.c.bf16 %v1534_v61, %v14206_v40  ;;  %v12346_v28 = vpack.c.bf16 %v14301_v26, %v14208_v49  ;;  %v12350_v62 = vpack.c.bf16 %v14303_v47, %v14210_v30  ;;  %1971 = vrot.lane.b32.xlu0 %v14295_v52, %s13527_s26 }
 0x1c7   : > { %v14343_v53 = vrot.slane %v14299_v31, %v14049_v46  ;;  %v1548_v56 = vrot.slane %v14325_v57, %v14049_v46  ;;  %v14354_v2 = vcombine.high %v14145_v4, %v1188_v22  ;;  %v12354_v14 = vpack.c.bf16 %v14305_v59, %v14212_v51 }
 0x1c8   : > { %12340 = vmatpush3.bf16.xpose.msk.msra.mxu0 %vm14317_vm2, %v12338_v38  ;;  %12344 = vmatpush3.bf16.xpose.msk.msra.mxu1 %vm14317_vm2, %v12342_v60  ;;  %v1172_v25 = vrot.slane %v1164_v36, %v14052_v48  ;;  %v1204_v55 = vrot.slane %v1196_v20, %v14052_v48  ;;  %v1179_v4 = vrot.slane %v1165_v7, %v14052_v48 }
 0x1c9   : > { %1989 = vrot.lane.b32.xlu1 %v14229_v9, %s13528_s1  ;;  %v14366_v15 = vrot.slane %v1548_v56, %v14052_v48  ;;  %11242 = vmatprep.subr.mxu0 %v18153_v0  ;;  %v1211_v44 = vrot.slane %v1197_v58, %v14052_v48  ;;  %v14377_v45 = vrot.slane %v14343_v53, %v14052_v48 }
 0x1ca   : > { %11257 = vmatprep.subr.mxu1 %v18153_v0  ;;  %v12358_v36 = vpack.c.bf16 %v14307_v13, %v14214_v8  ;;  %1983 = vrot.lane.b32.xlu0 %v14232_v43, %s13528_s1  ;;  %v1556_v20 = vcombine.high %v1548_v56, %v18153_v0  ;;  %v14388_v50 = vcombine.low %v1163_v12, %v1195_v6 }
 0x1cb   : > { %v14386_v39 = vcombine.high %v14366_v15, %v18153_v0  ;;  %v14390_v17 = vcombine.high %v1163_v12, %v1195_v6  ;;  %v12362_v7 = vpack.c.bf16 %v14309_v37, %v14216_v19  ;;  %v12366_v58 = vpack.c.bf16 %v14311_v11, %v14218_v24 }
 0x1cc   : > { %v14398_v5 = vcombine.low %v1172_v25, %v1204_v55  ;;  %v14400_v63 = vcombine.high %v1172_v25, %v1204_v55  ;;  %v14406_v22 = vcombine.high %v14377_v45, %v18153_v0  ;;  %v14408_v54 = vcombine.high %v1179_v4, %v1211_v44 }
 0x1cd   : > { %2001 = vrot.lane.b32.xlu1 %v14241_v29, %s13528_s1  ;;  %v14410_v35 = vcombine.low %v1179_v4, %v1211_v44  ;;  %v14413_v18 = vrot.slane %v1556_v20, %v14052_v48  ;;  %v14421_v23 = vpack.i.bf16 %v14303_v47, %v14210_v30  ;;  %v14425_v38 = vpack.i.bf16 %v14307_v13, %v14214_v8 }
 0x1ce   : > { %1995 = vrot.lane.b32.xlu0 %v14248_v3, %s13528_s1  ;;  %v14432_v60 = vpack.i.bf16 %v14311_v11, %v14218_v24  ;;  %v14435_v12 = vpack.i.bf16 %v1534_v61, %v14206_v40  ;;  %v14441_v30 = vpack.i.bf16 %v1533_v1, %v14204_v16  ;;  %v14449_v47 = vpack.i.bf16 %v14301_v26, %v14208_v49 }
 0x1cf   : > { %v14457_v16 = vpack.i.bf16 %v14305_v59, %v14212_v51  ;;  %v14465_v40 = vpack.i.bf16 %v14309_v37, %v14216_v19  ;;  %v14481_v49 = vcombine.high %v14413_v18, %v18153_v0  ;;  %v1541_v1 = vcombine.high %v14325_v57, %v18153_v0 }
 0x1d0   : > { %11243 = vmatpush3.xpose.msk.msra.mxu0 %vm2463_vm1, %v14366_v15  ;;  %11258 = vmatpush3.xpose.msk.msra.mxu1 %vm2463_vm1, %v14386_v39  ;;  %v1235_v61 = vcombine.high %v14343_v53, %v18153_v0 }
 0x1d1   : > { %2013 = vrot.lane.b32.xlu1 %v14268_v34, %s13528_s1  ;;  %12345 = vmatprep.subr.bf16.mxu0 %v18151_v42 }
 0x1d2   : > { %12349 = vmatprep.subr.bf16.mxu1 %v18151_v42  ;;  %2007 = vrot.lane.b32.xlu0 %v14289_v10, %s13528_s1 }
 0x1d3   : > { %11245 = vmatmul.mubr.msk.f32.vlgmr.msra.gmra.mrb[12].mxu0 %vm2463_vm1, %v14232_v43  ;;  %11260 = vmatmul.mubr.msk.f32.vlgmr.msra.gmra.mrb[56].mxu1 %vm2463_vm1, %v14229_v9 }
 0x1d4   : > { %12348 = vmatpush3.bf16.xpose.msk.msra.mxu0 %vm14317_vm2, %v12346_v28  ;;  %12352 = vmatpush3.bf16.xpose.msk.msra.mxu1 %vm14317_vm2, %v12350_v62 }
 0x1d5   : > { %2025 = vrot.lane.b32.xlu1 %v14292_v27, %s13528_s1  ;;  %11247 = vmatprep.mubr.msk.f32.mxu0 %vm13524_vm0, %v18153_v0 }
 0x1d6   : > { %11262 = vmatprep.mubr.msk.f32.mxu1 %vm13524_vm0, %v18153_v0  ;;  %2019 = vrot.lane.b32.xlu0 %v14295_v52, %s13528_s1 }
 0x1d7   : > { %11248 = vmatmul.mubr.msk.f32.gmra.mrb[14].mxu0 %vm2463_vm1, %v14334_v21  ;;  %11263 = vmatmul.mubr.msk.f32.gmra.mrb[58].mxu1 %vm2463_vm1, %v14354_v2 }
 0x1d8   : > { %11250 = vmatprep.mubr.msk.f32.mxu0 %vm13524_vm0, %v18153_v0  ;;  %11265 = vmatprep.mubr.msk.f32.mxu1 %vm13524_vm0, %v18153_v0 }
 0x1d9   : > { %2037 = vrot.lane.b32.xlu1 %v14229_v9, %s13529_s17  ;;  %11272 = vmatprep.subr.mxu0 %v18153_v0  ;;  %v1555_v9 = vrot.slane %v1541_v1, %v14049_v46 }
 0x1da   : > { %11287 = vmatprep.subr.mxu1 %v18153_v0  ;;  %2031 = vrot.lane.b32.xlu0 %v14232_v43, %s13529_s17  ;;  %v14514_v43 = vrot.slane %v1235_v61, %v14052_v48 }
 0x1db   : > { %11251 = vmatmul.mubr.msk.f32.gmra.mrb[16].mxu0 %vm2463_vm1, %v14377_v45  ;;  %11266 = vmatmul.mubr.msk.f32.gmra.mrb[60].mxu1 %vm2463_vm1, %v14406_v22  ;;  %v1571_v26 = vcombine.high %v1555_v9, %v18153_v0 }
 0x1dc   : > { %11273 = vmatpush3.xpose.msk.msra.mxu0 %vm2463_vm1, %v14413_v18  ;;  %11288 = vmatpush3.xpose.msk.msra.mxu1 %vm2463_vm1, %v14481_v49  ;;  %v14546_v51 = vcombine.high %v14514_v43, %v18153_v0 }
 0x1dd   : > { %2049 = vrot.lane.b32.xlu1 %v14241_v29, %s13529_s17  ;;  %11274 = vmatprep.mubr.msk.f32.mxu0 %vm13524_vm0, %v18153_v0  ;;  %v14610_v19 = vrot.slane %v1571_v26, %v14052_v48 }
 0x1de   : > { %11289 = vmatprep.mubr.msk.f32.mxu1 %vm13524_vm0, %v18153_v0  ;;  %12353 = vmatprep.subr.bf16.mxu0 %v18151_v42 }
 0x1df   : > { %11275 = vmatmul.mubr.msk.f32.vlgmr.msra.gmra.mrb[18].mxu0 %vm2463_vm1, %v14248_v3  ;;  %11290 = vmatmul.mubr.msk.f32.vlgmr.msra.gmra.mrb[62].mxu1 %vm2463_vm1, %v14241_v29  ;;  %v14527_v29 = vrot.slane %v1555_v9, %v14052_v48 }
 0x1e0   : > { %2043 = vrot.lane.b32.xlu0 %v14248_v3, %s13529_s17  ;;  %12357 = vmatprep.subr.bf16.mxu1 %v18151_v42  ;;  %v1220_v3 = vcombine.high %v14299_v31, %v18153_v0 }
 0x1e1   : > { %2061 = vrot.lane.b32.xlu1 %v14268_v34, %s13529_s17  ;;  %12356 = vmatpush3.bf16.xpose.msk.msra.mxu0 %vm14317_vm2, %v12354_v14  ;;  %v14557_v8 = vcombine.high %v14527_v29, %v18153_v0 }
 0x1e2   : > { %12360 = vmatpush3.bf16.xpose.msk.msra.mxu1 %vm14317_vm2, %v12358_v36  ;;  %11277 = vmatprep.mubr.msk.f32.mxu0 %vm13524_vm0, %v18153_v0  ;;  %v1234_v31 = vrot.slane %v1220_v3, %v14049_v46 }
 0x1e3   : > { %11292 = vmatprep.mubr.msk.f32.mxu1 %vm13524_vm0, %v18153_v0  ;;  %11278 = vmatmul.mubr.msk.f32.gmra.mrb[20].mxu0 %vm2463_vm1, %v14388_v50 }
 0x1e4   : > { %2055 = vrot.lane.b32.xlu0 %v14289_v10, %s13529_s17  ;;  %11293 = vmatmul.mubr.msk.f32.gmra.mrb[64].mxu1 %vm2463_vm1, %v14390_v17  ;;  %v1250_v59 = vcombine.high %v1234_v31, %v18153_v0 }
 0x1e5   : > { %2073 = vrot.lane.b32.xlu1 %v14292_v27, %s13529_s17  ;;  %11280 = vmatprep.mubr.msk.f32.mxu0 %vm13524_vm0, %v18153_v0 }
 0x1e6   : > { %11295 = vmatprep.mubr.msk.f32.mxu1 %vm13524_vm0, %v18153_v0  ;;  %11302 = vmatprep.subr.mxu0 %v18153_v0  ;;  %v14663_v13 = vrot.slane %v1250_v59, %v14052_v48 }
 0x1e7   : > { %11281 = vmatmul.mubr.msk.f32.gmra.mrb[22].mxu0 %vm2463_vm1, %v14514_v43  ;;  %11317 = vmatprep.subr.mxu1 %v18153_v0 }
 0x1e8   : > { %2067 = vrot.lane.b32.xlu0 %v14295_v52, %s13529_s17  ;;  %11296 = vmatmul.mubr.msk.f32.gmra.mrb[66].mxu1 %vm2463_vm1, %v14546_v51  ;;  %v14683_v11 = vcombine.high %v14663_v13, %v18153_v0 }
 0x1e9   : > { %2107 = vrot.lane.b32.xlu1 %v14366_v15, %s13527_s26  ;;  %11303 = vmatpush3.xpose.msk.msra.mxu0 %vm2463_vm1, %v14527_v29 }
 0x1ea   : > { %11318 = vmatpush3.xpose.msk.msra.mxu1 %vm2463_vm1, %v14557_v8  ;;  %11304 = vmatprep.mubr.msk.f32.mxu0 %vm13524_vm0, %v18153_v0 }
 0x1eb   : > { %11319 = vmatprep.mubr.msk.f32.mxu1 %vm13524_vm0, %v18153_v0  ;;  %12361 = vmatprep.subr.bf16.mxu0 %v18151_v42 }
 0x1ec   : > { %1939 = vrot.lane.b32.xlu0 %v14377_v45, %s13527_s26  ;;  %11305 = vmatmul.mubr.msk.f32.vlgmr.msra.gmra.mrb[24].mxu0 %vm2463_vm1, %v14289_v10  ;;  %v14603_v10 = vrot.slane %v1234_v31, %v14052_v48 }
 0x1ed   : > { %1943 = vrot.lane.b32.xlu1 %v14354_v2, %s13527_s26  ;;  %11320 = vmatmul.mubr.msk.f32.vlgmr.msra.gmra.mrb[68].mxu1 %vm2463_vm1, %v14268_v34  ;;  %v14636_v34 = vcombine.high %v14610_v19, %v18153_v0 }
 0x1ee   : > { %12365 = vmatprep.subr.bf16.mxu1 %v18151_v42  ;;  %12364 = vmatpush3.bf16.xpose.msk.msra.mxu0 %vm14317_vm2, %v12362_v7  ;;  %v14627_v24 = vcombine.high %v14603_v10, %v18153_v0 }
 0x1ef   : > { %12368 = vmatpush3.bf16.xpose.msk.msra.mxu1 %vm14317_vm2, %v12366_v58  ;;  %11307 = vmatprep.mubr.msk.f32.mxu0 %vm13524_vm0, %v18153_v0 }
 0x1f0   : > { %1987 = vrot.lane.b32.xlu0 %v14377_v45, %s13528_s1  ;;  %11322 = vmatprep.mubr.msk.f32.mxu1 %vm13524_vm0, %v18153_v0 }
 0x1f1   : > { %1945 = vrot.lane.b32.xlu1 %v14406_v22, %s13527_s26  ;;  %11308 = vmatmul.mubr.msk.f32.gmra.mrb[26].mxu0 %vm2463_vm1, %v14398_v5 }
 0x1f2   : > { %11323 = vmatmul.mubr.msk.f32.gmra.mrb[70].mxu1 %vm2463_vm1, %v14400_v63  ;;  %11310 = vmatprep.mubr.msk.f32.mxu0 %vm13524_vm0, %v18153_v0 }
 0x1f3   : > { %11325 = vmatprep.mubr.msk.f32.mxu1 %vm13524_vm0, %v18153_v0  ;;  %11332 = vmatprep.subr.mxu0 %v18153_v0 }
 0x1f4   : > { %2035 = vrot.lane.b32.xlu0 %v14377_v45, %s13529_s17  ;;  %11347 = vmatprep.subr.mxu1 %v18153_v0 }
 0x1f5   : > { %1955 = vrot.lane.b32.xlu1 %v14390_v17, %s13527_s26  ;;  %11311 = vmatmul.mubr.msk.f32.gmra.mrb[28].mxu0 %vm2463_vm1, %v14603_v10 }
 0x1f6   : > { %11326 = vmatmul.mubr.msk.f32.gmra.mrb[72].mxu1 %vm2463_vm1, %v14627_v24  ;;  %11333 = vmatpush3.xpose.msk.msra.mxu0 %vm2463_vm1, %v14610_v19 }
 0x1f7   : > { %11348 = vmatpush3.xpose.msk.msra.mxu1 %vm2463_vm1, %v14636_v34  ;;  %11334 = vmatprep.mubr.msk.f32.mxu0 %vm13524_vm0, %v18153_v0 }
 0x1f8   : > { %2155 = vrot.lane.b32.xlu0 %v14366_v15, %s13528_s1  ;;  %11349 = vmatprep.mubr.msk.f32.mxu1 %vm13524_vm0, %v18153_v0 }
 0x1f9   : > { %1967 = vrot.lane.b32.xlu1 %v14400_v63, %s13527_s26  ;;  %11335 = vmatmul.mubr.msk.f32.vlgmr.msra.gmra.mrb[30].mxu0 %vm2463_vm1, %v14295_v52  ;;  %v864_v52 = vpop.f32.mrb[22].mxu1 }
 0x1fa   : > { %11350 = vmatmul.mubr.msk.f32.vlgmr.msra.gmra.mrb[74].mxu1 %vm2463_vm1, %v14292_v27  ;;  %11337 = vmatprep.mubr.msk.f32.mxu0 %vm13524_vm0, %v18153_v0  ;;  %v626_v27 = vsub.s32 2, %v13788_v33  ;;  %v11189_v37 = vpop.f32.mrb[23].mxu1 }
 0x1fb   : > { %11352 = vmatprep.mubr.msk.f32.mxu1 %vm13524_vm0, %v18153_v0  ;;  %12369 = vmatprep.subr.bf16.mxu0 %v18151_v42  ;;  %v869_v28 = vpop.f32.mrb[24].mxu1 }
 0x1fc   : > { %2203 = vrot.lane.b32.xlu0 %v14366_v15, %s13529_s17  ;;  %12373 = vmatprep.subr.bf16.mxu1 %v18151_v42  ;;  %v14686_v57 = vrot.slane %v14019_v32, %v626_v27  ;;  %v11192_v33 = vpop.f32.mrb[25].mxu1 }
 0x1fd   : > { %1979 = vrot.lane.b32.xlu1 %v14408_v54, %s13527_s26  ;;  %11338 = vmatmul.mubr.msk.f32.gmra.mrb[32].mxu0 %vm2463_vm1, %v14410_v35  ;;  %v874_v6 = vpop.f32.mrb[26].mxu1 }
 0x1fe   : > { %11353 = vmatmul.mubr.msk.f32.gmra.mrb[76].mxu1 %vm2463_vm1, %v14408_v54  ;;  %11340 = vmatprep.mubr.msk.f32.mxu0 %vm13524_vm0, %v18153_v0  ;;  %v865_v62 = vadd.f32 %v864_v52, %v14686_v57  ;;  %v870_v32 = vadd.f32 %v869_v28, %v14686_v57  ;;  %v875_v53 = vadd.f32 %v874_v6, %v14686_v57  ;;  %v11195_v56 = vpop.f32.mrb[27].mxu1 }
 0x1ff   : > { %11355 = vmatprep.mubr.msk.f32.mxu1 %vm13524_vm0, %v18153_v0  ;;  %v879_v14 = vpop.f32.mrb[28].mxu1 }
 0x200   : > { %1937 = vrot.lane.b32.xlu0 %v14334_v21, %s13527_s26  ;;  %v1590_v25 = vcombine.low %v865_v62, %v875_v53  ;;  %v1591_v55 = vcombine.high %v865_v62, %v875_v53  ;;  %v880_v15 = vadd.f32 %v879_v14, %v14686_v57  ;;  %v11198_v4 = vpop.f32.mrb[29].mxu1 }
 0x201   : > { %1991 = vrot.lane.b32.xlu1 %v14354_v2, %s13528_s1  ;;  %11341 = vmatmul.mubr.msk.f32.gmra.mrb[34].mxu0 %vm2463_vm1, %v14663_v13  ;;  %v884_v44 = vpop.f32.mrb[30].mxu1 }
 0x202   : > { %11356 = vmatmul.mubr.msk.f32.gmra.mrb[78].mxu1 %vm2463_vm1, %v14683_v11  ;;  %11364 = vmatprep.mubr.msk.f32.mxu0 %vm13524_vm0, %v18153_v0  ;;  %v1598_v45 = vrot.slane %v1590_v25, %v14049_v46  ;;  %v1605_v36 = vrot.slane %v1591_v55, %v14049_v46  ;;  %v1606_v20 = vcombine.low %v870_v32, %v880_v15  ;;  %v11201_v58 = vpop.f32.mrb[31].mxu1 }
 0x203   : > { %11379 = vmatprep.mubr.msk.f32.mxu1 %vm13524_vm0, %v18153_v0  ;;  %v1607_v7 = vcombine.high %v870_v32, %v880_v15  ;;  %v889_v1 = vpop.f32.mrb[32].mxu1  ;;  %v885_v31 = vadd.f32 %v884_v44, %v14686_v57 }
 0x204   : > { %1949 = vrot.lane.b32.xlu0 %v14388_v50, %s13527_s26  ;;  %v1614_v61 = vrot.slane %v1606_v20, %v14049_v46  ;;  %v11204_v3 = vpop.f32.mrb[33].mxu1  ;;  %v890_v33 = vadd.f32 %v889_v1, %v14686_v57 }
 0x205   : > { %1993 = vrot.lane.b32.xlu1 %v14406_v22, %s13528_s1  ;;  %v1621_v9 = vrot.slane %v1607_v7, %v14049_v46  ;;  %v894_v26 = vpop.f32.mrb[34].mxu1 }
 0x206   : > { %v1654_v59 = vcombine.low %v1598_v45, %v1614_v61  ;;  %v1655_v27 = vcombine.high %v1598_v45, %v1614_v61  ;;  %v11207_v28 = vpop.f32.mrb[35].mxu1  ;;  %v895_v62 = vadd.f32 %v894_v26, %v14686_v57 }
 0x207   : > { %v1670_v52 = vcombine.low %v1605_v36, %v1621_v9  ;;  %v1671_v37 = vcombine.high %v1605_v36, %v1621_v9  ;;  %v899_v6 = vpop.f32.mrb[36].mxu1 }
 0x208   : > { %1951 = vrot.lane.b32.xlu0 %v14514_v43, %s13527_s26  ;;  %v11210_v32 = vpop.f32.mrb[37].mxu1  ;;  %v1622_v53 = vcombine.low %v885_v31, %v895_v62  ;;  %v1623_v56 = vcombine.high %v885_v31, %v895_v62  ;;  %v900_v14 = vadd.f32 %v899_v6, %v14686_v57  ;;  %v1662_v58 = vrot.slane %v1654_v59, %v14052_v48 }
 0x209   : > { %2003 = vrot.lane.b32.xlu1 %v14390_v17, %s13528_s1  ;;  %v904_v25 = vpop.f32.mrb[38].mxu1  ;;  %v1669_v3 = vrot.slane %v1655_v27, %v14052_v48  ;;  %v1678_v31 = vrot.slane %v1670_v52, %v14052_v48  ;;  %v1685_v27 = vrot.slane %v1671_v37, %v14052_v48 }
 0x20a   : > { %v11213_v55 = vpop.f32.mrb[39].mxu1  ;;  %v1630_v15 = vrot.slane %v1622_v53, %v14049_v46  ;;  %v1637_v4 = vrot.slane %v1623_v56, %v14049_v46  ;;  %v1638_v44 = vcombine.low %v890_v33, %v900_v14  ;;  %v1639_v45 = vcombine.high %v890_v33, %v900_v14 }
 0x20b   : > { %v909_v36 = vpop.f32.mrb[40].mxu1  ;;  %v905_v20 = vadd.f32 %v904_v25, %v14686_v57 }
 0x20c   : > { %1961 = vrot.lane.b32.xlu0 %v14398_v5, %s13527_s26  ;;  %v11216_v7 = vpop.f32.mrb[41].mxu1  ;;  %v1646_v1 = vrot.slane %v1638_v44, %v14049_v46  ;;  %v1653_v61 = vrot.slane %v1639_v45, %v14049_v46  ;;  %v910_v26 = vadd.f32 %v909_v36, %v14686_v57 }
 0x20d   : > { %2015 = vrot.lane.b32.xlu1 %v14400_v63, %s13528_s1  ;;  %v914_v9 = vpop.f32.mrb[42].mxu1 }
 0x20e   : > { %v915_v28 = vadd.f32 %v914_v9, %v14686_v57  ;;  %v11219_v33 = vpop.f32.mrb[43].mxu1  ;;  %v1686_v62 = vcombine.low %v1630_v15, %v1646_v1  ;;  %v1687_v6 = vcombine.high %v1630_v15, %v1646_v1  ;;  %v1702_v59 = vcombine.low %v1637_v4, %v1653_v61 }
 0x20f   : > { %v1703_v32 = vcombine.high %v1637_v4, %v1653_v61  ;;  %v919_v53 = vpop.f32.mrb[44].mxu1 }
 0x210   : > { %1963 = vrot.lane.b32.xlu0 %v14603_v10, %s13527_s26  ;;  %v1726_v56 = vcombine.low %v905_v20, %v915_v28  ;;  %v1727_v52 = vcombine.high %v905_v20, %v915_v28  ;;  %v920_v14 = vadd.f32 %v919_v53, %v14686_v57  ;;  %v11222_v25 = vpop.f32.mrb[45].mxu1  ;;  %v1694_v55 = vrot.slane %v1686_v62, %v14052_v48 }
 0x211   : > { %2027 = vrot.lane.b32.xlu1 %v14408_v54, %s13528_s1  ;;  %v1701_v44 = vrot.slane %v1687_v6, %v14052_v48  ;;  %v1710_v45 = vrot.slane %v1702_v59, %v14052_v48  ;;  %v1717_v15 = vrot.slane %v1703_v32, %v14052_v48  ;;  %v924_v4 = vpop.f32.mrb[46].mxu1 }
 0x212   : > { %v1734_v36 = vrot.slane %v1726_v56, %v14049_v46  ;;  %v1742_v7 = vcombine.low %v910_v26, %v920_v14  ;;  %v1743_v37 = vcombine.high %v910_v26, %v920_v14  ;;  %v11225_v1 = vpop.f32.mrb[47].mxu1  ;;  %v14750_v20 = vcombine.low %v1662_v58, %v1694_v55 }
 0x213   : > { %v14752_v61 = vcombine.high %v1662_v58, %v1694_v55  ;;  %v14754_v9 = vcombine.low %v1669_v3, %v1701_v44  ;;  %v14756_v28 = vcombine.high %v1669_v3, %v1701_v44  ;;  %v929_v33 = vpop.f32.mrb[48].mxu1  ;;  %v14760_v62 = vcombine.low %v1678_v31, %v1710_v45 }
 0x214   : > { %1973 = vrot.lane.b32.xlu0 %v14410_v35, %s13527_s26  ;;  %18336 = vst [vmem:[#allocation21_spill] sm:$0xff] %v14750_v20  ;;  %v14762_v6 = vcombine.high %v1678_v31, %v1710_v45  ;;  %v14764_v26 = vcombine.low %v1685_v27, %v1717_v15  ;;  %v14766_v59 = vcombine.high %v1685_v27, %v1717_v15  ;;  %v11228_v32 = vpop.f32.mrb[49].mxu1 }
 0x215   : > { %2039 = vrot.lane.b32.xlu1 %v14354_v2, %s13529_s17  ;;  %v1741_v2 = vrot.slane %v1727_v52, %v14049_v46  ;;  %18337 = vst [vmem:[#allocation22_spill] sm:$0xff] %v14752_v61  ;;  %18338 = vst [vmem:[#allocation23_spill] sm:$0xff] %v14754_v9  ;;  %v1750_v58 = vrot.slane %v1742_v7, %v14049_v46  ;;  %v1757_v53 = vrot.slane %v1743_v37, %v14049_v46  ;;  %v934_v56 = vpop.f32.mrb[50].mxu1 }
 0x216   : > { %18339 = vst [vmem:[#allocation24_spill] sm:$0xff] %v14756_v28  ;;  %18340 = vst [vmem:[#allocation25_spill] sm:$0xff] %v14760_v62  ;;  %v925_v3 = vadd.f32 %v924_v4, %v14686_v57  ;;  %v930_v52 = vadd.f32 %v929_v33, %v14686_v57  ;;  %v11231_v14 = vpop.f32.mrb[51].mxu1 }
 0x217   : > { %18341 = vst [vmem:[#allocation26_spill] sm:$0xff] %v14762_v6  ;;  %18342 = vst [vmem:[#allocation27_spill] sm:$0xff] %v14764_v26  ;;  %v1790_v31 = vcombine.low %v1734_v36, %v1750_v58  ;;  %v1791_v25 = vcombine.high %v1734_v36, %v1750_v58  ;;  %v1806_v27 = vcombine.low %v1741_v2, %v1757_v53  ;;  %v939_v44 = vpop.f32.mrb[52].mxu1 }
 0x218   : > { %1985 = vrot.lane.b32.xlu0 %v14334_v21, %s13528_s1  ;;  %18343 = vst [vmem:[#allocation28_spill] sm:$0xff] %v14766_v59  ;;  %v1807_v55 = vcombine.high %v1741_v2, %v1757_v53  ;;  %v940_v4 = vadd.f32 %v939_v44, %v14686_v57  ;;  %v11234_v7 = vpop.f32.mrb[53].mxu1 }
 0x219   : > { %2041 = vrot.lane.b32.xlu1 %v14406_v22, %s13529_s17  ;;  %v935_v22 = vadd.f32 %v934_v56, %v14686_v57  ;;  %v1798_v2 = vrot.slane %v1790_v31, %v14052_v48  ;;  %v1805_v58 = vrot.slane %v1791_v25, %v14052_v48 }
 0x21a   : > { %v1774_v33 = vcombine.low %v930_v52, %v940_v4  ;;  %v1775_v32 = vcombine.high %v930_v52, %v940_v4  ;;  %v1814_v52 = vrot.slane %v1806_v27, %v14052_v48  ;;  %v1821_v14 = vrot.slane %v1807_v55, %v14052_v48 }
 0x21b   : > { %v1758_v45 = vcombine.low %v925_v3, %v935_v22  ;;  %v1759_v15 = vcombine.high %v925_v3, %v935_v22 }
 0x21c   : > { %1997 = vrot.lane.b32.xlu0 %v14388_v50, %s13528_s1  ;;  %v1782_v36 = vrot.slane %v1774_v33, %v14049_v46 }
 0x21d   : > { %2051 = vrot.lane.b32.xlu1 %v14390_v17, %s13529_s17  ;;  %v1766_v37 = vrot.slane %v1758_v45, %v14049_v46  ;;  %v1773_v1 = vrot.slane %v1759_v15, %v14049_v46  ;;  %v1789_v17 = vrot.slane %v1775_v32, %v14049_v46 }
 0x21f   : > { %v1822_v53 = vcombine.low %v1766_v37, %v1782_v36  ;;  %v1823_v3 = vcombine.high %v1766_v37, %v1782_v36  ;;  %v1838_v56 = vcombine.low %v1773_v1, %v1789_v17  ;;  %v1839_v22 = vcombine.high %v1773_v1, %v1789_v17 }
 0x220   : > { %1999 = vrot.lane.b32.xlu0 %v14514_v43, %s13528_s1 }
 0x221   : > { %2063 = vrot.lane.b32.xlu1 %v14400_v63, %s13529_s17  ;;  %v14792_v63 = vpop.f32.mrb[54].mxu1  ;;  %v1830_v31 = vrot.slane %v1822_v53, %v14052_v48  ;;  %v1837_v25 = vrot.slane %v1823_v3, %v14052_v48  ;;  %v1846_v44 = vrot.slane %v1838_v56, %v14052_v48  ;;  %v1853_v45 = vrot.slane %v1839_v22, %v14052_v48 }
 0x222   : > { %v11237_v15 = vpop.f32.mrb[55].mxu1 }
 0x223   : > { %v14800_v4 = vcombine.low %v1798_v2, %v1830_v31  ;;  %v14802_v7 = vcombine.high %v1798_v2, %v1830_v31  ;;  %v14804_v27 = vcombine.low %v1805_v58, %v1837_v25  ;;  %v14806_v55 = vcombine.high %v1805_v58, %v1837_v25 }
 0x224   : > { %2009 = vrot.lane.b32.xlu0 %v14398_v5, %s13528_s1  ;;  %v14812_v37 = vcombine.high %v1814_v52, %v1846_v44  ;;  %v14814_v1 = vcombine.low %v1821_v14, %v1853_v45  ;;  %v14816_v33 = vcombine.high %v1821_v14, %v1853_v45 }
 0x225   : > { %2075 = vrot.lane.b32.xlu1 %v14408_v54, %s13529_s17  ;;  %18344 = vst [vmem:[#allocation29_spill] sm:$0xff] %v14800_v4  ;;  %18345 = vst [vmem:[#allocation30_spill] sm:$0xff] %v14802_v7  ;;  %v14810_v54 = vcombine.low %v1814_v52, %v1846_v44 }
 0x226   : > { %18346 = vst [vmem:[#allocation31_spill] sm:$0xff] %v14804_v27  ;;  %18347 = vst [vmem:[#allocation32_spill] sm:$0xff] %v14806_v55  ;;  %v14846_v3 = vpack.i.bf16 %v14812_v37, %v14762_v6  ;;  %v945_v6 = vadd.f32 %v14792_v63, %v14686_v57 }
 0x227   : > { %18348 = vst [vmem:[#allocation33_spill] sm:$0xff] %v14810_v54  ;;  %18349 = vst [vmem:[#allocation34_spill] sm:$0xff] %v14812_v37  ;;  %v14864_v22 = vpack.i.bf16 %v14810_v54, %v14760_v62 }
 0x228   : > { %2011 = vrot.lane.b32.xlu0 %v14603_v10, %s13528_s1  ;;  %18350 = vst [vmem:[#allocation35_spill] sm:$0xff] %v14814_v1  ;;  %18351 = vst [vmem:[#allocation36_spill] sm:$0xff] %v14816_v33 }
 0x229   : > { %2113 = vrot.lane.b32.xlu1 %v14386_v39, %s13527_s26  ;;  %18352 = vst [vmem:[#allocation37_spill] sm:$0xff] %v14846_v3  ;;  %18353 = vst [vmem:[#allocation38_spill] sm:$0xff] %v14864_v22 }
 0x22b   : > { %v14820_v32 = vpop.permute.xlu1 %1941 }
 0x22c   : > { %v14822_v36 = vpop.permute.xlu0 %1935  ;;  %2021 = vrot.lane.b32.xlu0 %v14410_v35, %s13528_s1 }
 0x22d   : > { %12712 = vrot.lane.b32.xlu1 %v14421_v23, %s13527_s26 }
 0x22f   : > { %v14828_v17 = vpop.permute.xlu1 %1953 }
 0x230   : > { %2033 = vrot.lane.b32.xlu0 %v14334_v21, %s13529_s17  ;;  %v14832_v2 = vpop.permute.xlu0 %1947 }
 0x231   : > { %12722 = vrot.lane.b32.xlu1 %v14425_v38, %s13527_s26 }
 0x233   : > { %v14836_v58 = vpop.permute.xlu1 %1965 }
 0x234   : > { %2045 = vrot.lane.b32.xlu0 %v14388_v50, %s13529_s17  ;;  %v14842_v53 = vpop.permute.xlu0 %1959 }
 0x235   : > { %12732 = vrot.lane.b32.xlu1 %v14432_v60, %s13527_s26 }
 0x237   : > { %v14848_v21 = vpop.permute.xlu1 %1977 }
 0x238   : > { %2047 = vrot.lane.b32.xlu0 %v14514_v43, %s13529_s17  ;;  %v14854_v56 = vpop.permute.xlu0 %1971 }
 0x239   : > { %12742 = vrot.lane.b32.xlu1 %v14435_v12, %s13528_s1 }
 0x23b   : > { %v14856_v50 = vpop.permute.xlu1 %1989 }
 0x23c   : > { %2057 = vrot.lane.b32.xlu0 %v14398_v5, %s13529_s17  ;;  %v14866_v52 = vpop.permute.xlu0 %1983 }
 0x23d   : > { %2161 = vrot.lane.b32.xlu1 %v14386_v39, %s13528_s1 }
 0x23f   : > { %v14868_v43 = vpop.permute.xlu1 %2001 }
 0x240   : > { %18354 = vst [vmem:[#allocation39_spill] sm:$0xff] %v14868_v43  ;;  %2059 = vrot.lane.b32.xlu0 %v14603_v10, %s13529_s17  ;;  %v14874_v14 = vpop.permute.xlu0 %1995 }
 0x241   : > { %12752 = vrot.lane.b32.xlu1 %v14421_v23, %s13528_s1  ;;  %18355 = vst [vmem:[#allocation40_spill] sm:$0xff] %v14874_v14 }
 0x243   : > { %v14876_v5 = vpop.permute.xlu1 %2013 }
 0x244   : > { %18356 = vst [vmem:[#allocation41_spill] sm:$0xff] %v14876_v5  ;;  %2069 = vrot.lane.b32.xlu0 %v14410_v35, %s13529_s17  ;;  %v14882_v31 = vpop.permute.xlu0 %2007  ;;  %v14984_v5 = vpack.i.bf16 %v14816_v33, %v14766_v59 }
 0x245   : > { %12762 = vrot.lane.b32.xlu1 %v14425_v38, %s13528_s1  ;;  %18357 = vst [vmem:[#allocation42_spill] sm:$0xff] %v14882_v31 }
 0x246   : > { %18372 = vst [vmem:[#allocation57_spill] sm:$0xff] %v14984_v5 }
 0x247   : > { %v14884_v25 = vpop.permute.xlu1 %2025 }
 0x248   : > { %18358 = vst [vmem:[#allocation43_spill] sm:$0xff] %v14884_v25  ;;  %12697 = vrot.lane.b32.xlu0 %v14441_v30, %s13527_s26  ;;  %v14890_v10 = vpop.permute.xlu0 %2019 }
 0x249   : > { %12772 = vrot.lane.b32.xlu1 %v14432_v60, %s13528_s1  ;;  %18359 = vst [vmem:[#allocation44_spill] sm:$0xff] %v14890_v10 }
 0x24b   : > { %v14892_v44 = vpop.permute.xlu1 %2037 }
 0x24c   : > { %18360 = vst [vmem:[#allocation45_spill] sm:$0xff] %v14892_v44  ;;  %12702 = vrot.lane.b32.xlu0 %v14435_v12, %s13527_s26  ;;  %v14898_v35 = vpop.permute.xlu0 %2031 }
 0x24d   : > { %12782 = vrot.lane.b32.xlu1 %v14435_v12, %s13529_s17  ;;  %18361 = vst [vmem:[#allocation46_spill] sm:$0xff] %v14898_v35 }
 0x24f   : > { %v14900_v45 = vpop.permute.xlu1 %2049 }
 0x250   : > { %18362 = vst [vmem:[#allocation47_spill] sm:$0xff] %v14900_v45  ;;  %12707 = vrot.lane.b32.xlu0 %v14449_v47, %s13527_s26 }
 0x251   : > { %2209 = vrot.lane.b32.xlu1 %v14386_v39, %s13529_s17 }
 0x252   : > { %v14906_v15 = vpop.permute.xlu0 %2043 }
 0x253   : > { %18363 = vst [vmem:[#allocation48_spill] sm:$0xff] %v14906_v15  ;;  %v14908_v42 = vpop.permute.xlu1 %2061 }
 0x254   : > { %18364 = vst [vmem:[#allocation49_spill] sm:$0xff] %v14908_v42  ;;  %2119 = vrot.lane.b32.xlu0 %v14413_v18, %s13527_s26 }
 0x255   : > { %12792 = vrot.lane.b32.xlu1 %v14421_v23, %s13529_s17 }
 0x256   : > { %v14914_v12 = vpop.permute.xlu0 %2055 }
 0x257   : > { %18365 = vst [vmem:[#allocation50_spill] sm:$0xff] %v14914_v12  ;;  %v14916_v0 = vpop.permute.xlu1 %2073 }
 0x258   : > { %18366 = vst [vmem:[#allocation51_spill] sm:$0xff] %v14916_v0  ;;  %12717 = vrot.lane.b32.xlu0 %v14457_v16, %s13527_s26 }
 0x259   : > { %12802 = vrot.lane.b32.xlu1 %v14425_v38, %s13529_s17 }
 0x25a   : > { %v14922_v39 = vpop.permute.xlu0 %2067 }
 0x25b   : > { %18367 = vst [vmem:[#allocation52_spill] sm:$0xff] %v14922_v39  ;;  %v14924_v15 = vpop.permute.xlu1 %2107 }
 0x25c   : > { %2131 = vrot.lane.b32.xlu0 %v14527_v29, %s13527_s26 }
 0x25d   : > { %12812 = vrot.lane.b32.xlu1 %v14432_v60, %s13529_s17 }
 0x25e   : > { %v14930_v23 = vpop.permute.xlu0 %1939 }
 0x25f   : > { %v14932_v12 = vpop.permute.xlu1 %1943 }
 0x260   : > { %12727 = vrot.lane.b32.xlu0 %v14465_v40, %s13527_s26 }
 0x261   : > { %1957 = vrot.lane.b32.xlu1 %v14546_v51, %s13527_s26 }
 0x262   : > { %v14938_v38 = vpop.permute.xlu0 %1987 }
 0x263   : > { %18368 = vst [vmem:[#allocation53_spill] sm:$0xff] %v14938_v38  ;;  %v14940_v39 = vpop.permute.xlu1 %1945 }
 0x264   : > { %12737 = vrot.lane.b32.xlu0 %v14441_v30, %s13528_s1 }
 0x265   : > { %1969 = vrot.lane.b32.xlu1 %v14627_v24, %s13527_s26 }
 0x266   : > { %v14946_v60 = vpop.permute.xlu0 %2035 }
 0x267   : > { %18369 = vst [vmem:[#allocation54_spill] sm:$0xff] %v14946_v60  ;;  %v14948_v0 = vpop.permute.xlu1 %1955 }
 0x268   : > { %12747 = vrot.lane.b32.xlu0 %v14449_v47, %s13528_s1 }
 0x269   : > { %2005 = vrot.lane.b32.xlu1 %v14546_v51, %s13528_s1 }
 0x26a   : > { %v14954_v42 = vpop.permute.xlu0 %2155 }
 0x26b   : > { %v14956_v45 = vpop.permute.xlu1 %1967 }
 0x26c   : > { %2167 = vrot.lane.b32.xlu0 %v14413_v18, %s13528_s1 }
 0x26d   : > { %2017 = vrot.lane.b32.xlu1 %v14627_v24, %s13528_s1 }
 0x26e   : > { %v14962_v35 = vpop.permute.xlu0 %2203 }
 0x26f   : > { %18370 = vst [vmem:[#allocation55_spill] sm:$0xff] %v14962_v35  ;;  %v14964_v60 = vpop.permute.xlu1 %1979  ;;  %v14980_v35 = vpack.i.bf16 %v14814_v1, %v14764_v26 }
 0x270   : > { %12757 = vrot.lane.b32.xlu0 %v14457_v16, %s13528_s1 }
 0x271   : > { %2053 = vrot.lane.b32.xlu1 %v14546_v51, %s13529_s17  ;;  %18371 = vst [vmem:[#allocation56_spill] sm:$0xff] %v14980_v35 }
 0x272   : > { %v14986_v44 = vpop.permute.xlu0 %1937 }
 0x273   : > { %v14988_v10 = vpop.permute.xlu1 %1991 }
 0x274   : > { %2179 = vrot.lane.b32.xlu0 %v14527_v29, %s13528_s1 }
 0x275   : > { %2065 = vrot.lane.b32.xlu1 %v14627_v24, %s13529_s17 }
 0x276   : > { %v14994_v25 = vpop.permute.xlu0 %1949 }
 0x277   : > { %v14996_v51 = vpop.permute.xlu1 %1993 }
 0x278   : > { %18373 = vst [vmem:[#allocation58_spill] sm:$0xff] %v14996_v51  ;;  %12767 = vrot.lane.b32.xlu0 %v14465_v40, %s13528_s1 }
 0x279   : > { %2125 = vrot.lane.b32.xlu1 %v14481_v49, %s13527_s26 }
 0x27a   : > { %v15002_v31 = vpop.permute.xlu0 %1951 }
 0x27b   : > { %v15004_v5 = vpop.permute.xlu1 %2003 }
 0x27c   : > { %18374 = vst [vmem:[#allocation59_spill] sm:$0xff] %v15004_v5  ;;  %12777 = vrot.lane.b32.xlu0 %v14441_v30, %s13529_s17 }
 0x27d   : > { %2137 = vrot.lane.b32.xlu1 %v14557_v8, %s13527_s26 }
 0x27e   : > { %v15010_v24 = vpop.permute.xlu0 %1961 }
 0x27f   : > { %v15012_v35 = vpop.permute.xlu1 %2015 }
 0x280   : > { %18375 = vst [vmem:[#allocation60_spill] sm:$0xff] %v15012_v35  ;;  %12787 = vrot.lane.b32.xlu0 %v14449_v47, %s13529_s17 }
 0x281   : > { %2173 = vrot.lane.b32.xlu1 %v14481_v49, %s13528_s1 }
 0x282   : > { %v15018_v26 = vpop.permute.xlu0 %1963 }
 0x283   : > { %v15020_v1 = vpop.permute.xlu1 %2027 }
 0x284   : > { %18376 = vst [vmem:[#allocation61_spill] sm:$0xff] %v15020_v1  ;;  %2215 = vrot.lane.b32.xlu0 %v14413_v18, %s13529_s17 }
 0x285   : > { %2185 = vrot.lane.b32.xlu1 %v14557_v8, %s13528_s1 }
 0x286   : > { %v15026_v30 = vpop.permute.xlu0 %1973 }
 0x287   : > { %v15028_v59 = vpop.permute.xlu1 %2039 }
 0x288   : > { %18377 = vst [vmem:[#allocation62_spill] sm:$0xff] %v15028_v59  ;;  %12797 = vrot.lane.b32.xlu0 %v14457_v16, %s13529_s17 }
 0x289   : > { %2221 = vrot.lane.b32.xlu1 %v14481_v49, %s13529_s17 }
 0x28a   : > { %v15034_v47 = vpop.permute.xlu0 %1985 }
 0x28b   : > { %v15036_v33 = vpop.permute.xlu1 %2041 }
 0x28c   : > { %18378 = vst [vmem:[#allocation63_spill] sm:$0xff] %v15036_v33  ;;  %2227 = vrot.lane.b32.xlu0 %v14527_v29, %s13529_s17 }
 0x28d   : > { %2233 = vrot.lane.b32.xlu1 %v14557_v8, %s13529_s17 }
 0x28e   : > { %v15042_v18 = vpop.permute.xlu0 %1997 }
 0x28f   : > { %18379 = vst [vmem:[#allocation64_spill] sm:$0xff] %v15042_v18  ;;  %v15044_v62 = vpop.permute.xlu1 %2051 }
 0x290   : > { %18380 = vst [vmem:[#allocation65_spill] sm:$0xff] %v15044_v62  ;;  %12807 = vrot.lane.b32.xlu0 %v14465_v40, %s13529_s17 }
 0x291   : > { %1981 = vrot.lane.b32.xlu1 %v14683_v11, %s13527_s26 }
 0x292   : > { %v15050_v16 = vpop.permute.xlu0 %1999 }
 0x293   : > { %18381 = vst [vmem:[#allocation66_spill] sm:$0xff] %v15050_v16  ;;  %v15052_v49 = vpop.permute.xlu1 %2063 }
 0x294   : > { %18382 = vst [vmem:[#allocation67_spill] sm:$0xff] %v15052_v49  ;;  %1975 = vrot.lane.b32.xlu0 %v14663_v13, %s13527_s26 }
 0x295   : > { %2029 = vrot.lane.b32.xlu1 %v14683_v11, %s13528_s1 }
 0x296   : > { %v15058_v29 = vpop.permute.xlu0 %2009 }
 0x297   : > { %18383 = vst [vmem:[#allocation68_spill] sm:$0xff] %v15058_v29  ;;  %v15060_v8 = vpop.permute.xlu1 %2075 }
 0x298   : > { %18384 = vst [vmem:[#allocation69_spill] sm:$0xff] %v15060_v8  ;;  %2023 = vrot.lane.b32.xlu0 %v14663_v13, %s13528_s1 }
 0x299   : > { %2077 = vrot.lane.b32.xlu1 %v14683_v11, %s13529_s17  ;;  %v1869_v11 = vrot.slane %v945_v6, %v14049_v46 }
 0x29a   : > { %v15066_v40 = vpop.permute.xlu0 %2011 }
 0x29b   : > { %18385 = vst [vmem:[#allocation70_spill] sm:$0xff] %v15066_v40  ;;  %v15068_v54 = vpop.permute.xlu1 %2113  ;;  %v15092_v57 = vrot.slane %v1869_v11, %v14052_v48 }
 0x29c   : > { %2071 = vrot.lane.b32.xlu0 %v14663_v13, %s13529_s17 }
 0x29d   : > { %2149 = vrot.lane.b32.xlu1 %v14636_v34, %s13527_s26  ;;  %18388 = vst [vmem:[#allocation73_spill] sm:$0xff] %v15092_v57 }
 0x29e   : > { %v15076_v37 = vpop.permute.xlu0 %2021 }
 0x29f   : > { %18386 = vst [vmem:[#allocation71_spill] sm:$0xff] %v15076_v37  ;;  %v15078_v8 = vpop.permute.xlu1 %12712  ;;  %v15108_v37 = vpack.i.bf16 %v14802_v7, %v14752_v61 }
 0x2a0   : > { %2143 = vrot.lane.b32.xlu0 %v14610_v19, %s13527_s26 }
 0x2a1   : > { %2197 = vrot.lane.b32.xlu1 %v14636_v34, %s13528_s1  ;;  %18390 = vst [vmem:[#allocation75_spill] sm:$0xff] %v15108_v37 }
 0x2a2   : > { %v15085_v49 = vpop.permute.xlu0 %2033 }
 0x2a3   : > { %18387 = vst [vmem:[#allocation72_spill] sm:$0xff] %v15085_v49  ;;  %v15087_v13 = vpop.permute.xlu1 %12722 }
 0x2a4   : > { %2191 = vrot.lane.b32.xlu0 %v14610_v19, %s13528_s1 }
 0x2a5   : > { %2245 = vrot.lane.b32.xlu1 %v14636_v34, %s13529_s17  ;;  %v15114_v34 = vpack.i.bf16 %v14800_v4, %v14750_v20  ;;  %v15135_v20 = vpack.i.bf16 %v14804_v27, %v14754_v9 }
 0x2a6   : > { %v15096_v63 = vpop.f32.mrb[12].mxu0  ;;  %v15098_v62 = vpop.permute.xlu0 %2045 }
 0x2a7   : > { %18389 = vst [vmem:[#allocation74_spill] sm:$0xff] %v15098_v62  ;;  %v15100_v33 = vpop.f32.mrb[56].mxu1  ;;  %v15102_v59 = vpop.permute.xlu1 %12732  ;;  %18391 = vst [vmem:[#allocation76_spill] sm:$0xff] %v15114_v34 }
 0x2a8   : > { %v11261_v49 = vpop.f32.mrb[57].mxu1  ;;  %2239 = vrot.lane.b32.xlu0 %v14610_v19, %s13529_s17  ;;  %v11246_v1 = vpop.f32.mrb[13].mxu0  ;;  %18395 = vst [vmem:[#allocation79_spill] sm:$0xff] %v15135_v20 }
 0x2a9   : > { %2275 = vrot.lane.b32.xlu1 %v15092_v57, %s13527_s26  ;;  %v18393_v1 = vmov 0.0  }
 0x2aa   : > { %v15116_v62 = vpop.f32.mrb[14].mxu0  ;;  %v15118_v40 = vpop.permute.xlu0 %2047  ;;  %v15128_v7 = vcombine.high %v15092_v57, %v18393_v1  ;;  %v1877_v4 = vcombine.high %v1869_v11, %v18393_v1  ;;  %v15150_v11 = vpack.i.bf16 %v14806_v55, %v14756_v28 }
 0x2ab   : > { %18392 = vst [vmem:[#allocation77_spill] sm:$0xff] %v15118_v40  ;;  %v15120_v49 = vpop.f32.mrb[58].mxu1  ;;  %v15122_v29 = vpop.permute.xlu1 %12742 }
 0x2ac   : > { %v11264_v19 = vpop.f32.mrb[59].mxu1  ;;  %12822 = vrot.lane.b32.xlu0 %v15108_v37, %s13527_s26  ;;  %18394 = vst [vmem:[#allocation78_spill] sm:$0xff] %v15128_v7  ;;  %v11249_v61 = vpop.f32.mrb[15].mxu0  ;;  %18398 = vst [vmem:[#allocation82_spill] sm:$0xff] %v15150_v11  ;;  %v15153_v27 = vrot.slane %v1877_v4, %v14052_v48 }
 0x2ad   : > { %12817 = vrot.lane.b32.xlu1 %v15114_v34, %s13527_s26  ;;  %v1862_v61 = vcombine.high %v945_v6, %v18393_v1 }
 0x2ae   : > { %v15137_v40 = vpop.f32.mrb[16].mxu0  ;;  %v15139_v19 = vpop.permute.xlu0 %2057  ;;  %18399 = vst [vmem:[#allocation83_spill] sm:$0xff] %v15153_v27 }
 0x2af   : > { %18396 = vst [vmem:[#allocation80_spill] sm:$0xff] %v15137_v40  ;;  %18397 = vst [vmem:[#allocation81_spill] sm:$0xff] %v15139_v19  ;;  %v15141_v35 = vpop.f32.mrb[60].mxu1  ;;  %v15143_v37 = vpop.permute.xlu1 %2161  ;;  %v15166_v16 = vrot.slane %v1862_v61, %v14049_v46  ;;  %v15188_v61 = vcombine.high %v15153_v27, %v18393_v1 }
 0x2b0   : > { %v11267_v57 = vpop.f32.mrb[61].mxu1  ;;  %2281 = vrot.lane.b32.xlu0 %v15128_v7, %s13527_s26  ;;  %v11252_v34 = vpop.f32.mrb[17].mxu0 }
 0x2b1   : > { %12827 = vrot.lane.b32.xlu1 %v15135_v20, %s13527_s26  ;;  %18402 = vst [vmem:[#allocation86_spill] sm:$0xff] %v15166_v16  ;;  %18406 = vst [vmem:[#allocation90_spill] sm:$0xff] %v15188_v61 }
 0x2b2   : > { %v15157_v9 = vpop.f32.mrb[18].mxu0  ;;  %v15159_v19 = vpop.permute.xlu0 %2059 }
 0x2b3   : > { %18400 = vst [vmem:[#allocation84_spill] sm:$0xff] %v15157_v9  ;;  %18401 = vst [vmem:[#allocation85_spill] sm:$0xff] %v15159_v19  ;;  %v15161_v57 = vpop.f32.mrb[62].mxu1  ;;  %v15163_v6 = vpop.permute.xlu1 %12752 }
 0x2b4   : > { %v11291_v7 = vpop.f32.mrb[63].mxu1  ;;  %12832 = vrot.lane.b32.xlu0 %v15150_v11, %s13527_s26  ;;  %v11276_v4 = vpop.f32.mrb[19].mxu0 }
 0x2b5   : > { %2287 = vrot.lane.b32.xlu1 %v15153_v27, %s13527_s26  ;;  %v15182_v7 = vrot.slane %v15166_v16, %v14052_v48 }
 0x2b6   : > { %v15172_v34 = vpop.permute.xlu0 %2069  ;;  %v15174_v20 = vpop.f32.mrb[20].mxu0 }
 0x2b7   : > { %18403 = vst [vmem:[#allocation87_spill] sm:$0xff] %v15172_v34  ;;  %v15176_v55 = vpop.permute.xlu1 %12762  ;;  %v15178_v28 = vpop.f32.mrb[64].mxu1  ;;  %18405 = vst [vmem:[#allocation89_spill] sm:$0xff] %v15182_v7 }
 0x2b8   : > { %18404 = vst [vmem:[#allocation88_spill] sm:$0xff] %v15176_v55  ;;  %12842 = vrot.lane.b32.xlu0 %v14846_v3, %s13527_s26  ;;  %v11294_v4 = vpop.f32.mrb[65].mxu1  ;;  %v11279_v46 = vpop.f32.mrb[21].mxu0  ;;  %v15202_v3 = vcombine.high %v15182_v7, %v18393_v1 }
 0x2b9   : > { %12837 = vrot.lane.b32.xlu1 %v14864_v22, %s13527_s26 }
 0x2ba   : > { %v12698_v11 = vpop.permute.xlu0 %12697  ;;  %v15192_v34 = vpop.f32.mrb[22].mxu0  ;;  %18409 = vst [vmem:[#allocation93_spill] sm:$0xff] %v15202_v3 }
 0x2bb   : > { %18407 = vst [vmem:[#allocation91_spill] sm:$0xff] %v15192_v34  ;;  %v12700_v19 = vunpack.i.h.bf16 %v12698_v11  ;;  %v12699_v18 = vunpack.i.l.bf16 %v12698_v11  ;;  %v15194_v5 = vpop.permute.xlu1 %12772  ;;  %v15196_v48 = vpop.f32.mrb[66].mxu1 }
 0x2bc   : > { %18408 = vst [vmem:[#allocation92_spill] sm:$0xff] %v15194_v5  ;;  %2293 = vrot.lane.b32.xlu0 %v15188_v61, %s13527_s26  ;;  %v11282_v46 = vpop.f32.mrb[23].mxu0  ;;  %v11297_v4 = vpop.f32.mrb[67].mxu1 }
 0x2bd   : > { %v12370_v16 = vpack.c.bf16 %v12700_v19, %v12699_v18  ;;  %2299 = vrot.lane.b32.xlu1 %v15182_v7, %s13527_s26 }
 0x2be   : > { %v12703_v22 = vpop.permute.xlu0 %12702 }
 0x2bf   : > { %v12705_v27 = vunpack.i.h.bf16 %v12703_v22  ;;  %v12704_v11 = vunpack.i.l.bf16 %v12703_v22  ;;  %12372 = vmatpush3.bf16.xpose.msk.msra.mxu0 %vm14317_vm2, %v12370_v16  ;;  %v15208_v5 = vpop.permute.xlu1 %12782  ;;  %v15210_v14 = vpop.f32.mrb[24].mxu0 }
 0x2c0   : > { %18410 = vst [vmem:[#allocation94_spill] sm:$0xff] %v15208_v5  ;;  %18411 = vst [vmem:[#allocation95_spill] sm:$0xff] %v15210_v14  ;;  %2305 = vrot.lane.b32.xlu0 %v15202_v3, %s13527_s26  ;;  %v15214_v61 = vpop.f32.mrb[68].mxu1  ;;  %v11306_v46 = vpop.f32.mrb[25].mxu0  ;;  %11362 = vmatprep.subr.mxu0 %v18393_v1 }
 0x2c1   : > { %v12374_v18 = vpack.c.bf16 %v12705_v27, %v12704_v11  ;;  %v11321_v19 = vpop.f32.mrb[69].mxu1  ;;  %v18413_v11 = vmov 0.0|0.0  }
 0x2c2   : > { %v12708_v4 = vpop.permute.xlu0 %12707  ;;  %v12715_v19 = vunpack.i.h.bf16 %v15078_v8 }
 0x2c3   : > { %12376 = vmatpush3.bf16.xpose.msk.msra.mxu1 %vm14317_vm2, %v12374_v18  ;;  %v15219_v22 = vpop.permute.xlu1 %2209  ;;  %v12710_v7 = vunpack.i.h.bf16 %v12708_v4  ;;  %v12709_v5 = vunpack.i.l.bf16 %v12708_v4 }
 0x2c4   : > { %18412 = vst [vmem:[#allocation96_spill] sm:$0xff] %v15219_v22  ;;  %v15221_v16 = vpop.f32.mrb[26].mxu0  ;;  %11377 = vmatprep.subr.mxu1 %v18393_v1  ;;  %v12714_v22 = vunpack.i.l.bf16 %v15078_v8 }
 0x2c5   : > { %v15224_v3 = vpop.f32.mrb[70].mxu1  ;;  %v11309_v43 = vpop.f32.mrb[27].mxu0  ;;  %v12378_v51 = vpack.c.bf16 %v12710_v7, %v12709_v5 }
 0x2c6   : > { %v2120_v46 = vpop.permute.xlu0 %2119  ;;  %v11324_v38 = vpop.f32.mrb[71].mxu1 }
 0x2c7   : > { %11363 = vmatpush3.xpose.msk.msra.mxu0 %vm2463_vm1, %v14924_v15  ;;  %v15228_v27 = vpop.permute.xlu1 %12792 }
 0x2c8   : > { %12377 = vmatprep.subr.bf16.mxu0 %v18413_v11  ;;  %v15231_v18 = vpop.f32.mrb[28].mxu0 }
 0x2c9   : > { %18414 = vst [vmem:[#allocation97_spill] sm:$0xff] %v15231_v18  ;;  %v15235_v4 = vpop.f32.mrb[72].mxu1  ;;  %v11312_v55 = vpop.f32.mrb[29].mxu0 }
 0x2ca   : > { %18415 = vst [vmem:[#allocation98_spill] sm:$0xff] %v15235_v4  ;;  %v12718_v43 = vpop.permute.xlu0 %12717  ;;  %11365 = vmatmul.mubr.msk.f32.vlgmr.msra.gmra.mrb[36].mxu0 %vm2463_vm1, %v14822_v36  ;;  %v11327_v38 = vpop.f32.mrb[73].mxu1  ;;  %v12382_v55 = vpack.c.bf16 %v12715_v19, %v12714_v22 }
 0x2cb   : > { %11378 = vmatpush3.xpose.msk.msra.mxu1 %vm2463_vm1, %v15068_v54  ;;  %12380 = vmatpush3.bf16.xpose.msk.msra.mxu0 %vm14317_vm2, %v12378_v51  ;;  %v15243_v15 = vpop.permute.xlu1 %12802  ;;  %v12719_v19 = vunpack.i.l.bf16 %v12718_v43 }
 0x2cc   : > { %11367 = vmatprep.mubr.msk.f32.mxu0 %vm13524_vm0, %v18393_v1  ;;  %12381 = vmatprep.subr.bf16.mxu1 %v18413_v11  ;;  %v15248_v5 = vpop.f32.mrb[30].mxu0 }
 0x2cd   : > { %18416 = vst [vmem:[#allocation99_spill] sm:$0xff] %v15248_v5  ;;  %v15250_v8 = vpop.f32.mrb[74].mxu1  ;;  %v11336_v36 = vpop.f32.mrb[31].mxu0  ;;  %11392 = vmatprep.subr.mxu0 %v18393_v1 }
 0x2ce   : > { %18417 = vst [vmem:[#allocation100_spill] sm:$0xff] %v15250_v8  ;;  %v2132_v7 = vpop.permute.xlu0 %2131  ;;  %11368 = vmatmul.mubr.msk.f32.gmra.mrb[38].mxu0 %vm2463_vm1, %v14986_v44  ;;  %11380 = vmatmul.mubr.msk.f32.vlgmr.msra.gmra.mrb[80].mxu1 %vm2463_vm1, %v14820_v32  ;;  %v11351_v54 = vpop.f32.mrb[75].mxu1  ;;  %v12720_v44 = vunpack.i.h.bf16 %v12718_v43 }
 0x2cf   : > { %12384 = vmatpush3.bf16.xpose.msk.msra.mxu1 %vm14317_vm2, %v12382_v55  ;;  %11370 = vmatprep.mubr.msk.f32.mxu0 %vm13524_vm0, %v18393_v1  ;;  %v15261_v51 = vpop.permute.xlu1 %12812 }
 0x2d0   : > { %18418 = vst [vmem:[#allocation101_spill] sm:$0xff] %v15261_v51  ;;  %11382 = vmatprep.mubr.msk.f32.mxu1 %vm13524_vm0, %v18393_v1  ;;  %v15265_v22 = vpop.f32.mrb[32].mxu0  ;;  %11407 = vmatprep.subr.mxu1 %v18393_v1 }
 0x2d1   : > { %18419 = vst [vmem:[#allocation102_spill] sm:$0xff] %v15265_v22  ;;  %v15268_v38 = vpop.f32.mrb[76].mxu1  ;;  %v11339_v32 = vpop.f32.mrb[33].mxu0 }
 0x2d2   : > { %18420 = vst [vmem:[#allocation103_spill] sm:$0xff] %v15268_v38  ;;  %v12728_v36 = vpop.permute.xlu0 %12727  ;;  %11371 = vmatmul.mubr.msk.f32.gmra.mrb[40].mxu0 %vm2463_vm1, %v14930_v23  ;;  %11383 = vmatmul.mubr.msk.f32.gmra.mrb[82].mxu1 %vm2463_vm1, %v14932_v12  ;;  %v11354_v55 = vpop.f32.mrb[77].mxu1  ;;  %v12386_v32 = vpack.c.bf16 %v12720_v44, %v12719_v19 }
 0x2d3   : > { %11393 = vmatpush3.xpose.msk.msra.mxu0 %vm2463_vm1, %v2120_v46  ;;  %11385 = vmatprep.mubr.msk.f32.mxu1 %vm13524_vm0, %v18393_v1  ;;  %v15277_v54 = vpop.permute.xlu1 %1957  ;;  %v12729_v44 = vunpack.i.l.bf16 %v12728_v36 }
 0x2d4   : > { %11394 = vmatprep.mubr.msk.f32.mxu0 %vm13524_vm0, %v18393_v1  ;;  %12385 = vmatprep.subr.bf16.mxu0 %v18413_v11  ;;  %v15282_v43 = vpop.f32.mrb[34].mxu0 }
 0x2d5   : > { %18421 = vst [vmem:[#allocation104_spill] sm:$0xff] %v15282_v43  ;;  %v15284_v23 = vpop.f32.mrb[78].mxu1  ;;  %v11342_v51 = vpop.f32.mrb[35].mxu0 }
 0x2d6   : > { %v15286_v12 = vpop.permute.xlu0 %12737  ;;  %11386 = vmatmul.mubr.msk.f32.gmra.mrb[84].mxu1 %vm2463_vm1, %v14940_v39  ;;  %11395 = vmatmul.mubr.msk.f32.vlgmr.msra.gmra.mrb[42].mxu0 %vm2463_vm1, %v14832_v2  ;;  %v11357_v46 = vpop.f32.mrb[79].mxu1  ;;  %v12730_v39 = vunpack.i.h.bf16 %v12728_v36  ;;  %v5419_v36 = vsel %vm5408_vm3, %v15100_v33, -inf }
 0x2d7   : > { %12388 = vmatpush3.bf16.xpose.msk.msra.mxu0 %vm14317_vm2, %v12386_v32  ;;  %11397 = vmatprep.mubr.msk.f32.mxu0 %vm13524_vm0, %v18393_v1  ;;  %v15296_v55 = vpop.permute.xlu1 %1969  ;;  %v5409_v32 = vsel %vm5408_vm3, %v15096_v63, -inf }
 0x2d8   : > { %11422 = vmatprep.subr.mxu0 %v18393_v1  ;;  %11409 = vmatprep.mubr.msk.f32.mxu1 %vm13524_vm0, %v18393_v1  ;;  %v12394_v46 = vpack.c.bf16 %v12730_v39, %v12729_v44  ;;  %v5416_v39 = vsel %vm5415_vm4, %v15137_v40, -inf }
 0x2da   : > { %v15301_v51 = vpop.permute.xlu0 %12747  ;;  %11398 = vmatmul.mubr.msk.f32.gmra.mrb[44].mxu0 %vm2463_vm1, %v14994_v25 }
 0x2db   : > { %11400 = vmatprep.mubr.msk.f32.mxu0 %vm13524_vm0, %v18393_v1  ;;  %v15307_v2 = vpop.permute.xlu1 %2005 }
 0x2de   : > { %v15309_v19 = vpop.permute.xlu0 %2167  ;;  %11401 = vmatmul.mubr.msk.f32.gmra.mrb[46].mxu0 %vm2463_vm1, %v15002_v31 }
 0x2df   : > { %11423 = vmatpush3.xpose.msk.msra.mxu0 %vm2463_vm1, %v2132_v7  ;;  %5410 = vmax.xlane.f32.xlu0 %v5409_v32  ;;  %v15316_v25 = vpop.permute.xlu1 %2017  ;;  %v5412_v7 = vsel %vm5408_vm3, %v15116_v62, -inf }
 0x2e0   : > { %11424 = vmatprep.mubr.msk.f32.mxu0 %vm13524_vm0, %v18393_v1  ;;  %12393 = vmatprep.subr.bf16.mxu0 %v18413_v11 }
 0x2e1   : > { %5420 = vmax.xlane.f32.xlu1 %v5419_v36 }
 0x2e2   : > { %v15323_v31 = vpop.permute.xlu0 %12757  ;;  %11425 = vmatmul.mubr.msk.f32.vlgmr.msra.gmra.mrb[48].mxu0 %vm2463_vm1, %v14842_v53  ;;  %v5422_v53 = vsel %vm5408_vm3, %v15120_v49, -inf }
 0x2e3   : > { %12396 = vmatpush3.bf16.xpose.msk.msra.mxu0 %vm14317_vm2, %v12394_v46  ;;  %5413 = vmax.xlane.f32.xlu0 %v5412_v7  ;;  %v15331_v32 = vpop.permute.xlu1 %2053  ;;  %v5428_v46 = vsel %vm5408_vm3, %v15157_v9, -inf  ;;  %v12725_v7 = vunpack.i.h.bf16 %v15087_v13 }
 0x2e4   : > { %11427 = vmatprep.mubr.msk.f32.mxu0 %vm13524_vm0, %v18393_v1  ;;  %11452 = vmatprep.subr.mxu0 %v18393_v1 }
 0x2e5   : > { %5417 = vmax.xlane.f32.xlu1 %v5416_v39  ;;  %v12724_v39 = vunpack.i.l.bf16 %v15087_v13 }
 0x2e6   : > { %v15338_v44 = vpop.permute.xlu0 %2179  ;;  %11428 = vmatmul.mubr.msk.f32.gmra.mrb[50].mxu0 %vm2463_vm1, %v15010_v24  ;;  %v5425_v24 = vsel %vm5415_vm4, %v15141_v35, -inf }
 0x2e7   : > { %5423 = vmax.xlane.f32.xlu0 %v5422_v53  ;;  %11430 = vmatprep.mubr.msk.f32.mxu0 %vm13524_vm0, %v18393_v1  ;;  %v15346_v36 = vpop.permute.xlu1 %2065  ;;  %v12390_v13 = vpack.c.bf16 %v12725_v7, %v12724_v39  ;;  %v5440_v39 = vsel %vm5408_vm3, %v15178_v28, -inf }
 0x2e9   : > { %5429 = vmax.xlane.f32.xlu1 %v5428_v46  ;;  %v5431_v46 = vsel %vm5408_vm3, %v15174_v20, -inf }
 0x2ea   : > { %v15352_v40 = vpop.permute.xlu0 %12767  ;;  %11431 = vmatmul.mubr.msk.f32.gmra.mrb[52].mxu0 %vm2463_vm1, %v15018_v26  ;;  %v5437_v26 = vsel %vm5408_vm3, %v15161_v57, -inf }
 0x2eb   : > { %5426 = vmax.xlane.f32.xlu0 %v5425_v24  ;;  %v2126_v53 = vpop.permute.xlu1 %2125  ;;  %11454 = vmatprep.mubr.msk.f32.mxu0 %vm13524_vm0, %v18393_v1 }
 0x2ec   : > { %11408 = vmatpush3.xpose.msk.msra.mxu1 %vm2463_vm1, %v2126_v53  ;;  %v5434_v53 = vsel %vm5415_vm4, %v15192_v34, -inf }
 0x2ed   : > { %5432 = vmax.xlane.f32.xlu1 %v5431_v46  ;;  %12389 = vmatprep.subr.bf16.mxu1 %v18413_v11 }
 0x2ee   : > { %v15364_v9 = vpop.permute.xlu0 %12777 }
 0x2ef   : > { %5438 = vmax.xlane.f32.xlu0 %v5437_v26  ;;  %v2138_v24 = vpop.permute.xlu1 %2137  ;;  %11410 = vmatmul.mubr.msk.f32.vlgmr.msra.gmra.mrb[86].mxu1 %vm2463_vm1, %v14828_v17  ;;  %v5446_v17 = vsel %vm5408_vm3, %v15210_v14, -inf  ;;  %v12734_v26 = vunpack.i.l.bf16 %v15102_v59 }
 0x2f0   : > { %12392 = vmatpush3.bf16.xpose.msk.msra.mxu1 %vm14317_vm2, %v12390_v13  ;;  %11412 = vmatprep.mubr.msk.f32.mxu1 %vm13524_vm0, %v18393_v1  ;;  %v12735_v13 = vunpack.i.h.bf16 %v15102_v59 }
 0x2f1   : > { %5435 = vmax.xlane.f32.xlu1 %v5434_v53  ;;  %11437 = vmatprep.subr.mxu1 %v18393_v1 }
 0x2f2   : > { %v15377_v7 = vpop.permute.xlu0 %12787  ;;  %v12398_v59 = vpack.c.bf16 %v12735_v13, %v12734_v26  ;;  %v5458_v13 = vsel %vm5408_vm3, %v15224_v3, -inf }
 0x2f3   : > { %5441 = vmax.xlane.f32.xlu0 %v5440_v39  ;;  %v15381_v46 = vpop.permute.xlu1 %2173  ;;  %11413 = vmatmul.mubr.msk.f32.gmra.mrb[88].mxu1 %vm2463_vm1, %v14948_v0  ;;  %v5443_v39 = vsel %vm5415_vm4, %v15196_v48, -inf  ;;  %v5449_v0 = vsel %vm5408_vm3, %v15221_v16, -inf }
 0x2f4   : > { %11415 = vmatprep.mubr.msk.f32.mxu1 %vm13524_vm0, %v18393_v1 }
 0x2f5   : > { %5447 = vmax.xlane.f32.xlu1 %v5446_v17 }
 0x2f6   : > { %v15391_v53 = vpop.permute.xlu0 %2215 }
 0x2f7   : > { %5444 = vmax.xlane.f32.xlu0 %v5443_v39  ;;  %v15395_v34 = vpop.permute.xlu1 %2185  ;;  %11416 = vmatmul.mubr.msk.f32.gmra.mrb[90].mxu1 %vm2463_vm1, %v15277_v54  ;;  %v5455_v39 = vsel %vm5408_vm3, %v15214_v61, -inf  ;;  %v5452_v54 = vsel %vm5415_vm4, %v15231_v18, -inf  ;;  %v12744_v18 = vunpack.i.l.bf16 %v15122_v29 }
 0x2f8   : > { %11438 = vmatpush3.xpose.msk.msra.mxu1 %vm2463_vm1, %v2138_v24  ;;  %11439 = vmatprep.mubr.msk.f32.mxu1 %vm13524_vm0, %v18393_v1 }
 0x2f9   : > { %5450 = vmax.xlane.f32.xlu1 %v5449_v0  ;;  %12397 = vmatprep.subr.bf16.mxu1 %v18413_v11 }
 0x2fa   : > { %v15405_v17 = vpop.permute.xlu0 %12797 }
 0x2fb   : > { %5456 = vmax.xlane.f32.xlu0 %v5455_v39  ;;  %v15409_v14 = vpop.permute.xlu1 %2221  ;;  %11440 = vmatmul.mubr.msk.f32.vlgmr.msra.gmra.mrb[92].mxu1 %vm2463_vm1, %v14836_v58  ;;  %v5464_v58 = vsel %vm5408_vm3, %v15248_v5, -inf }
 0x2fc   : > { %12400 = vmatpush3.bf16.xpose.msk.msra.mxu1 %vm14317_vm2, %v12398_v59  ;;  %11442 = vmatprep.mubr.msk.f32.mxu1 %vm13524_vm0, %v18393_v1  ;;  %v5461_v59 = vsel %vm5415_vm4, %v15235_v4, -inf }
 0x2fd   : > { %5453 = vmax.xlane.f32.xlu1 %v5452_v54  ;;  %11467 = vmatprep.subr.mxu1 %v18393_v1 }
 0x2fe   : > { %v15420_v24 = vpop.permute.xlu0 %2227 }
 0x2ff   : > { %5459 = vmax.xlane.f32.xlu0 %v5458_v13  ;;  %v15424_v26 = vpop.permute.xlu1 %2233  ;;  %11443 = vmatmul.mubr.msk.f32.gmra.mrb[94].mxu1 %vm2463_vm1, %v14956_v45  ;;  %v5467_v45 = vsel %vm5408_vm3, %v15265_v22, -inf  ;;  %v5473_v13 = vsel %vm5408_vm3, %v15250_v8, -inf }
 0x300   : > { %11445 = vmatprep.mubr.msk.f32.mxu1 %vm13524_vm0, %v18393_v1 }
 0x301   : > { %5465 = vmax.xlane.f32.xlu1 %v5464_v58 }
 0x302   : > { %v15432_v0 = vpop.permute.xlu0 %12807 }
 0x303   : > { %5462 = vmax.xlane.f32.xlu0 %v5461_v59  ;;  %v1982_v39 = vpop.permute.xlu1 %1981  ;;  %11446 = vmatmul.mubr.msk.f32.gmra.mrb[96].mxu1 %vm2463_vm1, %v15296_v55  ;;  %v5470_v59 = vsel %vm5415_vm4, %v15282_v43, -inf  ;;  %v5476_v55 = vsel %vm5408_vm3, %v15268_v38, -inf  ;;  %v12739_v38 = vunpack.i.l.bf16 %v15286_v12 }
 0x304   : > { %11469 = vmatprep.mubr.msk.f32.mxu1 %vm13524_vm0, %v18393_v1 }
 0x305   : > { %5468 = vmax.xlane.f32.xlu1 %v5467_v45  ;;  %v12745_v45 = vunpack.i.h.bf16 %v15122_v29 }
 0x306   : > { %v1976_v54 = vpop.permute.xlu0 %1975 }
 0x307   : > { %5474 = vmax.xlane.f32.xlu0 %v5473_v13  ;;  %v15444_v58 = vpop.permute.xlu1 %2029  ;;  %v5479_v13 = vsel %vm5415_vm4, %v15284_v23, -inf }
 0x309   : > { %5471 = vmax.xlane.f32.xlu1 %v5470_v59  ;;  %v12740_v59 = vunpack.i.h.bf16 %v15286_v12 }
 0x30a   : > { %v15448_v5 = vpop.permute.xlu0 %2023 }
 0x30b   : > { %5477 = vmax.xlane.f32.xlu0 %v5476_v55  ;;  %v15452_v22 = vpop.permute.xlu1 %2077  ;;  %v12406_v55 = vpack.c.bf16 %v12745_v45, %v12744_v18  ;;  %v12402_v29 = vpack.c.bf16 %v12740_v59, %v12739_v38  ;;  %v12750_v18 = vunpack.i.h.bf16 %v15301_v51  ;;  %v12770_v45 = vunpack.i.h.bf16 %v15352_v40  ;;  %v18430_v59 = vld [vmem:[#allocation66_spill] sm:$0xff] }
 0x30e   : > { %v15456_v8 = vpop.permute.xlu0 %2071 }
 0x30f   : > { %5480 = vmax.xlane.f32.xlu0 %v5479_v13  ;;  %v2150_v43 = vpop.permute.xlu1 %2149  ;;  %v12769_v13 = vunpack.i.l.bf16 %v15352_v40 }
 0x310   : > { %11468 = vmatpush3.xpose.msk.msra.mxu1 %vm2463_vm1, %v2150_v43  ;;  %v18425_v43 = vld [vmem:[#allocation39_spill] sm:$0xff] }
 0x311   : > { %12405 = vmatprep.subr.bf16.mxu1 %v18413_v11  ;;  %v12426_v40 = vpack.c.bf16 %v12770_v45, %v12769_v13  ;;  %v18447_v45 = vld [vmem:[#allocation63_spill] sm:$0xff]  ;;  %v12800_v13 = vunpack.i.h.bf16 %v15405_v17 }
 0x312   : > { %v2144_v4 = vpop.permute.xlu0 %2143 }
 0x313   : > { %11453 = vmatpush3.xpose.msk.msra.mxu0 %vm2463_vm1, %v2144_v4  ;;  %11470 = vmatmul.mubr.msk.f32.vlgmr.msra.gmra.mrb[98].mxu1 %vm2463_vm1, %v14848_v21  ;;  %v12755_v21 = vunpack.i.h.bf16 %v15163_v6  ;;  %v12759_v4 = vunpack.i.l.bf16 %v15323_v31 }
 0x314   : > { %12401 = vmatprep.subr.bf16.mxu0 %v18413_v11  ;;  %12408 = vmatpush3.bf16.xpose.msk.msra.mxu1 %vm14317_vm2, %v12406_v55 }
 0x315   : > { %11472 = vmatprep.mubr.msk.f32.mxu1 %vm13524_vm0, %v18393_v1  ;;  %11497 = vmatprep.subr.mxu1 %v18393_v1 }
 0x316   : > { %11455 = vmatmul.mubr.msk.f32.vlgmr.msra.gmra.mrb[54].mxu0 %vm2463_vm1, %v14854_v56  ;;  %v12754_v56 = vunpack.i.l.bf16 %v15163_v6  ;;  %v18423_v6 = vld [vmem:[#allocation58_spill] sm:$0xff] }
 0x317   : > { %12404 = vmatpush3.bf16.xpose.msk.msra.mxu0 %vm14317_vm2, %v12402_v29  ;;  %11457 = vmatprep.mubr.msk.f32.mxu0 %vm13524_vm0, %v18393_v1  ;;  %v18434_v29 = vld [vmem:[#allocation68_spill] sm:$0xff] }
 0x318   : > { %11473 = vmatmul.mubr.msk.f32.gmra.mrb[100].mxu1 %vm2463_vm1, %v14964_v60  ;;  %11482 = vmatprep.subr.mxu0 %v18393_v1  ;;  %v12749_v60 = vunpack.i.l.bf16 %v15301_v51  ;;  %v18426_v51 = vld [vmem:[#allocation40_spill] sm:$0xff] }
 0x319   : > { %11475 = vmatprep.mubr.msk.f32.mxu1 %vm13524_vm0, %v18393_v1 }
 0x31a   : > { %11458 = vmatmul.mubr.msk.f32.gmra.mrb[56].mxu0 %vm2463_vm1, %v15026_v30  ;;  %v12414_v30 = vpack.c.bf16 %v12755_v21, %v12754_v56  ;;  %v18435_v21 = vld [vmem:[#allocation94_spill] sm:$0xff] }
 0x31b   : > { %11460 = vmatprep.mubr.msk.f32.mxu0 %vm13524_vm0, %v18393_v1  ;;  %v12785_v56 = vunpack.i.h.bf16 %v18435_v21 }
 0x31c   : > { %11476 = vmatmul.mubr.msk.f32.gmra.mrb[102].mxu1 %vm2463_vm1, %v1982_v39 }
 0x31d   : > { %11498 = vmatpush3.xpose.msk.msra.mxu1 %vm2463_vm1, %v15143_v37  ;;  %11499 = vmatprep.mubr.msk.f32.mxu1 %vm13524_vm0, %v18393_v1  ;;  %v12410_v37 = vpack.c.bf16 %v12750_v18, %v12749_v60  ;;  %v12784_v18 = vunpack.i.l.bf16 %v18435_v21  ;;  %v2198_v60 = vpop.permute.xlu1 %2197  ;;  %v12810_v21 = vunpack.i.h.bf16 %v15432_v0 }
 0x31e   : > { %11461 = vmatmul.mubr.msk.f32.gmra.mrb[58].mxu0 %vm2463_vm1, %v1976_v54  ;;  %12413 = vmatprep.subr.bf16.mxu1 %v18413_v11 }
 0x31f   : > { %11483 = vmatpush3.xpose.msk.msra.mxu0 %vm2463_vm1, %v14954_v42  ;;  %11484 = vmatprep.mubr.msk.f32.mxu0 %vm13524_vm0, %v18393_v1  ;;  %v18422_v42 = vld [vmem:[#allocation88_spill] sm:$0xff] }
 0x320   : > { %11500 = vmatmul.mubr.msk.f32.vlgmr.msra.gmra.mrb[104].mxu1 %vm2463_vm1, %v14856_v50  ;;  %12409 = vmatprep.subr.bf16.mxu0 %v18413_v11  ;;  %v12765_v50 = vunpack.i.h.bf16 %v18422_v42 }
 0x321   : > { %12416 = vmatpush3.bf16.xpose.msk.msra.mxu1 %vm14317_vm2, %v12414_v30  ;;  %11502 = vmatprep.mubr.msk.f32.mxu1 %vm13524_vm0, %v18393_v1  ;;  %v12780_v30 = vunpack.i.h.bf16 %v15364_v9 }
 0x322   : > { %11485 = vmatmul.mubr.msk.f32.vlgmr.msra.gmra.mrb[60].mxu0 %vm2463_vm1, %v14866_v52  ;;  %11527 = vmatprep.subr.mxu1 %v18393_v1  ;;  %v12764_v52 = vunpack.i.l.bf16 %v18422_v42  ;;  %v2192_v42 = vpop.permute.xlu0 %2191 }
 0x323   : > { %12412 = vmatpush3.bf16.xpose.msk.msra.mxu0 %vm14317_vm2, %v12410_v37  ;;  %11487 = vmatprep.mubr.msk.f32.mxu0 %vm13524_vm0, %v18393_v1  ;;  %v12779_v37 = vunpack.i.l.bf16 %v15364_v9 }
 0x324   : > { %11503 = vmatmul.mubr.msk.f32.gmra.mrb[106].mxu1 %vm2463_vm1, %v14988_v10  ;;  %11512 = vmatprep.subr.mxu0 %v18393_v1  ;;  %v12760_v10 = vunpack.i.h.bf16 %v15323_v31  ;;  %v12422_v38 = vpack.c.bf16 %v12765_v50, %v12764_v52  ;;  %v18428_v31 = vld [vmem:[#allocation64_spill] sm:$0xff]  ;;  %v18436_v50 = vld [vmem:[#allocation70_spill] sm:$0xff]  ;;  %v12438_v52 = vpack.c.bf16 %v12785_v56, %v12784_v18  ;;  %v12809_v56 = vunpack.i.l.bf16 %v15432_v0  ;;  %v18454_v18 = vld [vmem:[#allocation77_spill] sm:$0xff] }
 0x325   : > { %11505 = vmatprep.mubr.msk.f32.mxu1 %vm13524_vm0, %v18393_v1  ;;  %v12434_v9 = vpack.c.bf16 %v12780_v30, %v12779_v37  ;;  %v18456_v0 = vld [vmem:[#allocation50_spill] sm:$0xff]  ;;  %v18458_v30 = vld [vmem:[#allocation81_spill] sm:$0xff]  ;;  %v2246_v37 = vpop.permute.xlu1 %2245 }
 0x326   : > { %11488 = vmatmul.mubr.msk.f32.gmra.mrb[62].mxu0 %vm2463_vm1, %v15034_v47  ;;  %v18424_v47 = vld [vmem:[#allocation53_spill] sm:$0xff]  ;;  %v12418_v12 = vpack.c.bf16 %v12760_v10, %v12759_v4  ;;  %v18440_v4 = vld [vmem:[#allocation71_spill] sm:$0xff]  ;;  %v2240_v41 = vpop.permute.xlu0 %2239 }
 0x327   : > { %11490 = vmatprep.mubr.msk.f32.mxu0 %vm13524_vm0, %v18393_v1  ;;  %v18439_v10 = vld [vmem:[#allocation61_spill] sm:$0xff] }
 0x328   : > { %11506 = vmatmul.mubr.msk.f32.gmra.mrb[108].mxu1 %vm2463_vm1, %v18423_v6  ;;  %v18438_v6 = vld [vmem:[#allocation44_spill] sm:$0xff] }
 0x329   : > { %11528 = vmatpush3.xpose.msk.msra.mxu1 %vm2463_vm1, %v15381_v46  ;;  %11529 = vmatprep.mubr.msk.f32.mxu1 %vm13524_vm0, %v18393_v1  ;;  %v18429_v46 = vld [vmem:[#allocation92_spill] sm:$0xff] }
 0x32a   : > { %11491 = vmatmul.mubr.msk.f32.gmra.mrb[64].mxu0 %vm2463_vm1, %v18424_v47  ;;  %12421 = vmatprep.subr.bf16.mxu1 %v18413_v11  ;;  %v12775_v39 = vunpack.i.h.bf16 %v18429_v46  ;;  %v12774_v54 = vunpack.i.l.bf16 %v18429_v46  ;;  %v12795_v47 = vunpack.i.h.bf16 %v15228_v27  ;;  %v18446_v46 = vld [vmem:[#allocation72_spill] sm:$0xff] }
 0x32b   : > { %11513 = vmatpush3.xpose.msk.msra.mxu0 %vm2463_vm1, %v15309_v19  ;;  %11514 = vmatprep.mubr.msk.f32.mxu0 %vm13524_vm0, %v18393_v1  ;;  %v18427_v19 = vld [vmem:[#allocation59_spill] sm:$0xff] }
 0x32c   : > { %11530 = vmatmul.mubr.msk.f32.vlgmr.msra.gmra.mrb[110].mxu1 %vm2463_vm1, %v18425_v43  ;;  %12417 = vmatprep.subr.bf16.mxu0 %v18413_v11  ;;  %v12430_v55 = vpack.c.bf16 %v12775_v39, %v12774_v54  ;;  %v12790_v43 = vunpack.i.h.bf16 %v15377_v7  ;;  %v12805_v39 = vunpack.i.h.bf16 %v15243_v15  ;;  %v12804_v54 = vunpack.i.l.bf16 %v15243_v15 }
 0x32d   : > { %12424 = vmatpush3.bf16.xpose.msk.msra.mxu1 %vm14317_vm2, %v12422_v38  ;;  %11532 = vmatprep.mubr.msk.f32.mxu1 %vm13524_vm0, %v18393_v1  ;;  %v12794_v38 = vunpack.i.l.bf16 %v15228_v27 }
 0x32e   : > { %11515 = vmatmul.mubr.msk.f32.vlgmr.msra.gmra.mrb[66].mxu0 %vm2463_vm1, %v18426_v51  ;;  %11557 = vmatprep.subr.mxu1 %v18393_v1  ;;  %v18441_v51 = vld [vmem:[#allocation96_spill] sm:$0xff]  ;;  %v12454_v15 = vpack.c.bf16 %v12805_v39, %v12804_v54 }
 0x32f   : > { %12420 = vmatpush3.bf16.xpose.msk.msra.mxu0 %vm14317_vm2, %v12418_v12  ;;  %11517 = vmatprep.mubr.msk.f32.mxu0 %vm13524_vm0, %v18393_v1  ;;  %v12789_v12 = vunpack.i.l.bf16 %v15377_v7  ;;  %v12446_v27 = vpack.c.bf16 %v12795_v47, %v12794_v38  ;;  %v18466_v47 = vld [vmem:[#allocation69_spill] sm:$0xff]  ;;  %v18467_v38 = vld [vmem:[#allocation78_spill] sm:$0xff] }
 0x330   : > { %11533 = vmatmul.mubr.msk.f32.gmra.mrb[112].mxu1 %vm2463_vm1, %v18427_v19  ;;  %11542 = vmatprep.subr.mxu0 %v18393_v1  ;;  %v18442_v19 = vld [vmem:[#allocation55_spill] sm:$0xff] }
 0x331   : > { %11535 = vmatprep.mubr.msk.f32.mxu1 %vm13524_vm0, %v18393_v1  ;;  %v12442_v7 = vpack.c.bf16 %v12790_v43, %v12789_v12  ;;  %v18468_v43 = vld [vmem:[#allocation87_spill] sm:$0xff]  ;;  %v18469_v12 = vld [vmem:[#allocation73_spill] sm:$0xff] }
 0x332   : > { %11518 = vmatmul.mubr.msk.f32.gmra.mrb[68].mxu0 %vm2463_vm1, %v18428_v31  ;;  %v18445_v31 = vld [vmem:[#allocation62_spill] sm:$0xff] }
 0x333   : > { %11520 = vmatprep.mubr.msk.f32.mxu0 %vm13524_vm0, %v18393_v1 }
 0x334   : > { %11536 = vmatmul.mubr.msk.f32.gmra.mrb[114].mxu1 %vm2463_vm1, %v15307_v2  ;;  %v18431_v2 = vld [vmem:[#allocation41_spill] sm:$0xff] }
 0x335   : > { %11558 = vmatpush3.xpose.msk.msra.mxu1 %vm2463_vm1, %v15395_v34  ;;  %11559 = vmatprep.mubr.msk.f32.mxu1 %vm13524_vm0, %v18393_v1  ;;  %v18432_v34 = vld [vmem:[#allocation42_spill] sm:$0xff] }
 0x336   : > { %11521 = vmatmul.mubr.msk.f32.gmra.mrb[70].mxu0 %vm2463_vm1, %v18430_v59  ;;  %12429 = vmatprep.subr.bf16.mxu1 %v18413_v11  ;;  %v12799_v59 = vunpack.i.l.bf16 %v15405_v17  ;;  %v18450_v17 = vld [vmem:[#allocation48_spill] sm:$0xff] }
 0x337   : > { %11543 = vmatpush3.xpose.msk.msra.mxu0 %vm2463_vm1, %v15338_v44  ;;  %11544 = vmatprep.mubr.msk.f32.mxu0 %vm13524_vm0, %v18393_v1  ;;  %v18433_v44 = vld [vmem:[#allocation60_spill] sm:$0xff] }
 0x338   : > { %11560 = vmatmul.mubr.msk.f32.vlgmr.msra.gmra.mrb[116].mxu1 %vm2463_vm1, %v18431_v2  ;;  %12425 = vmatprep.subr.bf16.mxu0 %v18413_v11  ;;  %v18449_v2 = vld [vmem:[#allocation47_spill] sm:$0xff] }
 0x339   : > { %12432 = vmatpush3.bf16.xpose.msk.msra.mxu1 %vm14317_vm2, %v12430_v55  ;;  %11562 = vmatprep.mubr.msk.f32.mxu1 %vm13524_vm0, %v18393_v1  ;;  %v18448_v55 = vld [vmem:[#allocation54_spill] sm:$0xff] }
 0x33a   : > { %11545 = vmatmul.mubr.msk.f32.vlgmr.msra.gmra.mrb[72].mxu0 %vm2463_vm1, %v18432_v34  ;;  %11587 = vmatprep.subr.mxu1 %v18393_v1  ;;  %v18453_v34 = vld [vmem:[#allocation101_spill] sm:$0xff] }
 0x33b   : > { %12428 = vmatpush3.bf16.xpose.msk.msra.mxu0 %vm14317_vm2, %v12426_v40  ;;  %11547 = vmatprep.mubr.msk.f32.mxu0 %vm13524_vm0, %v18393_v1  ;;  %v18452_v40 = vld [vmem:[#allocation74_spill] sm:$0xff] }
 0x33c   : > { %11563 = vmatmul.mubr.msk.f32.gmra.mrb[118].mxu1 %vm2463_vm1, %v18433_v44  ;;  %11572 = vmatprep.subr.mxu0 %v18393_v1  ;;  %v12815_v44 = vunpack.i.h.bf16 %v18453_v34 }
 0x33d   : > { %11565 = vmatprep.mubr.msk.f32.mxu1 %vm13524_vm0, %v18393_v1 }
 0x33e   : > { %11548 = vmatmul.mubr.msk.f32.gmra.mrb[74].mxu0 %vm2463_vm1, %v18434_v29  ;;  %v12814_v29 = vunpack.i.l.bf16 %v18453_v34 }
 0x33f   : > { %11550 = vmatprep.mubr.msk.f32.mxu0 %vm13524_vm0, %v18393_v1 }
 0x340   : > { %11566 = vmatmul.mubr.msk.f32.gmra.mrb[120].mxu1 %vm2463_vm1, %v15316_v25  ;;  %v18437_v25 = vld [vmem:[#allocation43_spill] sm:$0xff] }
 0x341   : > { %11588 = vmatpush3.xpose.msk.msra.mxu1 %vm2463_vm1, %v2198_v60  ;;  %11589 = vmatprep.mubr.msk.f32.mxu1 %vm13524_vm0, %v18393_v1  ;;  %v12462_v60 = vpack.c.bf16 %v12815_v44, %v12814_v29 }
 0x342   : > { %11551 = vmatmul.mubr.msk.f32.gmra.mrb[76].mxu0 %vm2463_vm1, %v18436_v50  ;;  %12437 = vmatprep.subr.bf16.mxu1 %v18413_v11  ;;  %v18460_v50 = vld [vmem:[#allocation22_spill] sm:$0xff] }
 0x343   : > { %11573 = vmatpush3.xpose.msk.msra.mxu0 %vm2463_vm1, %v2192_v42  ;;  %11574 = vmatprep.mubr.msk.f32.mxu0 %vm13524_vm0, %v18393_v1  ;;  %v18459_v42 = vld [vmem:[#allocation85_spill] sm:$0xff] }
 0x344   : > { %11590 = vmatmul.mubr.msk.f32.vlgmr.msra.gmra.mrb[122].mxu1 %vm2463_vm1, %v18437_v25  ;;  %12433 = vmatprep.subr.bf16.mxu0 %v18413_v11 }
 0x345   : > { %12440 = vmatpush3.bf16.xpose.msk.msra.mxu1 %vm14317_vm2, %v12438_v52  ;;  %11592 = vmatprep.mubr.msk.f32.mxu1 %vm13524_vm0, %v18393_v1  ;;  %v18461_v52 = vld [vmem:[#allocation30_spill] sm:$0xff] }
 0x346   : > { %11575 = vmatmul.mubr.msk.f32.vlgmr.msra.gmra.mrb[78].mxu0 %vm2463_vm1, %v18438_v6  ;;  %11617 = vmatprep.subr.mxu1 %v18393_v1  ;;  %v12469_v25 = vpack.c.bf16 %v18461_v52, %v18460_v50  ;;  %v18464_v6 = vld [vmem:[#allocation29_spill] sm:$0xff] }
 0x347   : > { %12436 = vmatpush3.bf16.xpose.msk.msra.mxu0 %vm14317_vm2, %v12434_v9  ;;  %11577 = vmatprep.mubr.msk.f32.mxu0 %vm13524_vm0, %v18393_v1  ;;  %v18463_v9 = vld [vmem:[#allocation21_spill] sm:$0xff] }
 0x348   : > { %11593 = vmatmul.mubr.msk.f32.gmra.mrb[124].mxu1 %vm2463_vm1, %v18439_v10  ;;  %11602 = vmatprep.subr.mxu0 %v18393_v1  ;;  %v12466_v10 = vpack.c.bf16 %v18464_v6, %v18463_v9 }
 0x349   : > { %11595 = vmatprep.mubr.msk.f32.mxu1 %vm13524_vm0, %v18393_v1 }
 0x34a   : > { %11578 = vmatmul.mubr.msk.f32.gmra.mrb[80].mxu0 %vm2463_vm1, %v18440_v4  ;;  %v18465_v4 = vld [vmem:[#allocation52_spill] sm:$0xff] }
 0x34b   : > { %11580 = vmatprep.mubr.msk.f32.mxu0 %vm13524_vm0, %v18393_v1 }
 0x34c   : > { %11596 = vmatmul.mubr.msk.f32.gmra.mrb[126].mxu1 %vm2463_vm1, %v15444_v58  ;;  %v18443_v58 = vld [vmem:[#allocation45_spill] sm:$0xff] }
 0x34d   : > { %11618 = vmatpush3.xpose.msk.msra.mxu1 %vm2463_vm1, %v18441_v51  ;;  %11619 = vmatprep.mubr.msk.f32.mxu1 %vm13524_vm0, %v18393_v1 }
 0x34e   : > { %11581 = vmatmul.mubr.msk.f32.gmra.mrb[82].mxu0 %vm2463_vm1, %v15448_v5  ;;  %12445 = vmatprep.subr.bf16.mxu1 %v18413_v11  ;;  %v18444_v5 = vld [vmem:[#allocation46_spill] sm:$0xff] }
 0x34f   : > { %11603 = vmatpush3.xpose.msk.msra.mxu0 %vm2463_vm1, %v18442_v19  ;;  %11604 = vmatprep.mubr.msk.f32.mxu0 %vm13524_vm0, %v18393_v1 }
 0x350   : > { %11620 = vmatmul.mubr.msk.f32.vlgmr.msra.gmra.mrb[128].mxu1 %vm2463_vm1, %v18443_v58  ;;  %12441 = vmatprep.subr.bf16.mxu0 %v18413_v11 }
 0x351   : > { %12448 = vmatpush3.bf16.xpose.msk.msra.mxu1 %vm14317_vm2, %v12446_v27  ;;  %11622 = vmatprep.mubr.msk.f32.mxu1 %vm13524_vm0, %v18393_v1 }
 0x352   : > { %11605 = vmatmul.mubr.msk.f32.vlgmr.msra.gmra.mrb[84].mxu0 %vm2463_vm1, %v18444_v5  ;;  %11647 = vmatprep.subr.mxu1 %v18393_v1 }
 0x353   : > { %12444 = vmatpush3.bf16.xpose.msk.msra.mxu0 %vm14317_vm2, %v12442_v7  ;;  %11607 = vmatprep.mubr.msk.f32.mxu0 %vm13524_vm0, %v18393_v1 }
 0x354   : > { %11623 = vmatmul.mubr.msk.f32.gmra.mrb[130].mxu1 %vm2463_vm1, %v18445_v31  ;;  %11632 = vmatprep.subr.mxu0 %v18393_v1 }
 0x355   : > { %11625 = vmatprep.mubr.msk.f32.mxu1 %vm13524_vm0, %v18393_v1 }
 0x356   : > { %11608 = vmatmul.mubr.msk.f32.gmra.mrb[86].mxu0 %vm2463_vm1, %v18446_v46 }
 0x357   : > { %11610 = vmatprep.mubr.msk.f32.mxu0 %vm13524_vm0, %v18393_v1 }
 0x358   : > { %11626 = vmatmul.mubr.msk.f32.gmra.mrb[132].mxu1 %vm2463_vm1, %v18447_v45 }
 0x359   : > { %11648 = vmatpush3.xpose.msk.msra.mxu1 %vm2463_vm1, %v15409_v14  ;;  %11649 = vmatprep.mubr.msk.f32.mxu1 %vm13524_vm0, %v18393_v1  ;;  %v12450_v14 = vpack.c.bf16 %v12800_v13, %v12799_v59 }
 0x35a   : > { %11611 = vmatmul.mubr.msk.f32.gmra.mrb[88].mxu0 %vm2463_vm1, %v18448_v55  ;;  %12453 = vmatprep.subr.bf16.mxu1 %v18413_v11 }
 0x35b   : > { %11633 = vmatpush3.xpose.msk.msra.mxu0 %vm2463_vm1, %v15391_v53  ;;  %11634 = vmatprep.mubr.msk.f32.mxu0 %vm13524_vm0, %v18393_v1  ;;  %v18451_v53 = vld [vmem:[#allocation65_spill] sm:$0xff] }
 0x35c   : > { %11650 = vmatmul.mubr.msk.f32.vlgmr.msra.gmra.mrb[134].mxu1 %vm2463_vm1, %v18449_v2  ;;  %12449 = vmatprep.subr.bf16.mxu0 %v18413_v11 }
 0x35d   : > { %12456 = vmatpush3.bf16.xpose.msk.msra.mxu1 %vm14317_vm2, %v12454_v15  ;;  %11652 = vmatprep.mubr.msk.f32.mxu1 %vm13524_vm0, %v18393_v1 }
 0x35e   : > { %11635 = vmatmul.mubr.msk.f32.vlgmr.msra.gmra.mrb[90].mxu0 %vm2463_vm1, %v18450_v17  ;;  %11677 = vmatprep.subr.mxu1 %v18393_v1 }
 0x35f   : > { %12452 = vmatpush3.bf16.xpose.msk.msra.mxu0 %vm14317_vm2, %v12450_v14  ;;  %11637 = vmatprep.mubr.msk.f32.mxu0 %vm13524_vm0, %v18393_v1 }
 0x360   : > { %11653 = vmatmul.mubr.msk.f32.gmra.mrb[136].mxu1 %vm2463_vm1, %v18451_v53  ;;  %11662 = vmatprep.subr.mxu0 %v18393_v1 }
 0x361   : > { %11655 = vmatprep.mubr.msk.f32.mxu1 %vm13524_vm0, %v18393_v1 }
 0x362   : > { %11638 = vmatmul.mubr.msk.f32.gmra.mrb[92].mxu0 %vm2463_vm1, %v18452_v40 }
 0x363   : > { %11640 = vmatprep.mubr.msk.f32.mxu0 %vm13524_vm0, %v18393_v1 }
 0x364   : > { %11656 = vmatmul.mubr.msk.f32.gmra.mrb[138].mxu1 %vm2463_vm1, %v15331_v32  ;;  %v18455_v32 = vld [vmem:[#allocation49_spill] sm:$0xff] }
 0x365   : > { %11678 = vmatpush3.xpose.msk.msra.mxu1 %vm2463_vm1, %v15424_v26  ;;  %11679 = vmatprep.mubr.msk.f32.mxu1 %vm13524_vm0, %v18393_v1  ;;  %v12458_v26 = vpack.c.bf16 %v12810_v21, %v12809_v56  ;;  %v15846_v21 = vpop.permute.xlu0 %12822 }
 0x366   : > { %11641 = vmatmul.mubr.msk.f32.gmra.mrb[94].mxu0 %vm2463_vm1, %v18454_v18  ;;  %12461 = vmatprep.subr.bf16.mxu1 %v18413_v11  ;;  %18470 = vst [vmem:[#allocation88_spill] sm:$0xff] %v15846_v21 }
 0x367   : > { %11663 = vmatpush3.xpose.msk.msra.mxu0 %vm2463_vm1, %v15420_v24  ;;  %11664 = vmatprep.mubr.msk.f32.mxu0 %vm13524_vm0, %v18393_v1  ;;  %v18457_v24 = vld [vmem:[#allocation67_spill] sm:$0xff] }
 0x368   : > { %11680 = vmatmul.mubr.msk.f32.vlgmr.msra.gmra.mrb[140].mxu1 %vm2463_vm1, %v18455_v32  ;;  %12457 = vmatprep.subr.bf16.mxu0 %v18413_v11 }
 0x369   : > { %12464 = vmatpush3.bf16.xpose.msk.msra.mxu1 %vm14317_vm2, %v12462_v60  ;;  %11682 = vmatprep.mubr.msk.f32.mxu1 %vm13524_vm0, %v18393_v1  ;;  %v15850_v60 = vpop.permute.xlu1 %2275 }
 0x36a   : > { %11665 = vmatmul.mubr.msk.f32.vlgmr.msra.gmra.mrb[96].mxu0 %vm2463_vm1, %v18456_v0  ;;  %11707 = vmatprep.subr.mxu1 %v18393_v1  ;;  %18471 = vst [vmem:[#allocation58_spill] sm:$0xff] %v15850_v60 }
 0x36b   : > { %12460 = vmatpush3.bf16.xpose.msk.msra.mxu0 %vm14317_vm2, %v12458_v26  ;;  %11667 = vmatprep.mubr.msk.f32.mxu0 %vm13524_vm0, %v18393_v1 }
 0x36c   : > { %11683 = vmatmul.mubr.msk.f32.gmra.mrb[142].mxu1 %vm2463_vm1, %v18457_v24  ;;  %11692 = vmatprep.subr.mxu0 %v18393_v1  ;;  %v15856_v24 = vpop.permute.xlu0 %2281 }
 0x36d   : > { %11685 = vmatprep.mubr.msk.f32.mxu1 %vm13524_vm0, %v18393_v1  ;;  %18472 = vst [vmem:[#allocation53_spill] sm:$0xff] %v15856_v24 }
 0x36e   : > { %11668 = vmatmul.mubr.msk.f32.gmra.mrb[98].mxu0 %vm2463_vm1, %v18458_v30 }
 0x36f   : > { %11670 = vmatprep.mubr.msk.f32.mxu0 %vm13524_vm0, %v18393_v1 }
 0x370   : > { %11686 = vmatmul.mubr.msk.f32.gmra.mrb[144].mxu1 %vm2463_vm1, %v15346_v36  ;;  %v18462_v36 = vld [vmem:[#allocation51_spill] sm:$0xff]  ;;  %v15866_v52 = vpop.permute.xlu0 %12832 }
 0x371   : > { %11708 = vmatpush3.xpose.msk.msra.mxu1 %vm2463_vm1, %v2246_v37  ;;  %11709 = vmatprep.mubr.msk.f32.mxu1 %vm13524_vm0, %v18393_v1  ;;  %18474 = vst [vmem:[#allocation40_spill] sm:$0xff] %v15866_v52 }
 0x372   : > { %11671 = vmatmul.mubr.msk.f32.gmra.mrb[100].mxu0 %vm2463_vm1, %v18459_v42  ;;  %12468 = vmatprep.subr.bf16.mxu1 %v18413_v11  ;;  %v15862_v42 = vpop.permute.xlu1 %12817 }
 0x373   : > { %11693 = vmatpush3.xpose.msk.msra.mxu0 %vm2463_vm1, %v2240_v41  ;;  %11694 = vmatprep.mubr.msk.f32.mxu0 %vm13524_vm0, %v18393_v1  ;;  %18473 = vst [vmem:[#allocation39_spill] sm:$0xff] %v15862_v42 }
 0x374   : > { %11710 = vmatmul.mubr.msk.f32.vlgmr.msra.gmra.mrb[146].mxu1 %vm2463_vm1, %v18462_v36  ;;  %12465 = vmatprep.subr.bf16.mxu0 %v18413_v11 }
 0x375   : > { %12470 = vmatpush3.bf16.msra.mxu1 %v12469_v25  ;;  %11712 = vmatprep.mubr.msk.f32.mxu1 %vm13524_vm0, %v18393_v1 }
 0x376   : > { %11695 = vmatmul.mubr.msk.f32.vlgmr.msra.gmra.mrb[102].mxu0 %vm2463_vm1, %v18465_v4  ;;  %11737 = vmatprep.subr.mxu1 %v18393_v1  ;;  %v15870_v9 = vpop.permute.xlu1 %12827 }
 0x377   : > { %12467 = vmatpush3.bf16.msra.mxu0 %v12466_v10  ;;  %11697 = vmatprep.mubr.msk.f32.mxu0 %vm13524_vm0, %v18393_v1  ;;  %18475 = vst [vmem:[#allocation59_spill] sm:$0xff] %v15870_v9 }
 0x378   : > { %11713 = vmatmul.mubr.msk.f32.gmra.mrb[148].mxu1 %vm2463_vm1, %v18466_v47  ;;  %11722 = vmatprep.subr.mxu0 %v18393_v1  ;;  %v15876_v47 = vpop.permute.xlu0 %12842 }
 0x379   : > { %11738 = vmatpush3.msk.msra.mxu1 %vm6475_vm5, %v18467_v38  ;;  %11715 = vmatprep.mubr.msk.f32.mxu1 %vm13524_vm0, %v18393_v1  ;;  %18476 = vst [vmem:[#allocation64_spill] sm:$0xff] %v15876_v47 }
 0x37a   : > { %11698 = vmatmul.mubr.msk.f32.gmra.mrb[104].mxu0 %vm2463_vm1, %v18468_v43  ;;  %12474 = vmatprep.subr.bf16.mxu1 %v18413_v11 }
 0x37b   : > { %11723 = vmatpush3.msk.msra.mxu0 %vm6475_vm5, %v18469_v12  ;;  %11700 = vmatprep.mubr.msk.f32.mxu0 %vm13524_vm0, %v18393_v1 }
 0x37c   : > { %11716 = vmatmul.mubr.msk.f32.gmra.mrb[150].mxu1 %vm2463_vm1, %v15452_v22  ;;  %12471 = vmatprep.subr.bf16.mxu0 %v18413_v11 }
 0x37d   : > { %11739 = vmatprep.mubr.msk.f32.mxu1 %vm13524_vm0, %v18393_v1 }
 0x37e   : > { %11701 = vmatmul.mubr.msk.f32.gmra.mrb[106].mxu0 %vm2463_vm1, %v15456_v8 }
 0x37f   : > { %11724 = vmatprep.mubr.msk.f32.mxu0 %vm13524_vm0, %v18393_v1 }
 0x39d   : > { %v15812_v51 = vpop.f32.mrb[36].mxu0 }
 0x39e   : > { %v11366_v27 = vpop.f32.mrb[37].mxu0  ;;  %v5482_v19 = vsel %vm5408_vm3, %v15812_v51, -inf }
 0x39f   : > { %5483 = vmax.xlane.f32.xlu1 %v5482_v19  ;;  %v15880_v27 = vpop.permute.xlu1 %2287 }
 0x3a0   : > { %18477 = vst [vmem:[#allocation92_spill] sm:$0xff] %v15880_v27 }
 0x3a1   : > { %v15816_v58 = vpop.f32.mrb[38].mxu0  ;;  %v15818_v22 = vpop.f32.mrb[80].mxu1 }
 0x3a2   : > { %v11369_v7 = vpop.f32.mrb[39].mxu0  ;;  %v11381_v5 = vpop.f32.mrb[81].mxu1  ;;  %v5491_v31 = vsel %vm5408_vm3, %v15818_v22, -inf  ;;  %v5485_v8 = vsel %vm5408_vm3, %v15816_v58, -inf }
 0x3a3   : > { %5492 = vmax.xlane.f32.xlu0 %v5491_v31  ;;  %5486 = vmax.xlane.f32.xlu1 %v5485_v8  ;;  %v15884_v5 = vpop.permute.xlu0 %2293 }
 0x3a4   : > { %18478 = vst [vmem:[#allocation66_spill] sm:$0xff] %v15884_v5 }
 0x3a5   : > { %v15824_v46 = vpop.f32.mrb[40].mxu0  ;;  %v15826_v39 = vpop.f32.mrb[82].mxu1 }
 0x3a6   : > { %v11372_v54 = vpop.f32.mrb[41].mxu0  ;;  %v11384_v45 = vpop.f32.mrb[83].mxu1  ;;  %v5494_v13 = vsel %vm5408_vm3, %v15826_v39, -inf  ;;  %v5488_v59 = vsel %vm5415_vm4, %v15824_v46, -inf }
 0x3a7   : > { %5495 = vmax.xlane.f32.xlu0 %v5494_v13  ;;  %5489 = vmax.xlane.f32.xlu1 %v5488_v59  ;;  %v15890_v45 = vpop.permute.xlu1 %12837  ;;  %v15892_v13 = vpop.permute.xlu0 %2305 }
 0x3a8   : > { %18479 = vst [vmem:[#allocation41_spill] sm:$0xff] %v15890_v45  ;;  %18480 = vst [vmem:[#allocation42_spill] sm:$0xff] %v15892_v13 }
 0x3a9   : > { %v15832_v55 = vpop.f32.mrb[84].mxu1  ;;  %v15834_v15 = vpop.f32.mrb[42].mxu0 }
 0x3aa   : > { %v11387_v2 = vpop.f32.mrb[85].mxu1  ;;  %v11396_v14 = vpop.f32.mrb[43].mxu0  ;;  %v5497_v17 = vsel %vm5415_vm4, %v15832_v55, -inf  ;;  %v5500_v53 = vsel %vm5408_vm3, %v15834_v15, -inf }
 0x3ab   : > { %5498 = vmax.xlane.f32.xlu0 %v5497_v17  ;;  %5501 = vmax.xlane.f32.xlu1 %v5500_v53  ;;  %v15898_v17 = vpop.permute.xlu1 %2299 }
 0x3ac   : > { %18481 = vst [vmem:[#allocation60_spill] sm:$0xff] %v15898_v17 }
 0x3ad   : > { %v15840_v40 = vpop.f32.mrb[44].mxu0 }
 0x3ae   : > { %v11399_v34 = vpop.f32.mrb[45].mxu0  ;;  %v5503_v44 = vsel %vm5408_vm3, %v15840_v40, -inf }
 0x3af   : > { %5504 = vmax.xlane.f32.xlu1 %v5503_v44 }
 0x3b1   : > { %v15844_v29 = vpop.f32.mrb[46].mxu0 }
 0x3b2   : > { %v11402_v56 = vpop.f32.mrb[47].mxu0  ;;  %v5506_v18 = vsel %vm5415_vm4, %v15844_v29, -inf }
 0x3b3   : > { %5507 = vmax.xlane.f32.xlu1 %v5506_v18  ;;  %v5411_v56 = vpop.xlane.xlu0 %5410 }
 0x3b5   : > { %v15852_v32 = vpop.f32.mrb[48].mxu0 }
 0x3b6   : > { %v11426_v26 = vpop.f32.mrb[49].mxu0  ;;  %v5518_v0 = vsel %vm5408_vm3, %v15852_v32, -inf }
 0x3b7   : > { %5519 = vmax.xlane.f32.xlu1 %v5518_v0 }
 0x3b9   : > { %v15858_v30 = vpop.f32.mrb[50].mxu0 }
 0x3ba   : > { %v11429_v37 = vpop.f32.mrb[51].mxu0  ;;  %v5521_v41 = vsel %vm5408_vm3, %v15858_v30, -inf }
 0x3bb   : > { %5522 = vmax.xlane.f32.xlu1 %v5521_v41  ;;  %v5421_v37 = vpop.xlane.xlu1 %5420  ;;  %v5414_v41 = vpop.xlane.xlu0 %5413 }
 0x3bd   : > { %v15864_v50 = vpop.f32.mrb[52].mxu0 }
 0x3be   : > { %v11432_v25 = vpop.f32.mrb[53].mxu0  ;;  %v5524_v36 = vsel %vm5415_vm4, %v15864_v50, -inf }
 0x3bf   : > { %5525 = vmax.xlane.f32.xlu1 %v5524_v36  ;;  %v5701_v25 = vsub.f32 %v15100_v33, %v5421_v37  ;;  %v5698_v36 = vsub.f32 %v15096_v63, %v5411_v56  ;;  %v5418_v56 = vpop.xlane.xlu1 %5417 }
 0x3c2   : > { %v15872_v6 = vpop.f32.mrb[86].mxu1 }
 0x3c3   : > { %v11411_v10 = vpop.f32.mrb[87].mxu1  ;;  %v5509_v4 = vsel %vm5408_vm3, %v15872_v6, -inf }
 0x3c4   : > { %5510 = vmax.xlane.f32.xlu0 %v5509_v4  ;;  %v5800_v10 = vmul.f32 1.442695, %v5701_v25  ;;  %v5424_v4 = vpop.xlane.xlu0 %5423 }
 0x3c6   : > { %v15878_v43 = vpop.f32.mrb[88].mxu1  ;;  %12938 = vpow2.f32 %v5800_v10 }
 0x3c7   : > { %v11414_v19 = vpop.f32.mrb[89].mxu1  ;;  %v5512_v7 = vsel %vm5408_vm3, %v15878_v43, -inf }
 0x3c8   : > { %5513 = vmax.xlane.f32.xlu0 %v5512_v7  ;;  %v5794_v19 = vmul.f32 1.442695, %v5698_v36  ;;  %v5702_v7 = vsub.f32 %v15120_v49, %v5424_v4  ;;  %v18482_v36 = vld [vmem:[#allocation80_spill] sm:$0xff] }
 0x3c9   : > { %v5700_v10 = vsub.f32 %v18482_v36, %v5418_v56 }
 0x3ca   : > { %v15886_v31 = vpop.f32.mrb[90].mxu1  ;;  %12940 = vpow2.f32 %v5794_v19 }
 0x3cb   : > { %v11417_v8 = vpop.f32.mrb[91].mxu1  ;;  %v5515_v54 = vsel %vm5415_vm4, %v15886_v31, -inf }
 0x3cc   : > { %5516 = vmax.xlane.f32.xlu0 %v5515_v54  ;;  %v5699_v8 = vsub.f32 %v15116_v62, %v5414_v41 }
 0x3ce   : > { %v15894_v59 = vpop.f32.mrb[92].mxu1  ;;  %v5796_v33 = vmul.f32 1.442695, %v5699_v8 }
 0x3cf   : > { %v11441_v2 = vpop.f32.mrb[93].mxu1  ;;  %v5527_v14 = vsel %vm5408_vm3, %v15894_v59, -inf }
 0x3d0   : > { %5528 = vmax.xlane.f32.xlu0 %v5527_v14  ;;  %v5802_v2 = vmul.f32 1.442695, %v5702_v7  ;;  %v15925_v25 = vpop.eup %12938 }
 0x3d2   : > { %v15900_v53 = vpop.f32.mrb[94].mxu1  ;;  %12942 = vpow2.f32 %v5802_v2 }
 0x3d3   : > { %v11444_v34 = vpop.f32.mrb[95].mxu1  ;;  %v5530_v44 = vsel %vm5408_vm3, %v15900_v53, -inf  ;;  %12944 = vpow2.f32 %v5796_v33  ;;  %v5798_v33 = vmul.f32 1.442695, %v5700_v10  ;;  %v18486_v10 = vld [vmem:[#allocation84_spill] sm:$0xff] }
 0x3d4   : > { %5531 = vmax.xlane.f32.xlu0 %v5530_v44  ;;  %v5427_v44 = vpop.xlane.xlu0 %5426 }
 0x3d5   : > { %v5703_v62 = vsub.f32 %v15141_v35, %v5427_v44  ;;  %v15932_v35 = vpop.eup %12940  ;;  %v5995_v44 = vsel %vm5408_vm3, %v15925_v25, 0.0 }
 0x3d6   : > { %v15904_v18 = vpop.f32.mrb[96].mxu1 }
 0x3d7   : > { %v11447_v26 = vpop.f32.mrb[97].mxu1  ;;  %v5533_v0 = vsel %vm5415_vm4, %v15904_v18, -inf  ;;  %v5804_v8 = vmul.f32 1.442695, %v5703_v62 }
 0x3d8   : > { %5534 = vmax.xlane.f32.xlu0 %v5533_v0 }
 0x3d9   : > { %12946 = vpow2.f32 %v5804_v8 }
 0x3da   : > { %12948 = vpow2.f32 %v5798_v33 }
 0x3e6   : > { %v15912_v54 = vpop.f32.mrb[98].mxu1 }
 0x3e7   : > { %v11471_v14 = vpop.f32.mrb[99].mxu1  ;;  %v5545_v34 = vsel %vm5408_vm3, %v15912_v54, -inf }
 0x3e8   : > { %5546 = vmax.xlane.f32.xlu0 %v5545_v34  ;;  %v5439_v14 = vpop.xlane.xlu0 %5438 }
 0x3e9   : > { %v15916_v63 = vpop.f32.mrb[54].mxu0  ;;  %v5707_v62 = vsub.f32 %v15161_v57, %v5439_v14 }
 0x3ea   : > { %v11456_v26 = vpop.f32.mrb[55].mxu0  ;;  %v5536_v49 = vsel %vm5408_vm3, %v15916_v63, -inf }
 0x3eb   : > { %5537 = vmax.xlane.f32.xlu1 %v5536_v49  ;;  %v15921_v0 = vpop.f32.mrb[100].mxu1  ;;  %v5430_v26 = vpop.xlane.xlu1 %5429  ;;  %v5812_v14 = vmul.f32 1.442695, %v5707_v62 }
 0x3ec   : > { %v11474_v37 = vpop.f32.mrb[101].mxu1  ;;  %v5548_v41 = vsel %vm5408_vm3, %v15921_v0, -inf }
 0x3ed   : > { %v15928_v4 = vpop.f32.mrb[56].mxu0  ;;  %5549 = vmax.xlane.f32.xlu0 %v5548_v41  ;;  %v5986_v37 = vsel %vm5408_vm3, %v15932_v35, 0.0  ;;  %12950 = vpow2.f32 %v5812_v14 }
 0x3ee   : > { %v11459_v19 = vpop.f32.mrb[57].mxu0  ;;  %v5539_v7 = vsel %vm5408_vm3, %v15928_v4, -inf }
 0x3ef   : > { %5540 = vmax.xlane.f32.xlu1 %v5539_v7  ;;  %v15934_v2 = vpop.f32.mrb[102].mxu1  ;;  %v15947_v7 = vpop.eup %12942 }
 0x3f0   : > { %v11477_v34 = vpop.f32.mrb[103].mxu1  ;;  %v5551_v19 = vsel %vm5415_vm4, %v15934_v2, -inf  ;;  %18485 = vst [vmem:[#allocation70_spill] sm:$0xff] %v15947_v7  ;;  %v15954_v57 = vpop.eup %12944  ;;  %v5998_v33 = vsel %vm5408_vm3, %v15947_v7, 0.0 }
 0x3f1   : > { %v15938_v56 = vpop.f32.mrb[58].mxu0  ;;  %5996 = vadd.xlane.f32.xlu0 %v5995_v44  ;;  %v5704_v34 = vsub.f32 %v18486_v10, %v5430_v26  ;;  %18488 = vst [vmem:[#allocation44_spill] sm:$0xff] %v15954_v57  ;;  %v15969_v13 = vpop.eup %12946 }
 0x3f2   : > { %18483 = vst [vmem:[#allocation68_spill] sm:$0xff] %v15938_v56  ;;  %v11462_v49 = vpop.f32.mrb[59].mxu0  ;;  %v5542_v8 = vsel %vm5415_vm4, %v15938_v56, -inf  ;;  %18492 = vst [vmem:[#allocation55_spill] sm:$0xff] %v15969_v13 }
 0x3f3   : > { %5987 = vadd.xlane.f32.xlu1 %v5986_v37  ;;  %v15943_v41 = vpop.f32.mrb[104].mxu1  ;;  %v5806_v12 = vmul.f32 1.442695, %v5704_v34 }
 0x3f4   : > { %18484 = vst [vmem:[#allocation94_spill] sm:$0xff] %v15943_v41  ;;  %v11501_v36 = vpop.f32.mrb[105].mxu1 }
 0x3f5   : > { %v15950_v44 = vpop.f32.mrb[60].mxu0  ;;  %5552 = vmax.xlane.f32.xlu0 %v5551_v19  ;;  %v5442_v36 = vpop.xlane.xlu0 %5441  ;;  %12952 = vpow2.f32 %v5806_v12  ;;  %v6001_v12 = vsel %vm5415_vm4, %v15969_v13, 0.0 }
 0x3f6   : > { %18487 = vst [vmem:[#allocation43_spill] sm:$0xff] %v15950_v44  ;;  %v11486_v49 = vpop.f32.mrb[61].mxu0  ;;  %v5433_v19 = vpop.xlane.xlu1 %5432  ;;  %v5708_v62 = vsub.f32 %v15178_v28, %v5442_v36  ;;  %v5554_v14 = vsel %vm5408_vm3, %v15950_v44, -inf }
 0x3f7   : > { %5543 = vmax.xlane.f32.xlu1 %v5542_v8  ;;  %v15956_v37 = vpop.f32.mrb[106].mxu1  ;;  %v5989_v49 = vsel %vm5408_vm3, %v15954_v57, 0.0  ;;  %v5705_v34 = vsub.f32 %v15174_v20, %v5433_v19  ;;  %v15976_v28 = vpop.eup %12948 }
 0x3f8   : > { %18489 = vst [vmem:[#allocation61_spill] sm:$0xff] %v15956_v37  ;;  %v11504_v38 = vpop.f32.mrb[107].mxu1  ;;  %18494 = vst [vmem:[#allocation46_spill] sm:$0xff] %v15976_v28  ;;  %v5814_v36 = vmul.f32 1.442695, %v5708_v62  ;;  %v15991_v5 = vpop.eup %12950 }
 0x3f9   : > { %v15960_v26 = vpop.f32.mrb[62].mxu0  ;;  %5999 = vadd.xlane.f32.xlu0 %v5998_v33  ;;  %v5563_v38 = vsel %vm5408_vm3, %v15943_v41, -inf  ;;  %v5808_v27 = vmul.f32 1.442695, %v5705_v34  ;;  %18498 = vst [vmem:[#allocation54_spill] sm:$0xff] %v15991_v5  ;;  %v18499_v34 = vld [vmem:[#allocation91_spill] sm:$0xff] }
 0x3fa   : > { %18490 = vst [vmem:[#allocation71_spill] sm:$0xff] %v15960_v26  ;;  %v11489_v10 = vpop.f32.mrb[63].mxu0  ;;  %v5436_v19 = vpop.xlane.xlu1 %5435  ;;  %12954 = vpow2.f32 %v5814_v36  ;;  %v5557_v36 = vsel %vm5408_vm3, %v15960_v26, -inf }
 0x3fb   : > { %5990 = vadd.xlane.f32.xlu1 %v5989_v49  ;;  %v15965_v8 = vpop.f32.mrb[108].mxu1  ;;  %v5445_v49 = vpop.xlane.xlu0 %5444  ;;  %12956 = vpow2.f32 %v5808_v27  ;;  %v6013_v27 = vsel %vm5408_vm3, %v15991_v5, 0.0 }
 0x3fc   : > { %18491 = vst [vmem:[#allocation96_spill] sm:$0xff] %v15965_v8  ;;  %v11507_v17 = vpop.f32.mrb[109].mxu1  ;;  %v5709_v62 = vsub.f32 %v15196_v48, %v5445_v49 }
 0x3fd   : > { %v15972_v33 = vpop.f32.mrb[64].mxu0  ;;  %5564 = vmax.xlane.f32.xlu0 %v5563_v38 }
 0x3fe   : > { %18493 = vst [vmem:[#allocation45_spill] sm:$0xff] %v15972_v33  ;;  %v11492_v10 = vpop.f32.mrb[65].mxu0  ;;  %v5816_v49 = vmul.f32 1.442695, %v5709_v62 }
 0x3ff   : > { %5555 = vmax.xlane.f32.xlu1 %v5554_v14  ;;  %v15978_v17 = vpop.f32.mrb[110].mxu1  ;;  %v5992_v10 = vsel %vm5415_vm4, %v15976_v28, 0.0  ;;  %v15998_v48 = vpop.eup %12952 }
 0x400   : > { %18495 = vst [vmem:[#allocation62_spill] sm:$0xff] %v15978_v17  ;;  %v11531_v45 = vpop.f32.mrb[111].mxu1  ;;  %18501 = vst [vmem:[#allocation48_spill] sm:$0xff] %v15998_v48  ;;  %12958 = vpow2.f32 %v5816_v49  ;;  %v5560_v49 = vsel %vm5415_vm4, %v15972_v33, -inf }
 0x401   : > { %v15982_v20 = vpop.f32.mrb[66].mxu0  ;;  %6002 = vadd.xlane.f32.xlu0 %v6001_v12  ;;  %v5566_v45 = vsel %vm5408_vm3, %v15956_v37, -inf  ;;  %v5706_v12 = vsub.f32 %v18499_v34, %v5436_v19 }
 0x402   : > { %18496 = vst [vmem:[#allocation72_spill] sm:$0xff] %v15982_v20  ;;  %v11516_v38 = vpop.f32.mrb[67].mxu0 }
 0x403   : > { %5993 = vadd.xlane.f32.xlu1 %v5992_v10  ;;  %v15987_v14 = vpop.f32.mrb[112].mxu1  ;;  %v5457_v10 = vpop.xlane.xlu0 %5456  ;;  %v5810_v60 = vmul.f32 1.442695, %v5706_v12  ;;  %v18506_v12 = vld [vmem:[#allocation95_spill] sm:$0xff] }
 0x404   : > { %18497 = vst [vmem:[#allocation63_spill] sm:$0xff] %v15987_v14  ;;  %v11534_v47 = vpop.f32.mrb[113].mxu1  ;;  %v5713_v62 = vsub.f32 %v15214_v61, %v5457_v10  ;;  %v16013_v42 = vpop.eup %12954 }
 0x405   : > { %v15994_v9 = vpop.f32.mrb[68].mxu0  ;;  %5567 = vmax.xlane.f32.xlu0 %v5566_v45  ;;  %v5448_v45 = vpop.xlane.xlu1 %5447  ;;  %18505 = vst [vmem:[#allocation77_spill] sm:$0xff] %v16013_v42  ;;  %12960 = vpow2.f32 %v5810_v60  ;;  %v6016_v60 = vsel %vm5408_vm3, %v16013_v42, 0.0 }
 0x406   : > { %18500 = vst [vmem:[#allocation47_spill] sm:$0xff] %v15994_v9  ;;  %v11519_v38 = vpop.f32.mrb[69].mxu0  ;;  %v16020_v61 = vpop.eup %12956  ;;  %v5824_v10 = vmul.f32 1.442695, %v5713_v62 }
 0x407   : > { %5558 = vmax.xlane.f32.xlu1 %v5557_v36  ;;  %v16000_v47 = vpop.f32.mrb[114].mxu1  ;;  %v6004_v38 = vsel %vm5408_vm3, %v15998_v48, 0.0  ;;  %18508 = vst [vmem:[#allocation50_spill] sm:$0xff] %v16020_v61 }
 0x408   : > { %18502 = vst [vmem:[#allocation65_spill] sm:$0xff] %v16000_v47  ;;  %v11537_v52 = vpop.f32.mrb[115].mxu1  ;;  %12962 = vpow2.f32 %v5824_v10  ;;  %v5572_v10 = vsel %vm5408_vm3, %v15982_v20, -inf  ;;  %v18517_v20 = vld [vmem:[#allocation98_spill] sm:$0xff] }
 0x409   : > { %v16004_v19 = vpop.f32.mrb[70].mxu0  ;;  %6014 = vadd.xlane.f32.xlu0 %v6013_v27  ;;  %v5569_v52 = vsel %vm5415_vm4, %v15965_v8, -inf  ;;  %v5710_v27 = vsub.f32 %v18506_v12, %v5448_v45 }
 0x40a   : > { %18503 = vst [vmem:[#allocation74_spill] sm:$0xff] %v16004_v19  ;;  %v11522_v34 = vpop.f32.mrb[71].mxu0  ;;  %v16035_v42 = vpop.eup %12958 }
 0x40b   : > { %6005 = vadd.xlane.f32.xlu1 %v6004_v38  ;;  %v16009_v36 = vpop.f32.mrb[116].mxu1  ;;  %v5460_v38 = vpop.xlane.xlu0 %5459  ;;  %v5818_v48 = vmul.f32 1.442695, %v5710_v27  ;;  %18512 = vst [vmem:[#allocation22_spill] sm:$0xff] %v16035_v42 }
 0x40c   : > { %18504 = vst [vmem:[#allocation101_spill] sm:$0xff] %v16009_v36  ;;  %v11561_v24 = vpop.f32.mrb[117].mxu1  ;;  %v5714_v62 = vsub.f32 %v15224_v3, %v5460_v38 }
 0x40d   : > { %v16016_v21 = vpop.f32.mrb[72].mxu0  ;;  %5570 = vmax.xlane.f32.xlu0 %v5569_v52  ;;  %v5451_v52 = vpop.xlane.xlu1 %5450  ;;  %12964 = vpow2.f32 %v5818_v48  ;;  %v6019_v48 = vsel %vm5415_vm4, %v16035_v42, 0.0 }
 0x40e   : > { %18507 = vst [vmem:[#allocation49_spill] sm:$0xff] %v16016_v21  ;;  %v11546_v34 = vpop.f32.mrb[73].mxu0  ;;  %v5711_v27 = vsub.f32 %v15221_v16, %v5451_v52  ;;  %v5826_v38 = vmul.f32 1.442695, %v5714_v62 }
 0x40f   : > { %5561 = vmax.xlane.f32.xlu1 %v5560_v49  ;;  %v16022_v24 = vpop.f32.mrb[118].mxu1  ;;  %v6007_v34 = vsel %vm5408_vm3, %v16020_v61, 0.0  ;;  %v16042_v3 = vpop.eup %12960 }
 0x410   : > { %18509 = vst [vmem:[#allocation67_spill] sm:$0xff] %v16022_v24  ;;  %v11564_v8 = vpop.f32.mrb[119].mxu1  ;;  %18514 = vst [vmem:[#allocation51_spill] sm:$0xff] %v16042_v3  ;;  %v5820_v61 = vmul.f32 1.442695, %v5711_v27  ;;  %12966 = vpow2.f32 %v5826_v38  ;;  %v18520_v27 = vld [vmem:[#allocation97_spill] sm:$0xff] }
 0x411   : > { %v16026_v45 = vpop.f32.mrb[74].mxu0  ;;  %6017 = vadd.xlane.f32.xlu0 %v6016_v60  ;;  %v5581_v8 = vsel %vm5408_vm3, %v15978_v17, -inf  ;;  %v5454_v52 = vpop.xlane.xlu1 %5453  ;;  %v5575_v38 = vsel %vm5408_vm3, %v15994_v9, -inf  ;;  %v18525_v9 = vld [vmem:[#allocation100_spill] sm:$0xff] }
 0x412   : > { %18510 = vst [vmem:[#allocation81_spill] sm:$0xff] %v16026_v45  ;;  %v11549_v12 = vpop.f32.mrb[75].mxu0  ;;  %v16057_v42 = vpop.eup %12962  ;;  %12968 = vpow2.f32 %v5820_v61 }
 0x413   : > { %6008 = vadd.xlane.f32.xlu1 %v6007_v34  ;;  %v16031_v49 = vpop.f32.mrb[120].mxu1  ;;  %v5463_v34 = vpop.xlane.xlu0 %5462  ;;  %18519 = vst [vmem:[#allocation69_spill] sm:$0xff] %v16057_v42  ;;  %v6031_v61 = vsel %vm5408_vm3, %v16057_v42, 0.0 }
 0x414   : > { %18511 = vst [vmem:[#allocation85_spill] sm:$0xff] %v16031_v49  ;;  %v11567_v33 = vpop.f32.mrb[121].mxu1  ;;  %v5715_v62 = vsub.f32 %v18517_v20, %v5463_v34 }
 0x415   : > { %v16038_v60 = vpop.f32.mrb[76].mxu0  ;;  %5582 = vmax.xlane.f32.xlu0 %v5581_v8 }
 0x416   : > { %18513 = vst [vmem:[#allocation30_spill] sm:$0xff] %v16038_v60  ;;  %v11552_v12 = vpop.f32.mrb[77].mxu0  ;;  %v5828_v34 = vmul.f32 1.442695, %v5715_v62 }
 0x417   : > { %5573 = vmax.xlane.f32.xlu1 %v5572_v10  ;;  %v16044_v33 = vpop.f32.mrb[122].mxu1  ;;  %v6010_v12 = vsel %vm5415_vm4, %v16042_v3, 0.0  ;;  %v16064_v20 = vpop.eup %12964 }
 0x418   : > { %18515 = vst [vmem:[#allocation21_spill] sm:$0xff] %v16044_v33  ;;  %v11591_v17 = vpop.f32.mrb[123].mxu1  ;;  %18522 = vst [vmem:[#allocation80_spill] sm:$0xff] %v16064_v20  ;;  %12970 = vpow2.f32 %v5828_v34  ;;  %v5578_v34 = vsel %vm5415_vm4, %v16004_v19, -inf  ;;  %v18533_v19 = vld [vmem:[#allocation103_spill] sm:$0xff] }
 0x419   : > { %v16048_v16 = vpop.f32.mrb[78].mxu0  ;;  %6020 = vadd.xlane.f32.xlu0 %v6019_v48  ;;  %v5584_v17 = vsel %vm5408_vm3, %v15987_v14, -inf  ;;  %v5712_v48 = vsub.f32 %v18520_v27, %v5454_v52 }
 0x41a   : > { %18516 = vst [vmem:[#allocation29_spill] sm:$0xff] %v16048_v16  ;;  %v11576_v8 = vpop.f32.mrb[79].mxu0  ;;  %v16079_v42 = vpop.eup %12966 }
 0x41b   : > { %6011 = vadd.xlane.f32.xlu1 %v6010_v12  ;;  %v16053_v10 = vpop.f32.mrb[124].mxu1  ;;  %v5475_v12 = vpop.xlane.xlu0 %5474  ;;  %v5822_v3 = vmul.f32 1.442695, %v5712_v48  ;;  %18527 = vst [vmem:[#allocation98_spill] sm:$0xff] %v16079_v42  ;;  %v18528_v48 = vld [vmem:[#allocation99_spill] sm:$0xff] }
 0x41c   : > { %18518 = vst [vmem:[#allocation52_spill] sm:$0xff] %v16053_v10  ;;  %v11594_v5 = vpop.f32.mrb[125].mxu1  ;;  %v5719_v62 = vsub.f32 %v18525_v9, %v5475_v12  ;;  %v16086_v9 = vpop.eup %12968 }
 0x41d   : > { %v16060_v28 = vpop.f32.mrb[80].mxu0  ;;  %5585 = vmax.xlane.f32.xlu0 %v5584_v17  ;;  %v5466_v17 = vpop.xlane.xlu1 %5465  ;;  %12972 = vpow2.f32 %v5822_v3  ;;  %18530 = vst [vmem:[#allocation100_spill] sm:$0xff] %v16086_v9  ;;  %v6034_v3 = vsel %vm5408_vm3, %v16079_v42, 0.0 }
 0x41e   : > { %18521 = vst [vmem:[#allocation87_spill] sm:$0xff] %v16060_v28  ;;  %v11579_v8 = vpop.f32.mrb[81].mxu0  ;;  %v5836_v12 = vmul.f32 1.442695, %v5719_v62 }
 0x41f   : > { %5576 = vmax.xlane.f32.xlu1 %v5575_v38  ;;  %v16066_v5 = vpop.f32.mrb[126].mxu1  ;;  %v6022_v8 = vsel %vm5408_vm3, %v16064_v20, 0.0 }
 0x420   : > { %18523 = vst [vmem:[#allocation84_spill] sm:$0xff] %v16066_v5  ;;  %v11597_v14 = vpop.f32.mrb[127].mxu1  ;;  %12974 = vpow2.f32 %v5836_v12  ;;  %v5590_v12 = vsel %vm5408_vm3, %v16016_v21, -inf  ;;  %v5602_v21 = vsel %vm5408_vm3, %v16022_v24, -inf }
 0x421   : > { %v16070_v52 = vpop.f32.mrb[82].mxu0  ;;  %6032 = vadd.xlane.f32.xlu0 %v6031_v61  ;;  %v5587_v14 = vsel %vm5415_vm4, %v16000_v47, -inf  ;;  %v5716_v61 = vsub.f32 %v18528_v48, %v5466_v17 }
 0x422   : > { %18524 = vst [vmem:[#allocation91_spill] sm:$0xff] %v16070_v52  ;;  %v11582_v27 = vpop.f32.mrb[83].mxu0  ;;  %v16101_v42 = vpop.eup %12970 }
 0x423   : > { %6023 = vadd.xlane.f32.xlu1 %v6022_v8  ;;  %v16075_v38 = vpop.f32.mrb[128].mxu1  ;;  %v5478_v8 = vpop.xlane.xlu0 %5477  ;;  %v5830_v20 = vmul.f32 1.442695, %v5716_v61  ;;  %18535 = vst [vmem:[#allocation106_spill] sm:$0xff] %v16101_v42  ;;  %v18536_v61 = vld [vmem:[#allocation102_spill] sm:$0xff] }
 0x424   : > { %18526 = vst [vmem:[#allocation95_spill] sm:$0xff] %v16075_v38  ;;  %v11621_v26 = vpop.f32.mrb[129].mxu1  ;;  %v5720_v62 = vsub.f32 %v18533_v19, %v5478_v8 }
 0x425   : > { %v16082_v13 = vpop.f32.mrb[84].mxu0  ;;  %5588 = vmax.xlane.f32.xlu0 %v5587_v14  ;;  %v5469_v14 = vpop.xlane.xlu1 %5468  ;;  %12976 = vpow2.f32 %v5830_v20 }
 0x426   : > { %18529 = vst [vmem:[#allocation97_spill] sm:$0xff] %v16082_v13  ;;  %v11606_v27 = vpop.f32.mrb[85].mxu0  ;;  %v5838_v8 = vmul.f32 1.442695, %v5720_v62 }
 0x427   : > { %5579 = vmax.xlane.f32.xlu1 %v5578_v34  ;;  %v16088_v26 = vpop.f32.mrb[130].mxu1  ;;  %v6025_v27 = vsel %vm5408_vm3, %v16086_v9, 0.0  ;;  %v16108_v19 = vpop.eup %12972 }
 0x428   : > { %18531 = vst [vmem:[#allocation99_spill] sm:$0xff] %v16088_v26  ;;  %v11624_v47 = vpop.f32.mrb[131].mxu1  ;;  %18538 = vst [vmem:[#allocation107_spill] sm:$0xff] %v16108_v19  ;;  %12978 = vpow2.f32 %v5838_v8  ;;  %v5593_v8 = vsel %vm5408_vm3, %v16026_v45, -inf }
 0x429   : > { %v16092_v17 = vpop.f32.mrb[86].mxu0  ;;  %6035 = vadd.xlane.f32.xlu0 %v6034_v3  ;;  %v5599_v47 = vsel %vm5408_vm3, %v16009_v36, -inf  ;;  %v5717_v3 = vsub.f32 %v18536_v61, %v5469_v14  ;;  %v6037_v36 = vsel %vm5415_vm4, %v16101_v42, 0.0 }
 0x42a   : > { %18532 = vst [vmem:[#allocation105_spill] sm:$0xff] %v16092_v17  ;;  %v11609_v48 = vpop.f32.mrb[87].mxu0  ;;  %v16123_v42 = vpop.eup %12974 }
 0x42b   : > { %6026 = vadd.xlane.f32.xlu1 %v6025_v27  ;;  %v16097_v34 = vpop.f32.mrb[132].mxu1  ;;  %v5481_v27 = vpop.xlane.xlu0 %5480  ;;  %v5832_v20 = vmul.f32 1.442695, %v5717_v3  ;;  %18542 = vst [vmem:[#allocation111_spill] sm:$0xff] %v16123_v42  ;;  %v18543_v3 = vld [vmem:[#allocation104_spill] sm:$0xff]  ;;  %v6049_v24 = vsel %vm5408_vm3, %v16123_v42, 0.0 }
 0x42c   : > { %18534 = vst [vmem:[#allocation103_spill] sm:$0xff] %v16097_v34  ;;  %v11627_v37 = vpop.f32.mrb[133].mxu1  ;;  %v5721_v62 = vsub.f32 %v15284_v23, %v5481_v27 }
 0x42d   : > { %v16104_v44 = vpop.f32.mrb[88].mxu0  ;;  %5600 = vmax.xlane.f32.xlu0 %v5599_v47  ;;  %v5472_v47 = vpop.xlane.xlu1 %5471  ;;  %12980 = vpow2.f32 %v5832_v20 }
 0x42e   : > { %18537 = vst [vmem:[#allocation102_spill] sm:$0xff] %v16104_v44  ;;  %v11612_v48 = vpop.f32.mrb[89].mxu0  ;;  %v5840_v27 = vmul.f32 1.442695, %v5721_v62 }
 0x42f   : > { %5591 = vmax.xlane.f32.xlu1 %v5590_v12  ;;  %v16110_v37 = vpop.f32.mrb[134].mxu1  ;;  %v6028_v48 = vsel %vm5415_vm4, %v16108_v19, 0.0  ;;  %v16130_v23 = vpop.eup %12976 }
 0x430   : > { %18539 = vst [vmem:[#allocation108_spill] sm:$0xff] %v16110_v37  ;;  %v11651_v14 = vpop.f32.mrb[135].mxu1  ;;  %18545 = vst [vmem:[#allocation112_spill] sm:$0xff] %v16130_v23  ;;  %12982 = vpow2.f32 %v5840_v27 }
 0x431   : > { %v16114_v9 = vpop.f32.mrb[90].mxu0  ;;  %6038 = vadd.xlane.f32.xlu0 %v6037_v36  ;;  %v5718_v14 = vsub.f32 %v18543_v3, %v5472_v47  ;;  %v16164_v45 = vpop.xlane.xlu1 %5483 }
 0x432   : > { %18540 = vst [vmem:[#allocation109_spill] sm:$0xff] %v16114_v9  ;;  %v11636_v61 = vpop.f32.mrb[91].mxu0 }
 0x433   : > { %6029 = vadd.xlane.f32.xlu1 %v6028_v48  ;;  %v16119_v12 = vpop.f32.mrb[136].mxu1  ;;  %v5834_v20 = vmul.f32 1.442695, %v5718_v14 }
 0x434   : > { %18541 = vst [vmem:[#allocation110_spill] sm:$0xff] %v16119_v12  ;;  %v11654_v61 = vpop.f32.mrb[137].mxu1 }
 0x435   : > { %v16126_v36 = vpop.f32.mrb[92].mxu0  ;;  %5603 = vmax.xlane.f32.xlu0 %v5602_v21  ;;  %v6040_v21 = vsel %vm5408_vm3, %v16130_v23, 0.0  ;;  %v5605_v61 = vsel %vm5415_vm4, %v16031_v49, -inf  ;;  %12984 = vpow2.f32 %v5834_v20  ;;  %v16184_v56 = vpop.xlane.xlu1 %5486 }
 0x436   : > { %18544 = vst [vmem:[#allocation104_spill] sm:$0xff] %v16126_v36  ;;  %v11639_v41 = vpop.f32.mrb[93].mxu0 }
 0x437   : > { %5594 = vmax.xlane.f32.xlu1 %v5593_v8  ;;  %v16132_v48 = vpop.f32.mrb[138].mxu1  ;;  %v16144_v8 = vpop.eup %12978 }
 0x438   : > { %18546 = vst [vmem:[#allocation113_spill] sm:$0xff] %v16132_v48  ;;  %v11657_v47 = vpop.f32.mrb[139].mxu1  ;;  %18549 = vst [vmem:[#allocation116_spill] sm:$0xff] %v16144_v8 }
 0x439   : > { %v16136_v19 = vpop.f32.mrb[94].mxu0  ;;  %6050 = vadd.xlane.f32.xlu0 %v6049_v24  ;;  %v5596_v24 = vsel %vm5415_vm4, %v16038_v60, -inf }
 0x43a   : > { %18547 = vst [vmem:[#allocation114_spill] sm:$0xff] %v16136_v19  ;;  %v11642_v3 = vpop.f32.mrb[95].mxu0 }
 0x43b   : > { %6041 = vadd.xlane.f32.xlu1 %v6040_v21  ;;  %v16140_v41 = vpop.f32.mrb[140].mxu1  ;;  %v16150_v3 = vpop.eup %12980 }
 0x43c   : > { %18548 = vst [vmem:[#allocation115_spill] sm:$0xff] %v16140_v41  ;;  %v11681_v62 = vpop.f32.mrb[141].mxu1  ;;  %18551 = vst [vmem:[#allocation118_spill] sm:$0xff] %v16150_v3  ;;  %v16168_v23 = vpop.eup %12982 }
 0x43d   : > { %v16146_v14 = vpop.f32.mrb[96].mxu0  ;;  %5606 = vmax.xlane.f32.xlu0 %v5605_v61  ;;  %v6052_v62 = vsel %vm5408_vm3, %v16144_v8, 0.0  ;;  %v6043_v61 = vsel %vm5408_vm3, %v16150_v3, 0.0  ;;  %18555 = vst [vmem:[#allocation122_spill] sm:$0xff] %v16168_v23 }
 0x43e   : > { %18550 = vst [vmem:[#allocation117_spill] sm:$0xff] %v16146_v14  ;;  %v11666_v47 = vpop.f32.mrb[97].mxu0 }
 0x43f   : > { %5597 = vmax.xlane.f32.xlu1 %v5596_v24  ;;  %v16152_v27 = vpop.f32.mrb[142].mxu1  ;;  %v16160_v47 = vpop.xlane.xlu0 %5492 }
 0x440   : > { %18552 = vst [vmem:[#allocation119_spill] sm:$0xff] %v16152_v27  ;;  %v11684_v21 = vpop.f32.mrb[143].mxu1  ;;  %v16174_v3 = vpop.eup %12984 }
 0x441   : > { %v16156_v49 = vpop.f32.mrb[98].mxu0  ;;  %6053 = vadd.xlane.f32.xlu0 %v6052_v62  ;;  %v5617_v21 = vsel %vm5408_vm3, %v16044_v33, -inf  ;;  %18557 = vst [vmem:[#allocation124_spill] sm:$0xff] %v16174_v3 }
 0x442   : > { %18553 = vst [vmem:[#allocation120_spill] sm:$0xff] %v16156_v49  ;;  %v11669_v20 = vpop.f32.mrb[99].mxu0 }
 0x443   : > { %6044 = vadd.xlane.f32.xlu1 %v6043_v61  ;;  %v16162_v60 = vpop.f32.mrb[144].mxu1  ;;  %v5608_v20 = vsel %vm5408_vm3, %v16048_v16, -inf  ;;  %v16180_v57 = vpop.xlane.xlu0 %5495 }
 0x444   : > { %18554 = vst [vmem:[#allocation121_spill] sm:$0xff] %v16162_v60  ;;  %v11687_v24 = vpop.f32.mrb[145].mxu1 }
 0x445   : > { %v16170_v8 = vpop.f32.mrb[100].mxu0  ;;  %5618 = vmax.xlane.f32.xlu0 %v5617_v21  ;;  %v6055_v24 = vsel %vm5415_vm4, %v16168_v23, 0.0 }
 0x446   : > { %18556 = vst [vmem:[#allocation123_spill] sm:$0xff] %v16170_v8  ;;  %v11672_v62 = vpop.f32.mrb[101].mxu0 }
 0x447   : > { %5609 = vmax.xlane.f32.xlu1 %v5608_v20  ;;  %v16176_v61 = vpop.f32.mrb[146].mxu1  ;;  %v6046_v62 = vsel %vm5415_vm4, %v16174_v3, 0.0  ;;  %v16196_v7 = vpop.xlane.xlu0 %5498 }
 0x448   : > { %18558 = vst [vmem:[#allocation125_spill] sm:$0xff] %v16176_v61  ;;  %v11711_v42 = vpop.f32.mrb[147].mxu1  ;;  %v16200_v3 = vpop.xlane.xlu1 %5489 }
 0x449   : > { %v16182_v33 = vpop.f32.mrb[102].mxu0  ;;  %6056 = vadd.xlane.f32.xlu0 %v6055_v24  ;;  %v5620_v42 = vsel %vm5408_vm3, %v16053_v10, -inf  ;;  %v5611_v24 = vsel %vm5408_vm3, %v16060_v28, -inf }
 0x44a   : > { %18559 = vst [vmem:[#allocation126_spill] sm:$0xff] %v16182_v33  ;;  %v11696_v21 = vpop.f32.mrb[103].mxu0 }
 0x44b   : > { %6047 = vadd.xlane.f32.xlu1 %v6046_v62  ;;  %v16188_v16 = vpop.f32.mrb[148].mxu1 }
 0x44c   : > { %18560 = vst [vmem:[#allocation127_spill] sm:$0xff] %v16188_v16  ;;  %v11714_v20 = vpop.f32.mrb[149].mxu1 }
 0x44d   : > { %v16192_v11 = vpop.f32.mrb[104].mxu0  ;;  %5621 = vmax.xlane.f32.xlu0 %v5620_v42  ;;  %v5623_v20 = vsel %vm5415_vm4, %v16066_v5, -inf }
 0x44e   : > { %v11699_v23 = vpop.f32.mrb[105].mxu0 }
 0x44f   : > { %5612 = vmax.xlane.f32.xlu1 %v5611_v24  ;;  %v16198_v21 = vpop.f32.mrb[150].mxu1  ;;  %v5614_v23 = vsel %vm5415_vm4, %v16070_v52, -inf  ;;  %v5635_v24 = vsel %vm5408_vm3, %v16075_v38, -inf  ;;  %v18618_v38 = vld [vmem:[#allocation39_spill] sm:$0xff] }
 0x450   : > { %18561 = vst [vmem:[#allocation128_spill] sm:$0xff] %v16198_v21  ;;  %v11717_v62 = vpop.f32.mrb[151].mxu1  ;;  %v16212_v21 = vpop.xlane.xlu1 %5501  ;;  %v12820_v52 = vunpack.i.h.bf16 %v18618_v38  ;;  %v12819_v5 = vunpack.i.l.bf16 %v18618_v38  ;;  %v18622_v38 = vld [vmem:[#allocation72_spill] sm:$0xff] }
 0x451   : > { %v16204_v16 = vpop.f32.mrb[106].mxu0  ;;  %5624 = vmax.xlane.f32.xlu0 %v5623_v20  ;;  %v16208_v42 = vpop.xlane.xlu0 %5510  ;;  %v5626_v62 = vsel %vm5408_vm3, %v16082_v13, -inf  ;;  %v5638_v20 = vsel %vm5408_vm3, %v16088_v26, -inf  ;;  %v5632_v13 = vsel %vm5415_vm4, %v16104_v44, -inf  ;;  %v5653_v26 = vsel %vm5408_vm3, %v16110_v37, -inf }
 0x452   : > { %18562 = vst [vmem:[#allocation129_spill] sm:$0xff] %v16204_v16  ;;  %v11702_v10 = vpop.f32.mrb[107].mxu0  ;;  %v5647_v44 = vsel %vm5408_vm3, %v16126_v36, -inf  ;;  %v5659_v37 = vsel %vm5415_vm4, %v16132_v48, -inf  ;;  %v5726_v36 = vsub.f32 %v15826_v39, %v16180_v57  ;;  %v5727_v39 = vsub.f32 %v15832_v55, %v16196_v7 }
 0x453   : > { %5615 = vmax.xlane.f32.xlu1 %v5614_v23  ;;  %v5629_v23 = vsel %vm5408_vm3, %v16092_v17, -inf  ;;  %v5674_v57 = vsel %vm5408_vm3, %v16152_v27, -inf  ;;  %v5731_v55 = vsub.f32 %v15872_v6, %v16208_v42  ;;  %v18614_v17 = vld [vmem:[#allocation107_spill] sm:$0xff] }
 0x454   : > { %v16222_v16 = vpop.xlane.xlu1 %5504 }
 0x455   : > { %5636 = vmax.xlane.f32.xlu0 %v5635_v24  ;;  %v16218_v10 = vpop.xlane.xlu0 %5513  ;;  %v5641_v24 = vsel %vm5415_vm4, %v16097_v34, -inf  ;;  %v5656_v34 = vsel %vm5408_vm3, %v16119_v12, -inf  ;;  %v5650_v12 = vsel %vm5415_vm4, %v16136_v19, -inf }
 0x456   : > { %v5732_v6 = vsub.f32 %v15878_v43, %v16218_v10 }
 0x457   : > { %5627 = vmax.xlane.f32.xlu1 %v5626_v62 }
 0x458   : > { %v5862_v10 = vmul.f32 1.442695, %v5732_v6 }
 0x459   : > { %5639 = vmax.xlane.f32.xlu0 %v5638_v20  ;;  %v16228_v62 = vpop.xlane.xlu0 %5516  ;;  %v16232_v20 = vpop.xlane.xlu1 %5507 }
 0x45b   : > { %5630 = vmax.xlane.f32.xlu1 %v5629_v23  ;;  %v5644_v23 = vsel %vm5408_vm3, %v16114_v9, -inf }
 0x45d   : > { %5642 = vmax.xlane.f32.xlu0 %v5641_v24  ;;  %v16238_v24 = vpop.xlane.xlu0 %5528 }
 0x45f   : > { %5633 = vmax.xlane.f32.xlu1 %v5632_v13  ;;  %v5725_v13 = vsub.f32 %v15818_v22, %v16160_v47  ;;  %v5671_v22 = vsel %vm5408_vm3, %v16140_v41, -inf  ;;  %v5723_v47 = vsub.f32 %v15816_v58, %v16184_v56  ;;  %v5724_v58 = vsub.f32 %v15824_v46, %v16200_v3 }
 0x460   : > { %v5728_v46 = vsub.f32 %v15834_v15, %v16212_v21  ;;  %v5729_v21 = vsub.f32 %v15840_v40, %v16222_v16 }
 0x461   : > { %5654 = vmax.xlane.f32.xlu0 %v5653_v26  ;;  %v16244_v26 = vpop.xlane.xlu1 %5519  ;;  %v16254_v9 = vpop.xlane.xlu0 %5531 }
 0x462   : > { %v5854_v15 = vmul.f32 1.442695, %v5728_v46  ;;  %v5856_v16 = vmul.f32 1.442695, %v5729_v21 }
 0x463   : > { %5645 = vmax.xlane.f32.xlu1 %v5644_v23  ;;  %v5722_v23 = vsub.f32 %v15812_v51, %v16164_v45  ;;  %v5662_v45 = vsel %vm5408_vm3, %v16146_v14, -inf }
 0x465   : > { %5657 = vmax.xlane.f32.xlu0 %v5656_v34  ;;  %v5848_v34 = vmul.f32 1.442695, %v5725_v13  ;;  %v16260_v51 = vpop.xlane.xlu1 %5522  ;;  %v16270_v56 = vpop.xlane.xlu0 %5534  ;;  %v5665_v13 = vsel %vm5408_vm3, %v16156_v49, -inf  ;;  %v18599_v49 = vld [vmem:[#allocation20_spill] sm:$0xff] }
 0x467   : > { %5648 = vmax.xlane.f32.xlu1 %v5647_v44  ;;  %v5842_v44 = vmul.f32 1.442695, %v5722_v23  ;;  %12986 = vpow2.f32 %v5848_v34  ;;  %v5677_v23 = vsel %vm5415_vm4, %v16162_v60, -inf  ;;  %v5846_v34 = vmul.f32 1.442695, %v5724_v58 }
 0x469   : > { %5660 = vmax.xlane.f32.xlu0 %v5659_v37  ;;  %v5850_v37 = vmul.f32 1.442695, %v5726_v36  ;;  %12988 = vpow2.f32 %v5842_v44  ;;  %v5852_v36 = vmul.f32 1.442695, %v5727_v39  ;;  %v16276_v7 = vpop.xlane.xlu1 %5525  ;;  %v5860_v44 = vmul.f32 1.442695, %v5731_v55 }
 0x46b   : > { %5651 = vmax.xlane.f32.xlu1 %v5650_v12  ;;  %v5844_v12 = vmul.f32 1.442695, %v5723_v47  ;;  %12990 = vpow2.f32 %v5850_v37  ;;  %v5689_v47 = vsel %vm5408_vm3, %v16176_v61, -inf  ;;  %v5680_v37 = vsel %vm5408_vm3, %v16182_v33, -inf  ;;  %v18595_v33 = vld [vmem:[#allocation22_spill] sm:$0xff]  ;;  %v18596_v61 = vld [vmem:[#allocation51_spill] sm:$0xff] }
 0x46d   : > { %5672 = vmax.xlane.f32.xlu0 %v5671_v22  ;;  %12992 = vpow2.f32 %v5844_v12  ;;  %v5668_v22 = vsel %vm5415_vm4, %v16170_v8, -inf }
 0x46e   : > { %12994 = vpow2.f32 %v5852_v36 }
 0x46f   : > { %5663 = vmax.xlane.f32.xlu1 %v5662_v45  ;;  %12996 = vpow2.f32 %v5846_v34 }
 0x470   : > { %12998 = vpow2.f32 %v5860_v44 }
 0x471   : > { %5675 = vmax.xlane.f32.xlu0 %v5674_v57  ;;  %v16292_v45 = vpop.eup %12986  ;;  %v5733_v57 = vsub.f32 %v15886_v31, %v16228_v62  ;;  %13000 = vpow2.f32 %v5854_v15  ;;  %v5737_v62 = vsub.f32 %v15894_v59, %v16238_v24 }
 0x472   : > { %v6067_v58 = vsel %vm5408_vm3, %v16292_v45, 0.0  ;;  %13002 = vpow2.f32 %v5862_v10 }
 0x473   : > { %5666 = vmax.xlane.f32.xlu1 %v5665_v13  ;;  %v16300_v43 = vpop.eup %12988  ;;  %v5730_v13 = vsub.f32 %v15844_v29, %v16232_v20  ;;  %v5864_v31 = vmul.f32 1.442695, %v5733_v57  ;;  %v5734_v20 = vsub.f32 %v15852_v32, %v16244_v26  ;;  %v5872_v24 = vmul.f32 1.442695, %v5737_v62 }
 0x474   : > { %v6058_v36 = vsel %vm5408_vm3, %v16300_v43, 0.0 }
 0x475   : > { %5678 = vmax.xlane.f32.xlu0 %v5677_v23  ;;  %v16282_v3 = vpop.xlane.xlu0 %5546  ;;  %v16308_v40 = vpop.eup %12990  ;;  %v5858_v29 = vmul.f32 1.442695, %v5730_v13  ;;  %v5866_v21 = vmul.f32 1.442695, %v5734_v20  ;;  %v18564_v20 = vld [vmem:[#allocation32_spill] sm:$0xff] }
 0x476   : > { %v6070_v46 = vsel %vm5408_vm3, %v16308_v40, 0.0 }
 0x477   : > { %5669 = vmax.xlane.f32.xlu1 %v5668_v22  ;;  %v16314_v23 = vpop.eup %12992 }
 0x478   : > { %v16288_v42 = vpop.xlane.xlu1 %5537  ;;  %v16320_v22 = vpop.eup %12994  ;;  %v6061_v44 = vsel %vm5408_vm3, %v16314_v23, 0.0 }
 0x479   : > { %5690 = vmax.xlane.f32.xlu0 %v5689_v47  ;;  %v16328_v59 = vpop.eup %12996  ;;  %v5738_v47 = vsub.f32 %v15900_v53, %v16254_v9  ;;  %v6073_v32 = vsel %vm5415_vm4, %v16320_v22, 0.0  ;;  %v5739_v9 = vsub.f32 %v15904_v18, %v16270_v56 }
 0x47a   : > { %v16298_v39 = vpop.xlane.xlu0 %5549  ;;  %v16336_v26 = vpop.eup %12998  ;;  %v6064_v10 = vsel %vm5415_vm4, %v16328_v59, 0.0 }
 0x47b   : > { %5681 = vmax.xlane.f32.xlu1 %v5680_v37  ;;  %v5735_v37 = vsub.f32 %v15858_v30, %v16260_v51  ;;  %v5874_v53 = vmul.f32 1.442695, %v5738_v47  ;;  %v6085_v13 = vsel %vm5408_vm3, %v16336_v26, 0.0  ;;  %v5736_v51 = vsub.f32 %v15864_v50, %v16276_v7  ;;  %v18563_v7 = vld [vmem:[#allocation24_spill] sm:$0xff] }
 0x47c   : > { %v16304_v12 = vpop.xlane.xlu1 %5540  ;;  %v5876_v62 = vmul.f32 1.442695, %v5739_v9 }
 0x47d   : > { %6068 = vadd.xlane.f32.xlu0 %v6067_v58  ;;  %v16342_v58 = vpop.eup %13000  ;;  %v5868_v30 = vmul.f32 1.442695, %v5735_v37 }
 0x47e   : > { %v5997_v55 = vpop.xlane.xlu0 %5996 }
 0x47f   : > { %6059 = vadd.xlane.f32.xlu1 %v6058_v36  ;;  %13004 = vrcp.f32 %v5997_v55  ;;  %v16348_v36 = vpop.eup %13002 }
 0x480   : > { %v5988_v34 = vpop.xlane.xlu1 %5987  ;;  %13006 = vpow2.f32 %v5856_v16 }
 0x481   : > { %6071 = vadd.xlane.f32.xlu0 %v6070_v46  ;;  %13008 = vrcp.f32 %v5988_v34  ;;  %v5743_v34 = vsub.f32 %v15912_v54, %v16282_v3  ;;  %v18566_v3 = vld [vmem:[#allocation31_spill] sm:$0xff] }
 0x482   : > { %v16326_v6 = vpop.xlane.xlu0 %5552  ;;  %13010 = vpow2.f32 %v5864_v31  ;;  %v6076_v31 = vsel %vm5408_vm3, %v16342_v58, 0.0 }
 0x483   : > { %6062 = vadd.xlane.f32.xlu1 %v6061_v44  ;;  %13012 = vpow2.f32 %v5858_v29  ;;  %v12475_v44 = vpack.c.bf16 %v18564_v20, %v18563_v7  ;;  %v18570_v7 = vld [vmem:[#allocation83_spill] sm:$0xff] }
 0x484   : > { %v16332_v15 = vpop.xlane.xlu1 %5543  ;;  %13014 = vpow2.f32 %v5872_v24  ;;  %v6088_v24 = vsel %vm5408_vm3, %v16348_v36, 0.0 }
 0x485   : > { %6074 = vadd.xlane.f32.xlu0 %v6073_v32  ;;  %v5870_v32 = vmul.f32 1.442695, %v5736_v51 }
 0x486   : > { %v6000_v57 = vpop.xlane.xlu0 %5999 }
 0x487   : > { %6065 = vadd.xlane.f32.xlu1 %v6064_v10  ;;  %13016 = vrcp.f32 %v6000_v57 }
 0x488   : > { %v5991_v16 = vpop.xlane.xlu1 %5990  ;;  %13018 = vpow2.f32 %v5866_v21  ;;  %v5740_v21 = vsub.f32 %v15916_v63, %v16288_v42  ;;  %v5884_v63 = vmul.f32 1.442695, %v5743_v34 }
 0x489   : > { %6086 = vadd.xlane.f32.xlu0 %v6085_v13  ;;  %v13005_v55 = vpop.eup %13004  ;;  %13020 = vrcp.f32 %v5991_v16 }
 0x48a   : > { %v16354_v18 = vpop.xlane.xlu0 %5564  ;;  %v16356_v56 = vpop.eup %13006  ;;  %13022 = vpow2.f32 %v5874_v53  ;;  %v6281_v46 = vmul.f32 %v13005_v55, %v15925_v25  ;;  %v18565_v25 = vld [vmem:[#allocation23_spill] sm:$0xff]  ;;  %v5878_v13 = vmul.f32 1.442695, %v5740_v21  ;;  %v18571_v21 = vld [vmem:[#allocation68_spill] sm:$0xff] }
 0x48b   : > { %6077 = vadd.xlane.f32.xlu1 %v6076_v31  ;;  %v13009_v29 = vpop.eup %13008  ;;  %13024 = vpow2.f32 %v5868_v30  ;;  %v12472_v37 = vpack.c.bf16 %v18566_v3, %v18565_v25  ;;  %v6079_v10 = vsel %vm5408_vm3, %v16356_v56, 0.0  ;;  %v5741_v30 = vsub.f32 %v15928_v4, %v16304_v12 }
 0x48c   : > { %v16361_v50 = vpop.xlane.xlu1 %5555  ;;  %v16367_v47 = vpop.eup %13010  ;;  %v6275_v54 = vmul.f32 %v13009_v29, %v15932_v35  ;;  %11740 = vmatmul.mubr.msk.f32.vlgmr.msra.gmra.mrb[152].mxu1 %vm5408_vm3, %v6281_v46  ;;  %13026 = vpow2.f32 %v5876_v62  ;;  %v5744_v35 = vsub.f32 %v15921_v0, %v16298_v39  ;;  %v18567_v39 = vld [vmem:[#allocation90_spill] sm:$0xff]  ;;  %v5745_v12 = vsub.f32 %v15934_v2, %v16326_v6  ;;  %v18572_v6 = vld [vmem:[#allocation44_spill] sm:$0xff] }
 0x48d   : > { %6089 = vadd.xlane.f32.xlu0 %v6088_v24  ;;  %12476 = vmatpush3.bf16.msra.mxu1 %v12475_v44  ;;  %v16379_v53 = vpop.eup %13012  ;;  %v6091_v9 = vsel %vm5415_vm4, %v16367_v47, 0.0  ;;  %v18568_v62 = vld [vmem:[#allocation70_spill] sm:$0xff]  ;;  %v18569_v46 = vmov 0.0|0.0   ;;  %v5742_v2 = vsub.f32 %v18571_v21, %v16332_v15 }
 0x48e   : > { %v6003_v57 = vpop.xlane.xlu0 %6002  ;;  %11742 = vmatprep.mubr.msk.f32.mxu1 %vm13524_vm0, %v18393_v1  ;;  %11725 = vmatmul.mubr.msk.f32.vlgmr.msra.gmra.mrb[108].mxu0 %vm5408_vm3, %v6275_v54  ;;  %v16387_v16 = vpop.eup %13014  ;;  %v6082_v51 = vsel %vm5415_vm4, %v16379_v53, 0.0  ;;  %v5886_v4 = vmul.f32 1.442695, %v5744_v35  ;;  %v18573_v15 = vld [vmem:[#allocation94_spill] sm:$0xff] }
 0x48f   : > { %6080 = vadd.xlane.f32.xlu1 %v6079_v10  ;;  %12473 = vmatpush3.bf16.msra.mxu0 %v12472_v37  ;;  %13028 = vrcp.f32 %v6003_v57  ;;  %v6103_v44 = vsel %vm5408_vm3, %v16387_v16, 0.0  ;;  %v5888_v10 = vmul.f32 1.442695, %v5745_v12  ;;  %v5749_v57 = vsub.f32 %v18573_v15, %v16354_v18 }
 0x490   : > { %v5994_v42 = vpop.xlane.xlu1 %5993  ;;  %11767 = vmatprep.subr.mxu1 %v18393_v1  ;;  %13030 = vpow2.f32 %v5870_v32  ;;  %11752 = vmatprep.subr.mxu0 %v18393_v1  ;;  %v5880_v32 = vmul.f32 1.442695, %v5741_v30 }
 0x491   : > { %6092 = vadd.xlane.f32.xlu0 %v6091_v9  ;;  %v13017_v0 = vpop.eup %13016  ;;  %13032 = vrcp.f32 %v5994_v42  ;;  %11768 = vmatpush3.msk.msra.mxu1 %vm6475_vm5, %v18567_v39  ;;  %v5882_v9 = vmul.f32 1.442695, %v5742_v2  ;;  %v5896_v12 = vmul.f32 1.442695, %v5749_v57  ;;  %v12490_v39 = vpack.c.bf16 %v12820_v52, %v12819_v5 }
 0x492   : > { %v16396_v55 = vpop.xlane.xlu0 %5567  ;;  %11727 = vmatprep.mubr.msk.f32.mxu0 %vm13524_vm0, %v18393_v1  ;;  %v16400_v31 = vpop.eup %13018  ;;  %13034 = vpow2.f32 %v5884_v63  ;;  %v6283_v34 = vmul.f32 %v13017_v0, %v18568_v62  ;;  %12480 = vmatprep.subr.bf16.mxu1 %v18569_v46  ;;  %v18575_v62 = vld [vmem:[#allocation61_spill] sm:$0xff] }
 0x493   : > { %6083 = vadd.xlane.f32.xlu1 %v6082_v51  ;;  %v13021_v29 = vpop.eup %13020  ;;  %11753 = vmatpush3.msk.msra.mxu0 %vm6475_vm5, %v18570_v7  ;;  %13036 = vpow2.f32 %v5878_v13  ;;  %v6094_v25 = vsel %vm5408_vm3, %v16400_v31, 0.0  ;;  %v18574_v13 = vld [vmem:[#allocation43_spill] sm:$0xff] }
 0x494   : > { %v5559_v20 = vpop.xlane.xlu1 %5558  ;;  %v16410_v24 = vpop.eup %13022  ;;  %v6277_v54 = vmul.f32 %v13021_v29, %v18572_v6  ;;  %11743 = vmatmul.mubr.msk.f32.gmra.mrb[154].mxu1 %vm5408_vm3, %v6283_v34  ;;  %12477 = vmatprep.subr.bf16.mxu0 %v18569_v46  ;;  %13038 = vpow2.f32 %v5886_v4  ;;  %v5746_v30 = vsub.f32 %v18574_v13, %v16361_v50  ;;  %v5750_v34 = vsub.f32 %v18575_v62, %v16396_v55  ;;  %v18576_v29 = vld [vmem:[#allocation55_spill] sm:$0xff]  ;;  %v18579_v62 = vld [vmem:[#allocation54_spill] sm:$0xff] }
 0x495   : > { %6104 = vadd.xlane.f32.xlu0 %v6103_v44  ;;  %11745 = vmatprep.mubr.msk.f32.mxu1 %vm13524_vm0, %v18393_v1  ;;  %v16421_v37 = vpop.eup %13024  ;;  %v6106_v35 = vsel %vm5408_vm3, %v16410_v24, 0.0 }
 0x496   : > { %v6015_v3 = vpop.xlane.xlu0 %6014  ;;  %11728 = vmatmul.mubr.msk.f32.gmra.mrb[110].mxu0 %vm5408_vm3, %v6277_v54  ;;  %v16430_v42 = vpop.eup %13026  ;;  %v6097_v0 = vsel %vm5408_vm3, %v16421_v37, 0.0  ;;  %v5890_v6 = vmul.f32 1.442695, %v5746_v30  ;;  %v18577_v54 = vld [vmem:[#allocation71_spill] sm:$0xff] }
 0x497   : > { %6095 = vadd.xlane.f32.xlu1 %v6094_v25  ;;  %13040 = vrcp.f32 %v6015_v3  ;;  %11730 = vmatprep.mubr.msk.f32.mxu0 %vm13524_vm0, %v18393_v1  ;;  %v6109_v21 = vsel %vm5415_vm4, %v16430_v42, 0.0  ;;  %v5747_v25 = vsub.f32 %v18577_v54, %v5559_v20  ;;  %v18578_v3 = vld [vmem:[#allocation46_spill] sm:$0xff] }
 0x498   : > { %v6006_v63 = vpop.xlane.xlu1 %6005  ;;  %13042 = vpow2.f32 %v5880_v32 }
 0x499   : > { %6107 = vadd.xlane.f32.xlu0 %v6106_v35  ;;  %v13029_v18 = vpop.eup %13028  ;;  %13044 = vrcp.f32 %v6006_v63  ;;  %v5898_v63 = vmul.f32 1.442695, %v5750_v34  ;;  %v5892_v13 = vmul.f32 1.442695, %v5747_v25  ;;  %v18581_v25 = vld [vmem:[#allocation34_spill] sm:$0xff] }
 0x49a   : > { %v16436_v51 = vpop.xlane.xlu0 %5570  ;;  %v16438_v4 = vpop.eup %13030  ;;  %13046 = vpow2.f32 %v5888_v10  ;;  %v6285_v44 = vmul.f32 %v13029_v18, %v18576_v29 }
 0x49b   : > { %6098 = vadd.xlane.f32.xlu1 %v6097_v0  ;;  %v13033_v32 = vpop.eup %13032  ;;  %13048 = vpow2.f32 %v5882_v9  ;;  %v6100_v55 = vsel %vm5415_vm4, %v16438_v4, 0.0 }
 0x49c   : > { %v16443_v50 = vpop.xlane.xlu1 %5561  ;;  %v16447_v2 = vpop.eup %13034  ;;  %v6279_v10 = vmul.f32 %v13033_v32, %v18578_v3  ;;  %11746 = vmatmul.mubr.msk.f32.gmra.mrb[156].mxu1 %vm5408_vm3, %v6285_v44  ;;  %13050 = vpow2.f32 %v5896_v12  ;;  %v18582_v3 = vld [vmem:[#allocation26_spill] sm:$0xff] }
 0x49d   : > { %6110 = vadd.xlane.f32.xlu0 %v6109_v21  ;;  %11769 = vmatprep.mubr.msk.f32.mxu1 %vm13524_vm0, %v18393_v1  ;;  %v16456_v57 = vpop.eup %13036  ;;  %v6121_v35 = vsel %vm5408_vm3, %v16447_v2, 0.0 }
 0x49e   : > { %v6018_v15 = vpop.xlane.xlu0 %6017  ;;  %11731 = vmatmul.mubr.msk.f32.gmra.mrb[112].mxu0 %vm5408_vm3, %v6279_v10  ;;  %v16463_v9 = vpop.eup %13038  ;;  %v6112_v18 = vsel %vm5408_vm3, %v16456_v57, 0.0  ;;  %v18583_v10 = vpack.c.bf16 %v18581_v25, %v18582_v3  ;;  %v18590_v25 = vld [vmem:[#allocation77_spill] sm:$0xff] }
 0x49f   : > { %6101 = vadd.xlane.f32.xlu1 %v6100_v55  ;;  %13052 = vrcp.f32 %v6018_v15  ;;  %11754 = vmatprep.mubr.msk.f32.mxu0 %vm13524_vm0, %v18393_v1  ;;  %v6124_v32 = vsel %vm5408_vm3, %v16463_v9, 0.0 }
 0x4a0   : > { %v6009_v20 = vpop.xlane.xlu1 %6008  ;;  %13054 = vpow2.f32 %v5890_v6  ;;  %v18580_v6 = vld [vmem:[#allocation48_spill] sm:$0xff] }
 0x4a1   : > { %6122 = vadd.xlane.f32.xlu0 %v6121_v35  ;;  %v13041_v30 = vpop.eup %13040  ;;  %13056 = vrcp.f32 %v6009_v20  ;;  %v18584_v20 = vld [vmem:[#allocation33_spill] sm:$0xff] }
 0x4a2   : > { %v16467_v0 = vpop.xlane.xlu0 %5582  ;;  %v16469_v12 = vpop.eup %13042  ;;  %13058 = vpow2.f32 %v5898_v63  ;;  %v6293_v34 = vmul.f32 %v13041_v30, %v18579_v62  ;;  %v18585_v35 = vld [vmem:[#allocation25_spill] sm:$0xff] }
 0x4a3   : > { %6113 = vadd.xlane.f32.xlu1 %v6112_v18  ;;  %v13045_v29 = vpop.eup %13044  ;;  %13060 = vpow2.f32 %v5892_v13  ;;  %v6115_v55 = vsel %vm5408_vm3, %v16469_v12, 0.0  ;;  %v18586_v13 = vpack.c.bf16 %v18584_v20, %v18585_v35 }
 0x4a4   : > { %v16472_v44 = vpop.xlane.xlu1 %5573  ;;  %v16476_v21 = vpop.eup %13046  ;;  %v6287_v54 = vmul.f32 %v13045_v29, %v18580_v6  ;;  %11770 = vmatmul.mubr.msk.f32.vlgmr.msra.gmra.mrb[158].mxu1 %vm5408_vm3, %v6293_v34  ;;  %v18588_v29 = vld [vmem:[#allocation93_spill] sm:$0xff] }
 0x4a5   : > { %6125 = vadd.xlane.f32.xlu0 %v6124_v32  ;;  %12482 = vmatpush3.bf16.msra.mxu1 %v18583_v10  ;;  %v16487_v63 = vpop.eup %13048  ;;  %v6127_v18 = vsel %vm5415_vm4, %v16476_v21, 0.0 }
 0x4a6   : > { %v6021_v15 = vpop.xlane.xlu0 %6020  ;;  %11772 = vmatprep.mubr.msk.f32.mxu1 %vm13524_vm0, %v18393_v1  ;;  %11755 = vmatmul.mubr.msk.f32.vlgmr.msra.gmra.mrb[114].mxu0 %vm5408_vm3, %v6287_v54  ;;  %v16496_v62 = vpop.eup %13050  ;;  %v6118_v32 = vsel %vm5415_vm4, %v16487_v63, 0.0 }
 0x4a7   : > { %6116 = vadd.xlane.f32.xlu1 %v6115_v55  ;;  %12479 = vmatpush3.bf16.msra.mxu0 %v18586_v13  ;;  %13062 = vrcp.f32 %v6021_v15  ;;  %18587 = vst [vmem:[#allocation24_spill] sm:$0xff] %v16496_v62  ;;  %v18591_v55 = vld [vmem:[#allocation89_spill] sm:$0xff]  ;;  %v6139_v20 = vsel %vm5408_vm3, %v16496_v62, 0.0  ;;  %v18593_v13 = vld [vmem:[#allocation50_spill] sm:$0xff] }
 0x4a8   : > { %v6012_v30 = vpop.xlane.xlu1 %6011  ;;  %11797 = vmatprep.subr.mxu1 %v18393_v1  ;;  %11782 = vmatprep.subr.mxu0 %v18393_v1 }
 0x4a9   : > { %6128 = vadd.xlane.f32.xlu0 %v6127_v18  ;;  %v13053_v34 = vpop.eup %13052  ;;  %13064 = vrcp.f32 %v6012_v30  ;;  %11798 = vmatpush3.msk.msra.mxu1 %vm6475_vm5, %v18588_v29 }
 0x4aa   : > { %v16503_v6 = vpop.xlane.xlu0 %5585  ;;  %11757 = vmatprep.mubr.msk.f32.mxu0 %vm13524_vm0, %v18393_v1  ;;  %v16507_v54 = vpop.eup %13054  ;;  %v6295_v3 = vmul.f32 %v13053_v34, %v18590_v25  ;;  %12486 = vmatprep.subr.bf16.mxu1 %v18569_v46 }
 0x4ab   : > { %18589 = vst [vmem:[#allocation32_spill] sm:$0xff] %v16507_v54  ;;  %6119 = vadd.xlane.f32.xlu1 %v6118_v32  ;;  %v13057_v10 = vpop.eup %13056  ;;  %11783 = vmatpush3.msk.msra.mxu0 %vm6475_vm5, %v18591_v55  ;;  %v6130_v18 = vsel %vm5408_vm3, %v16507_v54, 0.0 }
 0x4ac   : > { %v16513_v15 = vpop.xlane.xlu1 %5576  ;;  %v16517_v35 = vpop.eup %13058  ;;  %v6289_v30 = vmul.f32 %v13057_v10, %v18593_v13  ;;  %11773 = vmatmul.mubr.msk.f32.gmra.mrb[160].mxu1 %vm5408_vm3, %v6295_v3  ;;  %12483 = vmatprep.subr.bf16.mxu0 %v18569_v46 }
 0x4ad   : > { %18592 = vst [vmem:[#allocation23_spill] sm:$0xff] %v16517_v35  ;;  %6140 = vadd.xlane.f32.xlu0 %v6139_v20  ;;  %11775 = vmatprep.mubr.msk.f32.mxu1 %vm13524_vm0, %v18393_v1  ;;  %v16526_v32 = vpop.eup %13060  ;;  %v6142_v3 = vsel %vm5408_vm3, %v16517_v35, 0.0  ;;  %v18620_v35 = vld [vmem:[#allocation62_spill] sm:$0xff] }
 0x4ae   : > { %v6033_v34 = vpop.xlane.xlu0 %6032  ;;  %18594 = vst [vmem:[#allocation31_spill] sm:$0xff] %v16526_v32  ;;  %11758 = vmatmul.mubr.msk.f32.gmra.mrb[116].mxu0 %vm5408_vm3, %v6289_v30  ;;  %v6133_v20 = vsel %vm5408_vm3, %v16526_v32, 0.0  ;;  %v5755_v54 = vsub.f32 %v18620_v35, %v16467_v0 }
 0x4af   : > { %6131 = vadd.xlane.f32.xlu1 %v6130_v18  ;;  %13066 = vrcp.f32 %v6033_v34  ;;  %11760 = vmatprep.mubr.msk.f32.mxu0 %vm13524_vm0, %v18393_v1 }
 0x4b0   : > { %v6024_v25 = vpop.xlane.xlu1 %6023  ;;  %v5908_v0 = vmul.f32 1.442695, %v5755_v54  ;;  %v18625_v54 = vld [vmem:[#allocation58_spill] sm:$0xff] }
 0x4b1   : > { %6143 = vadd.xlane.f32.xlu0 %v6142_v3  ;;  %v13063_v10 = vpop.eup %13062  ;;  %13068 = vrcp.f32 %v6024_v25  ;;  %v18597_v25 = vld [vmem:[#allocation86_spill] sm:$0xff] }
 0x4b2   : > { %v16535_v13 = vpop.xlane.xlu0 %5588  ;;  %v6297_v30 = vmul.f32 %v13063_v10, %v18595_v33  ;;  %v1892_v3 = vcombine.high %v18597_v25, %v18393_v1  ;;  %v18603_v25 = vld [vmem:[#allocation28_spill] sm:$0xff] }
 0x4b3   : > { %6134 = vadd.xlane.f32.xlu1 %v6133_v20  ;;  %v13065_v18 = vpop.eup %13064 }
 0x4b4   : > { %v16538_v34 = vpop.xlane.xlu1 %5579  ;;  %v6291_v8 = vmul.f32 %v13065_v18, %v18596_v61  ;;  %11776 = vmatmul.mubr.msk.f32.gmra.mrb[162].mxu1 %vm5408_vm3, %v6297_v30  ;;  %v18598_v61 = vld [vmem:[#allocation69_spill] sm:$0xff]  ;;  %v16553_v27 = vrot.slane %v1892_v3, %v18599_v49  ;;  %v18605_v3 = vld [vmem:[#allocation35_spill] sm:$0xff] }
 0x4b5   : > { %11799 = vmatprep.mubr.msk.f32.mxu1 %vm13524_vm0, %v18393_v1 }
 0x4b6   : > { %v6036_v60 = vpop.xlane.xlu0 %6035  ;;  %11761 = vmatmul.mubr.msk.f32.gmra.mrb[118].mxu0 %vm5408_vm3, %v6291_v8  ;;  %18600 = vst [vmem:[#allocation70_spill] sm:$0xff] %v16553_v27  ;;  %v18601_v8 = vld [vmem:[#allocation80_spill] sm:$0xff] }
 0x4b7   : > { %13070 = vrcp.f32 %v6036_v60  ;;  %11784 = vmatprep.mubr.msk.f32.mxu0 %vm13524_vm0, %v18393_v1  ;;  %v18602_v60 = vld [vmem:[#allocation36_spill] sm:$0xff] }
 0x4b8   : > { %v6027_v20 = vpop.xlane.xlu1 %6026  ;;  %v18604_v19 = vpack.c.bf16 %v18602_v60, %v18603_v25  ;;  %v18610_v25 = vld [vmem:[#allocation56_spill] sm:$0xff] }
 0x4b9   : > { %v13067_v33 = vpop.eup %13066  ;;  %13072 = vrcp.f32 %v6027_v20  ;;  %v18606_v20 = vld [vmem:[#allocation27_spill] sm:$0xff] }
 0x4ba   : > { %v16549_v10 = vpop.xlane.xlu0 %5600  ;;  %v6305_v30 = vmul.f32 %v13067_v33, %v18598_v61  ;;  %v18607_v33 = vpack.c.bf16 %v18605_v3, %v18606_v20  ;;  %v18611_v3 = vld [vmem:[#allocation100_spill] sm:$0xff] }
 0x4bb   : > { %v13069_v18 = vpop.eup %13068 }
 0x4bc   : > { %v16555_v14 = vpop.xlane.xlu1 %5591  ;;  %v6299_v41 = vmul.f32 %v13069_v18, %v18601_v8  ;;  %11800 = vmatmul.mubr.msk.f32.vlgmr.msra.gmra.mrb[164].mxu1 %vm5408_vm3, %v6305_v30  ;;  %v16571_v30 = vcombine.high %v16553_v27, %v18393_v1  ;;  %v18609_v18 = vld [vmem:[#allocation98_spill] sm:$0xff] }
 0x4bd   : > { %12488 = vmatpush3.bf16.msra.mxu1 %v18604_v19  ;;  %11802 = vmatprep.mubr.msk.f32.mxu1 %vm13524_vm0, %v18393_v1 }
 0x4be   : > { %v6039_v48 = vpop.xlane.xlu0 %6038  ;;  %11785 = vmatmul.mubr.msk.f32.vlgmr.msra.gmra.mrb[120].mxu0 %vm5408_vm3, %v6299_v41  ;;  %11827 = vmatprep.subr.mxu1 %v18393_v1  ;;  %18608 = vst [vmem:[#allocation83_spill] sm:$0xff] %v16571_v30 }
 0x4bf   : > { %12485 = vmatpush3.bf16.msra.mxu0 %v18607_v33  ;;  %13074 = vrcp.f32 %v6039_v48  ;;  %11787 = vmatprep.mubr.msk.f32.mxu0 %vm13524_vm0, %v18393_v1 }
 0x4c0   : > { %v6030_v61 = vpop.xlane.xlu1 %6029  ;;  %11812 = vmatprep.subr.mxu0 %v18393_v1 }
 0x4c1   : > { %v13071_v19 = vpop.eup %13070  ;;  %13076 = vrcp.f32 %v6030_v61  ;;  %11828 = vmatpush3.msk.msra.mxu1 %vm6475_vm5, %v16571_v30  ;;  %v18612_v61 = vld [vmem:[#allocation57_spill] sm:$0xff] }
 0x4c2   : > { %v16578_v41 = vpop.xlane.xlu0 %5603  ;;  %v6307_v8 = vmul.f32 %v13071_v19, %v18609_v18  ;;  %12492 = vmatprep.subr.bf16.mxu1 %v18569_v46 }
 0x4c3   : > { %v13073_v48 = vpop.eup %13072  ;;  %11813 = vmatpush3.msk.msra.mxu0 %vm6475_vm5, %v16553_v27 }
 0x4c4   : > { %v16584_v60 = vpop.xlane.xlu1 %5594  ;;  %12847 = vrot.lane.b32.xlu1 %v18610_v25, %s13527_s26  ;;  %v6301_v20 = vmul.f32 %v13073_v48, %v18611_v3  ;;  %11803 = vmatmul.mubr.msk.f32.gmra.mrb[166].mxu1 %vm5408_vm3, %v6307_v8  ;;  %v18613_v8 = vld [vmem:[#allocation106_spill] sm:$0xff] }
 0x4c5   : > { %12489 = vmatprep.subr.bf16.mxu0 %v18569_v46  ;;  %11805 = vmatprep.mubr.msk.f32.mxu1 %vm13524_vm0, %v18393_v1 }
 0x4c6   : > { %v6051_v33 = vpop.xlane.xlu0 %6050  ;;  %11788 = vmatmul.mubr.msk.f32.gmra.mrb[122].mxu0 %vm5408_vm3, %v6301_v20 }
 0x4c7   : > { %12852 = vrot.lane.b32.xlu0 %v18612_v61, %s13527_s26  ;;  %13078 = vrcp.f32 %v6051_v33  ;;  %11790 = vmatprep.mubr.msk.f32.mxu0 %vm13524_vm0, %v18393_v1  ;;  %v18615_v33 = vld [vmem:[#allocation96_spill] sm:$0xff] }
 0x4c8   : > { %v6042_v19 = vpop.xlane.xlu1 %6041  ;;  %v5751_v61 = vsub.f32 %v18615_v33, %v16436_v51  ;;  %v18619_v33 = vld [vmem:[#allocation111_spill] sm:$0xff] }
 0x4c9   : > { %v13075_v18 = vpop.eup %13074  ;;  %13080 = vrcp.f32 %v6042_v19  ;;  %v18616_v19 = vld [vmem:[#allocation88_spill] sm:$0xff] }
 0x4ca   : > { %v16598_v48 = vpop.xlane.xlu0 %5606  ;;  %v6309_v3 = vmul.f32 %v13075_v18, %v18613_v8  ;;  %v12825_v55 = vunpack.i.h.bf16 %v18616_v19  ;;  %v12824_v18 = vunpack.i.l.bf16 %v18616_v19 }
 0x4cb   : > { %v13077_v49 = vpop.eup %13076 }
 0x4cc   : > { %v16601_v25 = vpop.xlane.xlu1 %5597  ;;  %v6303_v29 = vmul.f32 %v13077_v49, %v18614_v17  ;;  %11806 = vmatmul.mubr.msk.f32.gmra.mrb[168].mxu1 %vm5408_vm3, %v6309_v3  ;;  %v18617_v49 = vld [vmem:[#allocation45_spill] sm:$0xff] }
 0x4cd   : > { %11829 = vmatprep.mubr.msk.f32.mxu1 %vm13524_vm0, %v18393_v1  ;;  %v5748_v17 = vsub.f32 %v18617_v49, %v16443_v50  ;;  %v18621_v50 = vld [vmem:[#allocation112_spill] sm:$0xff] }
 0x4ce   : > { %v6054_v20 = vpop.xlane.xlu0 %6053  ;;  %11791 = vmatmul.mubr.msk.f32.gmra.mrb[124].mxu0 %vm5408_vm3, %v6303_v29  ;;  %v5900_v29 = vmul.f32 1.442695, %v5751_v61 }
 0x4cf   : > { %13082 = vrcp.f32 %v6054_v20  ;;  %11814 = vmatprep.mubr.msk.f32.mxu0 %vm13524_vm0, %v18393_v1  ;;  %v12493_v20 = vpack.c.bf16 %v12825_v55, %v12824_v18  ;;  %v5894_v62 = vmul.f32 1.442695, %v5748_v17  ;;  %v18626_v17 = vld [vmem:[#allocation118_spill] sm:$0xff] }
 0x4d0   : > { %v6045_v8 = vpop.xlane.xlu1 %6044 }
 0x4d1   : > { %v13079_v3 = vpop.eup %13078  ;;  %13084 = vrcp.f32 %v6045_v8  ;;  %v5752_v8 = vsub.f32 %v18622_v38, %v16472_v44  ;;  %v18623_v44 = vld [vmem:[#allocation53_spill] sm:$0xff]  ;;  %v18627_v38 = vld [vmem:[#allocation122_spill] sm:$0xff] }
 0x4d2   : > { %v16618_v51 = vpop.xlane.xlu0 %5618  ;;  %v6317_v32 = vmul.f32 %v13079_v3, %v18619_v33  ;;  %13086 = vpow2.f32 %v5900_v29 }
 0x4d3   : > { %v13081_v19 = vpop.eup %13080  ;;  %v5902_v52 = vmul.f32 1.442695, %v5752_v8 }
 0x4d4   : > { %v16623_v28 = vpop.xlane.xlu1 %5609  ;;  %v6311_v49 = vmul.f32 %v13081_v19, %v18621_v50  ;;  %11830 = vmatmul.mubr.msk.f32.vlgmr.msra.gmra.mrb[170].mxu1 %vm5408_vm3, %v6317_v32  ;;  %v18624_v32 = vld [vmem:[#allocation116_spill] sm:$0xff] }
 0x4d5   : > { %12494 = vmatpush3.bf16.msra.mxu1 %v12493_v20  ;;  %11832 = vmatprep.mubr.msk.f32.mxu1 %vm13524_vm0, %v18393_v1 }
 0x4d6   : > { %v6057_v61 = vpop.xlane.xlu0 %6056  ;;  %11815 = vmatmul.mubr.msk.f32.vlgmr.msra.gmra.mrb[126].mxu0 %vm5408_vm3, %v6311_v49  ;;  %11857 = vmatprep.subr.mxu1 %v18393_v1 }
 0x4d7   : > { %12491 = vmatpush3.bf16.msra.mxu0 %v12490_v39  ;;  %13088 = vrcp.f32 %v6057_v61  ;;  %11817 = vmatprep.mubr.msk.f32.mxu0 %vm13524_vm0, %v18393_v1 }
 0x4d8   : > { %v6048_v55 = vpop.xlane.xlu1 %6047  ;;  %13090 = vpow2.f32 %v5894_v62  ;;  %11842 = vmatprep.subr.mxu0 %v18393_v1 }
 0x4d9   : > { %v13083_v5 = vpop.eup %13082  ;;  %13092 = vrcp.f32 %v6048_v55  ;;  %11858 = vmatpush3.msk.msra.mxu1 %vm6475_vm5, %v18623_v44  ;;  %v18628_v55 = vld [vmem:[#allocation124_spill] sm:$0xff] }
 0x4da   : > { %v16638_v35 = vpop.xlane.xlu0 %5621  ;;  %v6319_v18 = vmul.f32 %v13083_v5, %v18624_v32  ;;  %12498 = vmatprep.subr.bf16.mxu1 %v18569_v46  ;;  %13094 = vpow2.f32 %v5908_v0 }
 0x4db   : > { %v13085_v39 = vpop.eup %13084  ;;  %11843 = vmatpush3.msk.msra.mxu0 %vm6475_vm5, %v18625_v54  ;;  %13096 = vpow2.f32 %v5902_v52 }
 0x4dc   : > { %v16644_v62 = vpop.xlane.xlu1 %5612  ;;  %v6313_v3 = vmul.f32 %v13085_v39, %v18626_v17  ;;  %11833 = vmatmul.mubr.msk.f32.gmra.mrb[172].mxu1 %vm5408_vm3, %v6319_v18  ;;  %12495 = vmatprep.subr.bf16.mxu0 %v18569_v46  ;;  %v16658_v19 = vpop.eup %13086 }
 0x4dd   : > { %11835 = vmatprep.mubr.msk.f32.mxu1 %vm13524_vm0, %v18393_v1  ;;  %v6145_v52 = vsel %vm5415_vm4, %v16658_v19, 0.0 }
 0x4de   : > { %v16649_v29 = vpop.xlane.xlu0 %5624  ;;  %11818 = vmatmul.mubr.msk.f32.gmra.mrb[128].mxu0 %vm5408_vm3, %v6313_v3 }
 0x4df   : > { %11820 = vmatprep.mubr.msk.f32.mxu0 %vm13524_vm0, %v18393_v1 }
 0x4e0   : > { %v16654_v33 = vpop.xlane.xlu1 %5615 }
 0x4e1   : > { %v13089_v20 = vpop.eup %13088 }
 0x4e2   : > { %v16660_v50 = vpop.xlane.xlu0 %5636  ;;  %v16662_v49 = vpop.eup %13090  ;;  %v6321_v8 = vmul.f32 %v13089_v20, %v18627_v38 }
 0x4e3   : > { %v13093_v61 = vpop.eup %13092  ;;  %v6136_v18 = vsel %vm5415_vm4, %v16662_v49, 0.0 }
 0x4e4   : > { %v16665_v0 = vpop.xlane.xlu1 %5627  ;;  %v6315_v5 = vmul.f32 %v13093_v61, %v18628_v55  ;;  %11836 = vmatmul.mubr.msk.f32.gmra.mrb[174].mxu1 %vm5408_vm3, %v6321_v8  ;;  %v16671_v44 = vpop.eup %13094 }
 0x4e5   : > { %18629 = vst [vmem:[#allocation68_spill] sm:$0xff] %v16671_v44  ;;  %11859 = vmatprep.mubr.msk.f32.mxu1 %vm13524_vm0, %v18393_v1  ;;  %v16680_v39 = vpop.eup %13096  ;;  %v6157_v17 = vsel %vm5408_vm3, %v16671_v44, 0.0 }
 0x4e6   : > { %6146 = vadd.xlane.f32.xlu0 %v6145_v52  ;;  %v16673_v32 = vpop.xlane.xlu0 %5639  ;;  %11821 = vmatmul.mubr.msk.f32.gmra.mrb[130].mxu0 %vm5408_vm3, %v6315_v5  ;;  %18630 = vst [vmem:[#allocation44_spill] sm:$0xff] %v16680_v39  ;;  %v6148_v20 = vsel %vm5408_vm3, %v16680_v39, 0.0 }
 0x4e7   : > { %11844 = vmatprep.mubr.msk.f32.mxu0 %vm13524_vm0, %v18393_v1 }
 0x4e8   : > { %v16682_v54 = vpop.xlane.xlu1 %5630  ;;  %6137 = vadd.xlane.f32.xlu1 %v6136_v18 }
 0x4ea   : > { %6158 = vadd.xlane.f32.xlu0 %v6157_v17  ;;  %v16688_v3 = vpop.xlane.xlu0 %5642 }
 0x4eb   : > { %18631 = vst [vmem:[#allocation94_spill] sm:$0xff] %v16688_v3 }
 0x4ec   : > { %v16692_v38 = vpop.xlane.xlu1 %5633  ;;  %6149 = vadd.xlane.f32.xlu1 %v6148_v20 }
 0x4ed   : > { %18632 = vst [vmem:[#allocation43_spill] sm:$0xff] %v16692_v38 }
 0x4ee   : > { %v16694_v8 = vpop.xlane.xlu0 %5654 }
 0x4ef   : > { %18633 = vst [vmem:[#allocation61_spill] sm:$0xff] %v16694_v8 }
 0x4f0   : > { %v16696_v61 = vpop.xlane.xlu1 %5645 }
 0x4f1   : > { %18634 = vst [vmem:[#allocation55_spill] sm:$0xff] %v16696_v61 }
 0x4f2   : > { %v16698_v55 = vpop.xlane.xlu0 %5657 }
 0x4f3   : > { %18635 = vst [vmem:[#allocation71_spill] sm:$0xff] %v16698_v55 }
 0x4f4   : > { %v16700_v5 = vpop.xlane.xlu1 %5648 }
 0x4f5   : > { %18636 = vst [vmem:[#allocation46_spill] sm:$0xff] %v16700_v5 }
 0x4f6   : > { %v16702_v52 = vpop.xlane.xlu0 %5660 }
 0x4f7   : > { %18637 = vst [vmem:[#allocation54_spill] sm:$0xff] %v16702_v52 }
 0x4f8   : > { %v16704_v18 = vpop.xlane.xlu1 %5651 }
 0x4f9   : > { %18638 = vst [vmem:[#allocation48_spill] sm:$0xff] %v16704_v18 }
 0x4fa   : > { %v16706_v17 = vpop.xlane.xlu0 %5672 }
 0x4fb   : > { %18639 = vst [vmem:[#allocation34_spill] sm:$0xff] %v16706_v17  ;;  %v18646_v17 = vld [vmem:[#allocation63_spill] sm:$0xff] }
 0x4fc   : > { %v16708_v3 = vpop.xlane.xlu1 %5663  ;;  %v5756_v18 = vsub.f32 %v18646_v17, %v16503_v6  ;;  %v18649_v6 = vld [vmem:[#allocation40_spill] sm:$0xff] }
 0x4fd   : > { %18640 = vst [vmem:[#allocation26_spill] sm:$0xff] %v16708_v3  ;;  %2311 = vrot.lane.b32.xlu1 %v16553_v27, %s13527_s26  ;;  %v18648_v27 = vld [vmem:[#allocation47_spill] sm:$0xff]  ;;  %v12835_v17 = vunpack.i.h.bf16 %v18649_v6 }
 0x4fe   : > { %v16712_v20 = vpop.xlane.xlu0 %5675  ;;  %v5753_v61 = vsub.f32 %v18648_v27, %v16513_v15  ;;  %v5910_v38 = vmul.f32 1.442695, %v5756_v18  ;;  %v18650_v15 = vld [vmem:[#allocation59_spill] sm:$0xff] }
 0x4ff   : > { %18641 = vst [vmem:[#allocation33_spill] sm:$0xff] %v16712_v20  ;;  %v12830_v18 = vunpack.i.h.bf16 %v18650_v15 }
 0x500   : > { %v16714_v8 = vpop.xlane.xlu1 %5666  ;;  %2317 = vrot.lane.b32.xlu0 %v16571_v30, %s13527_s26  ;;  %v5904_v39 = vmul.f32 1.442695, %v5753_v61  ;;  %v12829_v61 = vunpack.i.l.bf16 %v18650_v15 }
 0x501   : > { %18642 = vst [vmem:[#allocation25_spill] sm:$0xff] %v16714_v8 }
 0x502   : > { %v16718_v55 = vpop.xlane.xlu0 %5678 }
 0x503   : > { %18643 = vst [vmem:[#allocation77_spill] sm:$0xff] %v16718_v55 }
 0x504   : > { %v16720_v5 = vpop.xlane.xlu1 %5669 }
 0x505   : > { %18644 = vst [vmem:[#allocation50_spill] sm:$0xff] %v16720_v5 }
 0x506   : > { %v16722_v52 = vpop.xlane.xlu0 %5690 }
 0x507   : > { %18645 = vst [vmem:[#allocation22_spill] sm:$0xff] %v16722_v52 }
 0x508   : > { %v16726_v3 = vpop.xlane.xlu1 %5681 }
 0x509   : > { %18647 = vst [vmem:[#allocation51_spill] sm:$0xff] %v16726_v3  ;;  %v12834_v3 = vunpack.i.l.bf16 %v18649_v6 }
 0x50a   : > { %v6069_v20 = vpop.xlane.xlu0 %6068 }
 0x50b   : > { %13098 = vrcp.f32 %v6069_v20 }
 0x50c   : > { %v6060_v8 = vpop.xlane.xlu1 %6059 }
 0x50d   : > { %13100 = vrcp.f32 %v6060_v8 }
 0x50e   : > { %v6072_v30 = vpop.xlane.xlu0 %6071 }
 0x50f   : > { %13102 = vrcp.f32 %v6072_v30 }
 0x510   : > { %13104 = vpow2.f32 %v5910_v38  ;;  %v6063_v5 = vpop.xlane.xlu1 %6062 }
 0x511   : > { %13106 = vrcp.f32 %v6063_v5  ;;  %v12499_v5 = vpack.c.bf16 %v12835_v17, %v12834_v3 }
 0x512   : > { %13108 = vpow2.f32 %v5904_v39  ;;  %v6075_v52 = vpop.xlane.xlu0 %6074 }
 0x513   : > { %13110 = vrcp.f32 %v6075_v52 }
 0x514   : > { %v6066_v55 = vpop.xlane.xlu1 %6065 }
 0x515   : > { %13112 = vrcp.f32 %v6066_v55  ;;  %v13099_v27 = vpop.eup %13098  ;;  %v12496_v55 = vpack.c.bf16 %v12830_v18, %v12829_v61 }
 0x516   : > { %v6087_v8 = vpop.xlane.xlu0 %6086  ;;  %v6329_v30 = vmul.f32 %v13099_v27, %v16292_v45 }
 0x517   : > { %13114 = vrcp.f32 %v6087_v8  ;;  %v13101_v38 = vpop.eup %13100 }
 0x518   : > { %v6078_v39 = vpop.xlane.xlu1 %6077  ;;  %v6323_v52 = vmul.f32 %v13101_v38, %v16300_v43  ;;  %11860 = vmatmul.mubr.msk.f32.vlgmr.msra.gmra.mrb[176].mxu1 %vm5408_vm3, %v6329_v30 }
 0x519   : > { %v13103_v20 = vpop.eup %13102  ;;  %13116 = vrcp.f32 %v6078_v39  ;;  %12500 = vmatpush3.bf16.msra.mxu1 %v12499_v5  ;;  %11862 = vmatprep.mubr.msk.f32.mxu1 %vm13524_vm0, %v18393_v1  ;;  %v18653_v5 = vld [vmem:[#allocation92_spill] sm:$0xff] }
 0x51a   : > { %v16737_v6 = vpop.eup %13104  ;;  %v6090_v44 = vpop.xlane.xlu0 %6089  ;;  %v6331_v45 = vmul.f32 %v13103_v20, %v16308_v40  ;;  %11845 = vmatmul.mubr.msk.f32.vlgmr.msra.gmra.mrb[132].mxu0 %vm5408_vm3, %v6323_v52  ;;  %11887 = vmatprep.subr.mxu1 %v18393_v1  ;;  %v18651_v40 = vld [vmem:[#allocation66_spill] sm:$0xff] }
 0x51b   : > { %v13107_v27 = vpop.eup %13106  ;;  %13118 = vrcp.f32 %v6090_v44  ;;  %12497 = vmatpush3.bf16.msra.mxu0 %v12496_v55  ;;  %11847 = vmatprep.mubr.msk.f32.mxu0 %vm13524_vm0, %v18393_v1  ;;  %v6160_v18 = vsel %vm5408_vm3, %v16737_v6, 0.0  ;;  %v18654_v55 = vld [vmem:[#allocation41_spill] sm:$0xff] }
 0x51c   : > { %v16744_v43 = vpop.eup %13108  ;;  %v6081_v3 = vpop.xlane.xlu1 %6080  ;;  %v6325_v17 = vmul.f32 %v13107_v27, %v16314_v23  ;;  %11872 = vmatprep.subr.mxu0 %v18393_v1  ;;  %11863 = vmatmul.mubr.msk.f32.gmra.mrb[178].mxu1 %vm5408_vm3, %v6331_v45  ;;  %v18652_v23 = vld [vmem:[#allocation64_spill] sm:$0xff]  ;;  %v12840_v45 = vunpack.i.h.bf16 %v18654_v55  ;;  %v12839_v27 = vunpack.i.l.bf16 %v18654_v55 }
 0x51d   : > { %v13111_v15 = vpop.eup %13110  ;;  %13120 = vrcp.f32 %v6081_v3  ;;  %11888 = vmatpush3.msk.msra.mxu1 %vm6475_vm5, %v18651_v40  ;;  %11865 = vmatprep.mubr.msk.f32.mxu1 %vm13524_vm0, %v18393_v1  ;;  %v12845_v30 = vunpack.i.h.bf16 %v18652_v23  ;;  %v12844_v38 = vunpack.i.l.bf16 %v18652_v23  ;;  %v6151_v20 = vsel %vm5408_vm3, %v16744_v43, 0.0 }
 0x51e   : > { %v6093_v44 = vpop.xlane.xlu0 %6092  ;;  %v6333_v61 = vmul.f32 %v13111_v15, %v16320_v22  ;;  %11848 = vmatmul.mubr.msk.f32.gmra.mrb[134].mxu0 %vm5408_vm3, %v6325_v17  ;;  %12504 = vmatprep.subr.bf16.mxu1 %v18569_v46 }
 0x51f   : > { %v13113_v8 = vpop.eup %13112  ;;  %13122 = vrcp.f32 %v6093_v44  ;;  %6161 = vadd.xlane.f32.xlu0 %v6160_v18  ;;  %11873 = vmatpush3.msk.msra.mxu0 %vm6475_vm5, %v18653_v5  ;;  %v12502_v18 = vpack.c.bf16 %v12840_v45, %v12839_v27 }
 0x520   : > { %v6084_v39 = vpop.xlane.xlu1 %6083  ;;  %11850 = vmatprep.mubr.msk.f32.mxu0 %vm13524_vm0, %v18393_v1  ;;  %v6327_v22 = vmul.f32 %v13113_v8, %v16328_v59  ;;  %11866 = vmatmul.mubr.msk.f32.gmra.mrb[180].mxu1 %vm5408_vm3, %v6333_v61  ;;  %v12505_v59 = vpack.c.bf16 %v12845_v30, %v12844_v38 }
 0x521   : > { %v13115_v52 = vpop.eup %13114  ;;  %13124 = vrcp.f32 %v6084_v39  ;;  %6152 = vadd.xlane.f32.xlu1 %v6151_v20  ;;  %11889 = vmatprep.mubr.msk.f32.mxu1 %vm13524_vm0, %v18393_v1 }
 0x522   : > { %v6341_v3 = vmul.f32 %v13115_v52, %v16336_v26  ;;  %v6105_v17 = vpop.xlane.xlu0 %6104  ;;  %12501 = vmatprep.subr.bf16.mxu0 %v18569_v46  ;;  %11851 = vmatmul.mubr.msk.f32.gmra.mrb[136].mxu0 %vm5408_vm3, %v6327_v22 }
 0x523   : > { %v13117_v15 = vpop.eup %13116  ;;  %13126 = vrcp.f32 %v6105_v17  ;;  %11874 = vmatprep.mubr.msk.f32.mxu0 %vm13524_vm0, %v18393_v1 }
 0x524   : > { %v6335_v40 = vmul.f32 %v13117_v15, %v16342_v58  ;;  %v6096_v44 = vpop.xlane.xlu1 %6095  ;;  %11890 = vmatmul.mubr.msk.f32.vlgmr.msra.gmra.mrb[182].mxu1 %vm5408_vm3, %v6341_v3 }
 0x525   : > { %v13119_v26 = vpop.eup %13118  ;;  %13128 = vrcp.f32 %v6096_v44  ;;  %12506 = vmatpush3.bf16.msra.mxu1 %v12505_v59  ;;  %11892 = vmatprep.mubr.msk.f32.mxu1 %vm13524_vm0, %v18393_v1 }
 0x526   : > { %v6108_v61 = vpop.xlane.xlu0 %6107  ;;  %v6343_v8 = vmul.f32 %v13119_v26, %v16348_v36  ;;  %11875 = vmatmul.mubr.msk.f32.vlgmr.msra.gmra.mrb[138].mxu0 %vm5408_vm3, %v6335_v40  ;;  %11917 = vmatprep.subr.mxu1 %v18393_v1  ;;  %v18655_v36 = vld [vmem:[#allocation42_spill] sm:$0xff] }
 0x527   : > { %v13121_v23 = vpop.eup %13120  ;;  %13130 = vrcp.f32 %v6108_v61  ;;  %12503 = vmatpush3.bf16.msra.mxu0 %v12502_v18  ;;  %11877 = vmatprep.mubr.msk.f32.mxu0 %vm13524_vm0, %v18393_v1  ;;  %v18658_v18 = vld [vmem:[#allocation75_spill] sm:$0xff] }
 0x528   : > { %v6099_v58 = vpop.xlane.xlu1 %6098  ;;  %v6337_v30 = vmul.f32 %v13121_v23, %v16356_v56  ;;  %11902 = vmatprep.subr.mxu0 %v18393_v1  ;;  %11893 = vmatmul.mubr.msk.f32.gmra.mrb[184].mxu1 %vm5408_vm3, %v6343_v8  ;;  %v18656_v56 = vld [vmem:[#allocation60_spill] sm:$0xff] }
 0x529   : > { %v13123_v38 = vpop.eup %13122  ;;  %13132 = vrcp.f32 %v6099_v58  ;;  %11918 = vmatpush3.msk.msra.mxu1 %vm6475_vm5, %v18655_v36  ;;  %11895 = vmatprep.mubr.msk.f32.mxu1 %vm13524_vm0, %v18393_v1 }
 0x52a   : > { %v6111_v5 = vpop.xlane.xlu0 %6110  ;;  %v6345_v39 = vmul.f32 %v13123_v38, %v16367_v47  ;;  %11878 = vmatmul.mubr.msk.f32.gmra.mrb[140].mxu0 %vm5408_vm3, %v6337_v30  ;;  %12510 = vmatprep.subr.bf16.mxu1 %v18569_v46  ;;  %v18659_v30 = vld [vmem:[#allocation65_spill] sm:$0xff] }
 0x52b   : > { %v13125_v20 = vpop.eup %13124  ;;  %13134 = vrcp.f32 %v6111_v5  ;;  %11903 = vmatpush3.msk.msra.mxu0 %vm6475_vm5, %v18656_v56  ;;  %11880 = vmatprep.mubr.msk.f32.mxu0 %vm13524_vm0, %v18393_v1  ;;  %v5757_v38 = vsub.f32 %v18659_v30, %v16535_v13  ;;  %v18661_v56 = vld [vmem:[#allocation101_spill] sm:$0xff] }
 0x52c   : > { %v6102_v22 = vpop.xlane.xlu1 %6101  ;;  %v6339_v52 = vmul.f32 %v13125_v20, %v16379_v53  ;;  %11896 = vmatmul.mubr.msk.f32.gmra.mrb[186].mxu1 %vm5408_vm3, %v6345_v39  ;;  %12507 = vmatprep.subr.bf16.mxu0 %v18569_v46 }
 0x52d   : > { %v13127_v55 = vpop.eup %13126  ;;  %13136 = vrcp.f32 %v6102_v22  ;;  %11919 = vmatprep.mubr.msk.f32.mxu1 %vm13524_vm0, %v18393_v1  ;;  %v5912_v20 = vmul.f32 1.442695, %v5757_v38  ;;  %v5761_v22 = vsub.f32 %v18661_v56, %v16549_v10 }
 0x52e   : > { %v6353_v47 = vmul.f32 %v13127_v55, %v16387_v16  ;;  %v16806_v45 = vpop.xlane.xlu0 %6122  ;;  %11881 = vmatmul.mubr.msk.f32.gmra.mrb[142].mxu0 %vm5408_vm3, %v6339_v52  ;;  %v18657_v16 = vld [vmem:[#allocation76_spill] sm:$0xff] }
 0x52f   : > { %v13129_v27 = vpop.eup %13128  ;;  %11904 = vmatprep.mubr.msk.f32.mxu0 %vm13524_vm0, %v18393_v1  ;;  %13138 = vpow2.f32 %v5912_v20 }
 0x530   : > { %v6347_v3 = vmul.f32 %v13129_v27, %v16400_v31  ;;  %v16812_v17 = vpop.xlane.xlu1 %6113  ;;  %11920 = vmatmul.mubr.msk.f32.vlgmr.msra.gmra.mrb[188].mxu1 %vm5408_vm3, %v6353_v47 }
 0x531   : > { %v13131_v53 = vpop.eup %13130  ;;  %11922 = vmatprep.mubr.msk.f32.mxu1 %vm13524_vm0, %v18393_v1 }
 0x532   : > { %12857 = vrot.lane.b32.xlu1 %v18657_v16, %s13528_s1  ;;  %v16819_v15 = vpop.xlane.xlu0 %6125  ;;  %v6355_v59 = vmul.f32 %v13131_v53, %v16410_v24  ;;  %11905 = vmatmul.mubr.msk.f32.vlgmr.msra.gmra.mrb[144].mxu0 %vm5408_vm3, %v6347_v3  ;;  %v18662_v3 = vld [vmem:[#allocation49_spill] sm:$0xff] }
 0x533   : > { %v13133_v40 = vpop.eup %13132  ;;  %11907 = vmatprep.mubr.msk.f32.mxu0 %vm13524_vm0, %v18393_v1  ;;  %v5758_v53 = vsub.f32 %v18662_v3, %v16555_v14 }
 0x534   : > { %v16825_v31 = vpop.xlane.xlu1 %6116  ;;  %v6349_v44 = vmul.f32 %v13133_v40, %v16421_v37  ;;  %11923 = vmatmul.mubr.msk.f32.gmra.mrb[190].mxu1 %vm5408_vm3, %v6355_v59 }
 0x535   : > { %v13135_v26 = vpop.eup %13134  ;;  %12862 = vrot.lane.b32.xlu0 %v18658_v18, %s13528_s1  ;;  %11925 = vmatprep.mubr.msk.f32.mxu1 %vm13524_vm0, %v18393_v1 }
 0x536   : > { %v16833_v61 = vpop.xlane.xlu0 %6128  ;;  %v6357_v24 = vmul.f32 %v13135_v26, %v16430_v42  ;;  %11908 = vmatmul.mubr.msk.f32.gmra.mrb[146].mxu0 %vm5408_vm3, %v6349_v44  ;;  %v5920_v26 = vmul.f32 1.442695, %v5761_v22 }
 0x537   : > { %v13137_v8 = vpop.eup %13136  ;;  %11910 = vmatprep.mubr.msk.f32.mxu0 %vm13524_vm0, %v18393_v1 }
 0x538   : > { %v16839_v23 = vpop.xlane.xlu1 %6119  ;;  %v6351_v37 = vmul.f32 %v13137_v8, %v16438_v4  ;;  %11926 = vmatmul.mubr.msk.f32.gmra.mrb[192].mxu1 %vm5408_vm3, %v6357_v24  ;;  %v18660_v4 = vld [vmem:[#allocation74_spill] sm:$0xff]  ;;  %v5914_v24 = vmul.f32 1.442695, %v5758_v53  ;;  %v18667_v53 = vld [vmem:[#allocation73_spill] sm:$0xff] }
 0x539   : > { %11949 = vmatprep.mubr.msk.f32.mxu1 %vm13524_vm0, %v18393_v1  ;;  %v5754_v5 = vsub.f32 %v18660_v4, %v16538_v34  ;;  %v16868_v10 = vpop.eup %13138 }
 0x53a   : > { %v16845_v58 = vpop.xlane.xlu0 %6140  ;;  %11911 = vmatmul.mubr.msk.f32.gmra.mrb[148].mxu0 %vm5408_vm3, %v6351_v37  ;;  %v6163_v8 = vsel %vm5415_vm4, %v16868_v10, 0.0 }
 0x53b   : > { %11934 = vmatprep.mubr.msk.f32.mxu0 %vm13524_vm0, %v18393_v1  ;;  %v5906_v27 = vmul.f32 1.442695, %v5754_v5 }
 0x53c   : > { %v16850_v42 = vpop.xlane.xlu1 %6131 }
 0x53d   : > { %13140 = vpow2.f32 %v5906_v27 }
 0x53e   : > { %v16856_v36 = vpop.xlane.xlu0 %6143  ;;  %13142 = vpow2.f32 %v5920_v26 }
 0x53f   : > { %13144 = vpow2.f32 %v5914_v24 }
 0x540   : > { %v16860_v39 = vpop.xlane.xlu1 %6134  ;;  %13146 = vrcp.f32 %v16806_v45 }
 0x541   : > { %13148 = vrcp.f32 %v16812_v17 }
 0x542   : > { %v12853_v52 = vpop.permute.xlu0 %12852  ;;  %13150 = vrcp.f32 %v16819_v15 }
 0x543   : > { %v12855_v55 = vunpack.i.h.bf16 %v12853_v52  ;;  %v12854_v47 = vunpack.i.l.bf16 %v12853_v52  ;;  %13152 = vrcp.f32 %v16825_v31 }
 0x544   : > { %v12848_v59 = vpop.permute.xlu1 %12847  ;;  %13154 = vrcp.f32 %v16833_v61 }
 0x545   : > { %v12511_v13 = vpack.c.bf16 %v12855_v55, %v12854_v47  ;;  %v12850_v40 = vunpack.i.h.bf16 %v12848_v59  ;;  %v12849_v44 = vunpack.i.l.bf16 %v12848_v59  ;;  %v18668_v59 = vld [vmem:[#allocation78_spill] sm:$0xff]  ;;  %13156 = vrcp.f32 %v16839_v23  ;;  %v18674_v23 = vld [vmem:[#allocation81_spill] sm:$0xff] }
 0x547   : > { %v12508_v34 = vpack.c.bf16 %v12850_v40, %v12849_v44  ;;  %12512 = vmatpush3.bf16.msra.mxu1 %v12511_v13  ;;  %v16870_v14 = vpop.eup %13140 }
 0x548   : > { %11947 = vmatprep.subr.mxu1 %v18393_v1  ;;  %v16874_v37 = vpop.eup %13142  ;;  %v6154_v30 = vsel %vm5415_vm4, %v16870_v14, 0.0 }
 0x549   : > { %12509 = vmatpush3.bf16.msra.mxu0 %v12508_v34  ;;  %v16878_v38 = vpop.eup %13144  ;;  %v6175_v4 = vsel %vm5408_vm3, %v16874_v37, 0.0 }
 0x54a   : > { %11932 = vmatprep.subr.mxu0 %v18393_v1  ;;  %v6166_v5 = vsel %vm5408_vm3, %v16878_v38, 0.0 }
 0x554   : > { %6164 = vadd.xlane.f32.xlu0 %v6163_v8  ;;  %v13147_v8 = vpop.eup %13146 }
 0x556   : > { %6155 = vadd.xlane.f32.xlu1 %v6154_v30 }
 0x558   : > { %6176 = vadd.xlane.f32.xlu0 %v6175_v4  ;;  %v13149_v4 = vpop.eup %13148 }
 0x55a   : > { %6167 = vadd.xlane.f32.xlu1 %v6166_v5 }
 0x55f   : > { %v16884_v20 = vpop.f32.mrb[152].mxu1 }
 0x560   : > { %18663 = vst [vmem:[#allocation86_spill] sm:$0xff] %v16884_v20  ;;  %v11741_v56 = vpop.f32.mrb[153].mxu1 }
 0x561   : > { %v16886_v22 = vpop.f32.mrb[108].mxu0  ;;  %v18673_v56 = vld [vmem:[#allocation67_spill] sm:$0xff] }
 0x562   : > { %18664 = vst [vmem:[#allocation69_spill] sm:$0xff] %v16886_v22  ;;  %v11726_v52 = vpop.f32.mrb[109].mxu0  ;;  %v5762_v31 = vsub.f32 %v18673_v56, %v16578_v41 }
 0x563   : > { %v6365_v52 = vmul.f32 %v13147_v8, %v16447_v2 }
 0x564   : > { %v5922_v2 = vmul.f32 1.442695, %v5762_v31 }
 0x566   : > { %13158 = vpow2.f32 %v5922_v2 }
 0x567   : > { %v16888_v55 = vpop.f32.mrb[154].mxu1 }
 0x568   : > { %18665 = vst [vmem:[#allocation80_spill] sm:$0xff] %v16888_v55  ;;  %v11744_v47 = vpop.f32.mrb[155].mxu1 }
 0x569   : > { %v16890_v27 = vpop.f32.mrb[110].mxu0 }
 0x56a   : > { %18666 = vst [vmem:[#allocation36_spill] sm:$0xff] %v16890_v27  ;;  %v11729_v3 = vpop.f32.mrb[111].mxu0 }
 0x56b   : > { %2339 = vrot.lane.b32.xlu1 %v18667_v53, %s13528_s1  ;;  %v13151_v3 = vpop.eup %13150 }
 0x56c   : > { %v6367_v41 = vmul.f32 %v13151_v3, %v16463_v9 }
 0x56e   : > { %2345 = vrot.lane.b32.xlu0 %v18668_v59, %s13528_s1 }
 0x56f   : > { %v16898_v13 = vpop.f32.mrb[156].mxu1 }
 0x570   : > { %18669 = vst [vmem:[#allocation28_spill] sm:$0xff] %v16898_v13  ;;  %v11747_v40 = vpop.f32.mrb[157].mxu1 }
 0x571   : > { %v16901_v44 = vpop.f32.mrb[112].mxu0  ;;  %v5759_v40 = vsub.f32 %v18674_v23, %v16584_v60  ;;  %v18679_v23 = vld [vmem:[#allocation127_spill] sm:$0xff] }
 0x572   : > { %18670 = vst [vmem:[#allocation35_spill] sm:$0xff] %v16901_v44  ;;  %v11732_v26 = vpop.f32.mrb[113].mxu0 }
 0x573   : > { %v16903_v34 = vpop.xlane.xlu0 %6146  ;;  %v6359_v26 = vmul.f32 %v13149_v4, %v16456_v57  ;;  %v5916_v8 = vmul.f32 1.442695, %v5759_v40  ;;  %v5692_v40 = vsel %vm5408_vm3, %v18679_v23, -inf }
 0x575   : > { %v16906_v24 = vpop.xlane.xlu1 %6137  ;;  %13160 = vpow2.f32 %v5916_v8 }
 0x577   : > { %v16909_v45 = vpop.xlane.xlu0 %6158  ;;  %v16912_v17 = vpop.f32.mrb[158].mxu1 }
 0x578   : > { %18671 = vst [vmem:[#allocation27_spill] sm:$0xff] %v16912_v17  ;;  %v11771_v15 = vpop.f32.mrb[159].mxu1 }
 0x579   : > { %v16914_v30 = vpop.xlane.xlu1 %6149  ;;  %v16916_v5 = vpop.f32.mrb[114].mxu0 }
 0x57a   : > { %18672 = vst [vmem:[#allocation98_spill] sm:$0xff] %v16916_v5  ;;  %v11756_v47 = vpop.f32.mrb[115].mxu0  ;;  %v13153_v15 = vpop.eup %13152 }
 0x57b   : > { %v2318_v61 = vpop.permute.xlu0 %2317  ;;  %v13155_v60 = vpop.eup %13154 }
 0x57c   : > { %11948 = vmatpush3.msk.msra.mxu1 %vm6475_vm5, %v2318_v61  ;;  %v13157_v56 = vpop.eup %13156 }
 0x57d   : > { %v2312_v13 = vpop.permute.xlu1 %2311  ;;  %11950 = vmatmul.mubr.msk.f32.vlgmr.msra.gmra.mrb[194].mxu1 %vm5408_vm3, %v6365_v52  ;;  %12516 = vmatprep.subr.bf16.mxu1 %v18569_v46  ;;  %v6369_v52 = vmul.f32 %v13155_v60, %v16476_v21 }
 0x57e   : > { %11933 = vmatpush3.msk.msra.mxu0 %vm6475_vm5, %v2312_v13  ;;  %11952 = vmatprep.mubr.msk.f32.mxu1 %vm13524_vm0, %v18393_v1  ;;  %v6361_v13 = vmul.f32 %v13153_v15, %v16469_v12  ;;  %v6363_v12 = vmul.f32 %v13157_v56, %v16487_v63  ;;  %v16960_v63 = vpop.eup %13158 }
 0x57f   : > { %11935 = vmatmul.mubr.msk.f32.vlgmr.msra.gmra.mrb[150].mxu0 %vm5408_vm3, %v6359_v26  ;;  %12513 = vmatprep.subr.bf16.mxu0 %v18569_v46  ;;  %v16933_v57 = vpop.f32.mrb[160].mxu1  ;;  %v5683_v26 = vsel %vm5408_vm3, %v16192_v11, -inf  ;;  %v16964_v15 = vpop.eup %13160 }
 0x580   : > { %18675 = vst [vmem:[#allocation100_spill] sm:$0xff] %v16933_v57  ;;  %11937 = vmatprep.mubr.msk.f32.mxu0 %vm13524_vm0, %v18393_v1  ;;  %v11774_v4 = vpop.f32.mrb[161].mxu1  ;;  %v18692_v57 = vld [vmem:[#allocation30_spill] sm:$0xff] }
 0x581   : > { %11953 = vmatmul.mubr.msk.f32.gmra.mrb[196].mxu1 %vm5408_vm3, %v6367_v41  ;;  %v16939_v31 = vpop.f32.mrb[116].mxu0  ;;  %v6178_v41 = vsel %vm5408_vm3, %v16960_v63, 0.0  ;;  %v6169_v4 = vsel %vm5408_vm3, %v16964_v15, 0.0  ;;  %v5760_v55 = vsub.f32 %v18692_v57, %v16601_v25 }
 0x582   : > { %18676 = vst [vmem:[#allocation106_spill] sm:$0xff] %v16939_v31  ;;  %11955 = vmatprep.mubr.msk.f32.mxu1 %vm13524_vm0, %v18393_v1  ;;  %v11759_v9 = vpop.f32.mrb[117].mxu0 }
 0x583   : > { %11938 = vmatmul.mubr.msk.f32.gmra.mrb[152].mxu0 %vm5408_vm3, %v6361_v13 }
 0x584   : > { %11940 = vmatprep.mubr.msk.f32.mxu0 %vm13524_vm0, %v18393_v1 }
 0x585   : > { %11956 = vmatmul.mubr.msk.f32.gmra.mrb[198].mxu1 %vm5408_vm3, %v6369_v52 }
 0x586   : > { %11979 = vmatprep.mubr.msk.f32.mxu1 %vm13524_vm0, %v18393_v1 }
 0x587   : > { %11941 = vmatmul.mubr.msk.f32.gmra.mrb[154].mxu0 %vm5408_vm3, %v6363_v12  ;;  %v16952_v47 = vpop.f32.mrb[162].mxu1 }
 0x588   : > { %18677 = vst [vmem:[#allocation107_spill] sm:$0xff] %v16952_v47  ;;  %11964 = vmatprep.mubr.msk.f32.mxu0 %vm13524_vm0, %v18393_v1  ;;  %v11777_v61 = vpop.f32.mrb[163].mxu1 }
 0x589   : > { %v16956_v21 = vpop.f32.mrb[118].mxu0 }
 0x58a   : > { %18678 = vst [vmem:[#allocation96_spill] sm:$0xff] %v16956_v21  ;;  %v11762_v3 = vpop.f32.mrb[119].mxu0 }
 0x58d   : > { %5693 = vmax.xlane.f32.xlu0 %v5692_v40 }
 0x58f   : > { %5684 = vmax.xlane.f32.xlu1 %v5683_v26  ;;  %v16966_v2 = vpop.f32.mrb[164].mxu1 }
 0x590   : > { %18680 = vst [vmem:[#allocation88_spill] sm:$0xff] %v16966_v2  ;;  %v11801_v60 = vpop.f32.mrb[165].mxu1 }
 0x591   : > { %6179 = vadd.xlane.f32.xlu0 %v6178_v41  ;;  %v16970_v8 = vpop.f32.mrb[120].mxu0  ;;  %v18686_v41 = vld [vmem:[#allocation79_spill] sm:$0xff]  ;;  %v18687_v60 = vld [vmem:[#allocation82_spill] sm:$0xff] }
 0x592   : > { %18681 = vst [vmem:[#allocation45_spill] sm:$0xff] %v16970_v8  ;;  %v11786_v13 = vpop.f32.mrb[121].mxu0  ;;  %v18694_v8 = vld [vmem:[#allocation21_spill] sm:$0xff] }
 0x593   : > { %6170 = vadd.xlane.f32.xlu1 %v6169_v4 }
 0x597   : > { %v16974_v56 = vpop.f32.mrb[166].mxu1 }
 0x598   : > { %18682 = vst [vmem:[#allocation39_spill] sm:$0xff] %v16974_v56  ;;  %v11804_v9 = vpop.f32.mrb[167].mxu1 }
 0x599   : > { %v16976_v52 = vpop.f32.mrb[122].mxu0 }
 0x59a   : > { %18683 = vst [vmem:[#allocation111_spill] sm:$0xff] %v16976_v52  ;;  %v11789_v12 = vpop.f32.mrb[123].mxu0 }
 0x59f   : > { %v16978_v61 = vpop.f32.mrb[168].mxu1 }
 0x5a0   : > { %18684 = vst [vmem:[#allocation62_spill] sm:$0xff] %v16978_v61  ;;  %v11807_v3 = vpop.f32.mrb[169].mxu1 }
 0x5a1   : > { %v16980_v40 = vpop.f32.mrb[124].mxu0  ;;  %v18690_v3 = vld [vmem:[#allocation85_spill] sm:$0xff] }
 0x5a2   : > { %18685 = vst [vmem:[#allocation112_spill] sm:$0xff] %v16980_v40  ;;  %v11792_v26 = vpop.f32.mrb[125].mxu0  ;;  %v5763_v61 = vsub.f32 %v18690_v3, %v16598_v48  ;;  %v5767_v48 = vsub.f32 %v18694_v8, %v16618_v51 }
 0x5a4   : > { %12867 = vrot.lane.b32.xlu1 %v18686_v41, %s13528_s1  ;;  %v5932_v25 = vmul.f32 1.442695, %v5767_v48 }
 0x5a7   : > { %12872 = vrot.lane.b32.xlu0 %v18687_v60, %s13528_s1  ;;  %v16986_v13 = vpop.f32.mrb[170].mxu1 }
 0x5a8   : > { %18688 = vst [vmem:[#allocation72_spill] sm:$0xff] %v16986_v13  ;;  %v11831_v4 = vpop.f32.mrb[171].mxu1 }
 0x5a9   : > { %v16988_v47 = vpop.f32.mrb[126].mxu0 }
 0x5aa   : > { %18689 = vst [vmem:[#allocation53_spill] sm:$0xff] %v16988_v47  ;;  %v11816_v9 = vpop.f32.mrb[127].mxu0  ;;  %v5924_v47 = vmul.f32 1.442695, %v5763_v61 }
 0x5ac   : > { %v16990_v21 = vpop.xlane.xlu0 %6161  ;;  %13162 = vpow2.f32 %v5924_v47 }
 0x5ae   : > { %v16992_v12 = vpop.xlane.xlu1 %6152 }
 0x5af   : > { %v16996_v26 = vpop.f32.mrb[172].mxu1 }
 0x5b0   : > { %18691 = vst [vmem:[#allocation116_spill] sm:$0xff] %v16996_v26  ;;  %v12863_v40 = vpop.permute.xlu0 %12862  ;;  %v11834_v44 = vpop.f32.mrb[173].mxu1  ;;  %v5918_v26 = vmul.f32 1.442695, %v5760_v55 }
 0x5b1   : > { %v12865_v56 = vunpack.i.h.bf16 %v12863_v40  ;;  %v12864_v52 = vunpack.i.l.bf16 %v12863_v40  ;;  %v17000_v4 = vpop.f32.mrb[128].mxu0  ;;  %v18695_v44 = vld [vmem:[#allocation29_spill] sm:$0xff] }
 0x5b2   : > { %18693 = vst [vmem:[#allocation58_spill] sm:$0xff] %v17000_v4  ;;  %v12858_v31 = vpop.permute.xlu1 %12857  ;;  %v11819_v2 = vpop.f32.mrb[129].mxu0  ;;  %v5764_v40 = vsub.f32 %v18695_v44, %v16623_v28  ;;  %13164 = vpow2.f32 %v5918_v26  ;;  %v18698_v26 = vld [vmem:[#allocation90_spill] sm:$0xff] }
 0x5b3   : > { %v12517_v9 = vpack.c.bf16 %v12865_v56, %v12864_v52  ;;  %v12860_v27 = vunpack.i.h.bf16 %v12858_v31  ;;  %v12859_v13 = vunpack.i.l.bf16 %v12858_v31  ;;  %13166 = vpow2.f32 %v5932_v25  ;;  %v18700_v25 = vld [vmem:[#allocation24_spill] sm:$0xff] }
 0x5b4   : > { %v5926_v2 = vmul.f32 1.442695, %v5764_v40 }
 0x5b5   : > { %v12514_v3 = vpack.c.bf16 %v12860_v27, %v12859_v13  ;;  %12518 = vmatpush3.bf16.msra.mxu1 %v12517_v9 }
 0x5b6   : > { %11977 = vmatprep.subr.mxu1 %v18393_v1  ;;  %13168 = vpow2.f32 %v5926_v2  ;;  %v17012_v55 = vpop.eup %13162 }
 0x5b7   : > { %12515 = vmatpush3.bf16.msra.mxu0 %v12514_v3  ;;  %v17007_v57 = vpop.f32.mrb[174].mxu1  ;;  %v6181_v27 = vsel %vm5415_vm4, %v17012_v55, 0.0  ;;  %13170 = vrcp.f32 %v16845_v58 }
 0x5b8   : > { %18696 = vst [vmem:[#allocation118_spill] sm:$0xff] %v17007_v57  ;;  %11962 = vmatprep.subr.mxu0 %v18393_v1  ;;  %v11837_v31 = vpop.f32.mrb[175].mxu1  ;;  %13172 = vrcp.f32 %v16850_v42 }
 0x5b9   : > { %v17010_v56 = vpop.f32.mrb[130].mxu0  ;;  %13174 = vrcp.f32 %v16856_v36  ;;  %v18699_v36 = vld [vmem:[#allocation52_spill] sm:$0xff] }
 0x5ba   : > { %18697 = vst [vmem:[#allocation122_spill] sm:$0xff] %v17010_v56  ;;  %v11822_v51 = vpop.f32.mrb[131].mxu0  ;;  %13176 = vrcp.f32 %v16860_v39  ;;  %v5768_v40 = vsub.f32 %v18699_v36, %v16638_v35  ;;  %v18701_v39 = vld [vmem:[#allocation87_spill] sm:$0xff] }
 0x5bb   : > { %13178 = vrcp.f32 %v16903_v34  ;;  %v5765_v34 = vsub.f32 %v18701_v39, %v16644_v62  ;;  %v18704_v62 = vld [vmem:[#allocation23_spill] sm:$0xff] }
 0x5bc   : > { %v17014_v28 = vpop.eup %13164  ;;  %13180 = vrcp.f32 %v16906_v24  ;;  %v18706_v39 = vld [vmem:[#allocation31_spill] sm:$0xff] }
 0x5bd   : > { %v17018_v47 = vpop.eup %13166  ;;  %v6172_v8 = vsel %vm5415_vm4, %v17014_v28, 0.0 }
 0x5be   : > { %v6193_v61 = vsel %vm5408_vm3, %v17018_v47, 0.0 }
 0x5c0   : > { %v17022_v52 = vpop.eup %13168 }
 0x5c1   : > { %v6184_v13 = vsel %vm5408_vm3, %v17022_v52, 0.0  ;;  %v13171_v58 = vpop.eup %13170 }
 0x5c2   : > { %v13173_v42 = vpop.eup %13172  ;;  %v6377_v31 = vmul.f32 %v13171_v58, %v18700_v25 }
 0x5c3   : > { %v13175_v51 = vpop.eup %13174 }
 0x5c4   : > { %v13177_v24 = vpop.eup %13176  ;;  %v6379_v36 = vmul.f32 %v13175_v51, %v18704_v62 }
 0x5c6   : > { %6182 = vadd.xlane.f32.xlu0 %v6181_v27  ;;  %v18702_v27 = vld [vmem:[#allocation32_spill] sm:$0xff] }
 0x5c8   : > { %6173 = vadd.xlane.f32.xlu1 %v6172_v8  ;;  %v6371_v8 = vmul.f32 %v13173_v42, %v18702_v27  ;;  %v13179_v42 = vpop.eup %13178  ;;  %v6373_v27 = vmul.f32 %v13177_v24, %v18706_v39 }
 0x5ca   : > { %6194 = vadd.xlane.f32.xlu0 %v6193_v61 }
 0x5cc   : > { %6185 = vadd.xlane.f32.xlu1 %v6184_v13  ;;  %v5934_v13 = vmul.f32 1.442695, %v5768_v40  ;;  %v13181_v40 = vpop.eup %13180 }
 0x5cd   : > { %v6375_v24 = vmul.f32 %v13181_v40, %v16662_v49 }
 0x5ce   : > { %13182 = vpow2.f32 %v5934_v13 }
 0x5dd   : > { %2351 = vrot.lane.b32.xlu1 %v18570_v7, %s13528_s1 }
 0x5e0   : > { %2357 = vrot.lane.b32.xlu0 %v18698_v26, %s13528_s1 }
 0x5e1   : > { %v17035_v9 = vpop.xlane.xlu0 %6164 }
 0x5e3   : > { %v17038_v48 = vpop.xlane.xlu1 %6155 }
 0x5e5   : > { %v17041_v3 = vpop.xlane.xlu0 %6176 }
 0x5e7   : > { %v17044_v44 = vpop.xlane.xlu1 %6167 }
 0x5e9   : > { %v2346_v2 = vpop.permute.xlu0 %2345 }
 0x5ea   : > { %11978 = vmatpush3.msk.msra.mxu1 %vm6475_vm5, %v2346_v2 }
 0x5eb   : > { %v2340_v61 = vpop.permute.xlu1 %2339  ;;  %11980 = vmatmul.mubr.msk.f32.vlgmr.msra.gmra.mrb[200].mxu1 %vm5408_vm3, %v6377_v31  ;;  %12522 = vmatprep.subr.bf16.mxu1 %v18569_v46  ;;  %v17056_v35 = vpop.f32.mrb[176].mxu1  ;;  %v5928_v31 = vmul.f32 1.442695, %v5765_v34 }
 0x5ec   : > { %11963 = vmatpush3.msk.msra.mxu0 %vm6475_vm5, %v2340_v61  ;;  %18703 = vst [vmem:[#allocation124_spill] sm:$0xff] %v17056_v35  ;;  %11982 = vmatprep.mubr.msk.f32.mxu1 %vm13524_vm0, %v18393_v1  ;;  %v11861_v58 = vpop.f32.mrb[177].mxu1  ;;  %v18749_v35 = vld [vmem:[#allocation108_spill] sm:$0xff] }
 0x5ed   : > { %11965 = vmatmul.mubr.msk.f32.vlgmr.msra.gmra.mrb[156].mxu0 %vm5408_vm3, %v6371_v8  ;;  %12519 = vmatprep.subr.bf16.mxu0 %v18569_v46  ;;  %v17063_v25 = vpop.f32.mrb[132].mxu0  ;;  %v6381_v8 = vmul.f32 %v13179_v42, %v16658_v19  ;;  %13184 = vpow2.f32 %v5928_v31 }
 0x5ee   : > { %18705 = vst [vmem:[#allocation63_spill] sm:$0xff] %v17063_v25  ;;  %11967 = vmatprep.mubr.msk.f32.mxu0 %vm13524_vm0, %v18393_v1  ;;  %v11846_v2 = vpop.f32.mrb[133].mxu0  ;;  %v18750_v25 = vld [vmem:[#allocation55_spill] sm:$0xff] }
 0x5ef   : > { %11983 = vmatmul.mubr.msk.f32.gmra.mrb[202].mxu1 %vm5408_vm3, %v6379_v36  ;;  %v17069_v61 = vpop.f32.mrb[178].mxu1  ;;  %v17094_v2 = vpop.eup %13182 }
 0x5f0   : > { %18707 = vst [vmem:[#allocation47_spill] sm:$0xff] %v17069_v61  ;;  %11985 = vmatprep.mubr.msk.f32.mxu1 %vm13524_vm0, %v18393_v1  ;;  %v11864_v51 = vpop.f32.mrb[179].mxu1 }
 0x5f1   : > { %11968 = vmatmul.mubr.msk.f32.gmra.mrb[158].mxu0 %vm5408_vm3, %v6373_v27  ;;  %v17075_v58 = vpop.f32.mrb[134].mxu0 }
 0x5f2   : > { %18708 = vst [vmem:[#allocation40_spill] sm:$0xff] %v17075_v58  ;;  %11970 = vmatprep.mubr.msk.f32.mxu0 %vm13524_vm0, %v18393_v1  ;;  %v11849_v34 = vpop.f32.mrb[135].mxu0  ;;  %v18729_v58 = vld [vmem:[#allocation97_spill] sm:$0xff] }
 0x5f3   : > { %11986 = vmatmul.mubr.msk.f32.gmra.mrb[204].mxu1 %vm5408_vm3, %v6381_v8  ;;  %v17081_v62 = vpop.f32.mrb[180].mxu1  ;;  %v6196_v34 = vsel %vm5408_vm3, %v17094_v2, 0.0 }
 0x5f4   : > { %18709 = vst [vmem:[#allocation59_spill] sm:$0xff] %v17081_v62  ;;  %12009 = vmatprep.mubr.msk.f32.mxu1 %vm13524_vm0, %v18393_v1  ;;  %v11867_v13 = vpop.f32.mrb[181].mxu1 }
 0x5f5   : > { %11971 = vmatmul.mubr.msk.f32.gmra.mrb[160].mxu0 %vm5408_vm3, %v6375_v24  ;;  %v17086_v19 = vpop.f32.mrb[136].mxu0 }
 0x5f6   : > { %18710 = vst [vmem:[#allocation66_spill] sm:$0xff] %v17086_v19  ;;  %11994 = vmatprep.mubr.msk.f32.mxu0 %vm13524_vm0, %v18393_v1  ;;  %v11852_v36 = vpop.f32.mrb[137].mxu0  ;;  %v18728_v19 = vld [vmem:[#allocation95_spill] sm:$0xff] }
 0x5f7   : > { %v17090_v42 = vpop.f32.mrb[182].mxu1  ;;  %v17098_v40 = vpop.eup %13184 }
 0x5f8   : > { %18711 = vst [vmem:[#allocation64_spill] sm:$0xff] %v17090_v42  ;;  %v11891_v31 = vpop.f32.mrb[183].mxu1  ;;  %v6187_v36 = vsel %vm5408_vm3, %v17098_v40, 0.0 }
 0x5f9   : > { %v17092_v49 = vpop.f32.mrb[138].mxu0 }
 0x5fa   : > { %18712 = vst [vmem:[#allocation92_spill] sm:$0xff] %v17092_v49  ;;  %v11876_v39 = vpop.f32.mrb[139].mxu0 }
 0x5fb   : > { %v17096_v27 = vpop.f32.mrb[184].mxu1 }
 0x5fc   : > { %18713 = vst [vmem:[#allocation41_spill] sm:$0xff] %v17096_v27  ;;  %v11894_v51 = vpop.f32.mrb[185].mxu1 }
 0x5fd   : > { %v17100_v8 = vpop.f32.mrb[140].mxu0 }
 0x5fe   : > { %18714 = vst [vmem:[#allocation42_spill] sm:$0xff] %v17100_v8  ;;  %v11879_v24 = vpop.f32.mrb[141].mxu0 }
 0x5ff   : > { %6197 = vadd.xlane.f32.xlu0 %v6196_v34  ;;  %v17104_v13 = vpop.f32.mrb[186].mxu1 }
 0x600   : > { %18715 = vst [vmem:[#allocation60_spill] sm:$0xff] %v17104_v13  ;;  %v11897_v31 = vpop.f32.mrb[187].mxu1 }
 0x601   : > { %6188 = vadd.xlane.f32.xlu1 %v6187_v36  ;;  %v17108_v39 = vpop.f32.mrb[142].mxu0 }
 0x602   : > { %18716 = vst [vmem:[#allocation76_spill] sm:$0xff] %v17108_v39  ;;  %v11882_v57 = vpop.f32.mrb[143].mxu0 }
 0x603   : > { %v17110_v56 = vpop.f32.mrb[188].mxu1  ;;  %v18723_v57 = vld [vmem:[#allocation38_spill] sm:$0xff] }
 0x604   : > { %18717 = vst [vmem:[#allocation75_spill] sm:$0xff] %v17110_v56  ;;  %v11921_v51 = vpop.f32.mrb[189].mxu1  ;;  %v5770_v56 = vsub.f32 %v18729_v58, %v16665_v0 }
 0x605   : > { %v17112_v4 = vpop.f32.mrb[144].mxu0  ;;  %v18724_v51 = vld [vmem:[#allocation37_spill] sm:$0xff] }
 0x606   : > { %18718 = vst [vmem:[#allocation65_spill] sm:$0xff] %v17112_v4  ;;  %v11906_v5 = vpop.f32.mrb[145].mxu0 }
 0x607   : > { %v17114_v22 = vpop.f32.mrb[190].mxu1 }
 0x608   : > { %18719 = vst [vmem:[#allocation74_spill] sm:$0xff] %v17114_v22  ;;  %v11924_v24 = vpop.f32.mrb[191].mxu1  ;;  %v5773_v22 = vsub.f32 %v18728_v19, %v16660_v50  ;;  %v18730_v19 = vld [vmem:[#allocation89_spill] sm:$0xff] }
 0x609   : > { %v17116_v34 = vpop.f32.mrb[146].mxu0  ;;  %v18726_v24 = vld [vmem:[#allocation84_spill] sm:$0xff] }
 0x60a   : > { %18720 = vst [vmem:[#allocation101_spill] sm:$0xff] %v17116_v34  ;;  %v11909_v17 = vpop.f32.mrb[147].mxu0  ;;  %v5769_v39 = vsub.f32 %v18726_v24, %v16649_v29  ;;  %v5944_v49 = vmul.f32 1.442695, %v5773_v22 }
 0x60b   : > { %v17118_v20 = vpop.f32.mrb[192].mxu1 }
 0x60c   : > { %18721 = vst [vmem:[#allocation49_spill] sm:$0xff] %v17118_v20  ;;  %v11927_v13 = vpop.f32.mrb[193].mxu1 }
 0x60d   : > { %v17120_v36 = vpop.f32.mrb[148].mxu0  ;;  %v18727_v13 = vld [vmem:[#allocation91_spill] sm:$0xff] }
 0x60e   : > { %18722 = vst [vmem:[#allocation73_spill] sm:$0xff] %v17120_v36  ;;  %v11912_v31 = vpop.f32.mrb[149].mxu0  ;;  %v5766_v20 = vsub.f32 %v18727_v13, %v16654_v33 }
 0x60f   : > { %v5936_v31 = vmul.f32 1.442695, %v5769_v39  ;;  %v5938_v39 = vmul.f32 1.442695, %v5770_v56 }
 0x610   : > { %v5930_v61 = vmul.f32 1.442695, %v5766_v20 }
 0x611   : > { %13186 = vpow2.f32 %v5936_v31 }
 0x612   : > { %12877 = vrot.lane.b32.xlu1 %v18723_v57, %s13528_s1  ;;  %13188 = vpow2.f32 %v5930_v61 }
 0x613   : > { %13190 = vpow2.f32 %v5944_v49 }
 0x614   : > { %13192 = vpow2.f32 %v5938_v39 }
 0x615   : > { %12882 = vrot.lane.b32.xlu0 %v18724_v51, %s13528_s1  ;;  %13194 = vrcp.f32 %v16909_v45 }
 0x616   : > { %13196 = vrcp.f32 %v16914_v30 }
 0x617   : > { %13198 = vrcp.f32 %v16990_v21 }
 0x618   : > { %13200 = vrcp.f32 %v16992_v12  ;;  %v18738_v12 = vld [vmem:[#allocation105_spill] sm:$0xff] }
 0x619   : > { %13202 = vrcp.f32 %v17035_v9 }
 0x61a   : > { %v17126_v62 = vpop.xlane.xlu0 %5693  ;;  %13204 = vrcp.f32 %v17038_v48 }
 0x61b   : > { %18725 = vst [vmem:[#allocation78_spill] sm:$0xff] %v17126_v62  ;;  %v17144_v50 = vpop.eup %13186 }
 0x61c   : > { %v17128_v5 = vpop.xlane.xlu1 %5684  ;;  %v17146_v0 = vpop.eup %13188  ;;  %v6199_v20 = vsel %vm5415_vm4, %v17144_v50, 0.0 }
 0x61d   : > { %v17150_v58 = vpop.eup %13190  ;;  %v6190_v22 = vsel %vm5415_vm4, %v17146_v0, 0.0 }
 0x61e   : > { %v17132_v17 = vpop.xlane.xlu0 %6179  ;;  %v6211_v56 = vsel %vm5408_vm3, %v17150_v58, 0.0 }
 0x620   : > { %v17136_v36 = vpop.xlane.xlu1 %6170 }
 0x622   : > { %v12873_v34 = vpop.permute.xlu0 %12872 }
 0x623   : > { %v12875_v27 = vunpack.i.h.bf16 %v12873_v34  ;;  %v12874_v8 = vunpack.i.l.bf16 %v12873_v34 }
 0x624   : > { %v12868_v42 = vpop.permute.xlu1 %12867 }
 0x625   : > { %v12523_v29 = vpack.c.bf16 %v12875_v27, %v12874_v8  ;;  %v12870_v24 = vunpack.i.h.bf16 %v12868_v42  ;;  %v12869_v4 = vunpack.i.l.bf16 %v12868_v42  ;;  %v18731_v42 = vld [vmem:[#allocation93_spill] sm:$0xff] }
 0x627   : > { %v12520_v33 = vpack.c.bf16 %v12870_v24, %v12869_v4  ;;  %12524 = vmatpush3.bf16.msra.mxu1 %v12523_v29  ;;  %v17154_v4 = vpop.eup %13192  ;;  %v18736_v24 = vld [vmem:[#allocation99_spill] sm:$0xff] }
 0x628   : > { %12007 = vmatprep.subr.mxu1 %v18393_v1  ;;  %v6202_v61 = vsel %vm5408_vm3, %v17154_v4, 0.0 }
 0x629   : > { %12521 = vmatpush3.bf16.msra.mxu0 %v12520_v33  ;;  %v5774_v33 = vsub.f32 %v18736_v24, %v16673_v32 }
 0x62a   : > { %11992 = vmatprep.subr.mxu0 %v18393_v1 }
 0x634   : > { %6200 = vadd.xlane.f32.xlu0 %v6199_v20  ;;  %v13195_v20 = vpop.eup %13194 }
 0x635   : > { %v13197_v9 = vpop.eup %13196 }
 0x636   : > { %6191 = vadd.xlane.f32.xlu1 %v6190_v22 }
 0x638   : > { %6212 = vadd.xlane.f32.xlu0 %v6211_v56  ;;  %v5771_v56 = vsub.f32 %v18738_v12, %v16682_v54  ;;  %v18743_v12 = vld [vmem:[#allocation57_spill] sm:$0xff] }
 0x63a   : > { %6203 = vadd.xlane.f32.xlu1 %v6202_v61  ;;  %v5940_v48 = vmul.f32 1.442695, %v5771_v56  ;;  %v18744_v56 = vld [vmem:[#allocation94_spill] sm:$0xff] }
 0x64b   : > { %2363 = vrot.lane.b32.xlu1 %v18730_v19, %s13528_s1 }
 0x64e   : > { %2369 = vrot.lane.b32.xlu0 %v18731_v42, %s13528_s1 }
 0x650   : > { %v17166_v49 = vpop.f32.mrb[194].mxu1 }
 0x651   : > { %18732 = vst [vmem:[#allocation67_spill] sm:$0xff] %v17166_v49  ;;  %v11951_v27 = vpop.f32.mrb[195].mxu1  ;;  %v18741_v49 = vld [vmem:[#allocation44_spill] sm:$0xff] }
 0x652   : > { %v17169_v8 = vpop.f32.mrb[150].mxu0 }
 0x653   : > { %18733 = vst [vmem:[#allocation81_spill] sm:$0xff] %v17169_v8  ;;  %v11936_v34 = vpop.f32.mrb[151].mxu0  ;;  %v17171_v13 = vpop.xlane.xlu0 %6182 }
 0x654   : > { %v17174_v31 = vpop.f32.mrb[196].mxu1 }
 0x655   : > { %18734 = vst [vmem:[#allocation79_spill] sm:$0xff] %v17174_v31  ;;  %v17176_v45 = vpop.xlane.xlu1 %6173  ;;  %v11954_v29 = vpop.f32.mrb[197].mxu1  ;;  %v18740_v31 = vld [vmem:[#allocation68_spill] sm:$0xff] }
 0x656   : > { %v17179_v30 = vpop.f32.mrb[152].mxu0  ;;  %v5946_v29 = vmul.f32 1.442695, %v5774_v33  ;;  %v6389_v32 = vmul.f32 %v13195_v20, %v18740_v31 }
 0x657   : > { %18735 = vst [vmem:[#allocation82_spill] sm:$0xff] %v17179_v30  ;;  %v11939_v21 = vpop.f32.mrb[153].mxu0  ;;  %v17183_v39 = vpop.xlane.xlu0 %6194 }
 0x658   : > { %v17186_v22 = vpop.f32.mrb[198].mxu1  ;;  %v13199_v30 = vpop.eup %13198  ;;  %13206 = vpow2.f32 %v5946_v29 }
 0x659   : > { %18737 = vst [vmem:[#allocation85_spill] sm:$0xff] %v17186_v22  ;;  %v17190_v61 = vpop.xlane.xlu1 %6185  ;;  %v11957_v27 = vpop.f32.mrb[199].mxu1  ;;  %v6383_v22 = vmul.f32 %v13197_v9, %v18741_v49  ;;  %v6391_v31 = vmul.f32 %v13199_v30, %v16737_v6  ;;  %13208 = vpow2.f32 %v5940_v48 }
 0x65a   : > { %v17192_v34 = vpop.f32.mrb[154].mxu0  ;;  %v13201_v54 = vpop.eup %13200  ;;  %v18745_v27 = vld [vmem:[#allocation103_spill] sm:$0xff] }
 0x65b   : > { %18739 = vst [vmem:[#allocation30_spill] sm:$0xff] %v17192_v34  ;;  %v11942_v24 = vpop.f32.mrb[155].mxu0  ;;  %v2358_v21 = vpop.permute.xlu0 %2357  ;;  %v6385_v49 = vmul.f32 %v13201_v54, %v16744_v43  ;;  %v5775_v9 = vsub.f32 %v18745_v27, %v18744_v56  ;;  %v18748_v34 = vld [vmem:[#allocation61_spill] sm:$0xff] }
 0x65c   : > { %12008 = vmatpush3.msk.msra.mxu1 %vm6475_vm5, %v2358_v21  ;;  %v13203_v33 = vpop.eup %13202  ;;  %v18747_v24 = vld [vmem:[#allocation102_spill] sm:$0xff]  ;;  %v5779_v56 = vsub.f32 %v18749_v35, %v18748_v34  ;;  %v18752_v34 = vld [vmem:[#allocation128_spill] sm:$0xff] }
 0x65d   : > { %v2352_v8 = vpop.permute.xlu1 %2351  ;;  %12010 = vmatmul.mubr.msk.f32.vlgmr.msra.gmra.mrb[206].mxu1 %vm5408_vm3, %v6389_v32  ;;  %12528 = vmatprep.subr.bf16.mxu1 %v18569_v46  ;;  %v6393_v20 = vmul.f32 %v13203_v33, %v16868_v10  ;;  %v18746_v32 = vld [vmem:[#allocation43_spill] sm:$0xff]  ;;  %v5948_v54 = vmul.f32 1.442695, %v5775_v9 }
 0x65e   : > { %11993 = vmatpush3.msk.msra.mxu0 %vm6475_vm5, %v2352_v8  ;;  %12012 = vmatprep.mubr.msk.f32.mxu1 %vm13524_vm0, %v18393_v1  ;;  %v13205_v8 = vpop.eup %13204  ;;  %v5772_v21 = vsub.f32 %v18747_v24, %v18746_v32  ;;  %v18751_v32 = vld [vmem:[#allocation109_spill] sm:$0xff]  ;;  %v5956_v9 = vmul.f32 1.442695, %v5779_v56  ;;  %v18756_v56 = vld [vmem:[#allocation70_spill] sm:$0xff] }
 0x65f   : > { %11995 = vmatmul.mubr.msk.f32.vlgmr.msra.gmra.mrb[162].mxu0 %vm5408_vm3, %v6383_v22  ;;  %12525 = vmatprep.subr.bf16.mxu0 %v18569_v46  ;;  %v6387_v6 = vmul.f32 %v13205_v8, %v16870_v14  ;;  %v18742_v22 = vld [vmem:[#allocation56_spill] sm:$0xff]  ;;  %13210 = vpow2.f32 %v5948_v54  ;;  %v5776_v24 = vsub.f32 %v18751_v32, %v18750_v25 }
 0x660   : > { %11997 = vmatprep.mubr.msk.f32.mxu0 %vm13524_vm0, %v18393_v1  ;;  %v5942_v8 = vmul.f32 1.442695, %v5772_v21 }
 0x661   : > { %12013 = vmatmul.mubr.msk.f32.gmra.mrb[208].mxu1 %vm5408_vm3, %v6391_v31  ;;  %v5950_v21 = vmul.f32 1.442695, %v5776_v24 }
 0x662   : > { %12015 = vmatprep.mubr.msk.f32.mxu1 %vm13524_vm0, %v18393_v1  ;;  %v17222_v43 = vpop.eup %13206  ;;  %13212 = vpow2.f32 %v5942_v8  ;;  %v18754_v8 = vld [vmem:[#allocation129_spill] sm:$0xff] }
 0x663   : > { %11998 = vmatmul.mubr.msk.f32.gmra.mrb[164].mxu0 %vm5408_vm3, %v6385_v49  ;;  %v17224_v30 = vpop.eup %13208  ;;  %v6214_v10 = vsel %vm5408_vm3, %v17222_v43, 0.0  ;;  %13214 = vpow2.f32 %v5956_v9  ;;  %v18759_v9 = vld [vmem:[#allocation83_spill] sm:$0xff] }
 0x664   : > { %12000 = vmatprep.mubr.msk.f32.mxu0 %vm13524_vm0, %v18393_v1  ;;  %v6205_v14 = vsel %vm5408_vm3, %v17224_v30, 0.0  ;;  %13216 = vpow2.f32 %v5950_v21 }
 0x665   : > { %12016 = vmatmul.mubr.msk.f32.gmra.mrb[210].mxu1 %vm5408_vm3, %v6393_v20  ;;  %13218 = vrcp.f32 %v17041_v3 }
 0x666   : > { %12039 = vmatprep.mubr.msk.f32.mxu1 %vm13524_vm0, %v18393_v1  ;;  %13220 = vrcp.f32 %v17044_v44 }
 0x667   : > { %12001 = vmatmul.mubr.msk.f32.gmra.mrb[166].mxu0 %vm5408_vm3, %v6387_v6  ;;  %13222 = vrcp.f32 %v17132_v17 }
 0x668   : > { %12024 = vmatprep.mubr.msk.f32.mxu0 %vm13524_vm0, %v18393_v1  ;;  %13224 = vrcp.f32 %v17136_v36 }
 0x669   : > { %13226 = vrcp.f32 %v17171_v13 }
 0x66a   : > { %13228 = vrcp.f32 %v17176_v45  ;;  %v18767_v45 = vld [vmem:[#allocation104_spill] sm:$0xff] }
 0x66d   : > { %6215 = vadd.xlane.f32.xlu0 %v6214_v10 }
 0x66f   : > { %6206 = vadd.xlane.f32.xlu1 %v6205_v14 }
 0x680   : > { %12887 = vrot.lane.b32.xlu1 %v18742_v22, %s13528_s1 }
 0x683   : > { %12892 = vrot.lane.b32.xlu0 %v18743_v12, %s13528_s1 }
 0x68c   : > { %v17236_v29 = vpop.xlane.xlu0 %6197 }
 0x68e   : > { %v17240_v48 = vpop.xlane.xlu1 %6188 }
 0x690   : > { %v12883_v31 = vpop.permute.xlu0 %12882 }
 0x691   : > { %v12885_v33 = vunpack.i.h.bf16 %v12883_v31  ;;  %v12884_v49 = vunpack.i.l.bf16 %v12883_v31  ;;  %v17248_v31 = vpop.eup %13210 }
 0x692   : > { %v12878_v20 = vpop.permute.xlu1 %12877  ;;  %v17250_v54 = vpop.eup %13212  ;;  %v6217_v35 = vsel %vm5415_vm4, %v17248_v31, 0.0 }
 0x693   : > { %v12529_v6 = vpack.c.bf16 %v12885_v33, %v12884_v49  ;;  %v12880_v10 = vunpack.i.h.bf16 %v12878_v20  ;;  %v12879_v14 = vunpack.i.l.bf16 %v12878_v20  ;;  %v6208_v25 = vsel %vm5415_vm4, %v17250_v54, 0.0  ;;  %v17258_v49 = vpop.eup %13214 }
 0x694   : > { %v5695_v33 = vsel %vm5415_vm4, %v18752_v34, -inf  ;;  %18753 = vst [vmem:[#allocation21_spill] sm:$0xff] %v17258_v49  ;;  %v5686_v20 = vsel %vm5415_vm4, %v18754_v8, -inf }
 0x695   : > { %v12526_v27 = vpack.c.bf16 %v12880_v10, %v12879_v14  ;;  %12530 = vmatpush3.bf16.msra.mxu1 %v12529_v6  ;;  %v17262_v6 = vpop.eup %13216  ;;  %v6229_v10 = vsel %vm5408_vm3, %v17258_v49, 0.0 }
 0x696   : > { %12037 = vmatprep.subr.mxu1 %v18393_v1  ;;  %18755 = vst [vmem:[#allocation29_spill] sm:$0xff] %v17262_v6  ;;  %v6220_v14 = vsel %vm5408_vm3, %v17262_v6, 0.0  ;;  %v18764_v6 = vld [vmem:[#allocation71_spill] sm:$0xff] }
 0x697   : > { %12527 = vmatpush3.bf16.msra.mxu0 %v12526_v27 }
 0x698   : > { %12022 = vmatprep.subr.mxu0 %v18393_v1 }
 0x6a2   : > { %6218 = vadd.xlane.f32.xlu0 %v6217_v35 }
 0x6a4   : > { %6209 = vadd.xlane.f32.xlu1 %v6208_v25 }
 0x6a6   : > { %5696 = vmax.xlane.f32.xlu0 %v5695_v33 }
 0x6a8   : > { %5687 = vmax.xlane.f32.xlu1 %v5686_v20 }
 0x6aa   : > { %6230 = vadd.xlane.f32.xlu0 %v6229_v10  ;;  %v13219_v10 = vpop.eup %13218 }
 0x6ab   : > { %v6401_v13 = vmul.f32 %v13219_v10, %v16874_v37 }
 0x6ac   : > { %6221 = vadd.xlane.f32.xlu1 %v6220_v14 }
 0x6bd   : > { %2375 = vrot.lane.b32.xlu1 %v18756_v56, %s13528_s1 }
 0x6be   : > { %v17272_v27 = vpop.f32.mrb[200].mxu1 }
 0x6bf   : > { %18757 = vst [vmem:[#allocation90_spill] sm:$0xff] %v17272_v27  ;;  %v11981_v32 = vpop.f32.mrb[201].mxu1 }
 0x6c0   : > { %v17275_v24 = vpop.f32.mrb[156].mxu0  ;;  %2381 = vrot.lane.b32.xlu0 %v18759_v9, %s13528_s1 }
 0x6c1   : > { %18758 = vst [vmem:[#allocation52_spill] sm:$0xff] %v17275_v24  ;;  %v11966_v21 = vpop.f32.mrb[157].mxu0  ;;  %v17279_v35 = vpop.xlane.xlu0 %6200  ;;  %v18766_v24 = vld [vmem:[#allocation46_spill] sm:$0xff] }
 0x6c2   : > { %v17282_v3 = vpop.f32.mrb[202].mxu1  ;;  %v13221_v21 = vpop.eup %13220  ;;  %v5777_v23 = vsub.f32 %v18767_v45, %v18766_v24 }
 0x6c3   : > { %18760 = vst [vmem:[#allocation24_spill] sm:$0xff] %v17282_v3  ;;  %v17284_v25 = vpop.xlane.xlu1 %6191  ;;  %v11984_v44 = vpop.f32.mrb[203].mxu1 }
 0x6c4   : > { %v17287_v33 = vpop.f32.mrb[158].mxu0  ;;  %v18765_v44 = vld [vmem:[#allocation110_spill] sm:$0xff]  ;;  %v13223_v27 = vpop.eup %13222 }
 0x6c5   : > { %18761 = vst [vmem:[#allocation87_spill] sm:$0xff] %v17287_v33  ;;  %v11969_v17 = vpop.f32.mrb[159].mxu0  ;;  %v17289_v20 = vpop.xlane.xlu0 %6212  ;;  %v5780_v49 = vsub.f32 %v18765_v44, %v18764_v6  ;;  %v6403_v6 = vmul.f32 %v13223_v27, %v16960_v63 }
 0x6c6   : > { %v17292_v14 = vpop.f32.mrb[204].mxu1 }
 0x6c7   : > { %18762 = vst [vmem:[#allocation32_spill] sm:$0xff] %v17292_v14  ;;  %v17294_v32 = vpop.xlane.xlu1 %6203  ;;  %v11987_v36 = vpop.f32.mrb[205].mxu1  ;;  %v6395_v14 = vmul.f32 %v13221_v21, %v16878_v38  ;;  %v5958_v37 = vmul.f32 1.442695, %v5780_v49  ;;  %v5952_v38 = vmul.f32 1.442695, %v5777_v23 }
 0x6c8   : > { %v17296_v3 = vpop.f32.mrb[160].mxu0  ;;  %v13225_v36 = vpop.eup %13224  ;;  %v18770_v21 = vld [vmem:[#allocation113_spill] sm:$0xff] }
 0x6c9   : > { %18763 = vst [vmem:[#allocation23_spill] sm:$0xff] %v17296_v3  ;;  %v11972_v33 = vpop.f32.mrb[161].mxu0  ;;  %v2370_v17 = vpop.permute.xlu0 %2369  ;;  %13230 = vpow2.f32 %v5958_v37  ;;  %v18772_v37 = vld [vmem:[#allocation114_spill] sm:$0xff] }
 0x6ca   : > { %12038 = vmatpush3.msk.msra.mxu1 %vm6475_vm5, %v2370_v17  ;;  %v13227_v24 = vpop.eup %13226  ;;  %v6397_v33 = vmul.f32 %v13225_v36, %v16964_v15  ;;  %13232 = vpow2.f32 %v5952_v38  ;;  %v18771_v36 = vld [vmem:[#allocation48_spill] sm:$0xff]  ;;  %v18775_v3 = vld [vmem:[#allocation26_spill] sm:$0xff] }
 0x6cb   : > { %v2364_v62 = vpop.permute.xlu1 %2363  ;;  %12040 = vmatmul.mubr.msk.f32.vlgmr.msra.gmra.mrb[212].mxu1 %vm5408_vm3, %v6401_v13  ;;  %12534 = vmatprep.subr.bf16.mxu1 %v18569_v46  ;;  %v6405_v63 = vmul.f32 %v13227_v24, %v17012_v55 }
 0x6cc   : > { %12023 = vmatpush3.msk.msra.mxu0 %vm6475_vm5, %v2364_v62  ;;  %12042 = vmatprep.mubr.msk.f32.mxu1 %vm13524_vm0, %v18393_v1  ;;  %v13229_v62 = vpop.eup %13228 }
 0x6cd   : > { %12025 = vmatmul.mubr.msk.f32.vlgmr.msra.gmra.mrb[168].mxu0 %vm5408_vm3, %v6395_v14  ;;  %12531 = vmatprep.subr.bf16.mxu0 %v18569_v46  ;;  %v6399_v49 = vmul.f32 %v13229_v62, %v17014_v28  ;;  %v18769_v14 = vld [vmem:[#allocation54_spill] sm:$0xff] }
 0x6ce   : > { %12027 = vmatprep.mubr.msk.f32.mxu0 %vm13524_vm0, %v18393_v1  ;;  %v5781_v44 = vsub.f32 %v18770_v21, %v18769_v14 }
 0x6cf   : > { %12043 = vmatmul.mubr.msk.f32.gmra.mrb[214].mxu1 %vm5408_vm3, %v6403_v6  ;;  %v5778_v6 = vsub.f32 %v18772_v37, %v18771_v36 }
 0x6d0   : > { %12045 = vmatprep.mubr.msk.f32.mxu1 %vm13524_vm0, %v18393_v1  ;;  %v5960_v62 = vmul.f32 1.442695, %v5781_v44 }
 0x6d1   : > { %12028 = vmatmul.mubr.msk.f32.gmra.mrb[170].mxu0 %vm5408_vm3, %v6397_v33 }
 0x6d2   : > { %12030 = vmatprep.mubr.msk.f32.mxu0 %vm13524_vm0, %v18393_v1  ;;  %13234 = vpow2.f32 %v5960_v62 }
 0x6d3   : > { %12046 = vmatmul.mubr.msk.f32.gmra.mrb[216].mxu1 %vm5408_vm3, %v6405_v63  ;;  %v17330_v23 = vpop.eup %13230  ;;  %v18773_v63 = vld [vmem:[#allocation34_spill] sm:$0xff] }
 0x6d4   : > { %12069 = vmatprep.mubr.msk.f32.mxu1 %vm13524_vm0, %v18393_v1  ;;  %v17332_v15 = vpop.eup %13232  ;;  %v6232_v55 = vsel %vm5408_vm3, %v17330_v23, 0.0 }
 0x6d5   : > { %12031 = vmatmul.mubr.msk.f32.gmra.mrb[172].mxu0 %vm5408_vm3, %v6399_v49  ;;  %18768 = vst [vmem:[#allocation31_spill] sm:$0xff] %v17332_v15  ;;  %v6223_v28 = vsel %vm5408_vm3, %v17332_v15, 0.0  ;;  %v18776_v15 = vld [vmem:[#allocation117_spill] sm:$0xff] }
 0x6d6   : > { %12054 = vmatprep.mubr.msk.f32.mxu0 %vm13524_vm0, %v18393_v1  ;;  %v5782_v14 = vsub.f32 %v18776_v15, %v18775_v3 }
 0x6dc   : > { %v17356_v44 = vpop.eup %13234 }
 0x6df   : > { %6233 = vadd.xlane.f32.xlu0 %v6232_v55 }
 0x6e1   : > { %6224 = vadd.xlane.f32.xlu1 %v6223_v28  ;;  %v5954_v28 = vmul.f32 1.442695, %v5778_v6 }
 0x6e3   : > { %13236 = vpow2.f32 %v5954_v28 }
 0x6f2   : > { %12897 = vrot.lane.b32.xlu1 %v18657_v16, %s13529_s17 }
 0x6f5   : > { %12902 = vrot.lane.b32.xlu0 %v18658_v18, %s13529_s17  ;;  %v18774_v18 = vld [vmem:[#allocation115_spill] sm:$0xff] }
 0x6f6   : > { %v5785_v49 = vsub.f32 %v18774_v18, %v18773_v63 }
 0x6f8   : > { %v5968_v21 = vmul.f32 1.442695, %v5785_v49  ;;  %v18778_v49 = vld [vmem:[#allocation33_spill] sm:$0xff] }
 0x6fa   : > { %v17342_v27 = vpop.xlane.xlu0 %6215  ;;  %13238 = vpow2.f32 %v5968_v21 }
 0x6fc   : > { %v17344_v10 = vpop.xlane.xlu1 %6206 }
 0x6fe   : > { %v12893_v13 = vpop.permute.xlu0 %12892 }
 0x6ff   : > { %v12895_v17 = vunpack.i.h.bf16 %v12893_v13  ;;  %v12894_v45 = vunpack.i.l.bf16 %v12893_v13  ;;  %v5962_v13 = vmul.f32 1.442695, %v5782_v14 }
 0x700   : > { %v12888_v24 = vpop.permute.xlu1 %12887 }
 0x701   : > { %v12535_v38 = vpack.c.bf16 %v12895_v17, %v12894_v45  ;;  %v12890_v33 = vunpack.i.h.bf16 %v12888_v24  ;;  %v12889_v16 = vunpack.i.l.bf16 %v12888_v24  ;;  %13240 = vpow2.f32 %v5962_v13  ;;  %v17358_v17 = vpop.eup %13236 }
 0x702   : > { %v6235_v45 = vsel %vm5415_vm4, %v17356_v44, 0.0  ;;  %v6226_v3 = vsel %vm5415_vm4, %v17358_v17, 0.0  ;;  %13242 = vrcp.f32 %v17183_v39 }
 0x703   : > { %v12532_v55 = vpack.c.bf16 %v12890_v33, %v12889_v16  ;;  %12536 = vmatpush3.bf16.msra.mxu1 %v12535_v38  ;;  %13244 = vrcp.f32 %v17190_v61 }
 0x704   : > { %12067 = vmatprep.subr.mxu1 %v18393_v1  ;;  %v17362_v36 = vpop.eup %13238  ;;  %13246 = vrcp.f32 %v17236_v29 }
 0x705   : > { %12533 = vmatpush3.bf16.msra.mxu0 %v12532_v55  ;;  %v6247_v37 = vsel %vm5408_vm3, %v17362_v36, 0.0  ;;  %13248 = vrcp.f32 %v17240_v48  ;;  %v18779_v55 = vld [vmem:[#allocation119_spill] sm:$0xff]  ;;  %v18781_v48 = vld [vmem:[#allocation25_spill] sm:$0xff] }
 0x706   : > { %12052 = vmatprep.subr.mxu0 %v18393_v1  ;;  %13250 = vrcp.f32 %v17279_v35  ;;  %v5786_v28 = vsub.f32 %v18779_v55, %v18778_v49 }
 0x707   : > { %13252 = vrcp.f32 %v17284_v25 }
 0x70b   : > { %v17366_v15 = vpop.eup %13240 }
 0x70c   : > { %v6238_v6 = vsel %vm5408_vm3, %v17366_v15, 0.0  ;;  %v13243_v21 = vpop.eup %13242 }
 0x70d   : > { %v13245_v35 = vpop.eup %13244 }
 0x714   : > { %6236 = vadd.xlane.f32.xlu0 %v6235_v45  ;;  %v18782_v45 = vld [vmem:[#allocation120_spill] sm:$0xff] }
 0x716   : > { %6227 = vadd.xlane.f32.xlu1 %v6226_v3  ;;  %v5783_v3 = vsub.f32 %v18782_v45, %v18781_v48  ;;  %v18784_v45 = vld [vmem:[#allocation77_spill] sm:$0xff] }
 0x718   : > { %6248 = vadd.xlane.f32.xlu0 %v6247_v37  ;;  %v5964_v25 = vmul.f32 1.442695, %v5783_v3  ;;  %v18785_v3 = vld [vmem:[#allocation121_spill] sm:$0xff] }
 0x71a   : > { %6239 = vadd.xlane.f32.xlu1 %v6238_v6 }
 0x72b   : > { %2403 = vrot.lane.b32.xlu1 %v18667_v53, %s13529_s17 }
 0x72e   : > { %2409 = vrot.lane.b32.xlu0 %v18668_v59, %s13529_s17 }
 0x72f   : > { %v17377_v24 = vpop.xlane.xlu0 %6218 }
 0x730   : > { %v17380_v38 = vpop.f32.mrb[206].mxu1 }
 0x731   : > { %v17382_v33 = vpop.xlane.xlu1 %6209  ;;  %v12011_v16 = vpop.f32.mrb[207].mxu1 }
 0x732   : > { %v17385_v62 = vpop.f32.mrb[162].mxu0 }
 0x733   : > { %v11996_v63 = vpop.f32.mrb[163].mxu0  ;;  %v17387_v53 = vpop.xlane.xlu0 %5696 }
 0x734   : > { %v17390_v39 = vpop.f32.mrb[208].mxu1  ;;  %v5970_v63 = vmul.f32 1.442695, %v5786_v28 }
 0x735   : > { %18777 = vst [vmem:[#allocation38_spill] sm:$0xff] %v17390_v39  ;;  %v17392_v59 = vpop.xlane.xlu1 %5687  ;;  %v12014_v18 = vpop.f32.mrb[209].mxu1 }
 0x736   : > { %v17395_v61 = vpop.f32.mrb[164].mxu0  ;;  %v6413_v18 = vmul.f32 %v13243_v21, %v17018_v47  ;;  %13254 = vpow2.f32 %v5970_v63  ;;  %v18786_v63 = vld [vmem:[#allocation50_spill] sm:$0xff] }
 0x737   : > { %v11999_v29 = vpop.f32.mrb[165].mxu0  ;;  %v17399_v14 = vpop.xlane.xlu0 %6230  ;;  %13256 = vpow2.f32 %v5964_v25  ;;  %v18788_v25 = vld [vmem:[#allocation22_spill] sm:$0xff] }
 0x738   : > { %v17402_v13 = vpop.f32.mrb[210].mxu1  ;;  %v13247_v29 = vpop.eup %13246 }
 0x739   : > { %18780 = vst [vmem:[#allocation37_spill] sm:$0xff] %v17402_v13  ;;  %v17406_v37 = vpop.xlane.xlu1 %6221  ;;  %v12017_v6 = vpop.f32.mrb[211].mxu1  ;;  %v6407_v13 = vmul.f32 %v13245_v35, %v17022_v52  ;;  %v6415_v47 = vmul.f32 %v13247_v29, %v17094_v2 }
 0x73a   : > { %v17408_v16 = vpop.f32.mrb[166].mxu0  ;;  %v13249_v48 = vpop.eup %13248  ;;  %v5787_v6 = vsub.f32 %v18785_v3, %v18784_v45 }
 0x73b   : > { %18783 = vst [vmem:[#allocation84_spill] sm:$0xff] %v17408_v16  ;;  %v12002_v49 = vpop.f32.mrb[167].mxu0  ;;  %v2382_v55 = vpop.permute.xlu0 %2381  ;;  %v6409_v52 = vmul.f32 %v13249_v48, %v17098_v40  ;;  %v18789_v48 = vld [vmem:[#allocation125_spill] sm:$0xff] }
 0x73c   : > { %12068 = vmatpush3.msk.msra.mxu1 %vm6475_vm5, %v2382_v55  ;;  %v13251_v28 = vpop.eup %13250  ;;  %v5972_v29 = vmul.f32 1.442695, %v5787_v6 }
 0x73d   : > { %v2376_v39 = vpop.permute.xlu1 %2375  ;;  %12070 = vmatmul.mubr.msk.f32.vlgmr.msra.gmra.mrb[218].mxu1 %vm5408_vm3, %v6413_v18  ;;  %12540 = vmatprep.subr.bf16.mxu1 %v18569_v46  ;;  %v6417_v21 = vmul.f32 %v13251_v28, %v17144_v50  ;;  %v18787_v18 = vld [vmem:[#allocation123_spill] sm:$0xff] }
 0x73e   : > { %12053 = vmatpush3.msk.msra.mxu0 %vm6475_vm5, %v2376_v39  ;;  %12072 = vmatprep.mubr.msk.f32.mxu1 %vm13524_vm0, %v18393_v1  ;;  %v13253_v39 = vpop.eup %13252  ;;  %v5784_v49 = vsub.f32 %v18787_v18, %v18786_v63  ;;  %13258 = vpow2.f32 %v5972_v29 }
 0x73f   : > { %12055 = vmatmul.mubr.msk.f32.vlgmr.msra.gmra.mrb[174].mxu0 %vm5408_vm3, %v6407_v13  ;;  %12537 = vmatprep.subr.bf16.mxu0 %v18569_v46  ;;  %v6411_v2 = vmul.f32 %v13253_v39, %v17146_v0 }
 0x740   : > { %12057 = vmatprep.mubr.msk.f32.mxu0 %vm13524_vm0, %v18393_v1  ;;  %v17438_v40 = vpop.eup %13254  ;;  %v5966_v39 = vmul.f32 1.442695, %v5784_v49 }
 0x741   : > { %12073 = vmatmul.mubr.msk.f32.gmra.mrb[220].mxu1 %vm5408_vm3, %v6415_v47  ;;  %v17440_v13 = vpop.eup %13256  ;;  %v6250_v50 = vsel %vm5408_vm3, %v17438_v40, 0.0  ;;  %v5791_v47 = vsub.f32 %v18789_v48, %v18788_v25 }
 0x742   : > { %12075 = vmatprep.mubr.msk.f32.mxu1 %vm13524_vm0, %v18393_v1  ;;  %v6241_v0 = vsel %vm5408_vm3, %v17440_v13, 0.0  ;;  %13260 = vpow2.f32 %v5966_v39 }
 0x743   : > { %12058 = vmatmul.mubr.msk.f32.gmra.mrb[176].mxu0 %vm5408_vm3, %v6409_v52  ;;  %v5980_v16 = vmul.f32 1.442695, %v5791_v47 }
 0x744   : > { %12060 = vmatprep.mubr.msk.f32.mxu0 %vm13524_vm0, %v18393_v1 }
 0x745   : > { %12076 = vmatmul.mubr.msk.f32.gmra.mrb[222].mxu1 %vm5408_vm3, %v6417_v21  ;;  %v18790_v21 = vld [vmem:[#allocation51_spill] sm:$0xff]  ;;  %13262 = vpow2.f32 %v5980_v16 }
 0x746   : > { %12099 = vmatprep.mubr.msk.f32.mxu1 %vm13524_vm0, %v18393_v1 }
 0x747   : > { %12061 = vmatmul.mubr.msk.f32.gmra.mrb[178].mxu0 %vm5408_vm3, %v6411_v2 }
 0x748   : > { %12084 = vmatprep.mubr.msk.f32.mxu0 %vm13524_vm0, %v18393_v1  ;;  %v17464_v18 = vpop.eup %13258 }
 0x749   : > { %v6253_v25 = vsel %vm5415_vm4, %v17464_v18, 0.0 }
 0x74c   : > { %v17466_v49 = vpop.eup %13260 }
 0x74d   : > { %6251 = vadd.xlane.f32.xlu0 %v6250_v50  ;;  %v6244_v48 = vsel %vm5415_vm4, %v17466_v49, 0.0 }
 0x74f   : > { %6242 = vadd.xlane.f32.xlu1 %v6241_v0  ;;  %v17470_v29 = vpop.eup %13262 }
 0x750   : > { %v6265_v16 = vsel %vm5408_vm3, %v17470_v29, 0.0 }
 0x760   : > { %12907 = vrot.lane.b32.xlu1 %v18686_v41, %s13529_s17 }
 0x763   : > { %12912 = vrot.lane.b32.xlu0 %v18687_v60, %s13529_s17  ;;  %v18791_v60 = vld [vmem:[#allocation126_spill] sm:$0xff] }
 0x764   : > { %v5788_v2 = vsub.f32 %v18791_v60, %v18790_v21 }
 0x766   : > { %v5974_v6 = vmul.f32 1.442695, %v5788_v2 }
 0x768   : > { %13264 = vpow2.f32 %v5974_v6 }
 0x769   : > { %13266 = vrcp.f32 %v17289_v20 }
 0x76a   : > { %13268 = vrcp.f32 %v17294_v32 }
 0x76b   : > { %13270 = vrcp.f32 %v17342_v27 }
 0x76c   : > { %v17452_v35 = vpop.xlane.xlu0 %6233  ;;  %13272 = vrcp.f32 %v17344_v10 }
 0x76d   : > { %13274 = vrcp.f32 %v17377_v24 }
 0x76e   : > { %v17456_v55 = vpop.xlane.xlu1 %6224  ;;  %13276 = vrcp.f32 %v17382_v33 }
 0x770   : > { %v12903_v28 = vpop.permute.xlu0 %12902 }
 0x771   : > { %v12905_v52 = vunpack.i.h.bf16 %v12903_v28  ;;  %v12904_v41 = vunpack.i.l.bf16 %v12903_v28 }
 0x772   : > { %v12898_v50 = vpop.permute.xlu1 %12897  ;;  %v17474_v47 = vpop.eup %13264 }
 0x773   : > { %v12541_v0 = vpack.c.bf16 %v12905_v52, %v12904_v41  ;;  %v12900_v45 = vunpack.i.h.bf16 %v12898_v50  ;;  %v12899_v3 = vunpack.i.l.bf16 %v12898_v50  ;;  %v6256_v28 = vsel %vm5408_vm3, %v17474_v47, 0.0  ;;  %v13267_v21 = vpop.eup %13266 }
 0x774   : > { %v13269_v24 = vpop.eup %13268 }
 0x775   : > { %v12538_v63 = vpack.c.bf16 %v12900_v45, %v12899_v3  ;;  %12542 = vmatpush3.bf16.msra.mxu1 %v12541_v0  ;;  %v13271_v45 = vpop.eup %13270  ;;  %v6419_v33 = vmul.f32 %v13269_v24, %v17154_v4 }
 0x776   : > { %12097 = vmatprep.subr.mxu1 %v18393_v1 }
 0x777   : > { %12539 = vmatpush3.bf16.msra.mxu0 %v12538_v63  ;;  %v13273_v63 = vpop.eup %13272 }
 0x778   : > { %12082 = vmatprep.subr.mxu0 %v18393_v1  ;;  %v6421_v4 = vmul.f32 %v13273_v63, %v17224_v30  ;;  %v18794_v63 = vld [vmem:[#allocation63_spill] sm:$0xff] }
 0x782   : > { %6254 = vadd.xlane.f32.xlu0 %v6253_v25  ;;  %v5790_v25 = vsub.f32 %v18754_v8, %v17392_v59 }
 0x784   : > { %6245 = vadd.xlane.f32.xlu1 %v6244_v48 }
 0x786   : > { %6266 = vadd.xlane.f32.xlu0 %v6265_v16 }
 0x788   : > { %6257 = vadd.xlane.f32.xlu1 %v6256_v28 }
 0x799   : > { %2415 = vrot.lane.b32.xlu1 %v18570_v7, %s13529_s17 }
 0x79c   : > { %2421 = vrot.lane.b32.xlu0 %v18698_v26, %s13529_s17 }
 0x79d   : > { %12917 = vrot.lane.b32.xlu1 %v18723_v57, %s13529_s17 }
 0x79e   : > { %v17488_v52 = vpop.f32.mrb[212].mxu1 }
 0x79f   : > { %v12041_v41 = vpop.f32.mrb[213].mxu1 }
 0x7a0   : > { %v17491_v39 = vpop.f32.mrb[168].mxu0  ;;  %2427 = vrot.lane.b32.xlu0 %v18730_v19, %s13529_s17 }
 0x7a1   : > { %12922 = vrot.lane.b32.xlu1 %v18724_v51, %s13529_s17  ;;  %v12026_v7 = vpop.f32.mrb[169].mxu0  ;;  %v17497_v26 = vpop.xlane.xlu0 %6236 }
 0x7a2   : > { %v17500_v57 = vpop.f32.mrb[214].mxu1 }
 0x7a3   : > { %v17502_v20 = vpop.xlane.xlu1 %6227  ;;  %v12044_v32 = vpop.f32.mrb[215].mxu1 }
 0x7a4   : > { %v17505_v27 = vpop.f32.mrb[170].mxu0  ;;  %12927 = vrot.lane.b32.xlu0 %v18742_v22, %s13529_s17  ;;  %v6425_v22 = vmul.f32 %v13267_v21, %v17150_v58  ;;  %v6427_v58 = vmul.f32 %v13271_v45, %v17222_v43 }
 0x7a5   : > { %2433 = vrot.lane.b32.xlu1 %v18731_v42, %s13529_s17  ;;  %v12029_v51 = vpop.f32.mrb[171].mxu0  ;;  %v17511_v19 = vpop.xlane.xlu0 %6248 }
 0x7a6   : > { %v17514_v10 = vpop.f32.mrb[216].mxu1 }
 0x7a7   : > { %v17516_v60 = vpop.xlane.xlu1 %6239  ;;  %v12047_v2 = vpop.f32.mrb[217].mxu1 }
 0x7a8   : > { %v17518_v50 = vpop.f32.mrb[172].mxu0  ;;  %2439 = vrot.lane.b32.xlu0 %v18756_v56, %s13529_s17 }
 0x7a9   : > { %12932 = vrot.lane.b32.xlu1 %v18743_v12, %s13529_s17  ;;  %v12032_v42 = vpop.f32.mrb[173].mxu0  ;;  %v2410_v0 = vpop.permute.xlu0 %2409 }
 0x7aa   : > { %12098 = vmatpush3.msk.msra.mxu1 %vm6475_vm5, %v2410_v0  ;;  %v13275_v12 = vpop.eup %13274 }
 0x7ab   : > { %v2404_v3 = vpop.permute.xlu1 %2403  ;;  %12100 = vmatmul.mubr.msk.f32.vlgmr.msra.gmra.mrb[224].mxu1 %vm5408_vm3, %v6425_v22  ;;  %12546 = vmatprep.subr.bf16.mxu1 %v18569_v46  ;;  %v13277_v56 = vpop.eup %13276  ;;  %v6429_v43 = vmul.f32 %v13275_v12, %v17248_v31  ;;  %v18792_v31 = vld [vmem:[#allocation78_spill] sm:$0xff]  ;;  %v18795_v12 = vld [vmem:[#allocation124_spill] sm:$0xff] }
 0x7ac   : > { %12083 = vmatpush3.msk.msra.mxu0 %vm6475_vm5, %v2404_v3  ;;  %12102 = vmatprep.mubr.msk.f32.mxu1 %vm13524_vm0, %v18393_v1  ;;  %v6423_v6 = vmul.f32 %v13277_v56, %v17250_v54  ;;  %v18793_v54 = vld [vmem:[#allocation127_spill] sm:$0xff]  ;;  %v18797_v56 = vld [vmem:[#allocation65_spill] sm:$0xff] }
 0x7ad   : > { %2445 = vrot.lane.b32.xlu1 %v18759_v9, %s13529_s17  ;;  %12085 = vmatmul.mubr.msk.f32.vlgmr.msra.gmra.mrb[180].mxu0 %vm5408_vm3, %v6419_v33  ;;  %v5789_v9 = vsub.f32 %v16192_v11, %v17128_v5  ;;  %v5793_v11 = vsub.f32 %v18752_v34, %v17387_v53  ;;  %v5978_v5 = vmul.f32 1.442695, %v5790_v25  ;;  %v5792_v48 = vsub.f32 %v18793_v54, %v18792_v31  ;;  %v18802_v25 = vld [vmem:[#allocation67_spill] sm:$0xff] }
 0x7ae   : > { %12087 = vmatprep.mubr.msk.f32.mxu0 %vm13524_vm0, %v18393_v1  ;;  %12543 = vmatprep.subr.bf16.mxu0 %v18569_v46 }
 0x7af   : > { %12103 = vmatmul.mubr.msk.f32.gmra.mrb[226].mxu1 %vm5408_vm3, %v6427_v58  ;;  %v5976_v30 = vmul.f32 1.442695, %v5789_v9  ;;  %v5984_v16 = vmul.f32 1.442695, %v5793_v11  ;;  %v5982_v28 = vmul.f32 1.442695, %v5792_v48 }
 0x7b0   : > { %12105 = vmatprep.mubr.msk.f32.mxu1 %vm13524_vm0, %v18393_v1  ;;  %v18798_v9 = vld [vmem:[#allocation64_spill] sm:$0xff]  ;;  %v18803_v11 = vld [vmem:[#allocation90_spill] sm:$0xff] }
 0x7b1   : > { %12088 = vmatmul.mubr.msk.f32.gmra.mrb[182].mxu0 %vm5408_vm3, %v6421_v4  ;;  %13278 = vpow2.f32 %v5976_v30  ;;  %v18796_v4 = vld [vmem:[#allocation92_spill] sm:$0xff] }
 0x7b2   : > { %12090 = vmatprep.mubr.msk.f32.mxu0 %vm13524_vm0, %v18393_v1  ;;  %13280 = vpow2.f32 %v5978_v5  ;;  %v18801_v30 = vld [vmem:[#allocation52_spill] sm:$0xff] }
 0x7b3   : > { %12106 = vmatmul.mubr.msk.f32.gmra.mrb[228].mxu1 %vm5408_vm3, %v6429_v43  ;;  %13282 = vpow2.f32 %v5984_v16  ;;  %v18799_v43 = vld [vmem:[#allocation81_spill] sm:$0xff] }
 0x7b4   : > { %12129 = vmatprep.mubr.msk.f32.mxu1 %vm13524_vm0, %v18393_v1  ;;  %13284 = vpow2.f32 %v5982_v28  ;;  %v18804_v28 = vld [vmem:[#allocation21_spill] sm:$0xff] }
 0x7b5   : > { %12091 = vmatmul.mubr.msk.f32.gmra.mrb[184].mxu0 %vm5408_vm3, %v6423_v6  ;;  %v18800_v6 = vld [vmem:[#allocation75_spill] sm:$0xff]  ;;  %13286 = vrcp.f32 %v17399_v14 }
 0x7b6   : > { %12114 = vmatprep.mubr.msk.f32.mxu0 %vm13524_vm0, %v18393_v1  ;;  %13288 = vrcp.f32 %v17406_v37 }
 0x7b7   : > { %13290 = vrcp.f32 %v17452_v35 }
 0x7b8   : > { %13292 = vrcp.f32 %v17456_v55 }
 0x7b9   : > { %13294 = vrcp.f32 %v17497_v26 }
 0x7ba   : > { %13296 = vrcp.f32 %v17502_v20 }
 0x7bb   : > { %v17562_v41 = vpop.eup %13278  ;;  %13298 = vrcp.f32 %v17516_v60 }
 0x7bc   : > { %v6259_v8 = vsel %vm5408_vm3, %v17562_v41, 0.0  ;;  %v17566_v59 = vpop.eup %13280  ;;  %13300 = vrcp.f32 %v17511_v19 }
 0x7bd   : > { %v6262_v34 = vsel %vm5415_vm4, %v17566_v59, 0.0  ;;  %v17570_v53 = vpop.eup %13282 }
 0x7be   : > { %v17572_v7 = vpop.eup %13284  ;;  %v6271_v32 = vsel %vm5415_vm4, %v17570_v53, 0.0 }
 0x7bf   : > { %v6268_v51 = vsel %vm5408_vm3, %v17572_v7, 0.0  ;;  %v13287_v37 = vpop.eup %13286 }
 0x7c0   : > { %v13289_v48 = vpop.eup %13288 }
 0x7c7   : > { %6260 = vadd.xlane.f32.xlu0 %v6259_v8  ;;  %v6437_v8 = vmul.f32 %v13287_v37, %v18804_v28 }
 0x7cb   : > { %6263 = vadd.xlane.f32.xlu0 %v6262_v34 }
 0x7cf   : > { %6272 = vadd.xlane.f32.xlu0 %v6271_v32  ;;  %v13291_v32 = vpop.eup %13290 }
 0x7d1   : > { %6269 = vadd.xlane.f32.xlu1 %v6268_v51 }
 0x7da   : > { %v17578_v21 = vpop.xlane.xlu0 %6251 }
 0x7dc   : > { %v17580_v2 = vpop.xlane.xlu1 %6242 }
 0x7dd   : > { %13302 = vrcp.f32 %v17580_v2 }
 0x7de   : > { %v12913_v24 = vpop.permute.xlu0 %12912  ;;  %13304 = vrcp.f32 %v17578_v21 }
 0x7df   : > { %v12915_v22 = vunpack.i.h.bf16 %v12913_v24  ;;  %v12914_v42 = vunpack.i.l.bf16 %v12913_v24  ;;  %v18805_v24 = vld [vmem:[#allocation29_spill] sm:$0xff] }
 0x7e0   : > { %v12908_v0 = vpop.permute.xlu1 %12907  ;;  %v6431_v20 = vmul.f32 %v13289_v48, %v18805_v24 }
 0x7e1   : > { %v12547_v45 = vpack.c.bf16 %v12915_v22, %v12914_v42  ;;  %v12910_v33 = vunpack.i.h.bf16 %v12908_v0  ;;  %v12909_v3 = vunpack.i.l.bf16 %v12908_v0  ;;  %v13293_v0 = vpop.eup %13292 }
 0x7e2   : > { %9403 = vrot.lane.b32.xlu1 %v18794_v63, %s13529_s17  ;;  %v13295_v63 = vpop.eup %13294 }
 0x7e3   : > { %v12544_v58 = vpack.c.bf16 %v12910_v33, %v12909_v3  ;;  %12548 = vmatpush3.bf16.msra.mxu1 %v12547_v45  ;;  %v6439_v3 = vmul.f32 %v13291_v32, %v17330_v23  ;;  %v13297_v19 = vpop.eup %13296  ;;  %v6441_v2 = vmul.f32 %v13295_v63, %v17356_v44 }
 0x7e4   : > { %12127 = vmatprep.subr.mxu1 %v18393_v1 }
 0x7e5   : > { %12545 = vmatpush3.bf16.msra.mxu0 %v12544_v58  ;;  %9409 = vrot.lane.b32.xlu0 %v18795_v12, %s13529_s17  ;;  %v18806_v12 = vld [vmem:[#allocation31_spill] sm:$0xff] }
 0x7e6   : > { %9415 = vrot.lane.b32.xlu1 %v18796_v4, %s13529_s17  ;;  %12112 = vmatprep.subr.mxu0 %v18393_v1  ;;  %v6433_v4 = vmul.f32 %v13293_v0, %v18806_v12 }
 0x7e9   : > { %9427 = vrot.lane.b32.xlu0 %v18797_v56, %s13529_s17 }
 0x7ea   : > { %9421 = vrot.lane.b32.xlu1 %v18798_v9, %s13529_s17 }
 0x7ed   : > { %9439 = vrot.lane.b32.xlu0 %v18799_v43, %s13529_s17 }
 0x7ee   : > { %9433 = vrot.lane.b32.xlu1 %v18800_v6, %s13529_s17 }
 0x7f1   : > { %9499 = vrot.lane.b32.xlu0 %v18801_v30, %s13528_s1  ;;  %v6435_v30 = vmul.f32 %v13297_v19, %v17358_v17 }
 0x7f2   : > { %9445 = vrot.lane.b32.xlu1 %v18802_v25, %s13529_s17  ;;  %v13299_v25 = vpop.eup %13298 }
 0x7f3   : > { %v13301_v17 = vpop.eup %13300 }
 0x7f5   : > { %9511 = vrot.lane.b32.xlu0 %v17385_v62, %s13528_s1 }
 0x7f6   : > { %9505 = vrot.lane.b32.xlu1 %v18803_v11, %s13528_s1 }
 0x7f9   : > { %9523 = vrot.lane.b32.xlu0 %v17491_v39, %s13528_s1 }
 0x7fa   : > { %9517 = vrot.lane.b32.xlu1 %v17380_v38, %s13528_s1 }
 0x7fe   : > { %9529 = vrot.lane.b32.xlu1 %v17488_v52, %s13528_s1 }
 0x80f   : > { %v17615_v5 = vpop.xlane.xlu0 %6254 }
 0x810   : > { %v8637_v62 = vpop.f32.mrb[218].mxu1 }
 0x811   : > { %v6246_v31 = vpop.xlane.xlu1 %6245  ;;  %v12071_v54 = vpop.f32.mrb[219].mxu1  ;;  %9541 = vrot.lane.b32.xlu1 %v8637_v62, %s13528_s1 }
 0x812   : > { %v8546_v38 = vpop.f32.mrb[174].mxu0  ;;  %13306 = vrcp.f32 %v6246_v31  ;;  %v6443_v31 = vmul.f32 %v13299_v25, %v17366_v15  ;;  %v10062_v25 = vld [vmem:[#allocation8] sm:$0xff] }
 0x813   : > { %9535 = vrot.lane.b32.xlu0 %v8546_v38, %s13528_s1  ;;  %v12056_v52 = vpop.f32.mrb[175].mxu0  ;;  %v17621_v14 = vpop.xlane.xlu0 %6266  ;;  %13308 = vrcp.f32 %v17615_v5 }
 0x814   : > { %v17624_v35 = vpop.f32.mrb[220].mxu1  ;;  %v13303_v52 = vpop.eup %13302 }
 0x815   : > { %v6258_v39 = vpop.xlane.xlu1 %6257  ;;  %v12074_v55 = vpop.f32.mrb[221].mxu1  ;;  %v6445_v15 = vmul.f32 %v13303_v52, %v17440_v13 }
 0x816   : > { %v17626_v16 = vpop.f32.mrb[176].mxu0  ;;  %13310 = vrcp.f32 %v6258_v39  ;;  %v13305_v5 = vpop.eup %13304  ;;  %v6449_v39 = vmul.f32 %v13301_v17, %v17362_v36  ;;  %v10064_v17 = vld [vmem:[#allocation8 + $0x10] sm:$0xff] }
 0x817   : > { %v12059_v34 = vpop.f32.mrb[177].mxu0  ;;  %v2422_v26 = vpop.permute.xlu0 %2421  ;;  %13312 = vrcp.f32 %v17621_v14 }
 0x818   : > { %v17630_v51 = vpop.f32.mrb[222].mxu1  ;;  %12128 = vmatpush3.msk.msra.mxu1 %vm6475_vm5, %v2422_v26  ;;  %v6451_v26 = vmul.f32 %v13305_v5, %v17438_v40 }
 0x819   : > { %v2416_v22 = vpop.permute.xlu1 %2415  ;;  %v12077_v42 = vpop.f32.mrb[223].mxu1  ;;  %12130 = vmatmul.mubr.msk.f32.vlgmr.msra.gmra.mrb[230].mxu1 %vm5408_vm3, %v6437_v8  ;;  %12552 = vmatprep.subr.bf16.mxu1 %v18569_v46 }
 0x81a   : > { %v17636_v45 = vpop.f32.mrb[178].mxu0  ;;  %12113 = vmatpush3.msk.msra.mxu0 %vm6475_vm5, %v2416_v22  ;;  %12132 = vmatprep.mubr.msk.f32.mxu1 %vm13524_vm0, %v18393_v1 }
 0x81b   : > { %v12062_v60 = vpop.f32.mrb[179].mxu0  ;;  %12115 = vmatmul.mubr.msk.f32.vlgmr.msra.gmra.mrb[186].mxu0 %vm5408_vm3, %v6431_v20  ;;  %v2428_v33 = vpop.permute.xlu0 %2427  ;;  %12549 = vmatprep.subr.bf16.mxu0 %v18569_v46 }
 0x81c   : > { %12117 = vmatprep.mubr.msk.f32.mxu0 %vm13524_vm0, %v18393_v1  ;;  %v13307_v48 = vpop.eup %13306 }
 0x81d   : > { %v12918_v58 = vpop.permute.xlu1 %12917  ;;  %12133 = vmatmul.mubr.msk.f32.gmra.mrb[232].mxu1 %vm5408_vm3, %v6439_v3  ;;  %v13309_v36 = vpop.eup %13308  ;;  %v6447_v13 = vmul.f32 %v13307_v48, %v17466_v49  ;;  %v10068_v48 = vld [vmem:[#allocation8 + $0x30] sm:$0xff] }
 0x81e   : > { %v12920_v56 = vunpack.i.h.bf16 %v12918_v58  ;;  %v12919_v9 = vunpack.i.l.bf16 %v12918_v58  ;;  %12135 = vmatprep.mubr.msk.f32.mxu1 %vm13524_vm0, %v18393_v1  ;;  %v6453_v40 = vmul.f32 %v13309_v36, %v17464_v18 }
 0x81f   : > { %12118 = vmatmul.mubr.msk.f32.gmra.mrb[188].mxu0 %vm5408_vm3, %v6433_v4  ;;  %v12928_v23 = vpop.permute.xlu0 %12927 }
 0x820   : > { %v12550_v43 = vpack.c.bf16 %v12920_v56, %v12919_v9  ;;  %12120 = vmatprep.mubr.msk.f32.mxu0 %vm13524_vm0, %v18393_v1  ;;  %v12930_v11 = vunpack.i.h.bf16 %v12928_v23  ;;  %v12929_v62 = vunpack.i.l.bf16 %v12928_v23  ;;  %v13311_v32 = vpop.eup %13310 }
 0x821   : > { %v12923_v6 = vpop.permute.xlu1 %12922  ;;  %12136 = vmatmul.mubr.msk.f32.gmra.mrb[234].mxu1 %vm5408_vm3, %v6441_v2  ;;  %v6455_v24 = vmul.f32 %v13311_v32, %v17474_v47  ;;  %v13313_v49 = vpop.eup %13312 }
 0x822   : > { %v12925_v54 = vunpack.i.h.bf16 %v12923_v6  ;;  %v12924_v21 = vunpack.i.l.bf16 %v12923_v6  ;;  %12551 = vmatpush3.bf16.msra.mxu0 %v12550_v43  ;;  %12159 = vmatprep.mubr.msk.f32.mxu1 %vm13524_vm0, %v18393_v1  ;;  %v12556_v37 = vpack.c.bf16 %v12930_v11, %v12929_v62  ;;  %v6461_v47 = vmul.f32 %v13313_v49, %v17470_v29  ;;  %v10063_v11 = vld [vmem:[#allocation8 + $0x8] sm:$0xff] }
 0x823   : > { %12121 = vmatmul.mubr.msk.f32.gmra.mrb[190].mxu0 %vm5408_vm3, %v6435_v30  ;;  %12142 = vmatprep.subr.mxu0 %v18393_v1  ;;  %v2440_v14 = vpop.permute.xlu0 %2439  ;;  %v12562_v62 = vpack.c.bf16 %v10063_v11, %v10062_v25  ;;  %v10071_v49 = vld [vmem:[#allocation8 + $0x48] sm:$0xff]  ;;  %v10077_v25 = vld [vmem:[#allocation8 + $0x78] sm:$0xff] }
 0x824   : > { %v12553_v44 = vpack.c.bf16 %v12925_v54, %v12924_v21  ;;  %12144 = vmatprep.mubr.msk.f32.mxu0 %vm13524_vm0, %v18393_v1 }
 0x825   : > { %v2434_v38 = vpop.permute.xlu1 %2433 }
 0x826   : > { %12143 = vmatpush3.msk.msra.mxu0 %vm6475_vm5, %v2428_v33  ;;  %12554 = vmatpush3.bf16.msra.mxu1 %v12553_v44 }
 0x827   : > { %12145 = vmatmul.mubr.msk.f32.vlgmr.msra.gmra.mrb[192].mxu0 %vm5408_vm3, %v6443_v31  ;;  %12555 = vmatprep.subr.bf16.mxu0 %v18569_v46  ;;  %v10065_v31 = vld [vmem:[#allocation8 + $0x18] sm:$0xff] }
 0x828   : > { %12557 = vmatpush3.bf16.msra.mxu0 %v12556_v37  ;;  %12157 = vmatprep.subr.mxu1 %v18393_v1  ;;  %v12565_v52 = vpack.c.bf16 %v10065_v31, %v10064_v17  ;;  %v18810_v17 = vld [vmem:[#allocation41_spill] sm:$0xff] }
 0x829   : > { %v12933_v55 = vpop.permute.xlu1 %12932  ;;  %12147 = vmatprep.mubr.msk.f32.mxu0 %vm13524_vm0, %v18393_v1  ;;  %12172 = vmatprep.subr.mxu0 %v18393_v1  ;;  %v18811_v31 = vld [vmem:[#allocation101_spill] sm:$0xff] }
 0x82a   : > { %v12935_v28 = vunpack.i.h.bf16 %v12933_v55  ;;  %v12934_v8 = vunpack.i.l.bf16 %v12933_v55  ;;  %12158 = vmatpush3.msk.msra.mxu1 %vm6475_vm5, %v2434_v38  ;;  %v10066_v55 = vld [vmem:[#allocation8 + $0x20] sm:$0xff] }
 0x82b   : > { %12148 = vmatmul.mubr.msk.f32.gmra.mrb[194].mxu0 %vm5408_vm3, %v6445_v15  ;;  %12160 = vmatmul.mubr.msk.f32.vlgmr.msra.gmra.mrb[236].mxu1 %vm5408_vm3, %v6449_v39  ;;  %v10067_v15 = vld [vmem:[#allocation8 + $0x28] sm:$0xff] }
 0x82c   : > { %v12559_v34 = vpack.c.bf16 %v12935_v28, %v12934_v8  ;;  %12173 = vmatpush3.msk.msra.mxu0 %vm6475_vm5, %v2440_v14  ;;  %12558 = vmatprep.subr.bf16.mxu1 %v18569_v46  ;;  %v12568_v8 = vpack.c.bf16 %v10067_v15, %v10066_v55  ;;  %v10069_v14 = vld [vmem:[#allocation8 + $0x38] sm:$0xff]  ;;  %v18817_v15 = vld [vmem:[#allocation38_spill] sm:$0xff] }
 0x82d   : > { %12150 = vmatprep.mubr.msk.f32.mxu0 %vm13524_vm0, %v18393_v1  ;;  %12162 = vmatprep.mubr.msk.f32.mxu1 %vm13524_vm0, %v18393_v1  ;;  %v2446_v20 = vpop.permute.xlu1 %2445  ;;  %v18816_v55 = vld [vmem:[#allocation24_spill] sm:$0xff] }
 0x82e   : > { %12560 = vmatpush3.bf16.msra.mxu1 %v12559_v34  ;;  %12561 = vmatprep.subr.bf16.mxu0 %v18569_v46 }
 0x82f   : > { %12151 = vmatmul.mubr.msk.f32.gmra.mrb[196].mxu0 %vm5408_vm3, %v6447_v13  ;;  %12163 = vmatmul.mubr.msk.f32.gmra.mrb[238].mxu1 %vm5408_vm3, %v6451_v26  ;;  %v12571_v13 = vpack.c.bf16 %v10069_v14, %v10068_v48  ;;  %v18819_v14 = vld [vmem:[#allocation76_spill] sm:$0xff] }
 0x830   : > { %12187 = vmatprep.subr.mxu1 %v18393_v1  ;;  %12165 = vmatprep.mubr.msk.f32.mxu1 %vm13524_vm0, %v18393_v1 }
 0x831   : > { %12174 = vmatprep.mubr.msk.f32.mxu0 %vm13524_vm0, %v18393_v1 }
 0x832   : > { %12188 = vmatpush3.msk.msra.mxu1 %vm6475_vm5, %v2446_v20 }
 0x833   : > { %12166 = vmatmul.mubr.msk.f32.gmra.mrb[240].mxu1 %vm5408_vm3, %v6453_v40  ;;  %12175 = vmatmul.mubr.msk.f32.vlgmr.msra.gmra.mrb[198].mxu0 %vm5408_vm3, %v6455_v24  ;;  %v10070_v40 = vld [vmem:[#allocation8 + $0x40] sm:$0xff] }
 0x834   : > { %12189 = vmatprep.mubr.msk.f32.mxu1 %vm13524_vm0, %v18393_v1  ;;  %12177 = vmatprep.mubr.msk.f32.mxu0 %vm13524_vm0, %v18393_v1 }
 0x835   : > { %12563 = vmatpush3.bf16.msra.mxu0 %v12562_v62  ;;  %v18807_v62 = vld [vmem:[#allocation40_spill] sm:$0xff] }
 0x836   : > { %12564 = vmatprep.subr.bf16.mxu0 %v18569_v46 }
 0x837   : > { %12190 = vmatmul.mubr.msk.f32.vlgmr.msra.gmra.mrb[242].mxu1 %vm5408_vm3, %v6461_v47 }
 0x838   : > { %12192 = vmatprep.mubr.msk.f32.mxu1 %vm13524_vm0, %v18393_v1 }
 0x839   : > { %12566 = vmatpush3.bf16.msra.mxu0 %v12565_v52  ;;  %v18813_v52 = vld [vmem:[#allocation82_spill] sm:$0xff] }
 0x83a   : > { %12567 = vmatprep.subr.bf16.mxu0 %v18569_v46 }
 0x83d   : > { %12569 = vmatpush3.bf16.msra.mxu0 %v12568_v8 }
 0x83e   : > { %12570 = vmatprep.subr.bf16.mxu0 %v18569_v46 }
 0x841   : > { %12572 = vmatpush3.bf16.msra.mxu0 %v12571_v13 }
 0x842   : > { %12573 = vmatprep.subr.bf16.mxu0 %v18569_v46 }
 0x854   : > { %v6261_v18 = vpop.xlane.xlu0 %6260 }
 0x855   : > { %13314 = vrcp.f32 %v6261_v18 }
 0x858   : > { %v6264_v22 = vpop.xlane.xlu0 %6263 }
 0x859   : > { %13316 = vrcp.f32 %v6264_v22  ;;  %v12574_v22 = vpack.c.bf16 %v10071_v49, %v10070_v40  ;;  %v18821_v49 = vld [vmem:[#allocation59_spill] sm:$0xff] }
 0x85b   : > { %12575 = vmatpush3.bf16.msra.mxu0 %v12574_v22  ;;  %v18823_v22 = vld [vmem:[#allocation60_spill] sm:$0xff] }
 0x85c   : > { %v6273_v42 = vpop.xlane.xlu0 %6272  ;;  %12576 = vmatprep.subr.bf16.mxu0 %v18569_v46 }
 0x85e   : > { %v6270_v0 = vpop.xlane.xlu1 %6269 }
 0x85f   : > { %v13315_v60 = vpop.eup %13314  ;;  %13318 = vrcp.f32 %v6270_v0 }
 0x860   : > { %v6457_v33 = vmul.f32 %v13315_v60, %v17562_v41  ;;  %13320 = vrcp.f32 %v6273_v42 }
 0x862   : > { %12178 = vmatmul.mubr.msk.f32.gmra.mrb[200].mxu0 %vm5408_vm3, %v6457_v33  ;;  %v9404_v48 = vpop.permute.xlu1 %9403 }
 0x863   : > { %v13317_v3 = vpop.eup %13316  ;;  %12180 = vmatprep.mubr.msk.f32.mxu0 %vm13524_vm0, %v18393_v1 }
 0x864   : > { %v6459_v29 = vmul.f32 %v13317_v3, %v17566_v59 }
 0x866   : > { %12181 = vmatmul.mubr.msk.f32.gmra.mrb[202].mxu0 %vm5408_vm3, %v6459_v29 }
 0x867   : > { %12230 = vmatprep.mubr.msk.f32.mxu0 %vm13524_vm0, %v18393_v1 }
 0x869   : > { %v13319_v63 = vpop.eup %13318 }
 0x86a   : > { %v6463_v58 = vmul.f32 %v13319_v63, %v17572_v7  ;;  %v13321_v12 = vpop.eup %13320 }
 0x86b   : > { %v6465_v41 = vmul.f32 %v13321_v12, %v17570_v53  ;;  %v10072_v12 = vld [vmem:[#allocation8 + $0x50] sm:$0xff] }
 0x86c   : > { %12193 = vmatmul.mubr.msk.f32.gmra.mrb[244].mxu1 %vm5408_vm3, %v6463_v58 }
 0x86d   : > { %12195 = vmatprep.mubr.msk.f32.mxu1 %vm13524_vm0, %v18393_v1 }
 0x870   : > { %12196 = vmatmul.mubr.msk.f32.gmra.mrb[246].mxu1 %vm5408_vm3, %v6465_v41  ;;  %v10073_v41 = vld [vmem:[#allocation8 + $0x58] sm:$0xff] }
 0x87e   : > { %v8819_v4 = vpop.f32.mrb[224].mxu1 }
 0x87f   : > { %v12101_v59 = vpop.f32.mrb[225].mxu1  ;;  %9601 = vrot.lane.b32.xlu1 %v8819_v4, %s13527_s26 }
 0x880   : > { %v8728_v19 = vpop.f32.mrb[180].mxu0 }
 0x881   : > { %9595 = vrot.lane.b32.xlu0 %v8728_v19, %s13527_s26  ;;  %v12086_v56 = vpop.f32.mrb[181].mxu0  ;;  %v12577_v19 = vpack.c.bf16 %v10073_v41, %v10072_v12  ;;  %v18827_v12 = vld [vmem:[#allocation85_spill] sm:$0xff] }
 0x882   : > { %v17725_v9 = vpop.f32.mrb[226].mxu1  ;;  %v10074_v56 = vld [vmem:[#allocation8 + $0x60] sm:$0xff] }
 0x883   : > { %v12104_v7 = vpop.f32.mrb[227].mxu1  ;;  %12578 = vmatpush3.bf16.msra.mxu0 %v12577_v19 }
 0x884   : > { %v17727_v23 = vpop.f32.mrb[182].mxu0  ;;  %v10075_v7 = vld [vmem:[#allocation8 + $0x68] sm:$0xff]  ;;  %12579 = vmatprep.subr.bf16.mxu0 %v18569_v46 }
 0x885   : > { %v12089_v2 = vpop.f32.mrb[183].mxu0 }
 0x886   : > { %v17729_v43 = vpop.f32.mrb[228].mxu1  ;;  %v12580_v2 = vpack.c.bf16 %v10075_v7, %v10074_v56  ;;  %v18829_v56 = vld [vmem:[#allocation37_spill] sm:$0xff] }
 0x887   : > { %v12107_v6 = vpop.f32.mrb[229].mxu1 }
 0x888   : > { %v17731_v53 = vpop.f32.mrb[184].mxu0  ;;  %12581 = vmatpush3.bf16.msra.mxu0 %v12580_v2 }
 0x889   : > { %v12092_v30 = vpop.f32.mrb[185].mxu0  ;;  %12582 = vmatprep.subr.bf16.mxu0 %v18569_v46  ;;  %v18814_v46 = vld [vmem:[#allocation79_spill] sm:$0xff] }
 0x88a   : > { %v10076_v30 = vld [vmem:[#allocation8 + $0x70] sm:$0xff] }
 0x8ec   : > { %v9001_v54 = vpop.f32.mrb[230].mxu1 }
 0x8ed   : > { %v12131_v21 = vpop.f32.mrb[231].mxu1  ;;  %9613 = vrot.lane.b32.xlu1 %v9001_v54, %s13527_s26  ;;  %v12583_v54 = vpack.c.bf16 %v10077_v25, %v10076_v30  ;;  %v18831_v25 = vld [vmem:[#allocation27_spill] sm:$0xff] }
 0x8ee   : > { %v8910_v44 = vpop.f32.mrb[186].mxu0  ;;  %v18808_v21 = vld [vmem:[#allocation47_spill] sm:$0xff] }
 0x8ef   : > { %9607 = vrot.lane.b32.xlu0 %v8910_v44, %s13527_s26  ;;  %v12116_v38 = vpop.f32.mrb[187].mxu0  ;;  %v18809_v44 = vld [vmem:[#allocation42_spill] sm:$0xff]  ;;  %12584 = vmatpush3.bf16.msra.mxu0 %v12583_v54  ;;  %v18832_v54 = vld [vmem:[#allocation69_spill] sm:$0xff] }
 0x8f0   : > { %v17736_v37 = vpop.f32.mrb[232].mxu1  ;;  %v18812_v38 = vld [vmem:[#allocation74_spill] sm:$0xff] }
 0x8f1   : > { %v12134_v5 = vpop.f32.mrb[233].mxu1 }
 0x8f2   : > { %v17738_v39 = vpop.f32.mrb[188].mxu0  ;;  %v18815_v5 = vld [vmem:[#allocation87_spill] sm:$0xff] }
 0x8f3   : > { %v12119_v28 = vpop.f32.mrb[189].mxu0 }
 0x8f4   : > { %v17741_v34 = vpop.f32.mrb[234].mxu1  ;;  %v9410_v28 = vpop.permute.xlu0 %9409 }
 0x8f5   : > { %v12137_v36 = vpop.f32.mrb[235].mxu1 }
 0x8f6   : > { %v17743_v26 = vpop.f32.mrb[190].mxu0 }
 0x8f7   : > { %v12122_v32 = vpop.f32.mrb[191].mxu0 }
 0x8f8   : > { %v17807_v8 = vpop.permute.xlu0 %9427 }
 0x8fa   : > { %v9092_v24 = vpop.f32.mrb[192].mxu0 }
 0x8fb   : > { %9619 = vrot.lane.b32.xlu0 %v9092_v24, %s13527_s26  ;;  %v12146_v20 = vpop.f32.mrb[193].mxu0 }
 0x8fc   : > { %v17814_v32 = vpop.permute.xlu0 %9439  ;;  %v18820_v20 = vld [vmem:[#allocation73_spill] sm:$0xff] }
 0x8fe   : > { %v9097_v47 = vpop.f32.mrb[194].mxu0  ;;  %v9183_v18 = vpop.f32.mrb[236].mxu1 }
 0x8ff   : > { %v12161_v42 = vpop.f32.mrb[237].mxu1  ;;  %9625 = vrot.lane.b32.xlu1 %v9183_v18, %s13527_s26  ;;  %v12149_v0 = vpop.f32.mrb[195].mxu0  ;;  %v18822_v18 = vld [vmem:[#allocation30_spill] sm:$0xff] }
 0x900   : > { %v9500_v42 = vpop.permute.xlu0 %9499  ;;  %v18824_v0 = vld [vmem:[#allocation23_spill] sm:$0xff] }
 0x902   : > { %v17750_v60 = vpop.f32.mrb[196].mxu0  ;;  %v9188_v33 = vpop.f32.mrb[238].mxu1 }
 0x903   : > { %v12152_v3 = vpop.f32.mrb[197].mxu0  ;;  %v12164_v29 = vpop.f32.mrb[239].mxu1 }
 0x904   : > { %v9512_v29 = vpop.permute.xlu0 %9511 }
 0x906   : > { %v17752_v63 = vpop.f32.mrb[240].mxu1  ;;  %v9274_v58 = vpop.f32.mrb[198].mxu0 }
 0x907   : > { %v12167_v4 = vpop.f32.mrb[241].mxu1  ;;  %9631 = vrot.lane.b32.xlu0 %v9274_v58, %s13527_s26  ;;  %v12176_v59 = vpop.f32.mrb[199].mxu0  ;;  %v18826_v58 = vld [vmem:[#allocation84_spill] sm:$0xff] }
 0x908   : > { %v18828_v4 = vld [vmem:[#allocation32_spill] sm:$0xff]  ;;  %v9524_v59 = vpop.permute.xlu0 %9523 }
 0x90a   : > { %v9365_v6 = vpop.f32.mrb[242].mxu1 }
 0x90b   : > { %v12191_v11 = vpop.f32.mrb[243].mxu1  ;;  %9637 = vrot.lane.b32.xlu1 %v9365_v6, %s13527_s26  ;;  %9405 = vrot.lane.b32.xlu0 %v18807_v62, %s13529_s17  ;;  %v18830_v6 = vld [vmem:[#allocation86_spill] sm:$0xff] }
 0x90c   : > { %v9536_v7 = vpop.permute.xlu0 %9535  ;;  %v9670_v30 = vsel %vm2463_vm1, %v18830_v6, %v9410_v28 }
 0x90f   : > { %9411 = vrot.lane.b32.xlu1 %v18808_v21, %s13529_s17  ;;  %9417 = vrot.lane.b32.xlu0 %v18809_v44, %s13529_s17  ;;  %v18833_v21 = vld [vmem:[#allocation98_spill] sm:$0xff] }
 0x913   : > { %9423 = vrot.lane.b32.xlu1 %v18810_v17, %s13529_s17  ;;  %9429 = vrot.lane.b32.xlu0 %v18811_v31, %s13529_s17 }
 0x917   : > { %9435 = vrot.lane.b32.xlu1 %v18812_v38, %s13529_s17  ;;  %9441 = vrot.lane.b32.xlu0 %v18813_v52, %s13529_s17 }
 0x91b   : > { %9447 = vrot.lane.b32.xlu1 %v18814_v46, %s13529_s17  ;;  %9501 = vrot.lane.b32.xlu0 %v18815_v5, %s13528_s1 }
 0x91f   : > { %9507 = vrot.lane.b32.xlu1 %v18816_v55, %s13528_s1  ;;  %9513 = vrot.lane.b32.xlu0 %v17395_v61, %s13528_s1  ;;  %v9416_v61 = vpop.permute.xlu1 %9415 }
 0x920   : > { %v9673_v44 = vsel %vm2463_vm1, %v18833_v21, %v9416_v61 }
 0x921   : > { %v9698_v52 = vsel %vm9691_vm7, %v9673_v44, %v9512_v29 }
 0x923   : > { %9519 = vrot.lane.b32.xlu1 %v18817_v15, %s13528_s1  ;;  %9525 = vrot.lane.b32.xlu0 %v17505_v27, %s13528_s1 }
 0x927   : > { %9531 = vrot.lane.b32.xlu1 %v17500_v57, %s13528_s1  ;;  %9537 = vrot.lane.b32.xlu0 %v17626_v16, %s13528_s1  ;;  %v9422_v57 = vpop.permute.xlu1 %9421 }
 0x928   : > { %v9676_v11 = vsel %vm2463_vm1, %v18831_v25, %v9422_v57 }
 0x92b   : > { %9543 = vrot.lane.b32.xlu1 %v17624_v35, %s13528_s1  ;;  %9597 = vrot.lane.b32.xlu0 %v17727_v23, %s13527_s26 }
 0x92f   : > { %9603 = vrot.lane.b32.xlu1 %v17725_v9, %s13527_s26  ;;  %9609 = vrot.lane.b32.xlu0 %v17738_v39, %s13527_s26  ;;  %v17803_v9 = vpop.permute.xlu1 %9433  ;;  %v18818_v39 = vld [vmem:[#allocation66_spill] sm:$0xff] }
 0x933   : > { %9615 = vrot.lane.b32.xlu1 %v17736_v37, %s13527_s26  ;;  %9621 = vrot.lane.b32.xlu0 %v9097_v47, %s13527_s26  ;;  %v17812_v13 = vpop.permute.xlu1 %9445 }
 0x935   : > { %v9279_v27 = vpop.f32.mrb[200].mxu0 }
 0x936   : > { %v12179_v16 = vpop.f32.mrb[201].mxu0 }
 0x937   : > { %9627 = vrot.lane.b32.xlu1 %v9188_v33, %s13527_s26  ;;  %9633 = vrot.lane.b32.xlu0 %v9279_v27, %s13527_s26  ;;  %v9506_v47 = vpop.permute.xlu1 %9505  ;;  %v18825_v33 = vld [vmem:[#allocation49_spill] sm:$0xff] }
 0x939   : > { %v17801_v35 = vpop.f32.mrb[202].mxu0 }
 0x93a   : > { %v12182_v23 = vpop.f32.mrb[203].mxu0 }
 0x93b   : > { %9407 = vrot.lane.b32.xlu0 %v18818_v39, %s13529_s17  ;;  %v9518_v3 = vpop.permute.xlu1 %9517 }
 0x93c   : > { %v9701_v62 = vsel %vm9691_vm7, %v9676_v11, %v9518_v3  ;;  %v18839_v11 = vld [vmem:[#allocation20_spill] sm:$0xff] }
 0x93f   : > { %v9370_v37 = vpop.f32.mrb[244].mxu1  ;;  %9419 = vrot.lane.b32.xlu0 %v18819_v14, %s13529_s17  ;;  %v9530_v41 = vpop.permute.xlu1 %9529 }
 0x940   : > { %v12194_v36 = vpop.f32.mrb[245].mxu1  ;;  %9639 = vrot.lane.b32.xlu1 %v9370_v37, %s13527_s26 }
 0x943   : > { %v9375_v24 = vpop.f32.mrb[246].mxu1  ;;  %9431 = vrot.lane.b32.xlu0 %v18820_v20, %s13529_s17  ;;  %v9542_v19 = vpop.permute.xlu1 %9541  ;;  %v18836_v20 = vld [vmem:[#allocation53_spill] sm:$0xff] }
 0x944   : > { %v12197_v40 = vpop.f32.mrb[247].mxu1  ;;  %9413 = vrot.lane.b32.xlu1 %v18821_v49, %s13529_s17 }
 0x945   : > { %v9685_v40 = vsel %vm2463_vm1, %v18836_v20, %v17814_v32 }
 0x947   : > { %9443 = vrot.lane.b32.xlu0 %v18822_v18, %s13529_s17  ;;  %v9602_v2 = vpop.permute.xlu1 %9601 }
 0x948   : > { %9425 = vrot.lane.b32.xlu1 %v18823_v22, %s13529_s17 }
 0x94b   : > { %9503 = vrot.lane.b32.xlu0 %v18824_v0, %s13528_s1  ;;  %v18838_v0 = vld [vmem:[#allocation72_spill] sm:$0xff] }
 0x94c   : > { %9437 = vrot.lane.b32.xlu1 %v18825_v33, %s13529_s17  ;;  %v9688_v32 = vsel %vm2463_vm1, %v18838_v0, %v17812_v13 }
 0x94d   : > { %v9713_v3 = vsel %vm9691_vm7, %v9688_v32, %v9542_v19  ;;  %v18842_v32 = vld [vmem:[#allocation80_spill] sm:$0xff] }
 0x94f   : > { %9515 = vrot.lane.b32.xlu0 %v18826_v58, %s13528_s1 }
 0x950   : > { %9449 = vrot.lane.b32.xlu1 %v18827_v12, %s13529_s17 }
 0x953   : > { %9527 = vrot.lane.b32.xlu0 %v17518_v50, %s13528_s1  ;;  %v9596_v50 = vpop.permute.xlu0 %9595 }
 0x954   : > { %9509 = vrot.lane.b32.xlu1 %v18828_v4, %s13528_s1 }
 0x957   : > { %9539 = vrot.lane.b32.xlu0 %v17636_v45, %s13528_s1  ;;  %v9695_v45 = vsel %vm9691_vm7, %v9670_v30, %v9506_v47 }
 0x958   : > { %9521 = vrot.lane.b32.xlu1 %v18829_v56, %s13528_s1  ;;  %v9720_v17 = vsel %vm9716_vm6, %v9695_v45, %v9602_v2 }
 0x95b   : > { %9599 = vrot.lane.b32.xlu0 %v17731_v53, %s13527_s26 }
 0x95c   : > { %9533 = vrot.lane.b32.xlu1 %v17514_v10, %s13528_s1  ;;  %v9667_v10 = vsel %vm2463_vm1, %v18832_v54, %v9404_v48  ;;  %v18834_v48 = vld [vmem:[#allocation19_spill] sm:$0xff] }
 0x95d   : > { %v9692_v38 = vsel %vm9691_vm7, %v9667_v10, %v9500_v42  ;;  %v18837_v42 = vld [vmem:[#allocation88_spill] sm:$0xff] }
 0x95e   : > { %v9717_v55 = vsel %vm9716_vm6, %v9692_v38, %v9596_v50 }
 0x95f   : > { %9611 = vrot.lane.b32.xlu0 %v17743_v26, %s13527_s26  ;;  %v9614_v53 = vpop.permute.xlu1 %9613 }
 0x960   : > { %9545 = vrot.lane.b32.xlu1 %v17630_v51, %s13528_s1  ;;  %v9726_v31 = vsel %vm9716_vm6, %v9701_v62, %v9614_v53 }
 0x961   : > { %v9757_v46 = vcombine.low %v9720_v17, %v9726_v31  ;;  %v9758_v26 = vcombine.high %v9720_v17, %v9726_v31  ;;  %v9608_v5 = vpop.permute.xlu0 %9607 }
 0x962   : > { %v9723_v15 = vsel %vm9716_vm6, %v9698_v52, %v9608_v5 }
 0x963   : > { %v9765_v61 = vrot.slane %v9757_v46, %v18834_v48  ;;  %v9772_v57 = vrot.slane %v9758_v26, %v18834_v48  ;;  %v9741_v27 = vcombine.low %v9717_v55, %v9723_v15  ;;  %v9742_v16 = vcombine.high %v9717_v55, %v9723_v15  ;;  %9623 = vrot.lane.b32.xlu0 %v17750_v60, %s13527_s26  ;;  %v18835_v60 = vld [vmem:[#allocation45_spill] sm:$0xff] }
 0x964   : > { %9605 = vrot.lane.b32.xlu1 %v17729_v43, %s13527_s26  ;;  %v9679_v36 = vsel %vm2463_vm1, %v18835_v60, %v17807_v8  ;;  %v9682_v8 = vsel %vm2463_vm1, %v18837_v42, %v17803_v9 }
 0x965   : > { %v9749_v51 = vrot.slane %v9741_v27, %v18834_v48  ;;  %v9756_v28 = vrot.slane %v9742_v16, %v18834_v48  ;;  %v9704_v49 = vsel %vm9691_vm7, %v9679_v36, %v9524_v59  ;;  %v9707_v33 = vsel %vm9691_vm7, %v9682_v8, %v9530_v41 }
 0x967   : > { %v9805_v23 = vcombine.low %v9749_v51, %v9765_v61  ;;  %v9806_v39 = vcombine.high %v9749_v51, %v9765_v61  ;;  %v9821_v37 = vcombine.low %v9756_v28, %v9772_v57  ;;  %v9822_v14 = vcombine.high %v9756_v28, %v9772_v57  ;;  %9635 = vrot.lane.b32.xlu0 %v17801_v35, %s13527_s26 }
 0x968   : > { %9617 = vrot.lane.b32.xlu1 %v17741_v34, %s13527_s26  ;;  %v9710_v35 = vsel %vm9691_vm7, %v9685_v40, %v9536_v7  ;;  %v18840_v40 = vld [vmem:[#allocation36_spill] sm:$0xff] }
 0x969   : > { %v9813_v45 = vrot.slane %v9805_v23, %v18839_v11  ;;  %v9820_v62 = vrot.slane %v9806_v39, %v18839_v11  ;;  %v9829_v31 = vrot.slane %v9821_v37, %v18839_v11  ;;  %v9836_v38 = vrot.slane %v9822_v14, %v18839_v11 }
 0x96c   : > { %9629 = vrot.lane.b32.xlu1 %v17752_v63, %s13527_s26 }
 0x96d   : > { %v9620_v43 = vpop.permute.xlu0 %9619 }
 0x96e   : > { %v9729_v18 = vsel %vm9716_vm6, %v9704_v49, %v9620_v43 }
 0x970   : > { %9641 = vrot.lane.b32.xlu1 %v9375_v24, %s13527_s26 }
 0x971   : > { %v9626_v47 = vpop.permute.xlu1 %9625 }
 0x972   : > { %v9732_v12 = vsel %vm9716_vm6, %v9707_v33, %v9626_v47 }
 0x979   : > { %v9632_v34 = vpop.permute.xlu0 %9631 }
 0x97a   : > { %v9735_v63 = vsel %vm9716_vm6, %v9710_v35, %v9632_v34  ;;  %v18841_v35 = vld [vmem:[#allocation106_spill] sm:$0xff] }
 0x97b   : > { %v9773_v24 = vcombine.low %v9729_v18, %v9735_v63  ;;  %v9774_v22 = vcombine.high %v9729_v18, %v9735_v63 }
 0x97d   : > { %v9638_v29 = vpop.permute.xlu1 %9637  ;;  %v9406_v58 = vpop.permute.xlu0 %9405  ;;  %v9781_v7 = vrot.slane %v9773_v24, %v18834_v48  ;;  %v9788_v9 = vrot.slane %v9774_v22, %v18834_v48 }
 0x97e   : > { %v9738_v4 = vsel %vm9716_vm6, %v9713_v3, %v9638_v29  ;;  %v9668_v49 = vsel %vm2463_vm1, %v18840_v40, %v9406_v58  ;;  %v18843_v3 = vld [vmem:[#allocation100_spill] sm:$0xff] }
 0x97f   : > { %v9789_v59 = vcombine.low %v9732_v12, %v9738_v4  ;;  %v9790_v56 = vcombine.high %v9732_v12, %v9738_v4 }
 0x981   : > { %v9797_v2 = vrot.slane %v9789_v59, %v18834_v48  ;;  %v9804_v13 = vrot.slane %v9790_v56, %v18834_v48  ;;  %v9412_v50 = vpop.permute.xlu1 %9411  ;;  %v9418_v41 = vpop.permute.xlu0 %9417 }
 0x982   : > { %v9674_v47 = vsel %vm2463_vm1, %v18841_v35, %v9418_v41  ;;  %v9671_v33 = vsel %vm2463_vm1, %v18842_v32, %v9412_v50 }
 0x983   : > { %v9837_v6 = vcombine.low %v9781_v7, %v9797_v2  ;;  %v9838_v19 = vcombine.high %v9781_v7, %v9797_v2  ;;  %v9853_v30 = vcombine.low %v9788_v9, %v9804_v13  ;;  %v9854_v25 = vcombine.high %v9788_v9, %v9804_v13  ;;  %v18844_v9 = vld [vmem:[#allocation111_spill] sm:$0xff]  ;;  %v18845_v13 = vld [vmem:[#allocation58_spill] sm:$0xff] }
 0x985   : > { %v9845_v53 = vrot.slane %v9837_v6, %v18839_v11  ;;  %v9424_v54 = vpop.permute.xlu1 %9423  ;;  %v9430_v10 = vpop.permute.xlu0 %9429  ;;  %v9852_v21 = vrot.slane %v9838_v19, %v18839_v11  ;;  %v9861_v44 = vrot.slane %v9853_v30, %v18839_v11  ;;  %v9868_v17 = vrot.slane %v9854_v25, %v18839_v11 }
 0x986   : > { %v9677_v29 = vsel %vm2463_vm1, %v18843_v3, %v9424_v54  ;;  %v9680_v2 = vsel %vm2463_vm1, %v18844_v9, %v9430_v10 }
 0x987   : > { %v9869_v52 = vcombine.low %v9813_v45, %v9845_v53  ;;  %v9870_v46 = vcombine.high %v9813_v45, %v9845_v53  ;;  %v9871_v26 = vcombine.low %v9820_v62, %v9852_v21  ;;  %v9872_v5 = vcombine.high %v9820_v62, %v9852_v21 }
 0x988   : > { %v9873_v55 = vcombine.low %v9829_v31, %v9861_v44  ;;  %v9874_v15 = vcombine.high %v9829_v31, %v9861_v44  ;;  %v9875_v61 = vcombine.low %v9836_v38, %v9868_v17  ;;  %v9876_v57 = vcombine.high %v9836_v38, %v9868_v17 }
 0x989   : > { %v17911_v27 = vpop.permute.xlu1 %9435  ;;  %12231 = vmatmul.mubr.f32.vlgmr.msra.gmra.mrb[204].mxu0 %v9869_v52  ;;  %v9442_v16 = vpop.permute.xlu0 %9441 }
 0x98a   : > { %12233 = vmatprep.mubr.msk.f32.mxu0 %vm13524_vm0, %v18393_v1  ;;  %v9686_v50 = vsel %vm2463_vm1, %v18845_v13, %v9442_v16 }
 0x98d   : > { %v17915_v51 = vpop.permute.xlu1 %9447  ;;  %12234 = vmatmul.mubr.f32.gmra.mrb[206].mxu0 %v9870_v46  ;;  %v9502_v28 = vpop.permute.xlu0 %9501 }
 0x98e   : > { %12236 = vmatprep.mubr.msk.f32.mxu0 %vm13524_vm0, %v18393_v1  ;;  %v9693_v34 = vsel %vm9691_vm7, %v9668_v49, %v9502_v28 }
 0x991   : > { %v9508_v23 = vpop.permute.xlu1 %9507  ;;  %12237 = vmatmul.mubr.f32.gmra.mrb[208].mxu0 %v9871_v26  ;;  %v9514_v39 = vpop.permute.xlu0 %9513 }
 0x992   : > { %12239 = vmatprep.mubr.msk.f32.mxu0 %vm13524_vm0, %v18393_v1  ;;  %v9699_v18 = vsel %vm9691_vm7, %v9674_v47, %v9514_v39  ;;  %v9696_v58 = vsel %vm9691_vm7, %v9671_v33, %v9508_v23 }
 0x995   : > { %v9520_v37 = vpop.permute.xlu1 %9519  ;;  %12240 = vmatmul.mubr.f32.gmra.mrb[210].mxu0 %v9872_v5  ;;  %v9526_v14 = vpop.permute.xlu0 %9525 }
 0x996   : > { %12242 = vmatprep.mubr.msk.f32.mxu0 %vm13524_vm0, %v18393_v1  ;;  %v9702_v12 = vsel %vm9691_vm7, %v9677_v29, %v9520_v37  ;;  %v9705_v19 = vsel %vm9691_vm7, %v9680_v2, %v9526_v14 }
 0x999   : > { %v9532_v43 = vpop.permute.xlu1 %9531  ;;  %12243 = vmatmul.mubr.f32.gmra.mrb[212].mxu0 %v9873_v55  ;;  %v9538_v60 = vpop.permute.xlu0 %9537  ;;  %v18846_v55 = vld [vmem:[#allocation39_spill] sm:$0xff] }
 0x99a   : > { %12245 = vmatprep.mubr.msk.f32.mxu0 %vm13524_vm0, %v18393_v1  ;;  %v9711_v30 = vsel %vm9691_vm7, %v9686_v50, %v9538_v60 }
 0x99d   : > { %v9544_v36 = vpop.permute.xlu1 %9543  ;;  %12246 = vmatmul.mubr.f32.gmra.mrb[214].mxu0 %v9874_v15  ;;  %v9598_v20 = vpop.permute.xlu0 %9597  ;;  %v9683_v15 = vsel %vm2463_vm1, %v18846_v55, %v17911_v27 }
 0x99e   : > { %12248 = vmatprep.mubr.msk.f32.mxu0 %vm13524_vm0, %v18393_v1  ;;  %v9718_v22 = vsel %vm9716_vm6, %v9693_v34, %v9598_v20  ;;  %v9708_v28 = vsel %vm9691_vm7, %v9683_v15, %v9532_v43 }
 0x9a1   : > { %v9604_v63 = vpop.permute.xlu1 %9603  ;;  %12249 = vmatmul.mubr.f32.gmra.mrb[216].mxu0 %v9875_v61  ;;  %v9610_v24 = vpop.permute.xlu0 %9609  ;;  %v18847_v61 = vld [vmem:[#allocation116_spill] sm:$0xff] }
 0x9a2   : > { %v9724_v42 = vsel %vm9716_vm6, %v9699_v18, %v9610_v24  ;;  %12251 = vmatprep.mubr.msk.f32.mxu0 %vm13524_vm0, %v18393_v1  ;;  %v9721_v56 = vsel %vm9716_vm6, %v9696_v58, %v9604_v63 }
 0x9a3   : > { %v9877_v8 = vcombine.low %v9718_v22, %v9724_v42  ;;  %v9878_v0 = vcombine.high %v9718_v22, %v9724_v42 }
 0x9a5   : > { %v9616_v4 = vpop.permute.xlu1 %9615  ;;  %12252 = vmatmul.mubr.f32.gmra.mrb[218].mxu0 %v9876_v57  ;;  %v9622_v59 = vpop.permute.xlu0 %9621  ;;  %v9885_v25 = vrot.slane %v9877_v8, %v18834_v48  ;;  %v9892_v45 = vrot.slane %v9878_v0, %v18834_v48  ;;  %v9689_v57 = vsel %vm2463_vm1, %v18847_v61, %v17915_v51  ;;  %v18850_v61 = vld [vmem:[#allocation112_spill] sm:$0xff] }
 0x9a6   : > { %v9727_v7 = vsel %vm9716_vm6, %v9702_v12, %v9616_v4  ;;  %12254 = vmatprep.mubr.msk.f32.mxu0 %vm13524_vm0, %v18393_v1  ;;  %v9730_v10 = vsel %vm9716_vm6, %v9705_v19, %v9622_v59  ;;  %v9714_v23 = vsel %vm9691_vm7, %v9689_v57, %v9544_v36 }
 0x9a7   : > { %v9893_v41 = vcombine.low %v9721_v56, %v9727_v7  ;;  %v9894_v6 = vcombine.high %v9721_v56, %v9727_v7 }
 0x9a9   : > { %v9901_v62 = vrot.slane %v9893_v41, %v18834_v48  ;;  %v9908_v53 = vrot.slane %v9894_v6, %v18834_v48  ;;  %v9634_v54 = vpop.permute.xlu0 %9633  ;;  %v9628_v5 = vpop.permute.xlu1 %9627 }
 0x9aa   : > { %v9736_v21 = vsel %vm9716_vm6, %v9711_v30, %v9634_v54  ;;  %v9733_v37 = vsel %vm9716_vm6, %v9708_v28, %v9628_v5  ;;  %v18848_v54 = vld [vmem:[#allocation35_spill] sm:$0xff] }
 0x9ab   : > { %v9941_v44 = vcombine.low %v9885_v25, %v9901_v62  ;;  %v9942_v17 = vcombine.high %v9885_v25, %v9901_v62  ;;  %v9957_v31 = vcombine.low %v9892_v45, %v9908_v53  ;;  %v9958_v38 = vcombine.high %v9892_v45, %v9908_v53 }
 0x9ac   : > { %v9909_v52 = vcombine.low %v9730_v10, %v9736_v21  ;;  %v9910_v46 = vcombine.high %v9730_v10, %v9736_v21  ;;  %v18849_v21 = vld [vmem:[#allocation96_spill] sm:$0xff] }
 0x9ad   : > { %v9408_v26 = vpop.permute.xlu0 %9407  ;;  %v9949_v24 = vrot.slane %v9941_v44, %v18839_v11  ;;  %v9956_v8 = vrot.slane %v9942_v17, %v18839_v11  ;;  %v9965_v33 = vrot.slane %v9957_v31, %v18839_v11  ;;  %v9972_v3 = vrot.slane %v9958_v38, %v18839_v11 }
 0x9ae   : > { %v9917_v27 = vrot.slane %v9909_v52, %v18834_v48  ;;  %v9924_v49 = vrot.slane %v9910_v46, %v18834_v48  ;;  %v9669_v10 = vsel %vm2463_vm1, %v18848_v54, %v9408_v26 }
 0x9b1   : > { %v9420_v16 = vpop.permute.xlu0 %9419 }
 0x9b2   : > { %v9640_v39 = vpop.permute.xlu1 %9639  ;;  %v9675_v44 = vsel %vm2463_vm1, %v18849_v21, %v9420_v16  ;;  %v18851_v16 = vld [vmem:[#allocation122_spill] sm:$0xff] }
 0x9b3   : > { %v9739_v14 = vsel %vm9716_vm6, %v9714_v23, %v9640_v39  ;;  %v18852_v23 = vld [vmem:[#allocation28_spill] sm:$0xff] }
 0x9b4   : > { %v9925_v60 = vcombine.low %v9733_v37, %v9739_v14  ;;  %v9926_v20 = vcombine.high %v9733_v37, %v9739_v14  ;;  %v18853_v37 = vld [vmem:[#allocation107_spill] sm:$0xff] }
 0x9b5   : > { %v17969_v40 = vpop.permute.xlu0 %9431 }
 0x9b6   : > { %v9933_v51 = vrot.slane %v9925_v60, %v18834_v48  ;;  %v9940_v35 = vrot.slane %v9926_v20, %v18834_v48  ;;  %v9414_v43 = vpop.permute.xlu1 %9413  ;;  %v9681_v57 = vsel %vm2463_vm1, %v18850_v61, %v17969_v40 }
 0x9b7   : > { %v9672_v39 = vsel %vm2463_vm1, %v18852_v23, %v9414_v43 }
 0x9b8   : > { %v9973_v47 = vcombine.low %v9917_v27, %v9933_v51  ;;  %v9974_v36 = vcombine.high %v9917_v27, %v9933_v51  ;;  %v9989_v34 = vcombine.low %v9924_v49, %v9940_v35  ;;  %v9990_v18 = vcombine.high %v9924_v49, %v9940_v35 }
 0x9b9   : > { %v9444_v63 = vpop.permute.xlu0 %9443 }
 0x9ba   : > { %v9426_v22 = vpop.permute.xlu1 %9425  ;;  %v9981_v42 = vrot.slane %v9973_v47, %v18839_v11  ;;  %v9988_v0 = vrot.slane %v9974_v36, %v18839_v11  ;;  %v9997_v32 = vrot.slane %v9989_v34, %v18839_v11  ;;  %v10004_v29 = vrot.slane %v9990_v18, %v18839_v11 }
 0x9bb   : > { %v9687_v28 = vsel %vm2463_vm1, %v18851_v16, %v9444_v63  ;;  %v9678_v14 = vsel %vm2463_vm1, %v18853_v37, %v9426_v22 }
 0x9bc   : > { %v10005_v58 = vcombine.low %v9949_v24, %v9981_v42  ;;  %v10006_v12 = vcombine.high %v9949_v24, %v9981_v42  ;;  %v10007_v4 = vcombine.low %v9956_v8, %v9988_v0  ;;  %v10008_v59 = vcombine.high %v9956_v8, %v9988_v0  ;;  %v18854_v8 = vld [vmem:[#allocation62_spill] sm:$0xff] }
 0x9bd   : > { %v9504_v56 = vpop.permute.xlu0 %9503  ;;  %v10009_v7 = vcombine.low %v9965_v33, %v9997_v32  ;;  %v10010_v9 = vcombine.high %v9965_v33, %v9997_v32  ;;  %v10011_v2 = vcombine.low %v9972_v3, %v10004_v29  ;;  %v10012_v13 = vcombine.high %v9972_v3, %v10004_v29  ;;  %v18855_v32 = vld [vmem:[#allocation118_spill] sm:$0xff] }
 0x9be   : > { %v9438_v50 = vpop.permute.xlu1 %9437  ;;  %12255 = vmatmul.mubr.f32.gmra.mrb[220].mxu0 %v10005_v58  ;;  %v9694_v17 = vsel %vm9691_vm7, %v9669_v10, %v9504_v56 }
 0x9bf   : > { %12257 = vmatprep.mubr.msk.f32.mxu0 %vm13524_vm0, %v18393_v1  ;;  %v9684_v0 = vsel %vm2463_vm1, %v18854_v8, %v9438_v50  ;;  %v18042_v50 = vld [vmem:[%s18136_s5] ss:$0 sm:$0xff] }
 0x9c1   : > { %v9516_v41 = vpop.permute.xlu0 %9515 }
 0x9c2   : > { %v9450_v6 = vpop.permute.xlu1 %9449  ;;  %12258 = vmatmul.mubr.f32.gmra.mrb[222].mxu0 %v10006_v12  ;;  %v9700_v31 = vsel %vm9691_vm7, %v9675_v44, %v9516_v41 }
 0x9c3   : > { %12260 = vmatprep.mubr.msk.f32.mxu0 %vm13524_vm0, %v18393_v1  ;;  %v9690_v33 = vsel %vm2463_vm1, %v18855_v32, %v9450_v6 }
 0x9c5   : > { %v9528_v19 = vpop.permute.xlu0 %9527 }
 0x9c6   : > { %v9510_v30 = vpop.permute.xlu1 %9509  ;;  %12261 = vmatmul.mubr.f32.gmra.mrb[224].mxu0 %v10007_v4  ;;  %v9706_v60 = vsel %vm9691_vm7, %v9681_v57, %v9528_v19 }
 0x9c7   : > { %12263 = vmatprep.mubr.msk.f32.mxu0 %vm13524_vm0, %v18393_v1  ;;  %v9697_v49 = vsel %vm9691_vm7, %v9672_v39, %v9510_v30 }
 0x9c9   : > { %v9540_v25 = vpop.permute.xlu0 %9539 }
 0x9ca   : > { %v9522_v45 = vpop.permute.xlu1 %9521  ;;  %12264 = vmatmul.mubr.f32.gmra.mrb[226].mxu0 %v10008_v59  ;;  %v9712_v20 = vsel %vm9691_vm7, %v9687_v28, %v9540_v25 }
 0x9cb   : > { %12266 = vmatprep.mubr.msk.f32.mxu0 %vm13524_vm0, %v18393_v1  ;;  %v9703_v51 = vsel %vm9691_vm7, %v9678_v14, %v9522_v45 }
 0x9cd   : > { %v9600_v62 = vpop.permute.xlu0 %9599 }
 0x9ce   : > { %v9534_v53 = vpop.permute.xlu1 %9533  ;;  %12267 = vmatmul.mubr.f32.gmra.mrb[228].mxu0 %v10009_v7  ;;  %v9719_v52 = vsel %vm9716_vm6, %v9694_v17, %v9600_v62 }
 0x9cf   : > { %12269 = vmatprep.mubr.msk.f32.mxu0 %vm13524_vm0, %v18393_v1  ;;  %v9709_v3 = vsel %vm9691_vm7, %v9684_v0, %v9534_v53 }
 0x9d1   : > { %v9612_v38 = vpop.permute.xlu0 %9611 }
 0x9d2   : > { %v9546_v46 = vpop.permute.xlu1 %9545  ;;  %12270 = vmatmul.mubr.f32.gmra.mrb[230].mxu0 %v10010_v9  ;;  %v9725_v5 = vsel %vm9716_vm6, %v9700_v31, %v9612_v38 }
 0x9d3   : > { %v10013_v55 = vcombine.low %v9719_v52, %v9725_v5  ;;  %12272 = vmatprep.mubr.msk.f32.mxu0 %vm13524_vm0, %v18393_v1  ;;  %v9715_v29 = vsel %vm9691_vm7, %v9690_v33, %v9546_v46 }
 0x9d5   : > { %v9624_v15 = vpop.permute.xlu0 %9623  ;;  %v10020_v63 = vrot.slane %v10013_v55, %v18834_v48 }
 0x9d6   : > { %v9606_v26 = vpop.permute.xlu1 %9605  ;;  %12273 = vmatmul.mubr.f32.gmra.mrb[232].mxu0 %v10011_v2  ;;  %v9731_v40 = vsel %vm9716_vm6, %v9706_v60, %v9624_v15 }
 0x9d7   : > { %12275 = vmatprep.mubr.msk.f32.mxu0 %vm13524_vm0, %v18393_v1  ;;  %v9722_v43 = vsel %vm9716_vm6, %v9697_v49, %v9606_v26 }
 0x9d9   : > { %v9636_v27 = vpop.permute.xlu0 %9635 }
 0x9da   : > { %v9618_v35 = vpop.permute.xlu1 %9617  ;;  %12276 = vmatmul.mubr.f32.gmra.mrb[234].mxu0 %v10012_v13  ;;  %v9737_v47 = vsel %vm9716_vm6, %v9712_v20, %v9636_v27 }
 0x9db   : > { %v9728_v36 = vsel %vm9716_vm6, %v9703_v51, %v9618_v35  ;;  %v10029_v34 = vcombine.low %v9731_v40, %v9737_v47  ;;  %12278 = vmatprep.mubr.msk.f32.mxu0 %vm13524_vm0, %v18393_v1 }
 0x9dc   : > { %v10021_v18 = vcombine.low %v9722_v43, %v9728_v36 }
 0x9dd   : > { %v10036_v59 = vrot.slane %v10029_v34, %v18834_v48 }
 0x9de   : > { %v10028_v24 = vrot.slane %v10021_v18, %v18834_v48  ;;  %v9630_v22 = vpop.permute.xlu1 %9629 }
 0x9df   : > { %v9734_v1 = vsel %vm9716_vm6, %v9709_v3, %v9630_v22 }
 0x9e0   : > { %v10045_v42 = vcombine.low %v10020_v63, %v10028_v24 }
 0x9e2   : > { %v9642_v58 = vpop.permute.xlu1 %9641  ;;  %v10052_v9 = vrot.slane %v10045_v42, %v18839_v11 }
 0x9e3   : > { %v9740_v12 = vsel %vm9716_vm6, %v9715_v29, %v9642_v58 }
 0x9e4   : > { %v10037_v4 = vcombine.low %v9734_v1, %v9740_v12 }
 0x9e6   : > { %v10044_v56 = vrot.slane %v10037_v4, %v18834_v48 }
 0x9e8   : > { %v10053_v7 = vcombine.low %v10036_v59, %v10044_v56 }
 0x9ea   : > { %v10060_v2 = vrot.slane %v10053_v7, %v18839_v11 }
 0x9ec   : > { %v10061_v13 = vcombine.low %v10052_v9, %v10060_v2 }
 0x9ee   : > { %12279 = vmatmul.mubr.f32.gmra.mrb[236].mxu0 %v10061_v13 }
 0xa5c   : > { %v10151_v41 = vpop.f32.mrb[204].mxu0 }
 0xa5d   : > { %v10152_v6 = vadd.f32 %v18042_v50, %v10151_v41  ;;  %v12232_v19 = vpop.f32.mrb[205].mxu0 }
 0xa5f   : > { %10235 = vst [vmem:[%s18045_s16] sm:$0xff] %v10152_v6 }
 0xa60   : > { %v10156_v48 = vpop.f32.mrb[206].mxu0 }
 0xa61   : > { %v10157_v11 = vadd.f32 %v18042_v50, %v10156_v48  ;;  %v12235_v30 = vpop.f32.mrb[207].mxu0 }
 0xa63   : > { %10236 = vst [vmem:[%s18045_s16 + $0x8] sm:$0xff] %v10157_v11 }
 0xa64   : > { %v10161_v25 = vpop.f32.mrb[208].mxu0 }
 0xa65   : > { %v10162_v45 = vadd.f32 %v18042_v50, %v10161_v25  ;;  %v12238_v62 = vpop.f32.mrb[209].mxu0 }
 0xa67   : > { %10237 = vst [vmem:[%s18045_s16 + $0x10] sm:$0xff] %v10162_v45 }
 0xa68   : > { %v10166_v53 = vpop.f32.mrb[210].mxu0 }
 0xa69   : > { %v10167_v54 = vadd.f32 %v18042_v50, %v10166_v53  ;;  %v12241_v10 = vpop.f32.mrb[211].mxu0 }
 0xa6b   : > { %10238 = vst [vmem:[%s18045_s16 + $0x18] sm:$0xff] %v10167_v54 }
 0xa6c   : > { %v10171_v21 = vpop.f32.mrb[212].mxu0 }
 0xa6d   : > { %v10172_v44 = vadd.f32 %v18042_v50, %v10171_v21  ;;  %v12244_v17 = vpop.f32.mrb[213].mxu0 }
 0xa6f   : > { %10239 = vst [vmem:[%s18045_s16 + $0x20] sm:$0xff] %v10172_v44 }
 0xa70   : > { %v10176_v31 = vpop.f32.mrb[214].mxu0 }
 0xa71   : > { %v10177_v38 = vadd.f32 %v18042_v50, %v10176_v31  ;;  %v12247_v52 = vpop.f32.mrb[215].mxu0 }
 0xa73   : > { %10240 = vst [vmem:[%s18045_s16 + $0x28] sm:$0xff] %v10177_v38 }
 0xa74   : > { %v10181_v46 = vpop.f32.mrb[216].mxu0 }
 0xa75   : > { %v10182_v5 = vadd.f32 %v18042_v50, %v10181_v46  ;;  %v12250_v55 = vpop.f32.mrb[217].mxu0 }
 0xa77   : > { %10241 = vst [vmem:[%s18045_s16 + $0x30] sm:$0xff] %v10182_v5 }
 0xa78   : > { %v10186_v15 = vpop.f32.mrb[218].mxu0 }
 0xa79   : > { %v10187_v26 = vadd.f32 %v18042_v50, %v10186_v15  ;;  %v12253_v61 = vpop.f32.mrb[219].mxu0 }
 0xa7b   : > { %10242 = vst [vmem:[%s18045_s16 + $0x38] sm:$0xff] %v10187_v26 }
 0xa91   : > { %v10191_v57 = vpop.f32.mrb[220].mxu0 }
 0xa92   : > { %v10192_v16 = vadd.f32 %v18042_v50, %v10191_v57  ;;  %v12256_v28 = vpop.f32.mrb[221].mxu0 }
 0xa94   : > { %10243 = vst [vmem:[%s18045_s16 + $0x40] sm:$0xff] %v10192_v16 }
 0xa95   : > { %v10196_v23 = vpop.f32.mrb[222].mxu0 }
 0xa96   : > { %v10197_v39 = vadd.f32 %v18042_v50, %v10196_v23  ;;  %v12259_v37 = vpop.f32.mrb[223].mxu0 }
 0xa98   : > { %10244 = vst [vmem:[%s18045_s16 + $0x48] sm:$0xff] %v10197_v39 }
 0xa99   : > { %v10201_v14 = vpop.f32.mrb[224].mxu0 }
 0xa9a   : > { %v10202_v60 = vadd.f32 %v18042_v50, %v10201_v14  ;;  %v12262_v20 = vpop.f32.mrb[225].mxu0 }
 0xa9c   : > { %10245 = vst [vmem:[%s18045_s16 + $0x50] sm:$0xff] %v10202_v60 }
 0xa9d   : > { %v10206_v27 = vpop.f32.mrb[226].mxu0 }
 0xa9e   : > { %v10207_v49 = vadd.f32 %v18042_v50, %v10206_v27  ;;  %v12265_v51 = vpop.f32.mrb[227].mxu0 }
 0xaa0   : > { %10246 = vst [vmem:[%s18045_s16 + $0x58] sm:$0xff] %v10207_v49 }
 0xaa1   : > { %v10211_v40 = vpop.f32.mrb[228].mxu0 }
 0xaa2   : > { %v10212_v35 = vadd.f32 %v18042_v50, %v10211_v40  ;;  %v12268_v47 = vpop.f32.mrb[229].mxu0 }
 0xaa4   : > { %10247 = vst [vmem:[%s18045_s16 + $0x60] sm:$0xff] %v10212_v35 }
 0xaa5   : > { %v10216_v43 = vpop.f32.mrb[230].mxu0 }
 0xaa6   : > { %v10217_v36 = vadd.f32 %v18042_v50, %v10216_v43  ;;  %v12271_v34 = vpop.f32.mrb[231].mxu0 }
 0xaa8   : > { %10248 = vst [vmem:[%s18045_s16 + $0x68] sm:$0xff] %v10217_v36 }
 0xaa9   : > { %v10221_v18 = vpop.f32.mrb[232].mxu0 }
 0xaaa   : > { %v10222_v63 = vadd.f32 %v18042_v50, %v10221_v18  ;;  %v12274_v24 = vpop.f32.mrb[233].mxu0 }
 0xaac   : > { %10249 = vst [vmem:[%s18045_s16 + $0x70] sm:$0xff] %v10222_v63 }
 0xaad   : > { %v10226_v22 = vpop.f32.mrb[234].mxu0 }
 0xaae   : > { %v10227_v42 = vadd.f32 %v18042_v50, %v10226_v22  ;;  %v12277_v8 = vpop.f32.mrb[235].mxu0 }
 0xab0   : > { %10250 = vst [vmem:[%s18045_s16 + $0x78] sm:$0xff] %v10227_v42 }
 0xac1   : > { %v10231_v0 = vpop.f32.mrb[236].mxu0 }
 0xac2   : > { %v10232_v32 = vadd.f32 %v18042_v50, %v10231_v0  ;;  %v12280_v33 = vpop.f32.mrb[237].mxu0 }
 0xac4   : > { %10251 = vst [vmem:[%s18045_s16 + $0x80] sm:$0xff] %v10232_v32 }
 0xac5   : > { %13449 = shalt.err (!%p13446_p12)
}
 0xac6   : > { %s13450_s7 = scalar_lea.hbm %s18083_s18, 2176  ;;  %s13454_s26 = scalar_lea.hbm %s18137_s6, 4352 }
 0xac7   : > { %p13451_p3 = scmp.ne.s32.totalorder %s18083_s18, %s13450_s7  ;;  %p13455_p13 = scmp.lt.u32.totalorder %s18083_s18, %s18137_s6 }
 0xac8   : > { %p13456_p7 = scmp.lt.u32.totalorder %s13454_s26, %s13450_s7  ;;  %p13458_p10 = scmp.lt.u32.totalorder %s13450_s7, %s18083_s18 }
 0xac9   : > { %p13452_p6 = pnand %p13451_p3, %p18856_p1 }
 0xaca   : > { %p13457_p9 = por %p13456_p7, %p13455_p13 }
 0xacb   : > { %p13453_p2 = pneg %p13452_p6 }
 0xacc   : > { %p13459_p4 = por %p13458_p10, %p13457_p9 }
 0xace   : > { %p13460_p0 = pnand %p13459_p4, %p13453_p2 }
 0xad0   : > { %13463 = shalt.err (!%p13460_p0)
}
 0xad1   : > { %s13531_s20 = smov 128   ;;  %s13532_s29 = smov 256  }
 0xad2   : > { %s13533_s12 = smov 8  }
 0xad3   : > { %12616 = dma.vmem_to_hbm [thread:$0]  (%p18856_p1), %s18085_s10, 2176, %s18083_s18, %s10253_s27, %s13531_s20, %s13532_s29, %s13533_s12  }
 0xad4 PF: > { %s18857_s16 = sld [smem:[#allocation15_spill]]  ;;  %s18858_s21 = sld [smem:[#allocation18_spill]] }
 0xad5   : > { %p18860_p5 = scmp.ge.s32.totalorder %s13510_s24, 2 }
 0xada   : > { %s10280_s19 = sand.u32 1, %s18857_s16   ;;  %p18859_p8 = scmp.ne.s32.totalorder %s18858_s21, 0 }
 0xadb   : > { %s10281_s28 = scalar_lea.sflag [#allocation4], %s10280_s19 }
 0xadc   : > { %p12633_p11 = pnand %p18860_p5, %p18859_p8 }
 0xade   : > { %13493 = dma.done.wait (!%p12633_p11), %s10281_s28, 2176  }
 0xadf   : > { %13495 = vsyncadd (!%p12633_p11), %s10281_s28, 4294965120  ;;  %s18861_s24 = sld [smem:[#allocation16_spill]]  ;;  %s18862_s30 = sld [smem:[#allocation17_spill]] }
 0xae0   : > { %s18863_s21 = smov %s13502_s22  ;;  %s18864_s22 = smov %s13506_s23 }
 0xae5   : > { %p21_p12 = scmp.ge.s32.totalorder %s18861_s24, 4   ;;  %s18865_s23 = smov %s18862_s30 }
 0xae7   :  { %23 = sbr.rel (!%p21_p12) target bundleno = 9 (0x9), region = 101 }
 0xaee   :  { %10286 = vsyncpa [#allocation3], 1 }
 0xaef   :  { %10288 = vsyncpa [#allocation3 + $0x1], 1 }
 0xaf0   :  { %10289 = vsyncpa [#allocation6], 1 }
 0xaf1   :  { %10290 = vsyncpa [#allocation9], 1 }
 0xaf2   :  { %10291 = vsyncpa [#allocation4], 1 }
 0xaf3   :  { %10293 = vsyncpa [#allocation4 + $0x1], 1 }

</bundles_post_ra>
